<compile_context>
chip_gen: v5e
topology: v5e:2x2
jax: 0.10.0
libtpu: 0.0.40
codegen_flags: <defaults>
</compile_context>

<pallas_src>
import math

import jax
import jax.numpy as jnp
from jax import lax
from jax.experimental import pallas as pl
from jax.experimental.pallas import tpu as pltpu

HIDDEN = 21 + 384 + 3          # 408 (true hidden size)
H_PAD = 512                    # padded hidden (8 heads * 64)
FFN = 32                       # true FFN width (stored unpadded)
HEADS = 8
D_HEAD = HIDDEN // HEADS       # 51 (true per-head dim)
D_PAD = 64                     # padded per-head dim
N_LAYERS = 8
LN_EPS = 1e-5
SCALE = D_HEAD ** (-0.5)


def _gelu(x):
    # exact (erf-based) GELU, matching torch.nn.GELU() default
    return 0.5 * x * (1.0 + lax.erf(x * (1.0 / math.sqrt(2.0))))


def _use_int8_weight_storage():
    # int8 here is a storage/DMA format only (dequantized to bf16 in-kernel),
    # so it is *safe* everywhere; it is only *worth it* on DMA-starved chips.
    # v7x (3.2 TB/s HBM) is compute-bound at these shapes -> keep bf16 there.
    try:
        kind = jax.devices()[0].device_kind.lower()
    except Exception:
        return True
    return "7" not in kind


# ----------------------------- fused Pallas kernel ----------------------------

def encoder_stack_pallas(x0, bias, layer_stacks, final_params, batch, seq):
    """Runs the 8 encoder layers + final LN/fc1/fc2 block in one pallas_call."""
    rows = batch * seq

    def kernel(x0_ref, bias_ref,
               ln1g_ref, ln1b_ref, wqkv_ref, sqkv_ref, bqkv_ref,
               wo_ref, so_ref, bo_ref,
               ln2g_ref, ln2b_ref, w1_ref, b1_ref, w2_ref, b2_ref,
               lnfg_ref, lnfb_ref, wf1_ref, bf1_ref, wf2_ref, bf2_ref,
               out_ref):
        l = pl.program_id(0)

        # Load the initial activations into the resident output block once.
        @pl.when(l == 0)
        def _():
            out_ref[...] = x0_ref[...]

        act = out_ref[...]                                     # [rows, H_PAD] f32
        inv_n = 1.0 / HIDDEN

        def layer_norm(x, g, b):
            # Pad columns (408:512) of x are exactly zero, so plain sums give
            # the true statistics over the 408 real features; gamma/beta are
            # zero-padded so the pad outputs stay exactly zero.
            mu = jnp.sum(x, axis=-1, keepdims=True) * inv_n
            ms = jnp.sum(x * x, axis=-1, keepdims=True) * inv_n
            var = ms - mu * mu
            return (x - mu) * lax.rsqrt(var + LN_EPS) * g + b

        def dq_dot(x, w_ref, s_ref, b_ref):
            # Weights stored int8 (v5e/v6e) or bf16 (v7x); always fed to the
            # MXU as bf16; per-output-channel scale applied to the tiny result.
            w = w_ref[0].astype(jnp.bfloat16)
            y = jnp.dot(x.astype(jnp.bfloat16), w,
                        preferred_element_type=jnp.float32)
            return y * s_ref[0] + b_ref[0]

        # -------------------- self-attention block --------------------
        y = layer_norm(act, ln1g_ref[0], ln1b_ref[0])
        qkv = dq_dot(y, wqkv_ref, sqkv_ref, bqkv_ref)          # [rows, 1536] f32
        qkv3 = qkv.reshape(batch, seq, 3 * H_PAD)              # [B, S, 1536]

        # Stack the per-head slices along the batch axis once -> batched
        # einsums + ONE softmax over all heads (z = h * batch + b).
        q_p, k_p, v_p = [], [], []
        for h in range(HEADS):
            base = h * D_PAD
            q_p.append(qkv3[:, :, base:base + D_PAD])
            k_p.append(qkv3[:, :, H_PAD + base:H_PAD + base + D_PAD])
            v_p.append(qkv3[:, :, 2 * H_PAD + base:2 * H_PAD + base + D_PAD])
        qh = jnp.concatenate(q_p, axis=0)                      # [H*B, S, 64]
        kh = jnp.concatenate(k_p, axis=0)
        vh = jnp.concatenate(v_p, axis=0)

        s = jnp.einsum('zqd,zkd->zqk', qh, kh,
                       preferred_element_type=jnp.float32)     # [H*B, S, S]
        s = s + bias_ref[...]
        s = s - jnp.max(s, axis=-1, keepdims=True)
        p = jnp.exp(s)
        p = p * pl.reciprocal(jnp.sum(p, axis=-1, keepdims=True), approx=True)
        ctx_z = jnp.einsum('zqk,zkd->zqd', p, vh,
                           preferred_element_type=jnp.float32)  # [H*B, S, 64]
        ctx = jnp.concatenate(
            [ctx_z[h * batch:(h + 1) * batch] for h in range(HEADS)],
            axis=-1).reshape(rows, H_PAD)                       # [rows, 512]
        act = act + dq_dot(ctx, wo_ref, so_ref, bo_ref)

        # -------------------- feed-forward block (FFN=32, unpadded) ----------
        y2 = layer_norm(act, ln2g_ref[0], ln2b_ref[0])
        hid = _gelu(jnp.dot(y2.astype(jnp.bfloat16), w1_ref[0],
                            preferred_element_type=jnp.float32) + b1_ref[0])
        act = act + (jnp.dot(hid.astype(jnp.bfloat16), w2_ref[0],
                             preferred_element_type=jnp.float32) + b2_ref[0])

        @pl.when(l < N_LAYERS - 1)
        def _():
            out_ref[...] = act

        # ---------- final LN + fc1/GELU/fc2 + residual (last layer only) -----
        @pl.when(l == N_LAYERS - 1)
        def _():
            yf = layer_norm(act, lnfg_ref[...], lnfb_ref[...])
            hf = _gelu(jnp.dot(yf.astype(jnp.bfloat16), wf1_ref[...],
                               preferred_element_type=jnp.float32) + bf1_ref[...])
            of = jnp.dot(hf.astype(jnp.bfloat16), wf2_ref[...],
                         preferred_element_type=jnp.float32) + bf2_ref[...]
            out_ref[...] = act + of

    def layer_spec(arr):          # stacked per-layer params: pick layer l
        nd = arr.ndim
        return pl.BlockSpec((1,) + arr.shape[1:],
                            lambda l, _nd=nd: (l,) + (0,) * (_nd - 1))

    def const_spec(arr):          # constant index map -> fetched once, resident
        nd = arr.ndim
        return pl.BlockSpec(arr.shape, lambda l, _nd=nd: (0,) * _nd)

    in_specs = ([const_spec(x0), const_spec(bias)]
                + [layer_spec(a) for a in layer_stacks]
                + [const_spec(a) for a in final_params])

    return pl.pallas_call(
        kernel,
        out_shape=jax.ShapeDtypeStruct((rows, H_PAD), jnp.float32),
        grid=(N_LAYERS,),
        in_specs=in_specs,
        out_specs=pl.BlockSpec((rows, H_PAD), lambda l: (0, 0)),
        compiler_params=pltpu.CompilerParams(
            dimension_semantics=("arbitrary",)),
    )(x0, bias, *layer_stacks, *final_params)


# ----------------------------- parameters ------------------------------------

def init_params(key, quantize_weights):
    keys = iter(jax.random.split(key, 512))

    def nrm(shape, scale=0.02):
        return (scale * jax.random.normal(next(keys), shape)).astype(jnp.float32)

    p = {}
    # embeddings (padding_idx=0 -> row 0 zeroed, like nn.Embedding init)
    p["rel_pos_table"] = nrm((64, HEADS)).at[0].set(0.0)
    p["height_table"] = nrm((64, HIDDEN)).at[0].set(0.0)
    p["super_token"] = nrm((1, HIDDEN))
    p["virt_dist"] = nrm((1, HEADS))
    # mlp_c: Linear(3,128) -> GELU -> Linear(128,3)   (runs in plain XLA)
    p["mlp_c"] = (nrm((3, 128)), nrm((1, 128)), nrm((128, 3)), nrm((1, 3)))

    dpad = D_PAD - D_HEAD

    def head_pad_cols(w):   # [in, 408] -> [in, 512]  (head-major 51 -> 64)
        return jnp.pad(w.reshape(-1, HEADS, D_HEAD),
                       ((0, 0), (0, 0), (0, dpad))).reshape(-1, HEADS * D_PAD)

    def head_pad_vec(b):    # [408] -> [512]
        return jnp.pad(b.reshape(HEADS, D_HEAD), ((0, 0), (0, dpad))).reshape(-1)

    def pack_big(w):        # [in,out] f32 -> (stored weight, per-col f32 scale)
        if quantize_weights:
            amax = jnp.max(jnp.abs(w), axis=0)
            scale = jnp.where(amax > 0.0, amax / 127.0, 1.0).astype(jnp.float32)
            q = jnp.clip(jnp.round(w / scale), -127.0, 127.0).astype(jnp.int8)
            return q, scale
        return w.astype(jnp.bfloat16), jnp.ones((w.shape[1],), jnp.float32)

    stacks = [[] for _ in range(14)]
    for _ in range(N_LAYERS):
        wq, bq = nrm((HIDDEN, HIDDEN)), nrm((HIDDEN,))
        wk, bk = nrm((HIDDEN, HIDDEN)), nrm((HIDDEN,))
        wv, bv = nrm((HIDDEN, HIDDEN)), nrm((HIDDEN,))
        wo, bo = nrm((HIDDEN, HIDDEN)), nrm((HIDDEN,))
        w1, b1 = nrm((HIDDEN, FFN)), nrm((FFN,))
        w2, b2 = nrm((FFN, HIDDEN)), nrm((HIDDEN,))

        # fused QKV, 1/sqrt(51) folded into Q, heads padded 51->64, input 408->512
        wqkv = jnp.concatenate([head_pad_cols(wq * SCALE),
                                head_pad_cols(wk),
                                head_pad_cols(wv)], axis=1)
        wqkv = jnp.pad(wqkv, ((0, H_PAD - HIDDEN), (0, 0)))          # [512,1536]
        bqkv = jnp.concatenate([head_pad_vec(bq * SCALE),
                                head_pad_vec(bk),
                                head_pad_vec(bv)])                   # [1536]
        wqkv_q, sqkv = pack_big(wqkv)

        # output projection: rows follow the head-padded ctx layout, cols padded
        wo_p = jnp.pad(wo.reshape(HEADS, D_HEAD, HIDDEN),
                       ((0, 0), (0, dpad), (0, 0))).reshape(HEADS * D_PAD, HIDDEN)
        wo_p = jnp.pad(wo_p, ((0, 0), (0, H_PAD - HIDDEN)))          # [512,512]
        wo_q, so = pack_big(wo_p)
        bo_p = jnp.pad(bo, (0, H_PAD - HIDDEN))

        ln_g = jnp.pad(jnp.ones((HIDDEN,), jnp.float32), (0, H_PAD - HIDDEN))
        ln_b = jnp.zeros((H_PAD,), jnp.float32)

        # FFN weights stored unpadded in the FFN dim (32), bf16 (tiny anyway)
        w1_p = jnp.pad(w1, ((0, H_PAD - HIDDEN), (0, 0))).astype(jnp.bfloat16)
        w2_p = jnp.pad(w2, ((0, 0), (0, H_PAD - HIDDEN))).astype(jnp.bfloat16)
        b2_p = jnp.pad(b2, (0, H_PAD - HIDDEN))

        layer = (ln_g, ln_b, wqkv_q, sqkv, bqkv, wo_q, so, bo_p,
                 ln_g, ln_b, w1_p, b1, w2_p, b2_p)
        for slot, arr in zip(stacks, layer):
            slot.append(arr)

    def stack(lst):
        a = jnp.stack(lst)
        if a.ndim == 2:                # per-layer vectors -> [L, 1, N]
            a = a[:, None, :]
        return a

    p["layer_stacks"] = tuple(stack(lst) for lst in stacks)

    # final LN + fc1(H,128) + fc2(128,H)
    wf1, bf1 = nrm((HIDDEN, 128)), nrm((128,))
    wf2, bf2 = nrm((128, HIDDEN)), nrm((HIDDEN,))
    p["final"] = (
        jnp.pad(jnp.ones((HIDDEN,), jnp.float32), (0, H_PAD - HIDDEN))[None, :],
        jnp.zeros((1, H_PAD), jnp.float32),
        jnp.pad(wf1, ((0, H_PAD - HIDDEN), (0, 0))).astype(jnp.bfloat16),
        bf1[None, :],
        jnp.pad(wf2, ((0, 0), (0, H_PAD - HIDDEN))).astype(jnp.bfloat16),
        jnp.pad(bf2, (0, H_PAD - HIDDEN))[None, :],
    )
    return p


# ----------------------------- forward ---------------------------------------

def queryformer_encoder(attn_bias, rel_pos, x, heights, params):
    B, N = x.shape[0], x.shape[1]
    S = N + 1

    # cost-feature MLP (K=3 matmul) in plain XLA — not worth a kernel launch.
    w1c, b1c, w2c, b2c = params["mlp_c"]
    cost = x[..., 21 + 384:]
    cost = _gelu(cost @ w1c + b1c) @ w2c + b2c
    x = jnp.concatenate([x[..., :21 + 384], cost], axis=-1)

    # tree attention bias, packed as [HEADS*B, S, S] (z = h*B + b) to match
    # the in-kernel head-batched layout.
    tab = jnp.broadcast_to(attn_bias[:, None, :, :].astype(jnp.float32),
                           (B, HEADS, S, S))
    rel_bias = jnp.transpose(jnp.take(params["rel_pos_table"], rel_pos, axis=0),
                             (0, 3, 1, 2))                          # [B,h,N,N]
    # TODO(synk): jnp.take clamps out-of-range indices (torch Embedding raises).
    tab = tab.at[:, :, 1:, 1:].add(rel_bias)
    t = params["virt_dist"].reshape(1, HEADS, 1)
    tab = tab.at[:, :, 1:, 0].add(t)
    tab = tab.at[:, :, 0, :].add(t)
    tab = jnp.transpose(tab, (1, 0, 2, 3)).reshape(HEADS * B, S, S)

    # node features + height embedding, prepend super token, pad hidden -> 512
    node = x + jnp.take(params["height_table"], heights, axis=0)
    super_tok = jnp.broadcast_to(params["super_token"][None, :, :],
                                 (B, 1, HIDDEN))
    act0 = jnp.concatenate([super_tok, node], axis=1)               # [B,S,408]
    act0 = jnp.pad(act0, ((0, 0), (0, 0), (0, H_PAD - HIDDEN)))     # [B,S,512]
    act0 = act0.reshape(B * S, H_PAD)

    out = encoder_stack_pallas(act0, tab, params["layer_stacks"],
                               params["final"], B, S)               # [B*S,512]
    cls = out.reshape(B, S, H_PAD)[:, 0, :HIDDEN]                   # [B,408]
    return cls.reshape(-1, 3, HIDDEN)                               # eval=False


# ----------------------------- main -------------------------------------------

if __name__ == "__main__":
    quantize = _use_int8_weight_storage()

    key = jax.random.PRNGKey(0)
    kp, k1, k2, k3, k4 = jax.random.split(key, 5)
    params = init_params(kp, quantize)

    B, N = 3, 7          # B must be divisible by 3 (final .view(-1, 3, H))
    S = N + 1
    attn_bias = 0.1 * jax.random.normal(k1, (B, S, S), jnp.float32)
    rel_pos = jax.random.randint(k2, (B, N, N), 0, 64, dtype=jnp.int32)
    x = jax.random.normal(k3, (B, N, HIDDEN), jnp.float32)
    heights = jax.random.randint(k4, (B, N), 0, 64, dtype=jnp.int32)

    fwd = jax.jit(queryformer_encoder)
    out = fwd(attn_bias, rel_pos, x, heights, params)
    out = jax.block_until_ready(out)
    assert out.shape == (B // 3, 3, HIDDEN), out.shape
    assert bool(jnp.all(jnp.isfinite(out)))
    print("KERNEL_OK")
</pallas_src>

<mosaic_0001>
module attributes {stable_mosaic.version = 11 : i64} {
  func.func @kernel(%arg0: i32, %arg1: memref<24x512xf32, #tpu.memory_space<vmem>>, %arg2: memref<24x8x8xf32, #tpu.memory_space<vmem>>, %arg3: memref<1x1x512xf32, #tpu.memory_space<vmem>>, %arg4: memref<1x1x512xf32, #tpu.memory_space<vmem>>, %arg5: memref<1x512x1536xi8, #tpu.memory_space<vmem>>, %arg6: memref<1x1x1536xf32, #tpu.memory_space<vmem>>, %arg7: memref<1x1x1536xf32, #tpu.memory_space<vmem>>, %arg8: memref<1x512x512xi8, #tpu.memory_space<vmem>>, %arg9: memref<1x1x512xf32, #tpu.memory_space<vmem>>, %arg10: memref<1x1x512xf32, #tpu.memory_space<vmem>>, %arg11: memref<1x1x512xf32, #tpu.memory_space<vmem>>, %arg12: memref<1x1x512xf32, #tpu.memory_space<vmem>>, %arg13: memref<1x512x32xbf16, #tpu.memory_space<vmem>>, %arg14: memref<1x1x32xf32, #tpu.memory_space<vmem>>, %arg15: memref<1x32x512xbf16, #tpu.memory_space<vmem>>, %arg16: memref<1x1x512xf32, #tpu.memory_space<vmem>>, %arg17: memref<1x512xf32, #tpu.memory_space<vmem>>, %arg18: memref<1x512xf32, #tpu.memory_space<vmem>>, %arg19: memref<512x128xbf16, #tpu.memory_space<vmem>>, %arg20: memref<1x128xf32, #tpu.memory_space<vmem>>, %arg21: memref<128x512xbf16, #tpu.memory_space<vmem>>, %arg22: memref<1x512xf32, #tpu.memory_space<vmem>>, %arg23: memref<24x512xf32, #tpu.memory_space<vmem>>) attributes {dimension_semantics = [#tpu.dimension_semantics<arbitrary>], iteration_bounds = array<i64: 8>, scalar_prefetch = 0 : i64, scratch_operands = 0 : i64, tpu.core_type = #tpu.core_type<tc>, window_params = [{pipeline_mode = #tpu.pipeline_mode<synchronous>, transform_indices = @transform_0, window_bounds = array<i64: 24, 512>}, {pipeline_mode = #tpu.pipeline_mode<synchronous>, transform_indices = @transform_1, window_bounds = array<i64: 24, 8, 8>}, {transform_indices = @transform_2, window_bounds = array<i64: 1, 1, 512>}, {transform_indices = @transform_3, window_bounds = array<i64: 1, 1, 512>}, {transform_indices = @transform_4, window_bounds = array<i64: 1, 512, 1536>}, {transform_indices = @transform_5, window_bounds = array<i64: 1, 1, 1536>}, {transform_indices = @transform_6, window_bounds = array<i64: 1, 1, 1536>}, {transform_indices = @transform_7, window_bounds = array<i64: 1, 512, 512>}, {transform_indices = @transform_8, window_bounds = array<i64: 1, 1, 512>}, {transform_indices = @transform_9, window_bounds = array<i64: 1, 1, 512>}, {transform_indices = @transform_10, window_bounds = array<i64: 1, 1, 512>}, {transform_indices = @transform_11, window_bounds = array<i64: 1, 1, 512>}, {transform_indices = @transform_12, window_bounds = array<i64: 1, 512, 32>}, {transform_indices = @transform_13, window_bounds = array<i64: 1, 1, 32>}, {transform_indices = @transform_14, window_bounds = array<i64: 1, 32, 512>}, {transform_indices = @transform_15, window_bounds = array<i64: 1, 1, 512>}, {pipeline_mode = #tpu.pipeline_mode<synchronous>, transform_indices = @transform_16, window_bounds = array<i64: 1, 512>}, {pipeline_mode = #tpu.pipeline_mode<synchronous>, transform_indices = @transform_17, window_bounds = array<i64: 1, 512>}, {pipeline_mode = #tpu.pipeline_mode<synchronous>, transform_indices = @transform_18, window_bounds = array<i64: 512, 128>}, {pipeline_mode = #tpu.pipeline_mode<synchronous>, transform_indices = @transform_19, window_bounds = array<i64: 1, 128>}, {pipeline_mode = #tpu.pipeline_mode<synchronous>, transform_indices = @transform_20, window_bounds = array<i64: 128, 512>}, {pipeline_mode = #tpu.pipeline_mode<synchronous>, transform_indices = @transform_21, window_bounds = array<i64: 1, 512>}, {pipeline_mode = #tpu.pipeline_mode<synchronous>, transform_indices = @transform_22, window_bounds = array<i64: 24, 512>}]} {
    %c0_i32 = arith.constant 0 : i32
    %0 = arith.cmpi eq, %arg0, %c0_i32 : i32
    %1 = arith.extui %0 : i1 to i32
    %c0_i32_0 = arith.constant 0 : i32
    %2 = arith.cmpi ne, %1, %c0_i32_0 : i32
    scf.if %2 {
      %c0_70 = arith.constant 0 : index
      %c0_71 = arith.constant 0 : index
      %166 = vector.load %arg1[%c0_70, %c0_71] : memref<24x512xf32, #tpu.memory_space<vmem>>, vector<24x512xf32>
      %c0_72 = arith.constant 0 : index
      %c0_73 = arith.constant 0 : index
      %167 = vector.load %arg23[%c0_72, %c0_73] : memref<24x512xf32, #tpu.memory_space<vmem>>, vector<24x512xf32>
      tpu.vector_store %arg23[%c0_72, %c0_73], %166 {strides = array<i32>} : memref<24x512xf32, #tpu.memory_space<vmem>>, vector<24x512xf32>,
    } else {
    }
    %c0 = arith.constant 0 : index
    %c0_1 = arith.constant 0 : index
    %3 = vector.load %arg23[%c0, %c0_1] : memref<24x512xf32, #tpu.memory_space<vmem>>, vector<24x512xf32>
    %c0_2 = arith.constant 0 : index
    %c0_3 = arith.constant 0 : index
    %c0_4 = arith.constant 0 : index
    %4 = vector.load %arg3[%c0_2, %c0_3, %c0_4] : memref<1x1x512xf32, #tpu.memory_space<vmem>>, vector<1x1x512xf32>
    %5 = vector.shape_cast %4 : vector<1x1x512xf32> to vector<1x512xf32>
    %c0_5 = arith.constant 0 : index
    %c0_6 = arith.constant 0 : index
    %c0_7 = arith.constant 0 : index
    %6 = vector.load %arg4[%c0_5, %c0_6, %c0_7] : memref<1x1x512xf32, #tpu.memory_space<vmem>>, vector<1x1x512xf32>
    %7 = vector.shape_cast %6 : vector<1x1x512xf32> to vector<1x512xf32>
    %cst = arith.constant dense<0.000000e+00> : vector<24xf32>
    %8 = vector.multi_reduction <add>, %3, %cst [1] : vector<24x512xf32> to vector<24xf32>
    %9 = vector.shape_cast %8 : vector<24xf32> to vector<24x1xf32>
    %cst_8 = arith.constant 0.00245098048 : f32
    %10 = vector.broadcast %cst_8 : f32 to vector<24x1xf32>
    %11 = arith.mulf %9, %10 : vector<24x1xf32>
    %12 = arith.mulf %3, %3 : vector<24x512xf32>
    %cst_9 = arith.constant dense<0.000000e+00> : vector<24xf32>
    %13 = vector.multi_reduction <add>, %12, %cst_9 [1] : vector<24x512xf32> to vector<24xf32>
    %14 = vector.shape_cast %13 : vector<24xf32> to vector<24x1xf32>
    %cst_10 = arith.constant 0.00245098048 : f32
    %15 = vector.broadcast %cst_10 : f32 to vector<24x1xf32>
    %16 = arith.mulf %14, %15 : vector<24x1xf32>
    %17 = arith.mulf %11, %11 : vector<24x1xf32>
    %18 = arith.subf %16, %17 : vector<24x1xf32>
    %19 = vector.broadcast %11 : vector<24x1xf32> to vector<24x512xf32>
    %20 = arith.subf %3, %19 : vector<24x512xf32>
    %cst_11 = arith.constant 9.99999974E-6 : f32
    %21 = vector.broadcast %cst_11 : f32 to vector<24x1xf32>
    %22 = arith.addf %18, %21 : vector<24x1xf32>
    %23 = math.rsqrt %22 : vector<24x1xf32>
    %24 = vector.broadcast %23 : vector<24x1xf32> to vector<24x512xf32>
    %25 = arith.mulf %20, %24 : vector<24x512xf32>
    %26 = vector.broadcast %5 : vector<1x512xf32> to vector<24x512xf32>
    %27 = arith.mulf %25, %26 : vector<24x512xf32>
    %28 = vector.broadcast %7 : vector<1x512xf32> to vector<24x512xf32>
    %29 = arith.addf %27, %28 : vector<24x512xf32>
    %c0_12 = arith.constant 0 : index
    %c0_13 = arith.constant 0 : index
    %c0_14 = arith.constant 0 : index
    %30 = vector.load %arg5[%c0_12, %c0_13, %c0_14] : memref<1x512x1536xi8, #tpu.memory_space<vmem>>, vector<1x512x1536xi8>
    %31 = vector.shape_cast %30 : vector<1x512x1536xi8> to vector<512x1536xi8>
    %32 = arith.sitofp %31 : vector<512x1536xi8> to vector<512x1536xbf16>
    %33 = arith.truncf %29 : vector<24x512xf32> to vector<24x512xbf16>
    %cst_15 = arith.constant dense<0.000000e+00> : vector<24x1536xf32>
    %34 = tpu.matmul %33, %32, %cst_15 {dimension_numbers = #tpu.dot_dimension_numbers<[1], [0], [0], [1], [0, 0, 1, 1], [], []>} : vector<24x512xbf16>, vector<512x1536xbf16>, vector<24x1536xf32> -> vector<24x1536xf32>
    %c0_16 = arith.constant 0 : index
    %c0_17 = arith.constant 0 : index
    %c0_18 = arith.constant 0 : index
    %35 = vector.load %arg6[%c0_16, %c0_17, %c0_18] : memref<1x1x1536xf32, #tpu.memory_space<vmem>>, vector<1x1x1536xf32>
    %36 = vector.shape_cast %35 : vector<1x1x1536xf32> to vector<1x1536xf32>
    %37 = vector.broadcast %36 : vector<1x1536xf32> to vector<24x1536xf32>
    %38 = arith.mulf %34, %37 : vector<24x1536xf32>
    %c0_19 = arith.constant 0 : index
    %c0_20 = arith.constant 0 : index
    %c0_21 = arith.constant 0 : index
    %39 = vector.load %arg7[%c0_19, %c0_20, %c0_21] : memref<1x1x1536xf32, #tpu.memory_space<vmem>>, vector<1x1x1536xf32>
    %40 = vector.shape_cast %39 : vector<1x1x1536xf32> to vector<1x1536xf32>
    %41 = vector.broadcast %40 : vector<1x1536xf32> to vector<24x1536xf32>
    %42 = arith.addf %38, %41 : vector<24x1536xf32>
    %43 = vector.shape_cast %42 : vector<24x1536xf32> to vector<3x8x1536xf32>
    %44 = vector.extract_strided_slice %43 {offsets = [0, 0, 0], sizes = [3, 8, 64], strides = [1, 1, 1]} : vector<3x8x1536xf32> to vector<3x8x64xf32>
    %45 = vector.extract_strided_slice %43 {offsets = [0, 0, 512], sizes = [3, 8, 64], strides = [1, 1, 1]} : vector<3x8x1536xf32> to vector<3x8x64xf32>
    %46 = vector.extract_strided_slice %43 {offsets = [0, 0, 1024], sizes = [3, 8, 64], strides = [1, 1, 1]} : vector<3x8x1536xf32> to vector<3x8x64xf32>
    %47 = vector.extract_strided_slice %43 {offsets = [0, 0, 64], sizes = [3, 8, 64], strides = [1, 1, 1]} : vector<3x8x1536xf32> to vector<3x8x64xf32>
    %48 = vector.extract_strided_slice %43 {offsets = [0, 0, 576], sizes = [3, 8, 64], strides = [1, 1, 1]} : vector<3x8x1536xf32> to vector<3x8x64xf32>
    %49 = vector.extract_strided_slice %43 {offsets = [0, 0, 1088], sizes = [3, 8, 64], strides = [1, 1, 1]} : vector<3x8x1536xf32> to vector<3x8x64xf32>
    %50 = vector.extract_strided_slice %43 {offsets = [0, 0, 128], sizes = [3, 8, 64], strides = [1, 1, 1]} : vector<3x8x1536xf32> to vector<3x8x64xf32>
    %51 = vector.extract_strided_slice %43 {offsets = [0, 0, 640], sizes = [3, 8, 64], strides = [1, 1, 1]} : vector<3x8x1536xf32> to vector<3x8x64xf32>
    %52 = vector.extract_strided_slice %43 {offsets = [0, 0, 1152], sizes = [3, 8, 64], strides = [1, 1, 1]} : vector<3x8x1536xf32> to vector<3x8x64xf32>
    %53 = vector.extract_strided_slice %43 {offsets = [0, 0, 192], sizes = [3, 8, 64], strides = [1, 1, 1]} : vector<3x8x1536xf32> to vector<3x8x64xf32>
    %54 = vector.extract_strided_slice %43 {offsets = [0, 0, 704], sizes = [3, 8, 64], strides = [1, 1, 1]} : vector<3x8x1536xf32> to vector<3x8x64xf32>
    %55 = vector.extract_strided_slice %43 {offsets = [0, 0, 1216], sizes = [3, 8, 64], strides = [1, 1, 1]} : vector<3x8x1536xf32> to vector<3x8x64xf32>
    %56 = vector.extract_strided_slice %43 {offsets = [0, 0, 256], sizes = [3, 8, 64], strides = [1, 1, 1]} : vector<3x8x1536xf32> to vector<3x8x64xf32>
    %57 = vector.extract_strided_slice %43 {offsets = [0, 0, 768], sizes = [3, 8, 64], strides = [1, 1, 1]} : vector<3x8x1536xf32> to vector<3x8x64xf32>
    %58 = vector.extract_strided_slice %43 {offsets = [0, 0, 1280], sizes = [3, 8, 64], strides = [1, 1, 1]} : vector<3x8x1536xf32> to vector<3x8x64xf32>
    %59 = vector.extract_strided_slice %43 {offsets = [0, 0, 320], sizes = [3, 8, 64], strides = [1, 1, 1]} : vector<3x8x1536xf32> to vector<3x8x64xf32>
    %60 = vector.extract_strided_slice %43 {offsets = [0, 0, 832], sizes = [3, 8, 64], strides = [1, 1, 1]} : vector<3x8x1536xf32> to vector<3x8x64xf32>
    %61 = vector.extract_strided_slice %43 {offsets = [0, 0, 1344], sizes = [3, 8, 64], strides = [1, 1, 1]} : vector<3x8x1536xf32> to vector<3x8x64xf32>
    %62 = vector.extract_strided_slice %43 {offsets = [0, 0, 384], sizes = [3, 8, 64], strides = [1, 1, 1]} : vector<3x8x1536xf32> to vector<3x8x64xf32>
    %63 = vector.extract_strided_slice %43 {offsets = [0, 0, 896], sizes = [3, 8, 64], strides = [1, 1, 1]} : vector<3x8x1536xf32> to vector<3x8x64xf32>
    %64 = vector.extract_strided_slice %43 {offsets = [0, 0, 1408], sizes = [3, 8, 64], strides = [1, 1, 1]} : vector<3x8x1536xf32> to vector<3x8x64xf32>
    %65 = vector.extract_strided_slice %43 {offsets = [0, 0, 448], sizes = [3, 8, 64], strides = [1, 1, 1]} : vector<3x8x1536xf32> to vector<3x8x64xf32>
    %66 = vector.extract_strided_slice %43 {offsets = [0, 0, 960], sizes = [3, 8, 64], strides = [1, 1, 1]} : vector<3x8x1536xf32> to vector<3x8x64xf32>
    %67 = vector.extract_strided_slice %43 {offsets = [0, 0, 1472], sizes = [3, 8, 64], strides = [1, 1, 1]} : vector<3x8x1536xf32> to vector<3x8x64xf32>
    %68 = tpu.concatenate %44, %47, %50, %53, %56, %59, %62, %65 in 0 : vector<3x8x64xf32>, vector<3x8x64xf32>, vector<3x8x64xf32>, vector<3x8x64xf32>, vector<3x8x64xf32>, vector<3x8x64xf32>, vector<3x8x64xf32>, vector<3x8x64xf32> -> vector<24x8x64xf32>
    %69 = tpu.concatenate %45, %48, %51, %54, %57, %60, %63, %66 in 0 : vector<3x8x64xf32>, vector<3x8x64xf32>, vector<3x8x64xf32>, vector<3x8x64xf32>, vector<3x8x64xf32>, vector<3x8x64xf32>, vector<3x8x64xf32>, vector<3x8x64xf32> -> vector<24x8x64xf32>
    %70 = tpu.concatenate %46, %49, %52, %55, %58, %61, %64, %67 in 0 : vector<3x8x64xf32>, vector<3x8x64xf32>, vector<3x8x64xf32>, vector<3x8x64xf32>, vector<3x8x64xf32>, vector<3x8x64xf32>, vector<3x8x64xf32>, vector<3x8x64xf32> -> vector<24x8x64xf32>
    "tpu.trace_start"() <{level = 10 : i32, message = "zqd,zkd->zqk"}> : () -> ()
    %cst_22 = arith.constant dense<0.000000e+00> : vector<24x8x8xf32>
    %71 = tpu.matmul %68, %69, %cst_22 {dimension_numbers = #tpu.dot_dimension_numbers<[2], [2], [1], [1], [0, 0, 0, 1, 1, 1], [0], [0]>} : vector<24x8x64xf32>, vector<24x8x64xf32>, vector<24x8x8xf32> -> vector<24x8x8xf32>
    "tpu.trace_stop"() : () -> ()
    %c0_23 = arith.constant 0 : index
    %c0_24 = arith.constant 0 : index
    %c0_25 = arith.constant 0 : index
    %72 = vector.load %arg2[%c0_23, %c0_24, %c0_25] : memref<24x8x8xf32, #tpu.memory_space<vmem>>, vector<24x8x8xf32>
    %73 = arith.addf %71, %72 : vector<24x8x8xf32>
    %cst_26 = arith.constant dense<0xFF800000> : vector<24x8xf32>
    %74 = vector.multi_reduction <maximumf>, %73, %cst_26 [2] : vector<24x8x8xf32> to vector<24x8xf32>
    %75 = vector.shape_cast %74 : vector<24x8xf32> to vector<24x8x1xf32>
    %76 = vector.broadcast %75 : vector<24x8x1xf32> to vector<24x8x8xf32>
    %77 = arith.subf %73, %76 : vector<24x8x8xf32>
    %78 = math.exp %77 : vector<24x8x8xf32>
    %cst_27 = arith.constant dense<0.000000e+00> : vector<24x8xf32>
    %79 = vector.multi_reduction <add>, %78, %cst_27 [2] : vector<24x8x8xf32> to vector<24x8xf32>
    %80 = vector.shape_cast %79 : vector<24x8xf32> to vector<24x8x1xf32>
    %81 = tpu.reciprocal %80 {approx = true} : vector<24x8x1xf32> -> vector<24x8x1xf32>
    %82 = vector.broadcast %81 : vector<24x8x1xf32> to vector<24x8x8xf32>
    %83 = arith.mulf %78, %82 : vector<24x8x8xf32>
    "tpu.trace_start"() <{level = 10 : i32, message = "zqk,zkd->zqd"}> : () -> ()
    %cst_28 = arith.constant dense<0.000000e+00> : vector<24x8x64xf32>
    %84 = tpu.matmul %83, %70, %cst_28 {dimension_numbers = #tpu.dot_dimension_numbers<[2], [1], [1], [2], [0, 0, 0, 1, 1, 2], [0], [0]>} : vector<24x8x8xf32>, vector<24x8x64xf32>, vector<24x8x64xf32> -> vector<24x8x64xf32>
    "tpu.trace_stop"() : () -> ()
    %85 = vector.extract_strided_slice %84 {offsets = [0, 0, 0], sizes = [3, 8, 64], strides = [1, 1, 1]} : vector<24x8x64xf32> to vector<3x8x64xf32>
    %86 = vector.extract_strided_slice %84 {offsets = [3, 0, 0], sizes = [3, 8, 64], strides = [1, 1, 1]} : vector<24x8x64xf32> to vector<3x8x64xf32>
    %87 = vector.extract_strided_slice %84 {offsets = [6, 0, 0], sizes = [3, 8, 64], strides = [1, 1, 1]} : vector<24x8x64xf32> to vector<3x8x64xf32>
    %88 = vector.extract_strided_slice %84 {offsets = [9, 0, 0], sizes = [3, 8, 64], strides = [1, 1, 1]} : vector<24x8x64xf32> to vector<3x8x64xf32>
    %89 = vector.extract_strided_slice %84 {offsets = [12, 0, 0], sizes = [3, 8, 64], strides = [1, 1, 1]} : vector<24x8x64xf32> to vector<3x8x64xf32>
    %90 = vector.extract_strided_slice %84 {offsets = [15, 0, 0], sizes = [3, 8, 64], strides = [1, 1, 1]} : vector<24x8x64xf32> to vector<3x8x64xf32>
    %91 = vector.extract_strided_slice %84 {offsets = [18, 0, 0], sizes = [3, 8, 64], strides = [1, 1, 1]} : vector<24x8x64xf32> to vector<3x8x64xf32>
    %92 = vector.extract_strided_slice %84 {offsets = [21, 0, 0], sizes = [3, 8, 64], strides = [1, 1, 1]} : vector<24x8x64xf32> to vector<3x8x64xf32>
    %93 = tpu.concatenate %85, %86, %87, %88, %89, %90, %91, %92 in 2 : vector<3x8x64xf32>, vector<3x8x64xf32>, vector<3x8x64xf32>, vector<3x8x64xf32>, vector<3x8x64xf32>, vector<3x8x64xf32>, vector<3x8x64xf32>, vector<3x8x64xf32> -> vector<3x8x512xf32>
    %94 = vector.shape_cast %93 : vector<3x8x512xf32> to vector<24x512xf32>
    %c0_29 = arith.constant 0 : index
    %c0_30 = arith.constant 0 : index
    %c0_31 = arith.constant 0 : index
    %95 = vector.load %arg8[%c0_29, %c0_30, %c0_31] : memref<1x512x512xi8, #tpu.memory_space<vmem>>, vector<1x512x512xi8>
    %96 = vector.shape_cast %95 : vector<1x512x512xi8> to vector<512x512xi8>
    %97 = arith.sitofp %96 : vector<512x512xi8> to vector<512x512xbf16>
    %98 = arith.truncf %94 : vector<24x512xf32> to vector<24x512xbf16>
    %cst_32 = arith.constant dense<0.000000e+00> : vector<24x512xf32>
    %99 = tpu.matmul %98, %97, %cst_32 {dimension_numbers = #tpu.dot_dimension_numbers<[1], [0], [0], [1], [0, 0, 1, 1], [], []>} : vector<24x512xbf16>, vector<512x512xbf16>, vector<24x512xf32> -> vector<24x512xf32>
    %c0_33 = arith.constant 0 : index
    %c0_34 = arith.constant 0 : index
    %c0_35 = arith.constant 0 : index
    %100 = vector.load %arg9[%c0_33, %c0_34, %c0_35] : memref<1x1x512xf32, #tpu.memory_space<vmem>>, vector<1x1x512xf32>
    %101 = vector.shape_cast %100 : vector<1x1x512xf32> to vector<1x512xf32>
    %102 = vector.broadcast %101 : vector<1x512xf32> to vector<24x512xf32>
    %103 = arith.mulf %99, %102 : vector<24x512xf32>
    %c0_36 = arith.constant 0 : index
    %c0_37 = arith.constant 0 : index
    %c0_38 = arith.constant 0 : index
    %104 = vector.load %arg10[%c0_36, %c0_37, %c0_38] : memref<1x1x512xf32, #tpu.memory_space<vmem>>, vector<1x1x512xf32>
    %105 = vector.shape_cast %104 : vector<1x1x512xf32> to vector<1x512xf32>
    %106 = vector.broadcast %105 : vector<1x512xf32> to vector<24x512xf32>
    %107 = arith.addf %103, %106 : vector<24x512xf32>
    %108 = arith.addf %3, %107 : vector<24x512xf32>
    %c0_39 = arith.constant 0 : index
    %c0_40 = arith.constant 0 : index
    %c0_41 = arith.constant 0 : index
    %109 = vector.load %arg11[%c0_39, %c0_40, %c0_41] : memref<1x1x512xf32, #tpu.memory_space<vmem>>, vector<1x1x512xf32>
    %110 = vector.shape_cast %109 : vector<1x1x512xf32> to vector<1x512xf32>
    %c0_42 = arith.constant 0 : index
    %c0_43 = arith.constant 0 : index
    %c0_44 = arith.constant 0 : index
    %111 = vector.load %arg12[%c0_42, %c0_43, %c0_44] : memref<1x1x512xf32, #tpu.memory_space<vmem>>, vector<1x1x512xf32>
    %112 = vector.shape_cast %111 : vector<1x1x512xf32> to vector<1x512xf32>
    %cst_45 = arith.constant dense<0.000000e+00> : vector<24xf32>
    %113 = vector.multi_reduction <add>, %108, %cst_45 [1] : vector<24x512xf32> to vector<24xf32>
    %114 = vector.shape_cast %113 : vector<24xf32> to vector<24x1xf32>
    %cst_46 = arith.constant 0.00245098048 : f32
    %115 = vector.broadcast %cst_46 : f32 to vector<24x1xf32>
    %116 = arith.mulf %114, %115 : vector<24x1xf32>
    %117 = arith.mulf %108, %108 : vector<24x512xf32>
    %cst_47 = arith.constant dense<0.000000e+00> : vector<24xf32>
    %118 = vector.multi_reduction <add>, %117, %cst_47 [1] : vector<24x512xf32> to vector<24xf32>
    %119 = vector.shape_cast %118 : vector<24xf32> to vector<24x1xf32>
    %cst_48 = arith.constant 0.00245098048 : f32
    %120 = vector.broadcast %cst_48 : f32 to vector<24x1xf32>
    %121 = arith.mulf %119, %120 : vector<24x1xf32>
    %122 = arith.mulf %116, %116 : vector<24x1xf32>
    %123 = arith.subf %121, %122 : vector<24x1xf32>
    %124 = vector.broadcast %116 : vector<24x1xf32> to vector<24x512xf32>
    %125 = arith.subf %108, %124 : vector<24x512xf32>
    %cst_49 = arith.constant 9.99999974E-6 : f32
    %126 = vector.broadcast %cst_49 : f32 to vector<24x1xf32>
    %127 = arith.addf %123, %126 : vector<24x1xf32>
    %128 = math.rsqrt %127 : vector<24x1xf32>
    %129 = vector.broadcast %128 : vector<24x1xf32> to vector<24x512xf32>
    %130 = arith.mulf %125, %129 : vector<24x512xf32>
    %131 = vector.broadcast %110 : vector<1x512xf32> to vector<24x512xf32>
    %132 = arith.mulf %130, %131 : vector<24x512xf32>
    %133 = vector.broadcast %112 : vector<1x512xf32> to vector<24x512xf32>
    %134 = arith.addf %132, %133 : vector<24x512xf32>
    %135 = arith.truncf %134 : vector<24x512xf32> to vector<24x512xbf16>
    %c0_50 = arith.constant 0 : index
    %c0_51 = arith.constant 0 : index
    %c0_52 = arith.constant 0 : index
    %136 = vector.load %arg13[%c0_50, %c0_51, %c0_52] : memref<1x512x32xbf16, #tpu.memory_space<vmem>>, vector<1x512x32xbf16>
    %137 = vector.shape_cast %136 : vector<1x512x32xbf16> to vector<512x32xbf16>
    %cst_53 = arith.constant dense<0.000000e+00> : vector<24x32xf32>
    %138 = tpu.matmul %135, %137, %cst_53 {dimension_numbers = #tpu.dot_dimension_numbers<[1], [0], [0], [1], [0, 0, 1, 1], [], []>} : vector<24x512xbf16>, vector<512x32xbf16>, vector<24x32xf32> -> vector<24x32xf32>
    %c0_54 = arith.constant 0 : index
    %c0_55 = arith.constant 0 : index
    %c0_56 = arith.constant 0 : index
    %139 = vector.load %arg14[%c0_54, %c0_55, %c0_56] : memref<1x1x32xf32, #tpu.memory_space<vmem>>, vector<1x1x32xf32>
    %140 = vector.shape_cast %139 : vector<1x1x32xf32> to vector<1x32xf32>
    %141 = vector.broadcast %140 : vector<1x32xf32> to vector<24x32xf32>
    %142 = arith.addf %138, %141 : vector<24x32xf32>
    %cst_57 = arith.constant 5.000000e-01 : f32
    %143 = vector.broadcast %cst_57 : f32 to vector<24x32xf32>
    %144 = arith.mulf %143, %142 : vector<24x32xf32>
    %cst_58 = arith.constant 0.707106769 : f32
    %145 = vector.broadcast %cst_58 : f32 to vector<24x32xf32>
    %146 = arith.mulf %142, %145 : vector<24x32xf32>
    %147 = math.erf %146 : vector<24x32xf32>
    %cst_59 = arith.constant 1.000000e+00 : f32
    %148 = vector.broadcast %cst_59 : f32 to vector<24x32xf32>
    %149 = arith.addf %148, %147 : vector<24x32xf32>
    %150 = arith.mulf %144, %149 : vector<24x32xf32>
    %151 = arith.truncf %150 : vector<24x32xf32> to vector<24x32xbf16>
    %c0_60 = arith.constant 0 : index
    %c0_61 = arith.constant 0 : index
    %c0_62 = arith.constant 0 : index
    %152 = vector.load %arg15[%c0_60, %c0_61, %c0_62] : memref<1x32x512xbf16, #tpu.memory_space<vmem>>, vector<1x32x512xbf16>
    %153 = vector.shape_cast %152 : vector<1x32x512xbf16> to vector<32x512xbf16>
    %cst_63 = arith.constant dense<0.000000e+00> : vector<24x512xf32>
    %154 = tpu.matmul %151, %153, %cst_63 {dimension_numbers = #tpu.dot_dimension_numbers<[1], [0], [0], [1], [0, 0, 1, 1], [], []>} : vector<24x32xbf16>, vector<32x512xbf16>, vector<24x512xf32> -> vector<24x512xf32>
    %c0_64 = arith.constant 0 : index
    %c0_65 = arith.constant 0 : index
    %c0_66 = arith.constant 0 : index
    %155 = vector.load %arg16[%c0_64, %c0_65, %c0_66] : memref<1x1x512xf32, #tpu.memory_space<vmem>>, vector<1x1x512xf32>
    %156 = vector.shape_cast %155 : vector<1x1x512xf32> to vector<1x512xf32>
    %157 = vector.broadcast %156 : vector<1x512xf32> to vector<24x512xf32>
    %158 = arith.addf %154, %157 : vector<24x512xf32>
    %159 = arith.addf %108, %158 : vector<24x512xf32>
    %c7_i32 = arith.constant 7 : i32
    %160 = arith.cmpi slt, %arg0, %c7_i32 : i32
    %161 = arith.extui %160 : i1 to i32
    %c0_i32_67 = arith.constant 0 : i32
    %162 = arith.cmpi ne, %161, %c0_i32_67 : i32
    scf.if %162 {
      %c0_70 = arith.constant 0 : index
      %c0_71 = arith.constant 0 : index
      %166 = vector.load %arg23[%c0_70, %c0_71] : memref<24x512xf32, #tpu.memory_space<vmem>>, vector<24x512xf32>
      tpu.vector_store %arg23[%c0_70, %c0_71], %159 {strides = array<i32>} : memref<24x512xf32, #tpu.memory_space<vmem>>, vector<24x512xf32>,
    } else {
    }
    %c7_i32_68 = arith.constant 7 : i32
    %163 = arith.cmpi eq, %arg0, %c7_i32_68 : i32
    %164 = arith.extui %163 : i1 to i32
    %c0_i32_69 = arith.constant 0 : i32
    %165 = arith.cmpi ne, %164, %c0_i32_69 : i32
    scf.if %165 {
      %c0_70 = arith.constant 0 : index
      %c0_71 = arith.constant 0 : index
      %166 = vector.load %arg17[%c0_70, %c0_71] : memref<1x512xf32, #tpu.memory_space<vmem>>, vector<1x512xf32>
      %c0_72 = arith.constant 0 : index
      %c0_73 = arith.constant 0 : index
      %167 = vector.load %arg18[%c0_72, %c0_73] : memref<1x512xf32, #tpu.memory_space<vmem>>, vector<1x512xf32>
      %cst_74 = arith.constant dense<0.000000e+00> : vector<24xf32>
      %168 = vector.multi_reduction <add>, %159, %cst_74 [1] : vector<24x512xf32> to vector<24xf32>
      %169 = vector.shape_cast %168 : vector<24xf32> to vector<24x1xf32>
      %cst_75 = arith.constant 0.00245098048 : f32
      %170 = vector.broadcast %cst_75 : f32 to vector<24x1xf32>
      %171 = arith.mulf %169, %170 : vector<24x1xf32>
      %172 = arith.mulf %159, %159 : vector<24x512xf32>
      %cst_76 = arith.constant dense<0.000000e+00> : vector<24xf32>
      %173 = vector.multi_reduction <add>, %172, %cst_76 [1] : vector<24x512xf32> to vector<24xf32>
      %174 = vector.shape_cast %173 : vector<24xf32> to vector<24x1xf32>
      %cst_77 = arith.constant 0.00245098048 : f32
      %175 = vector.broadcast %cst_77 : f32 to vector<24x1xf32>
      %176 = arith.mulf %174, %175 : vector<24x1xf32>
      %177 = arith.mulf %171, %171 : vector<24x1xf32>
      %178 = arith.subf %176, %177 : vector<24x1xf32>
      %179 = vector.broadcast %171 : vector<24x1xf32> to vector<24x512xf32>
      %180 = arith.subf %159, %179 : vector<24x512xf32>
      %cst_78 = arith.constant 9.99999974E-6 : f32
      %181 = vector.broadcast %cst_78 : f32 to vector<24x1xf32>
      %182 = arith.addf %178, %181 : vector<24x1xf32>
      %183 = math.rsqrt %182 : vector<24x1xf32>
      %184 = vector.broadcast %183 : vector<24x1xf32> to vector<24x512xf32>
      %185 = arith.mulf %180, %184 : vector<24x512xf32>
      %186 = vector.broadcast %166 : vector<1x512xf32> to vector<24x512xf32>
      %187 = arith.mulf %185, %186 : vector<24x512xf32>
      %188 = vector.broadcast %167 : vector<1x512xf32> to vector<24x512xf32>
      %189 = arith.addf %187, %188 : vector<24x512xf32>
      %190 = arith.truncf %189 : vector<24x512xf32> to vector<24x512xbf16>
      %c0_79 = arith.constant 0 : index
      %c0_80 = arith.constant 0 : index
      %191 = vector.load %arg19[%c0_79, %c0_80] : memref<512x128xbf16, #tpu.memory_space<vmem>>, vector<512x128xbf16>
      %cst_81 = arith.constant dense<0.000000e+00> : vector<24x128xf32>
      %192 = tpu.matmul %190, %191, %cst_81 {dimension_numbers = #tpu.dot_dimension_numbers<[1], [0], [0], [1], [0, 0, 1, 1], [], []>} : vector<24x512xbf16>, vector<512x128xbf16>, vector<24x128xf32> -> vector<24x128xf32>
      %c0_82 = arith.constant 0 : index
      %c0_83 = arith.constant 0 : index
      %193 = vector.load %arg20[%c0_82, %c0_83] : memref<1x128xf32, #tpu.memory_space<vmem>>, vector<1x128xf32>
      %194 = vector.broadcast %193 : vector<1x128xf32> to vector<24x128xf32>
      %195 = arith.addf %192, %194 : vector<24x128xf32>
      %cst_84 = arith.constant 5.000000e-01 : f32
      %196 = vector.broadcast %cst_84 : f32 to vector<24x128xf32>
      %197 = arith.mulf %196, %195 : vector<24x128xf32>
      %cst_85 = arith.constant 0.707106769 : f32
      %198 = vector.broadcast %cst_85 : f32 to vector<24x128xf32>
      %199 = arith.mulf %195, %198 : vector<24x128xf32>
      %200 = math.erf %199 : vector<24x128xf32>
      %cst_86 = arith.constant 1.000000e+00 : f32
      %201 = vector.broadcast %cst_86 : f32 to vector<24x128xf32>
      %202 = arith.addf %201, %200 : vector<24x128xf32>
      %203 = arith.mulf %197, %202 : vector<24x128xf32>
      %204 = arith.truncf %203 : vector<24x128xf32> to vector<24x128xbf16>
      %c0_87 = arith.constant 0 : index
      %c0_88 = arith.constant 0 : index
      %205 = vector.load %arg21[%c0_87, %c0_88] : memref<128x512xbf16, #tpu.memory_space<vmem>>, vector<128x512xbf16>
      %cst_89 = arith.constant dense<0.000000e+00> : vector<24x512xf32>
      %206 = tpu.matmul %204, %205, %cst_89 {dimension_numbers = #tpu.dot_dimension_numbers<[1], [0], [0], [1], [0, 0, 1, 1], [], []>} : vector<24x128xbf16>, vector<128x512xbf16>, vector<24x512xf32> -> vector<24x512xf32>
      %c0_90 = arith.constant 0 : index
      %c0_91 = arith.constant 0 : index
      %207 = vector.load %arg22[%c0_90, %c0_91] : memref<1x512xf32, #tpu.memory_space<vmem>>, vector<1x512xf32>
      %208 = vector.broadcast %207 : vector<1x512xf32> to vector<24x512xf32>
      %209 = arith.addf %206, %208 : vector<24x512xf32>
      %210 = arith.addf %159, %209 : vector<24x512xf32>
      %c0_92 = arith.constant 0 : index
      %c0_93 = arith.constant 0 : index
      %211 = vector.load %arg23[%c0_92, %c0_93] : memref<24x512xf32, #tpu.memory_space<vmem>>, vector<24x512xf32>
      tpu.vector_store %arg23[%c0_92, %c0_93], %210 {strides = array<i32>} : memref<24x512xf32, #tpu.memory_space<vmem>>, vector<24x512xf32>,
    } else {
    }
    return
  }
  func.func @transform_0(%arg0: i32) -> (i32, i32) {
    %c0_i32 = arith.constant 0 : i32
    %c0_i32_0 = arith.constant 0 : i32
    %c0_i32_1 = arith.constant 0 : i32
    return %c0_i32, %c0_i32_0 : i32, i32
  }
  func.func @transform_1(%arg0: i32) -> (i32, i32, i32) {
    %c0_i32 = arith.constant 0 : i32
    %c0_i32_0 = arith.constant 0 : i32
    %c0_i32_1 = arith.constant 0 : i32
    %c0_i32_2 = arith.constant 0 : i32
    return %c0_i32, %c0_i32_0, %c0_i32_1 : i32, i32, i32
  }
  func.func @transform_2(%arg0: i32) -> (i32, i32, i32) {
    %c0_i32 = arith.constant 0 : i32
    %c0_i32_0 = arith.constant 0 : i32
    %c0_i32_1 = arith.constant 0 : i32
    return %arg0, %c0_i32, %c0_i32_0 : i32, i32, i32
  }
  func.func @transform_3(%arg0: i32) -> (i32, i32, i32) {
    %c0_i32 = arith.constant 0 : i32
    %c0_i32_0 = arith.constant 0 : i32
    %c0_i32_1 = arith.constant 0 : i32
    return %arg0, %c0_i32, %c0_i32_0 : i32, i32, i32
  }
  func.func @transform_4(%arg0: i32) -> (i32, i32, i32) {
    %c0_i32 = arith.constant 0 : i32
    %c0_i32_0 = arith.constant 0 : i32
    %c0_i32_1 = arith.constant 0 : i32
    return %arg0, %c0_i32, %c0_i32_0 : i32, i32, i32
  }
  func.func @transform_5(%arg0: i32) -> (i32, i32, i32) {
    %c0_i32 = arith.constant 0 : i32
    %c0_i32_0 = arith.constant 0 : i32
    %c0_i32_1 = arith.constant 0 : i32
    return %arg0, %c0_i32, %c0_i32_0 : i32, i32, i32
  }
  func.func @transform_6(%arg0: i32) -> (i32, i32, i32) {
    %c0_i32 = arith.constant 0 : i32
    %c0_i32_0 = arith.constant 0 : i32
    %c0_i32_1 = arith.constant 0 : i32
    return %arg0, %c0_i32, %c0_i32_0 : i32, i32, i32
  }
  func.func @transform_7(%arg0: i32) -> (i32, i32, i32) {
    %c0_i32 = arith.constant 0 : i32
    %c0_i32_0 = arith.constant 0 : i32
    %c0_i32_1 = arith.constant 0 : i32
    return %arg0, %c0_i32, %c0_i32_0 : i32, i32, i32
  }
  func.func @transform_8(%arg0: i32) -> (i32, i32, i32) {
    %c0_i32 = arith.constant 0 : i32
    %c0_i32_0 = arith.constant 0 : i32
    %c0_i32_1 = arith.constant 0 : i32
    return %arg0, %c0_i32, %c0_i32_0 : i32, i32, i32
  }
  func.func @transform_9(%arg0: i32) -> (i32, i32, i32) {
    %c0_i32 = arith.constant 0 : i32
    %c0_i32_0 = arith.constant 0 : i32
    %c0_i32_1 = arith.constant 0 : i32
    return %arg0, %c0_i32, %c0_i32_0 : i32, i32, i32
  }
  func.func @transform_10(%arg0: i32) -> (i32, i32, i32) {
    %c0_i32 = arith.constant 0 : i32
    %c0_i32_0 = arith.constant 0 : i32
    %c0_i32_1 = arith.constant 0 : i32
    return %arg0, %c0_i32, %c0_i32_0 : i32, i32, i32
  }
  func.func @transform_11(%arg0: i32) -> (i32, i32, i32) {
    %c0_i32 = arith.constant 0 : i32
    %c0_i32_0 = arith.constant 0 : i32
    %c0_i32_1 = arith.constant 0 : i32
    return %arg0, %c0_i32, %c0_i32_0 : i32, i32, i32
  }
  func.func @transform_12(%arg0: i32) -> (i32, i32, i32) {
    %c0_i32 = arith.constant 0 : i32
    %c0_i32_0 = arith.constant 0 : i32
    %c0_i32_1 = arith.constant 0 : i32
    return %arg0, %c0_i32, %c0_i32_0 : i32, i32, i32
  }
  func.func @transform_13(%arg0: i32) -> (i32, i32, i32) {
    %c0_i32 = arith.constant 0 : i32
    %c0_i32_0 = arith.constant 0 : i32
    %c0_i32_1 = arith.constant 0 : i32
    return %arg0, %c0_i32, %c0_i32_0 : i32, i32, i32
  }
  func.func @transform_14(%arg0: i32) -> (i32, i32, i32) {
    %c0_i32 = arith.constant 0 : i32
    %c0_i32_0 = arith.constant 0 : i32
    %c0_i32_1 = arith.constant 0 : i32
    return %arg0, %c0_i32, %c0_i32_0 : i32, i32, i32
  }
  func.func @transform_15(%arg0: i32) -> (i32, i32, i32) {
    %c0_i32 = arith.constant 0 : i32
    %c0_i32_0 = arith.constant 0 : i32
    %c0_i32_1 = arith.constant 0 : i32
    return %arg0, %c0_i32, %c0_i32_0 : i32, i32, i32
  }
  func.func @transform_16(%arg0: i32) -> (i32, i32) {
    %c0_i32 = arith.constant 0 : i32
    %c0_i32_0 = arith.constant 0 : i32
    %c0_i32_1 = arith.constant 0 : i32
    return %c0_i32, %c0_i32_0 : i32, i32
  }
  func.func @transform_17(%arg0: i32) -> (i32, i32) {
    %c0_i32 = arith.constant 0 : i32
    %c0_i32_0 = arith.constant 0 : i32
    %c0_i32_1 = arith.constant 0 : i32
    return %c0_i32, %c0_i32_0 : i32, i32
  }
  func.func @transform_18(%arg0: i32) -> (i32, i32) {
    %c0_i32 = arith.constant 0 : i32
    %c0_i32_0 = arith.constant 0 : i32
    %c0_i32_1 = arith.constant 0 : i32
    return %c0_i32, %c0_i32_0 : i32, i32
  }
  func.func @transform_19(%arg0: i32) -> (i32, i32) {
    %c0_i32 = arith.constant 0 : i32
    %c0_i32_0 = arith.constant 0 : i32
    %c0_i32_1 = arith.constant 0 : i32
    return %c0_i32, %c0_i32_0 : i32, i32
  }
  func.func @transform_20(%arg0: i32) -> (i32, i32) {
    %c0_i32 = arith.constant 0 : i32
    %c0_i32_0 = arith.constant 0 : i32
    %c0_i32_1 = arith.constant 0 : i32
    return %c0_i32, %c0_i32_0 : i32, i32
  }
  func.func @transform_21(%arg0: i32) -> (i32, i32) {
    %c0_i32 = arith.constant 0 : i32
    %c0_i32_0 = arith.constant 0 : i32
    %c0_i32_1 = arith.constant 0 : i32
    return %c0_i32, %c0_i32_0 : i32, i32
  }
  func.func @transform_22(%arg0: i32) -> (i32, i32) {
    %c0_i32 = arith.constant 0 : i32
    %c0_i32_0 = arith.constant 0 : i32
    %c0_i32_1 = arith.constant 0 : i32
    return %c0_i32, %c0_i32_0 : i32, i32
  }
}

</mosaic_0001>

<bundles_post_ra>
// kernel: queryformer_encoder.1
= control target key start
LH: loop header
LB: loop body
LE: loop exit
PB: predicated region body
PF: predicated region fallthrough
CT: control target
= control target key end

     0   :  { %s14239_s0 = inlined_call_operand.vmem [shape: f32[24,512], index: 0, kind: input, shape index: {}]   ;;  %s14240_s1 = inlined_call_operand.vmem [shape: f32[24,8,8], index: 1, kind: input, shape index: {}]   ;;  %s14241_s2 = inlined_call_operand.hbm [shape: f32[8,1,512], index: 2, kind: input, shape index: {}]   ;;  %s14242_s3 = inlined_call_operand.hbm [shape: f32[8,1,512], index: 3, kind: input, shape index: {}]   ;;  %s14243_s4 = inlined_call_operand.hbm [shape: s8[8,512,1536], index: 4, kind: input, shape index: {}]   ;;  %s14244_s5 = inlined_call_operand.hbm [shape: f32[8,1,1536], index: 5, kind: input, shape index: {}]   ;;  %s14245_s6 = inlined_call_operand.hbm [shape: f32[8,1,1536], index: 6, kind: input, shape index: {}]   ;;  %s14246_s7 = inlined_call_operand.hbm [shape: s8[8,512,512], index: 7, kind: input, shape index: {}]   ;;  %s14247_s8 = inlined_call_operand.hbm [shape: f32[8,1,512], index: 8, kind: input, shape index: {}]   ;;  %s14248_s9 = inlined_call_operand.hbm [shape: f32[8,1,512], index: 9, kind: input, shape index: {}]   ;;  %s14249_s10 = inlined_call_operand.hbm [shape: f32[8,1,512], index: 10, kind: input, shape index: {}]   ;;  %s14250_s11 = inlined_call_operand.hbm [shape: f32[8,1,512], index: 11, kind: input, shape index: {}]   ;;  %s14251_s12 = inlined_call_operand.vmem [shape: bf16[8,512,32], index: 12, kind: input, shape index: {}]   ;;  %s14252_s13 = inlined_call_operand.hbm [shape: f32[8,1,32], index: 13, kind: input, shape index: {}]   ;;  %s14253_s14 = inlined_call_operand.hbm [shape: bf16[8,32,512], index: 14, kind: input, shape index: {}]   ;;  %s14254_s15 = inlined_call_operand.hbm [shape: f32[8,1,512], index: 15, kind: input, shape index: {}]   ;;  %s14255_s16 = inlined_call_operand.hbm [shape: f32[1,512], index: 16, kind: input, shape index: {}]   ;;  %s14256_s17 = inlined_call_operand.hbm [shape: f32[1,512], index: 17, kind: input, shape index: {}]   ;;  %s14257_s18 = inlined_call_operand.hbm [shape: bf16[512,128], index: 18, kind: input, shape index: {}]   ;;  %s14258_s19 = inlined_call_operand.hbm [shape: f32[1,128], index: 19, kind: input, shape index: {}]   ;;  %s14259_s20 = inlined_call_operand.hbm [shape: bf16[128,512], index: 20, kind: input, shape index: {}]   ;;  %s14260_s21 = inlined_call_operand.hbm [shape: f32[1,512], index: 21, kind: input, shape index: {}]   ;;  %s14261_s22 = inlined_call_operand.vmem [shape: f32[24,512], index: 22, kind: output, shape index: {}]  }
   0x1   :  { %14301 = sst [smem:[#allocation60_spill]] %s14239_s0 }
   0x2   :  { %14302 = sst [smem:[#allocation61_spill]] %s14240_s1 }
   0x3   :  { %14303 = sst [smem:[#allocation62_spill]] %s14241_s2 }
   0x4   :  { %14304 = sst [smem:[#allocation63_spill]] %s14242_s3 }
   0x5   :  { %14305 = sst [smem:[#allocation64_spill]] %s14243_s4 }
   0x6   :  { %14306 = sst [smem:[#allocation65_spill]] %s14244_s5 }
   0x7   :  { %14307 = sst [smem:[#allocation66_spill]] %s14245_s6 }
   0x8   :  { %14308 = sst [smem:[#allocation67_spill]] %s14246_s7 }
   0x9   :  { %14309 = sst [smem:[#allocation68_spill]] %s14248_s9 }
   0xa   :  { %14310 = sst [smem:[#allocation69_spill]] %s14251_s12 }
   0xb   :  { %14311 = sst [smem:[#allocation70_spill]] %s14255_s16 }
   0xc   :  { %14312 = sst [smem:[#allocation71_spill]] %s14256_s17 }
   0xd   :  { %14313 = sst [smem:[#allocation72_spill]] %s14257_s18 }
   0xe   :  { %14314 = sst [smem:[#allocation73_spill]] %s14258_s19 }
   0xf   :  { %14315 = sst [smem:[#allocation74_spill]] %s14259_s20 }
  0x10   :  { %14316 = sst [smem:[#allocation75_spill]] %s14260_s21 }
  0x11   :  { %14317 = sst [smem:[#allocation76_spill]] %s14261_s22 }
  0x12   :  { %27 = vsyncpa [#allocation3], 0 }
  0x13   :  { %29 = vsyncpa [#allocation3 + $0x1], 0 }
  0x14   :  { %30 = vsyncpa [#allocation5], 0 }
  0x15   :  { %32 = vsyncpa [#allocation5 + $0x1], 0 }
  0x16   :  { %33 = vsyncpa [#allocation8], 0 }
  0x17   :  { %35 = vsyncpa [#allocation8 + $0x1], 0 }
  0x18   :  { %36 = vsyncpa [#allocation11], 0 }
  0x19   :  { %38 = vsyncpa [#allocation11 + $0x1], 0 }
  0x1a   :  { %39 = vsyncpa [#allocation14], 0 }
  0x1b   :  { %41 = vsyncpa [#allocation14 + $0x1], 0 }
  0x1c   :  { %42 = vsyncpa [#allocation17], 0 }
  0x1d   :  { %44 = vsyncpa [#allocation17 + $0x1], 0 }
  0x1e   :  { %45 = vsyncpa [#allocation20], 0 }
  0x1f   :  { %47 = vsyncpa [#allocation20 + $0x1], 0 }
  0x20   :  { %48 = vsyncpa [#allocation23], 0 }
  0x21   :  { %49 = vsyncpa [#allocation26], 0 }
  0x22   :  { %50 = vsyncpa [#allocation29], 0  ;;  %s11050_s3 = smov 0   ;;  %s11052_s28 = smov 0  }
  0x23   :  { %s11054_s29 = smov 0   ;;  %s11056_s30 = smov 0  }
  0x24 LB: > { %14318 = sst [smem:[#allocation41_spill]] %s10908_s28  ;;  %s11069_s4 = sadd.s32 4294967295, %s10916_s30   ;;  %s10916_s30 = sphi %s11056_s30, %s14398_s30   ;;  %s10912_s29 = sphi %s11054_s29, %s14401_s29   ;;  %s10908_s28 = sphi %s11052_s28, %s14400_s28   ;;  %s10904_s3 = sphi %s11050_s3, %s14399_s3  }
  0x25   : > { %14319 = sst [smem:[#allocation42_spill]] %s10912_s29  ;;  %s11072_s0 = sadd.s32 1, %s10916_s30  }
  0x26   : > { %14320 = sst [smem:[#allocation43_spill]] %s11069_s4  ;;  %s102_s23 = ssub.s32 %s10916_s30, %s11072_s0 }
  0x27   : > { %14321 = sst [smem:[#allocation44_spill]] %s11072_s0  ;;  %s105_s1 = sadd.s32 1, %s10912_s29 }
  0x28   : > { %p103_p0 = scmp.eq.s32.totalorder %s102_s23, 0  ;;  %p112_p1 = scmp.ne.s32.totalorder %s10912_s29, %s10908_s28 }
  0x29   : > { %p113_p2 = scmp.eq.s32.totalorder %s10916_s30, 0  ;;  %p118_p3 = scmp.ne.s32.totalorder %s10908_s28, %s10904_s3 }
  0x2a   : > { %s11082_s5 = scalar_select %p103_p0, %s10912_s29, %s105_s1  }
  0x2b   : > { %p11084_p4 = por %p113_p2, %p112_p1  ;;  %p119_p5 = scmp.eq.s32.totalorder %s11069_s4, 0 }
  0x2c   : > { %14322 = sst [smem:[#allocation45_spill]] %s11082_s5  ;;  %p9304_p6 = scmp.ge.s32.totalorder %s10916_s30, 1 }
  0x2d   : > { %p614_p7 = scmp.lt.s32.totalorder %s10916_s30, 9  ;;  %p11093_p8 = por %p119_p5, %p118_p3 }
  0x2e   : > { %p9305_p9 = scmp.ne.s32.totalorder %s11069_s4, 0  ;;  %s14328_s16 = sld [smem:[#allocation70_spill]] }
  0x2f   : > { %s14324_s6 = scalar_select %p11093_p8, 1, 0 }
  0x30   : > { %p11098_p10 = pnand %p9304_p6, %p614_p7  ;;  %s10918_s3 = smov [#allocation22]  }
  0x31   : > { %14325 = sst [smem:[#allocation46_spill]] %s14324_s6  ;;  %s634_s23 = sshll.u32 %s10918_s3, 4  ;;  %s635_s23 = int_to_ptr.vmem [resolvable:$true] %s634_s23 }
  0x32   : > { %s14326_s25 = scalar_select %p11098_p10, 1, 0 }
  0x33   : > { %p10023_p11 = pneg %p11098_p10  ;;  %s14329_s18 = sld [smem:[#allocation72_spill]] }
  0x34   : > { %14327 = sst [smem:[#allocation47_spill]] %s14326_s25  ;;  %s632_s27 = sshll.u32 %s14328_s16, 4  ;;  %s633_s27 = int_to_ptr.hbm [resolvable:$true] %s632_s27 }
  0x35   : > { %p11112_p12 = pnand %p10023_p11, %p119_p5  ;;  %s10919_s26 = smov [#allocation25]  }
  0x36   : > { %s657_s2 = sshll.u32 %s10919_s26, 4  ;;  %s10920_s3 = smov 64   ;;  %s658_s2 = int_to_ptr.vmem [resolvable:$true] %s657_s2 }
  0x37   : > { %10026 = dma.hbm_to_vmem [thread:$0]  (!%p11112_p12), %s633_s27, 64, %s635_s23, [#allocation23]  }
  0x38   : > { %s10921_s16 = smov 4   ;;  %s14331_s20 = sld [smem:[#allocation74_spill]] }
  0x39   : > { %s655_s0 = sshll.u32 %s14329_s18, 4  ;;  %s10922_s12 = smov [#allocation28]   ;;  %s656_s0 = int_to_ptr.hbm [resolvable:$true] %s655_s0 }
  0x3a   : > { %10032 = dma.hbm_to_vmem [thread:$0]  (!%p11112_p12), %s656_s0, 4096, %s658_s2, [#allocation26], %s10920_s3, %s10920_s3, %s10921_s16  }
  0x3b   : > { %s683_s4 = sshll.u32 %s10922_s12, 4  ;;  %s14332_s17 = sld [smem:[#allocation71_spill]]  ;;  %s684_s4 = int_to_ptr.vmem [resolvable:$true] %s683_s4 }
  0x3c   : > { %s10923_s27 = smov 256   ;;  %s10924_s23 = smov 16  }
  0x3d   : > { %s10925_s16 = smov [#allocation24]   ;;  %s14333_s19 = sld [smem:[#allocation73_spill]] }
  0x3e   : > { %s681_s18 = sshll.u32 %s14331_s20, 4  ;;  %s646_s0 = sshll.u32 %s10925_s16, 4  ;;  %s682_s18 = int_to_ptr.hbm [resolvable:$true] %s681_s18  ;;  %s647_s0 = int_to_ptr.vmem [resolvable:$true] %s646_s0 }
  0x3f   : > { %10038 = dma.hbm_to_vmem [thread:$0]  (!%p11112_p12), %s682_s18, 4096, %s684_s4, [#allocation29], %s10923_s27, %s10923_s27, %s10924_s23  }
  0x40   : > { %s14334_s21 = sld [smem:[#allocation75_spill]]  ;;  %s10926_s1 = smov [#allocation27]  }
  0x41   : > { %s644_s26 = sshll.u32 %s14332_s17, 4  ;;  %s672_s17 = sshll.u32 %s10926_s1, 4  ;;  %s645_s26 = int_to_ptr.hbm [resolvable:$true] %s644_s26  ;;  %s673_s17 = int_to_ptr.vmem [resolvable:$true] %s672_s17 }
  0x42   : > { %10029 = dma.hbm_to_vmem [thread:$0]  (!%p11112_p12), %s645_s26, 64, %s647_s0, [#allocation23]  }
  0x43   : > { %s670_s5 = sshll.u32 %s14333_s19, 4  ;;  %s10927_s18 = smov [#allocation30]   ;;  %s671_s5 = int_to_ptr.hbm [resolvable:$true] %s670_s5 }
  0x44   : > { %10035 = dma.hbm_to_vmem [thread:$0]  (!%p11112_p12), %s671_s5, 16, %s673_s17, [#allocation26]  }
  0x45   : > { %s698_s4 = sshll.u32 %s10927_s18, 4  ;;  %p9311_p13 = scmp.ge.s32.totalorder %s10916_s30, 8  ;;  %s699_s4 = int_to_ptr.vmem [resolvable:$true] %s698_s4 }
  0x46   : > { %s696_s6 = sshll.u32 %s14334_s21, 4  ;;  %s11142_s26 = sand.u32 (!%p9311_p13), 1, %s10912_s29   ;;  %s697_s6 = int_to_ptr.hbm [resolvable:$true] %s696_s6 }
  0x47   : > { %10041 = dma.hbm_to_vmem [thread:$0]  (!%p11112_p12), %s697_s6, 64, %s699_s4, [#allocation29]  }
  0x48   : > { %705 = sbr.rel (%p9311_p13) target bundleno = 306 (0x132), region = 48  ;;  %s11145_s27 = sshll.u32 (!%p9311_p13), %s10916_s30, 2 }
  0x49   : > { %s11148_s23 = sshll.u32 (!%p9311_p13), %s11142_s26, 2  ;;  %s11151_s17 = sand.u32 (!%p9311_p13), 1, %s10916_s30  }
  0x4a   : > { %s14335_s0 = sld [smem:[#allocation63_spill]] (!%p9311_p13)  ;;  %s732_s3 = scalar_lea.vmem (!%p9311_p13), [#allocation4], %s11148_s23 }
  0x4b   : > { %s740_s5 = sshll.u32 (!%p9311_p13), %s732_s3, 4  ;;  %s14282_s28 = scalar_lea.sflag (!%p9311_p13), [#allocation5], %s11151_s17  ;;  %s741_s5 = int_to_ptr.vmem [resolvable:$true] %s740_s5 }
  0x50   : > { %s736_s2 = scalar_lea.hbm %s14335_s0, %s11145_s27  ;;  %s10488_s19 = scalar_lea.hbm %s14335_s0, 32 }
  0x51   : > { %s738_s12 = sshll.u32 %s736_s2, 4  ;;  %s739_s12 = int_to_ptr.hbm [resolvable:$true] %s738_s12 }
  0x52   : > { %s10482_s6 = sshra.s32 %s739_s12, 4  ;;  %s10483_s6 = int_to_ptr.hbm [resolvable:$true] %s10482_s6 }
  0x53   : > { %s10484_s1 = scalar_lea.hbm %s10483_s6, 4  ;;  %p10489_p3 = scmp.lt.s32.totalorder %s10483_s6, %s14335_s0 }
  0x54   : > { %p10485_p0 = scmp.ne.s32.totalorder %s10483_s6, %s10484_s1  ;;  %p10490_p6 = scmp.lt.s32.totalorder %s10488_s19, %s10484_s1 }
  0x56   : > { %p10486_p1 = pnand %p10485_p0, %p11084_p4  ;;  %p10491_p7 = por %p10490_p6, %p10489_p3 }
  0x58   : > { %p10487_p2 = pneg %p10486_p1 }
  0x5a   : > { %p10492_p11 = pnand %p10491_p7, %p10487_p2 }
  0x5c   : > { %10495 = shalt.err (!%p10492_p11)
}
  0x5d   : > { %9986 = dma.hbm_to_vmem [thread:$0]  (%p11084_p4), %s739_s12, 64, %s741_s5, %s14282_s28  }
  0x5e   : > { %s14284_s2 = smul.u32 12, %s11142_s26  ;;  %s9317_s6 = sshll.u32 %s11142_s26, 9 }
  0x5f   : > { %s14283_s3 = smul.u32 12, %s10916_s30  ;;  %s14336_s18 = sld [smem:[#allocation65_spill]] }
  0x60   : > { %s773_s22 = scalar_lea.vmem [#allocation7], %s14284_s2  ;;  %s9858_s20 = sshll.u32 %s10916_s30, 9 }
  0x61   : > { %s781_s16 = sshll.u32 %s773_s22, 4  ;;  %s14286_s21 = scalar_lea.sflag [#allocation8], %s11151_s17  ;;  %s782_s16 = int_to_ptr.vmem [resolvable:$true] %s781_s16 }
  0x65   : > { %s777_s4 = scalar_lea.hbm %s14336_s18, %s14283_s3  ;;  %s10516_s19 = scalar_lea.hbm %s14336_s18, 96 }
  0x66   : > { %s779_s0 = sshll.u32 %s777_s4, 4  ;;  %s780_s0 = int_to_ptr.hbm [resolvable:$true] %s779_s0 }
  0x67   : > { %s10510_s29 = sshra.s32 %s780_s0, 4  ;;  %s10511_s29 = int_to_ptr.hbm [resolvable:$true] %s10510_s29 }
  0x68   : > { %s10512_s5 = scalar_lea.hbm %s10511_s29, 12  ;;  %p10517_p1 = scmp.lt.s32.totalorder %s10511_s29, %s14336_s18 }
  0x69   : > { %p10513_p12 = scmp.ne.s32.totalorder %s10511_s29, %s10512_s5  ;;  %p10518_p2 = scmp.lt.s32.totalorder %s10516_s19, %s10512_s5 }
  0x6b   : > { %p10514_p13 = pnand %p10513_p12, %p11084_p4  ;;  %p10519_p3 = por %p10518_p2, %p10517_p1 }
  0x6d   : > { %p10515_p0 = pneg %p10514_p13 }
  0x6f   : > { %p10520_p6 = pnand %p10519_p3, %p10515_p0 }
  0x71   : > { %10523 = shalt.err (!%p10520_p6)
}
  0x72   : > { %9988 = dma.hbm_to_vmem [thread:$0]  (%p11084_p4), %s780_s0, 192, %s782_s16, %s14286_s21  }
  0x73   : > { %s14337_s7 = sld [smem:[#allocation67_spill]]  ;;  %s811_s12 = scalar_lea.vmem [#allocation10], %s9317_s6 }
  0x74   : > { %s819_s2 = sshll.u32 %s811_s12, 4  ;;  %s14289_s29 = scalar_lea.sflag [#allocation11], %s11151_s17  ;;  %s820_s2 = int_to_ptr.vmem [resolvable:$true] %s819_s2 }
  0x79   : > { %s816_s28 = scalar_lea.hbm %s14337_s7, %s9858_s20  ;;  %s10544_s0 = scalar_lea.hbm %s14337_s7, 4096 }
  0x7a   : > { %s817_s25 = sshll.u32 %s816_s28, 4  ;;  %s818_s25 = int_to_ptr.hbm [resolvable:$true] %s817_s25 }
  0x7b   : > { %s10538_s3 = sshra.s32 %s818_s25, 4  ;;  %s10539_s3 = int_to_ptr.hbm [resolvable:$true] %s10538_s3 }
  0x7c   : > { %s10540_s5 = scalar_lea.hbm %s10539_s3, 512  ;;  %p10545_p13 = scmp.lt.s32.totalorder %s10539_s3, %s14337_s7 }
  0x7d   : > { %p10541_p7 = scmp.ne.s32.totalorder %s10539_s3, %s10540_s5  ;;  %p10546_p0 = scmp.lt.s32.totalorder %s10544_s0, %s10540_s5 }
  0x7f   : > { %p10542_p11 = pnand %p10541_p7, %p11084_p4  ;;  %p10547_p1 = por %p10546_p0, %p10545_p13 }
  0x81   : > { %p10543_p12 = pneg %p10542_p11 }
  0x83   : > { %p10548_p2 = pnand %p10547_p1, %p10543_p12 }
  0x85   : > { %10551 = shalt.err (!%p10548_p2)
}
  0x86   : > { %s10928_s20 = smov 512   ;;  %s10929_s6 = smov 32  }
  0x87   : > { %9990 = dma.hbm_to_vmem [thread:$0]  (%p11084_p4), %s818_s25, 8192, %s820_s2, %s14289_s29, %s10928_s20, %s10928_s20, %s10929_s6  }
  0x88   : > { %s14338_s9 = sld [smem:[#allocation68_spill]]  ;;  %s852_s5 = scalar_lea.vmem [#allocation13], %s11148_s23 }
  0x89   : > { %s860_s19 = sshll.u32 %s852_s5, 4  ;;  %s14288_s1 = scalar_lea.sflag [#allocation14], %s11151_s17  ;;  %s861_s19 = int_to_ptr.vmem [resolvable:$true] %s860_s19 }
  0x8e   : > { %s856_s12 = scalar_lea.hbm %s14338_s9, %s11145_s27  ;;  %s10572_s25 = scalar_lea.hbm %s14338_s9, 32 }
  0x8f   : > { %s858_s3 = sshll.u32 %s856_s12, 4  ;;  %s859_s3 = int_to_ptr.hbm [resolvable:$true] %s858_s3 }
  0x90   : > { %s10566_s0 = sshra.s32 %s859_s3, 4  ;;  %s10567_s0 = int_to_ptr.hbm [resolvable:$true] %s10566_s0 }
  0x91   : > { %s10568_s16 = scalar_lea.hbm %s10567_s0, 4  ;;  %p10573_p11 = scmp.lt.s32.totalorder %s10567_s0, %s14338_s9 }
  0x92   : > { %p10569_p3 = scmp.ne.s32.totalorder %s10567_s0, %s10568_s16  ;;  %p10574_p12 = scmp.lt.s32.totalorder %s10572_s25, %s10568_s16 }
  0x94   : > { %p10570_p6 = pnand %p10569_p3, %p11084_p4  ;;  %p10575_p13 = por %p10574_p12, %p10573_p11 }
  0x96   : > { %p10571_p7 = pneg %p10570_p6 }
  0x98   : > { %p10576_p0 = pnand %p10575_p13, %p10571_p7 }
  0x9a   : > { %10579 = shalt.err (!%p10576_p0)
}
  0x9b   : > { %9992 = dma.hbm_to_vmem [thread:$0]  (%p11084_p4), %s859_s3, 64, %s861_s19, %s14288_s1  }
  0x9c   : > { %s894_s22 = scalar_lea.hbm %s14250_s11, %s11145_s27  ;;  %s890_s28 = scalar_lea.vmem [#allocation16], %s11148_s23 }
  0x9d   : > { %s898_s12 = sshll.u32 %s890_s28, 4  ;;  %s896_s5 = sshll.u32 %s894_s22, 4  ;;  %s899_s12 = int_to_ptr.vmem [resolvable:$true] %s898_s12  ;;  %s897_s5 = int_to_ptr.hbm [resolvable:$true] %s896_s5 }
  0x9e   : > { %s14287_s0 = scalar_lea.sflag [#allocation17], %s11151_s17  ;;  %s10594_s16 = sshra.s32 %s897_s5, 4  ;;  %s10595_s16 = int_to_ptr.hbm [resolvable:$true] %s10594_s16 }
  0x9f   : > { %s10596_s4 = scalar_lea.hbm %s10595_s16, 4  ;;  %s10600_s3 = scalar_lea.hbm %s14250_s11, 32 }
  0xa0   : > { %p10597_p1 = scmp.ne.s32.totalorder %s10595_s16, %s10596_s4  ;;  %p10601_p6 = scmp.lt.s32.totalorder %s10595_s16, %s14250_s11 }
  0xa1   : > { %p10602_p7 = scmp.lt.s32.totalorder %s10600_s3, %s10596_s4 }
  0xa2   : > { %p10598_p2 = pnand %p10597_p1, %p11084_p4 }
  0xa3   : > { %p10603_p11 = por %p10602_p7, %p10601_p6 }
  0xa4   : > { %p10599_p3 = pneg %p10598_p2 }
  0xa6   : > { %p10604_p12 = pnand %p10603_p11, %p10599_p3 }
  0xa8   : > { %10607 = shalt.err (!%p10604_p12)
}
  0xa9   : > { %9994 = dma.hbm_to_vmem [thread:$0]  (%p11084_p4), %s897_s5, 64, %s899_s12, %s14287_s0  }
  0xaa   : > { %s9328_s6 = sshll.u32 %s11142_s26, 6  ;;  %s9859_s21 = sshll.u32 %s10916_s30, 6 }
  0xab   : > { %s939_s25 = scalar_lea.hbm %s14253_s14, %s9859_s21  ;;  %s934_s4 = scalar_lea.vmem [#allocation19], %s9328_s6 }
  0xac   : > { %s940_s16 = sshll.u32 %s939_s25, 4  ;;  %s942_s2 = sshll.u32 %s934_s4, 4  ;;  %s941_s16 = int_to_ptr.hbm [resolvable:$true] %s940_s16  ;;  %s943_s2 = int_to_ptr.vmem [resolvable:$true] %s942_s2 }
  0xad   : > { %s14290_s3 = scalar_lea.sflag [#allocation20], %s11151_s17  ;;  %s10622_s19 = sshra.s32 %s941_s16, 4  ;;  %s10623_s19 = int_to_ptr.hbm [resolvable:$true] %s10622_s19 }
  0xae   : > { %s10624_s20 = scalar_lea.hbm %s10623_s19, 64  ;;  %s10628_s0 = scalar_lea.hbm %s14253_s14, 512 }
  0xaf   : > { %p10625_p13 = scmp.ne.s32.totalorder %s10623_s19, %s10624_s20  ;;  %p10629_p2 = scmp.lt.s32.totalorder %s10623_s19, %s14253_s14 }
  0xb0   : > { %p10630_p3 = scmp.lt.s32.totalorder %s10628_s0, %s10624_s20 }
  0xb1   : > { %p10626_p0 = pnand %p10625_p13, %p11084_p4 }
  0xb2   : > { %p10631_p6 = por %p10630_p3, %p10629_p2 }
  0xb3   : > { %p10627_p1 = pneg %p10626_p0 }
  0xb5   : > { %p10632_p7 = pnand %p10631_p6, %p10627_p1 }
  0xb7   : > { %10635 = shalt.err (!%p10632_p7)
}
  0xb8   : > { %s10930_s6 = smov 256   ;;  %s10931_s21 = smov 16  }
  0xb9   : > { %9996 = dma.hbm_to_vmem [thread:$0]  (%p11084_p4), %s941_s16, 1024, %s943_s2, %s14290_s3, %s10930_s6, %s10930_s6, %s10931_s21  }
  0xba   : > { %s14339_s1 = sld [smem:[#allocation62_spill]]  ;;  %s713_s0 = scalar_lea.vmem [#allocation2], %s11148_s23 }
  0xbb   : > { %s721_s19 = sshll.u32 %s713_s0, 4  ;;  %s9965_s12 = smul.u32 1536, %s11142_s26  ;;  %s722_s19 = int_to_ptr.vmem [resolvable:$true] %s721_s19 }
  0xbc   : > { %s710_s5 = scalar_lea.sflag [#allocation3], %s11142_s26 }
  0xc0   : > { %s717_s4 = scalar_lea.hbm %s14339_s1, %s11145_s27  ;;  %s10656_s2 = scalar_lea.hbm %s14339_s1, 32 }
  0xc1   : > { %s719_s20 = sshll.u32 %s717_s4, 4  ;;  %s720_s20 = int_to_ptr.hbm [resolvable:$true] %s719_s20 }
  0xc2   : > { %s10650_s22 = sshra.s32 %s720_s20, 4  ;;  %s10651_s22 = int_to_ptr.hbm [resolvable:$true] %s10650_s22 }
  0xc3   : > { %s10652_s29 = scalar_lea.hbm %s10651_s22, 4  ;;  %p10657_p0 = scmp.lt.s32.totalorder %s10651_s22, %s14339_s1 }
  0xc4   : > { %p10653_p11 = scmp.ne.s32.totalorder %s10651_s22, %s10652_s29  ;;  %p10658_p1 = scmp.lt.s32.totalorder %s10656_s2, %s10652_s29 }
  0xc6   : > { %p10654_p12 = pnand %p10653_p11, %p11084_p4  ;;  %p10659_p2 = por %p10658_p1, %p10657_p0 }
  0xc8   : > { %p10655_p13 = pneg %p10654_p12 }
  0xca   : > { %p10660_p3 = pnand %p10659_p2, %p10655_p13 }
  0xcc   : > { %10663 = shalt.err (!%p10660_p3)
}
  0xcd   : > { %9985 = dma.hbm_to_vmem [thread:$0]  (%p11084_p4), %s720_s20, 64, %s722_s19, %s710_s5  }
  0xce   : > { %s9966_s28 = smul.u32 1536, %s10916_s30  ;;  %s751_s25 = scalar_lea.vmem [#allocation6], %s9965_s12 }
  0xcf   : > { %s759_s4 = sshll.u32 %s751_s25, 4  ;;  %s14340_s7 = sld [smem:[#allocation64_spill]]  ;;  %s760_s4 = int_to_ptr.vmem [resolvable:$true] %s759_s4 }
  0xd5   : > { %s756_s16 = scalar_lea.hbm %s14340_s7, %s9966_s28  ;;  %s10684_s19 = scalar_lea.hbm %s14340_s7, 12288 }
  0xd6   : > { %s757_s9 = sshll.u32 %s756_s16, 4  ;;  %s758_s9 = int_to_ptr.hbm [resolvable:$true] %s757_s9 }
  0xd7   : > { %s10678_s22 = sshra.s32 %s758_s9, 4  ;;  %s10679_s22 = int_to_ptr.hbm [resolvable:$true] %s10678_s22 }
  0xd8   : > { %s10680_s29 = scalar_lea.hbm %s10679_s22, 1536  ;;  %p10685_p12 = scmp.lt.s32.totalorder %s10679_s22, %s14340_s7 }
  0xd9   : > { %p10681_p6 = scmp.ne.s32.totalorder %s10679_s22, %s10680_s29  ;;  %p10686_p13 = scmp.lt.s32.totalorder %s10684_s19, %s10680_s29 }
  0xdb   : > { %p10682_p7 = pnand %p10681_p6, %p11084_p4  ;;  %p10687_p0 = por %p10686_p13, %p10685_p12 }
  0xdd   : > { %p10683_p11 = pneg %p10682_p7 }
  0xdf   : > { %p10688_p1 = pnand %p10687_p0, %p10683_p11 }
  0xe1   : > { %10691 = shalt.err (!%p10688_p1)
}
  0xe2   : > { %s10932_s3 = smov 1536   ;;  %s10933_s5 = smov 96  }
  0xe3   : > { %s14341_s21 = scalar_lea.sflag [#allocation5], %s11151_s17  ;;  %s14342_s28 = smul.u32 12, %s10916_s30 }
  0xe4   : > { %9987 = dma.hbm_to_vmem [thread:$0]  (%p11084_p4), %s758_s9, 24576, %s760_s4, %s14341_s21, %s10932_s3, %s10932_s3, %s10933_s5  }
  0xe5   : > { %s14343_s16 = sld [smem:[#allocation66_spill]]  ;;  %s14344_s22 = smul.u32 12, %s11142_s26 }
  0xe7   : > { %s792_s29 = scalar_lea.vmem [#allocation9], %s14344_s22 }
  0xe8   : > { %s800_s6 = sshll.u32 %s792_s29, 4  ;;  %s801_s6 = int_to_ptr.vmem [resolvable:$true] %s800_s6 }
  0xeb   : > { %s796_s2 = scalar_lea.hbm %s14343_s16, %s14342_s28  ;;  %s10712_s4 = scalar_lea.hbm %s14343_s16, 96 }
  0xec   : > { %s798_s19 = sshll.u32 %s796_s2, 4  ;;  %s799_s19 = int_to_ptr.hbm [resolvable:$true] %s798_s19 }
  0xed   : > { %s10706_s20 = sshra.s32 %s799_s19, 4  ;;  %s10707_s20 = int_to_ptr.hbm [resolvable:$true] %s10706_s20 }
  0xee   : > { %s10708_s12 = scalar_lea.hbm %s10707_s20, 12  ;;  %p10713_p7 = scmp.lt.s32.totalorder %s10707_s20, %s14343_s16 }
  0xef   : > { %p10709_p2 = scmp.ne.s32.totalorder %s10707_s20, %s10708_s12  ;;  %p10714_p11 = scmp.lt.s32.totalorder %s10712_s4, %s10708_s12 }
  0xf1   : > { %p10710_p3 = pnand %p10709_p2, %p11084_p4  ;;  %p10715_p12 = por %p10714_p11, %p10713_p7 }
  0xf3   : > { %p10711_p6 = pneg %p10710_p3 }
  0xf5   : > { %p10716_p13 = pnand %p10715_p12, %p10711_p6 }
  0xf7   : > { %10719 = shalt.err (!%p10716_p13)
}
  0xf8   : > { %s14345_s21 = scalar_lea.sflag [#allocation8], %s11151_s17  ;;  %s837_s1 = scalar_lea.hbm %s14247_s8, %s11145_s27 }
  0xf9   : > { %9989 = dma.hbm_to_vmem [thread:$0]  (%p11084_p4), %s799_s19, 192, %s801_s6, %s14345_s21  }
  0xfa   : > { %s833_s0 = scalar_lea.vmem [#allocation12], %s11148_s23  ;;  %s839_s22 = sshll.u32 %s837_s1, 4  ;;  %s840_s22 = int_to_ptr.hbm [resolvable:$true] %s839_s22 }
  0xfb   : > { %s841_s2 = sshll.u32 %s833_s0, 4  ;;  %s10734_s29 = sshra.s32 %s840_s22, 4  ;;  %s842_s2 = int_to_ptr.vmem [resolvable:$true] %s841_s2  ;;  %s10735_s29 = int_to_ptr.hbm [resolvable:$true] %s10734_s29 }
  0xfc   : > { %s10736_s20 = scalar_lea.hbm %s10735_s29, 4  ;;  %s10740_s6 = scalar_lea.hbm %s14247_s8, 32 }
  0xfd   : > { %p10737_p0 = scmp.ne.s32.totalorder %s10735_s29, %s10736_s20  ;;  %p10741_p3 = scmp.lt.s32.totalorder %s10735_s29, %s14247_s8 }
  0xfe   : > { %p10742_p6 = scmp.lt.s32.totalorder %s10740_s6, %s10736_s20 }
  0xff   : > { %p10738_p1 = pnand %p10737_p0, %p11084_p4 }
 0x100   : > { %p10743_p7 = por %p10742_p6, %p10741_p3 }
 0x101   : > { %p10739_p2 = pneg %p10738_p1 }
 0x103   : > { %p10744_p11 = pnand %p10743_p7, %p10739_p2 }
 0x105   : > { %10747 = shalt.err (!%p10744_p11)
}
 0x106   : > { %s14346_s3 = scalar_lea.sflag [#allocation11], %s11151_s17  ;;  %s875_s28 = scalar_lea.hbm %s14249_s10, %s11145_s27 }
 0x107   : > { %9991 = dma.hbm_to_vmem [thread:$0]  (%p11084_p4), %s840_s22, 64, %s842_s2, %s14346_s3  }
 0x108   : > { %s871_s25 = scalar_lea.vmem [#allocation15], %s11148_s23  ;;  %s877_s0 = sshll.u32 %s875_s28, 4  ;;  %s878_s0 = int_to_ptr.hbm [resolvable:$true] %s877_s0 }
 0x109   : > { %s879_s1 = sshll.u32 %s871_s25, 4  ;;  %s10762_s29 = sshra.s32 %s878_s0, 4  ;;  %s880_s1 = int_to_ptr.vmem [resolvable:$true] %s879_s1  ;;  %s10763_s29 = int_to_ptr.hbm [resolvable:$true] %s10762_s29 }
 0x10a   : > { %s10764_s20 = scalar_lea.hbm %s10763_s29, 4  ;;  %s10768_s2 = scalar_lea.hbm %s14249_s10, 32 }
 0x10b   : > { %p10765_p12 = scmp.ne.s32.totalorder %s10763_s29, %s10764_s20  ;;  %p10769_p1 = scmp.lt.s32.totalorder %s10763_s29, %s14249_s10 }
 0x10c   : > { %p10770_p2 = scmp.lt.s32.totalorder %s10768_s2, %s10764_s20 }
 0x10d   : > { %p10766_p13 = pnand %p10765_p12, %p11084_p4 }
 0x10e   : > { %p10771_p3 = por %p10770_p2, %p10769_p1 }
 0x10f   : > { %p10767_p0 = pneg %p10766_p13 }
 0x111   : > { %p10772_p6 = pnand %p10771_p3, %p10767_p0 }
 0x113   : > { %10775 = shalt.err (!%p10772_p6)
}
 0x114   : > { %s14347_s19 = scalar_lea.sflag [#allocation14], %s11151_s17  ;;  %s919_s5 = scalar_lea.hbm %s14252_s13, %s10916_s30 }
 0x115   : > { %9993 = dma.hbm_to_vmem [thread:$0]  (%p11084_p4), %s878_s0, 64, %s880_s1, %s14347_s19  }
 0x116   : > { %s916_s21 = scalar_lea.vmem [#allocation18], %s11142_s26  ;;  %s921_s25 = sshll.u32 %s919_s5, 4  ;;  %s922_s25 = int_to_ptr.hbm [resolvable:$true] %s921_s25 }
 0x117   : > { %s923_s28 = sshll.u32 %s916_s21, 4  ;;  %s10790_s29 = sshra.s32 %s922_s25, 4  ;;  %s924_s28 = int_to_ptr.vmem [resolvable:$true] %s923_s28  ;;  %s10791_s29 = int_to_ptr.hbm [resolvable:$true] %s10790_s29 }
 0x118   : > { %s10792_s20 = scalar_lea.hbm %s10791_s29, 1  ;;  %s10796_s1 = scalar_lea.hbm %s14252_s13, 8 }
 0x119   : > { %p10793_p7 = scmp.ne.s32.totalorder %s10791_s29, %s10792_s20  ;;  %p10797_p13 = scmp.lt.s32.totalorder %s10791_s29, %s14252_s13 }
 0x11a   : > { %p10798_p0 = scmp.lt.s32.totalorder %s10796_s1, %s10792_s20 }
 0x11b   : > { %p10794_p11 = pnand %p10793_p7, %p11084_p4 }
 0x11c   : > { %p10799_p1 = por %p10798_p0, %p10797_p13 }
 0x11d   : > { %p10795_p12 = pneg %p10794_p11 }
 0x11f   : > { %p10800_p2 = pnand %p10799_p1, %p10795_p12 }
 0x121   : > { %10803 = shalt.err (!%p10800_p2)
}
 0x122   : > { %s14348_s30 = scalar_lea.sflag [#allocation17], %s11151_s17  ;;  %s960_s6 = scalar_lea.hbm %s14254_s15, %s11145_s27 }
 0x123   : > { %9995 = dma.hbm_to_vmem [thread:$0]  (%p11084_p4), %s922_s25, 16, %s924_s28, %s14348_s30  }
 0x124   : > { %s956_s19 = scalar_lea.vmem [#allocation21], %s11148_s23  ;;  %s962_s3 = sshll.u32 %s960_s6, 4  ;;  %s963_s3 = int_to_ptr.hbm [resolvable:$true] %s962_s3 }
 0x125   : > { %s964_s4 = sshll.u32 %s956_s19, 4  ;;  %s10818_s5 = sshra.s32 %s963_s3, 4  ;;  %s965_s4 = int_to_ptr.vmem [resolvable:$true] %s964_s4  ;;  %s10819_s5 = int_to_ptr.hbm [resolvable:$true] %s10818_s5 }
 0x126   : > { %s10820_s21 = scalar_lea.hbm %s10819_s5, 4  ;;  %s10824_s28 = scalar_lea.hbm %s14254_s15, 32 }
 0x127   : > { %p10821_p3 = scmp.ne.s32.totalorder %s10819_s5, %s10820_s21  ;;  %p10825_p11 = scmp.lt.s32.totalorder %s10819_s5, %s14254_s15 }
 0x128   : > { %p10826_p12 = scmp.lt.s32.totalorder %s10824_s28, %s10820_s21 }
 0x129   : > { %p10822_p6 = pnand %p10821_p3, %p11084_p4 }
 0x12a   : > { %p10827_p13 = por %p10826_p12, %p10825_p11 }
 0x12b   : > { %p10823_p7 = pneg %p10822_p6 }
 0x12d   : > { %p10828_p0 = pnand %p10827_p13, %p10823_p7 }
 0x12f   : > { %10831 = shalt.err (!%p10828_p0)
}
 0x130   : > { %s14349_s27 = scalar_lea.sflag [#allocation20], %s11151_s17 }
 0x131   : > { %9997 = dma.hbm_to_vmem [thread:$0]  (%p11084_p4), %s963_s3, 64, %s965_s4, %s14349_s27  }
 0x132 PF: > { %973 = sbr.rel (%p11098_p10) target bundleno = 3126 (0xc36), region = 108 }
 0x137   : > { %s14351_s9 = sld [smem:[#allocation41_spill]] }
 0x13d   : > { %s11388_s0 = sand.u32 1, %s14351_s9  }
 0x13e   : > { %s11391_s2 = sshll.u32 %s11388_s0, 2  ;;  %s976_s30 = scalar_lea.sflag [#allocation3], %s11388_s0 }
 0x13f   : > { %10863 = dma.done.wait (%p11093_p8), %s976_s30, 64  }
 0x140   : > { %10865 = vsyncadd (%p11093_p8), %s976_s30, 4294967232  ;;  %s14353_s24 = sld [smem:[#allocation43_spill]] }
 0x146   : > { %s11400_s17 = sand.u32 1, %s14353_s24  }
 0x147   : > { %s986_s22 = scalar_lea.sflag [#allocation5], %s11400_s17 }
 0x148   : > { %10867 = dma.done.wait (%p11093_p8), %s986_s22, 24640  }
 0x149   : > { %10869 = vsyncadd (%p11093_p8), %s986_s22, 4294942656  ;;  %s9971_s19 = smul.u32 1536, %s11388_s0  ;;  %s1006_s5 = scalar_lea.sflag [#allocation8], %s11400_s17 }
 0x14a   : > { %s9972_s4 = smul.u32 12, %s11388_s0 }
 0x14b   : > { %s11410_s3 = scalar_lea.vmem [#allocation6], %s9971_s19 }
 0x14c   : > { %s11413_s21 = scalar_lea.vmem [#allocation7], %s9972_s4 }
 0x14d   : > { %10871 = dma.done.wait (%p11093_p8), %s1006_s5, 384  }
 0x14e   : > { %10873 = vsyncadd (%p11093_p8), %s1006_s5, 4294966912  ;;  %s9336_s29 = sshll.u32 %s11388_s0, 9  ;;  %s11420_s20 = scalar_lea.vmem [#allocation9], %s9972_s4 }
 0x14f   : > { %s1026_s28 = scalar_lea.sflag [#allocation11], %s11400_s17  ;;  %s11423_s25 = scalar_lea.vmem [#allocation10], %s9336_s29 }
 0x150   : > { %10875 = dma.done.wait (%p11093_p8), %s1026_s28, 8256  }
 0x151   : > { %10877 = vsyncadd (%p11093_p8), %s1026_s28, 4294959040  ;;  %s1046_s27 = scalar_lea.sflag [#allocation14], %s11400_s17 }
 0x152   : > { %10879 = dma.done.wait (%p11093_p8), %s1046_s27, 128  }
 0x153   : > { %10881 = vsyncadd (%p11093_p8), %s1046_s27, 4294967168  ;;  %s1066_s30 = scalar_lea.sflag [#allocation17], %s11400_s17 }
 0x154   : > { %10883 = dma.done.wait (%p11093_p8), %s1066_s30, 80  }
 0x155   : > { %10885 = vsyncadd (%p11093_p8), %s1066_s30, 4294967216  ;;  %s9341_s19 = sshll.u32 %s11388_s0, 6  ;;  %s1085_s5 = scalar_lea.sflag [#allocation20], %s11400_s17 }
 0x156   : > { %s11446_s29 = scalar_lea.vmem [#allocation19], %s9341_s19 }
 0x157   : > { %10887 = dma.done.wait (%p11093_p8), %s1085_s5, 1088  }
 0x158   : > { %10889 = vsyncadd (%p11093_p8), %s1085_s5, 4294966208 }
 0x159   : > { %10891 = dma.done.wait (%p119_p5), [#allocation23], 128  }
 0x15a   : > { %10893 = vsyncadd (%p119_p5), [#allocation23], 4294967168 }
 0x15b   : > { %10895 = dma.done.wait (%p119_p5), [#allocation26], 4112  }
 0x15c   : > { %10897 = vsyncadd (%p119_p5), [#allocation26], 4294963184 }
 0x15d   : > { %10899 = dma.done.wait (%p119_p5), [#allocation29], 4160  }
 0x15e   : > { %10901 = vsyncadd (%p119_p5), [#allocation29], 4294963136  ;;  %p1249_p4 = scmp.lt.s32.totalorder %s14353_s24, 7  ;;  %s14354_s19 = sld [smem:[#allocation69_spill]] }
 0x15f   : > { %s14355_s22 = sld [smem:[#allocation60_spill]] (!%p9305_p9) }
 0x160   : > { %s1250_s1 = scalar_select %p1249_p4, %s14353_s24, 7 }
 0x161   : > { %1258 = sbr.rel (%p9305_p9) target bundleno = 371 (0x173), region = 188  ;;  %s14356_s27 = sld [smem:[#allocation76_spill]] (!%p9305_p9) }
 0x162   : > { %s9860_s17 = sshll.u32 %s1250_s1, 8 }
 0x164   : > { %s11470_s5 = scalar_lea.vmem %s14354_s19, %s9860_s17 }
 0x166   : > { %v1259_v0 = vld [vmem:[%s14355_s22] sm:$0xff]  ;;  %v1260_v1 = vld [vmem:[%s14355_s22 + $0x8] sm:$0xff]  ;;  %v1261_v2 = vld [vmem:[%s14355_s22 + $0x10] sm:$0xff] }
 0x167   : > { %1271 = vst [vmem:[%s14356_s27] sm:$0xff] %v1259_v0  ;;  %v1262_v3 = vld [vmem:[%s14355_s22 + $0x18] sm:$0xff]  ;;  %v1263_v4 = vld [vmem:[%s14355_s22 + $0x20] sm:$0xff]  ;;  %v1264_v5 = vld [vmem:[%s14355_s22 + $0x28] sm:$0xff] }
 0x168   : > { %1272 = vst [vmem:[%s14356_s27 + $0x8] sm:$0xff] %v1260_v1  ;;  %v1265_v6 = vld [vmem:[%s14355_s22 + $0x30] sm:$0xff]  ;;  %v1266_v7 = vld [vmem:[%s14355_s22 + $0x38] sm:$0xff]  ;;  %v1267_v8 = vld [vmem:[%s14355_s22 + $0x40] sm:$0xff] }
 0x169   : > { %1273 = vst [vmem:[%s14356_s27 + $0x10] sm:$0xff] %v1261_v2  ;;  %v1268_v9 = vld [vmem:[%s14355_s22 + $0x48] sm:$0xff]  ;;  %v1269_v10 = vld [vmem:[%s14355_s22 + $0x50] sm:$0xff]  ;;  %v1270_v11 = vld [vmem:[%s14355_s22 + $0x58] sm:$0xff] }
 0x16a   : > { %1274 = vst [vmem:[%s14356_s27 + $0x18] sm:$0xff] %v1262_v3 }
 0x16b   : > { %1275 = vst [vmem:[%s14356_s27 + $0x20] sm:$0xff] %v1263_v4 }
 0x16c   : > { %1276 = vst [vmem:[%s14356_s27 + $0x28] sm:$0xff] %v1264_v5 }
 0x16d   : > { %1277 = vst [vmem:[%s14356_s27 + $0x30] sm:$0xff] %v1265_v6 }
 0x16e   : > { %1278 = vst [vmem:[%s14356_s27 + $0x38] sm:$0xff] %v1266_v7 }
 0x16f   : > { %1279 = vst [vmem:[%s14356_s27 + $0x40] sm:$0xff] %v1267_v8 }
 0x170   : > { %1280 = vst [vmem:[%s14356_s27 + $0x48] sm:$0xff] %v1268_v9 }
 0x171   : > { %1281 = vst [vmem:[%s14356_s27 + $0x50] sm:$0xff] %v1269_v10 }
 0x172   : > { %1282 = vst [vmem:[%s14356_s27 + $0x58] sm:$0xff] %v1270_v11 }
 0x173 PF: > { %s14357_s23 = sld [smem:[#allocation76_spill]]  ;;  %s14358_s4 = scalar_lea.vmem [#allocation2], %s11391_s2  ;;  %v1486_v61 = vld [vmem:[%s11410_s3 + $0x120] sm:$0xff]  ;;  %vm4706_vm9 = vcmask 523264   ;;  %vm5283_vm10 = vcmask 64512  }
 0x174   : > { %v1295_v54 = vld [vmem:[%s14358_s4] sm:$0xf]  ;;  %s14359_s28 = scalar_lea.vmem [#allocation4], %s11391_s2  ;;  %v1534_v62 = vld [vmem:[%s11410_s3 + $0x2a0] sm:$0xff]  ;;  %v1810_v0 = vunpack.c.2.s8 %v1486_v61  ;;  %v1822_v1 = vunpack.c.3.s8 %v1486_v61  ;;  %s10934_s9 = smov 64  }
 0x175   : > { %v11646_v55 = vld [vmem:[%s14359_s28] sm:$0xf]  ;;  %v11648_v56 = vperm.slane %v1295_v54, 0  ;;  %v11650_v57 = vperm.slane %v1295_v54, 1  ;;  %v11652_v58 = vperm.slane %v1295_v54, 2  ;;  %v11654_v59 = vperm.slane %v1295_v54, 3 }
 0x176   : > { %v11657_v60 = vperm.slane %v11646_v55, 0  ;;  %v1582_v63 = vld [vmem:[%s11410_s3 + $0x420] sm:$0xff]  ;;  %v2002_v2 = vunpack.c.2.s8 %v1534_v62  ;;  %v2014_v3 = vunpack.c.3.s8 %v1534_v62  ;;  %v2578_v9 = vcvt.s32.f32 %v1810_v0  ;;  %s14391_s1 = scalar_lea.vmem [#allocation16], %s11391_s2 }
 0x177   : > { %v1630_v4 = vld [vmem:[%s11410_s3 + $0x5a0] sm:$0xff]  ;;  %v2194_v5 = vunpack.c.2.s8 %v1582_v63  ;;  %v2206_v6 = vunpack.c.3.s8 %v1582_v63  ;;  %v2590_v10 = vcvt.s32.f32 %v1822_v1 }
 0x178   : > { %v2386_v7 = vunpack.c.2.s8 %v1630_v4  ;;  %v2398_v8 = vunpack.c.3.s8 %v1630_v4  ;;  %v2770_v11 = vcvt.s32.f32 %v2002_v2 }
 0x179   : > { %v11549_v12 = vld [vmem:[%s14357_s23 + $0x40] sm:$0xff]  ;;  %v11554_v13 = vld [vmem:[%s14357_s23 + $0x48] sm:$0xff]  ;;  %v11559_v14 = vld [vmem:[%s14357_s23 + $0x50] sm:$0xff] }
 0x17a   : > { %v11564_v15 = vld [vmem:[%s14357_s23 + $0x58] sm:$0xff]  ;;  %v1307_v16 = vadd.f32 %v11554_v13, %v11549_v12  ;;  %v11571_v17 = vld [vmem:[%s14357_s23] sm:$0xff]  ;;  %v11576_v18 = vld [vmem:[%s14357_s23 + $0x8] sm:$0xff]  ;;  %v1323_v19 = vmul.f32 %v11549_v12, %v11549_v12  ;;  %v1324_v20 = vmul.f32 %v11554_v13, %v11554_v13  ;;  %v1325_v26 = vmul.f32 %v11559_v14, %v11559_v14 }
 0x17b   : > { %v11585_v21 = vld [vmem:[%s14357_s23 + $0x10] sm:$0xff]  ;;  %v11590_v22 = vld [vmem:[%s14357_s23 + $0x18] sm:$0xff]  ;;  %v1297_v23 = vadd.f32 %v11576_v18, %v11571_v17  ;;  %v1315_v24 = vmul.f32 %v11571_v17, %v11571_v17  ;;  %v1316_v25 = vmul.f32 %v11576_v18, %v11576_v18  ;;  %v11603_v27 = vld [vmem:[%s14357_s23 + $0x20] sm:$0xff]  ;;  %v1326_v43 = vmul.f32 %v11564_v15, %v11564_v15 }
 0x17c   : > { %v1308_v28 = vadd.f32 %v1307_v16, %v11559_v14  ;;  %v1317_v29 = vmul.f32 %v11585_v21, %v11585_v21  ;;  %v1318_v30 = vmul.f32 %v11590_v22, %v11590_v22  ;;  %v1337_v31 = vadd.f32 %v1324_v20, %v1323_v19  ;;  %v11613_v32 = vld [vmem:[%s14357_s23 + $0x28] sm:$0xff]  ;;  %v11618_v33 = vld [vmem:[%s14357_s23 + $0x30] sm:$0xff]  ;;  %v11636_v45 = vld [vmem:[%s14357_s23 + $0x38] sm:$0xff] }
 0x17d   : > { %v1298_v34 = vadd.f32 %v1297_v23, %v11585_v21  ;;  %v1327_v35 = vadd.f32 %v1316_v25, %v1315_v24  ;;  %v1302_v36 = vadd.f32 %v11613_v32, %v11603_v27  ;;  %v1319_v37 = vmul.f32 %v11603_v27, %v11603_v27 }
 0x17e   : > { %v1309_v38 = vadd.f32 %v1308_v28, %v11564_v15  ;;  %v1320_v39 = vmul.f32 %v11613_v32, %v11613_v32  ;;  %v1321_v42 = vmul.f32 %v11618_v33, %v11618_v33  ;;  %v1338_v44 = vadd.f32 %v1337_v31, %v1325_v26 }
 0x17f   : > { %v1299_v40 = vadd.f32 %v1298_v34, %v11590_v22  ;;  %v1328_v41 = vadd.f32 %v1327_v35, %v1317_v29  ;;  %v1303_v48 = vadd.f32 %v1302_v36, %v11618_v33  ;;  %v1322_v49 = vmul.f32 %v11636_v45, %v11636_v45 }
 0x180   : > { %1310 = vadd.xlane.f32.xlu2 %v1309_v38  ;;  %v1332_v46 = vadd.f32 %v1320_v39, %v1319_v37  ;;  %v1339_v51 = vadd.f32 %v1338_v44, %v1326_v43  ;;  %v2782_v16 = vcvt.s32.f32 %v2014_v3  ;;  %v2962_v19 = vcvt.s32.f32 %v2194_v5  ;;  %v1474_v44 = vld [vmem:[%s11410_s3 + $0xc0] sm:$0xff] }
 0x181   : > { %1300 = vadd.xlane.f32.xlu0 %v1299_v40  ;;  %v1329_v47 = vadd.f32 %v1328_v41, %v1318_v30  ;;  %v1304_v52 = vadd.f32 %v1303_v48, %v11636_v45  ;;  %v2974_v20 = vcvt.s32.f32 %v2206_v6  ;;  %v3154_v23 = vcvt.s32.f32 %v2386_v7 }
 0x182   : > { %v1333_v50 = vadd.f32 %v1332_v46, %v1321_v42  ;;  %v3166_v24 = vcvt.s32.f32 %v2398_v8  ;;  %v3262_v25 = vpack.c.bf16 %v2590_v10, %v2578_v9  ;;  %v3358_v26 = vpack.c.bf16 %v2782_v16, %v2770_v11  ;;  %v1522_v46 = vld [vmem:[%s11410_s3 + $0x240] sm:$0xff] }
 0x183   : > { %1330 = vadd.xlane.f32.xlu1 %v1329_v47  ;;  %v1786_v28 = vunpack.c.0.s8 %v1486_v61  ;;  %v1798_v29 = vunpack.c.1.s8 %v1486_v61  ;;  %v3454_v30 = vpack.c.bf16 %v2974_v20, %v2962_v19  ;;  %v1978_v34 = vunpack.c.0.s8 %v1534_v62 }
 0x184   : > { %v1334_v53 = vadd.f32 %v1333_v50, %v1322_v49  ;;  %v3550_v31 = vpack.c.bf16 %v3166_v24, %v3154_v23  ;;  %v1990_v35 = vunpack.c.1.s8 %v1534_v62  ;;  %3570 = vmatpush.bf16.msra.mxu0 %v3262_v25  ;;  %3588 = vmatpush.bf16.msra.mxu1 %v3358_v26  ;;  %v2170_v38 = vunpack.c.0.s8 %v1582_v63  ;;  %v1618_v62 = vld [vmem:[%s11410_s3 + $0x540] sm:$0xff] }
 0x185   : > { %v2554_v36 = vcvt.s32.f32 %v1786_v28  ;;  %v2566_v37 = vcvt.s32.f32 %v1798_v29  ;;  %v2182_v39 = vunpack.c.1.s8 %v1582_v63  ;;  %3606 = vmatpush.bf16.msra.mxu2 %v3454_v30  ;;  %v2746_v40 = vcvt.s32.f32 %v1978_v34  ;;  %v11668_v34 = vld [vmem:[%s11410_s3 + $0x60] sm:$0xff] }
 0x186   : > { %3624 = vmatpush.bf16.msra.mxu3 %v3550_v31  ;;  %v2758_v41 = vcvt.s32.f32 %v1990_v35  ;;  %v2362_v42 = vunpack.c.0.s8 %v1630_v4  ;;  %v2374_v43 = vunpack.c.1.s8 %v1630_v4  ;;  %v2938_v48 = vcvt.s32.f32 %v2170_v38 }
 0x187   : > { %v3250_v47 = vpack.c.bf16 %v2566_v37, %v2554_v36  ;;  %v2950_v49 = vcvt.s32.f32 %v2182_v39  ;;  %v1762_v50 = vunpack.c.2.s8 %v1474_v44  ;;  %v1774_v61 = vunpack.c.3.s8 %v1474_v44 }
 0x188   : > { %1340 = vadd.xlane.f32.xlu2 %v1339_v51  ;;  %v1570_v51 = vld [vmem:[%s11410_s3 + $0x3c0] sm:$0xff]  ;;  %v3142_v54 = vcvt.s32.f32 %v2374_v43  ;;  %v1954_v1 = vunpack.c.2.s8 %v1522_v46  ;;  %v1966_v2 = vunpack.c.3.s8 %v1522_v46  ;;  %v2338_v9 = vunpack.c.2.s8 %v1618_v62 }
 0x189   : > { %1305 = vadd.xlane.f32.xlu0 %v1304_v52  ;;  %v3346_v52 = vpack.c.bf16 %v2758_v41, %v2746_v40  ;;  %3571 = vmatpush.bf16.msra.mxu0 %v3250_v47  ;;  %v3442_v63 = vpack.c.bf16 %v2950_v49, %v2938_v48  ;;  %v2530_v0 = vcvt.s32.f32 %v1762_v50  ;;  %v2542_v4 = vcvt.s32.f32 %v1774_v61  ;;  %v11671_v43 = vld [vmem:[%s11410_s3 + $0x1e0] sm:$0xff] }
 0x18a   : > { %v2146_v5 = vunpack.c.2.s8 %v1570_v51  ;;  %v2158_v6 = vunpack.c.3.s8 %v1570_v51  ;;  %v2722_v7 = vcvt.s32.f32 %v1954_v1  ;;  %v2734_v8 = vcvt.s32.f32 %v1966_v2  ;;  %v11675_v49 = vld [vmem:[%s11410_s3 + $0x360] sm:$0xff] }
 0x18b   : > { %1335 = vadd.xlane.f32.xlu1 %v1334_v53  ;;  %v3130_v53 = vcvt.s32.f32 %v2362_v42  ;;  %3589 = vmatpush.bf16.msra.mxu1 %v3346_v52  ;;  %v2350_v10 = vunpack.c.3.s8 %v1618_v62  ;;  %v3238_v11 = vpack.c.bf16 %v2542_v4, %v2530_v0  ;;  %v1738_v20 = vunpack.c.0.s8 %v1474_v44 }
 0x18c   : > { %3607 = vmatpush.bf16.msra.mxu2 %v3442_v63  ;;  %v2914_v16 = vcvt.s32.f32 %v2146_v5  ;;  %v2926_v19 = vcvt.s32.f32 %v2158_v6  ;;  %v3334_v23 = vpack.c.bf16 %v2734_v8, %v2722_v7  ;;  %v3106_v24 = vcvt.s32.f32 %v2338_v9 }
 0x18d   : > { %v3538_v3 = vpack.c.bf16 %v3142_v54, %v3130_v53  ;;  %v3118_v25 = vcvt.s32.f32 %v2350_v10  ;;  %v1750_v26 = vunpack.c.1.s8 %v1474_v44  ;;  %3572 = vmatpush.bf16.msra.mxu0 %v3238_v11  ;;  %v2506_v29 = vcvt.s32.f32 %v1738_v20  ;;  %v11679_v54 = vld [vmem:[%s11410_s3 + $0x4e0] sm:$0xff] }
 0x18e   : > { %v3430_v28 = vpack.c.bf16 %v2926_v19, %v2914_v16  ;;  %v1930_v30 = vunpack.c.0.s8 %v1522_v46  ;;  %v1942_v31 = vunpack.c.1.s8 %v1522_v46  ;;  %v2122_v37 = vunpack.c.0.s8 %v1570_v51 }
 0x18f   : > { %3625 = vmatpush.bf16.msra.mxu3 %v3538_v3  ;;  %3590 = vmatpush.bf16.msra.mxu1 %v3334_v23  ;;  %v3526_v35 = vpack.c.bf16 %v3118_v25, %v3106_v24  ;;  %v2518_v36 = vcvt.s32.f32 %v1750_v26  ;;  %v2134_v38 = vunpack.c.1.s8 %v1570_v51  ;;  %v2314_v41 = vunpack.c.0.s8 %v1618_v62 }
 0x190   : > { %3608 = vmatpush.bf16.msra.mxu2 %v3430_v28  ;;  %v2698_v39 = vcvt.s32.f32 %v1930_v30  ;;  %v2710_v40 = vcvt.s32.f32 %v1942_v31  ;;  %v2326_v42 = vunpack.c.1.s8 %v1618_v62  ;;  %v2890_v47 = vcvt.s32.f32 %v2122_v37 }
 0x191   : > { %v3226_v44 = vpack.c.bf16 %v2518_v36, %v2506_v29  ;;  %v2902_v46 = vcvt.s32.f32 %v2134_v38  ;;  %v1714_v48 = vunpack.c.2.s8 %v11668_v34  ;;  %v3082_v52 = vcvt.s32.f32 %v2314_v41 }
 0x192   : > { %v3322_v50 = vpack.c.bf16 %v2710_v40, %v2698_v39  ;;  %v3094_v53 = vcvt.s32.f32 %v2326_v42  ;;  %v1726_v51 = vunpack.c.3.s8 %v11668_v34  ;;  %v1906_v63 = vunpack.c.2.s8 %v11671_v43 }
 0x193   : > { %3626 = vmatpush.bf16.msra.mxu3 %v3526_v35  ;;  %3573 = vmatpush.bf16.msra.mxu0 %v3226_v44  ;;  %v3418_v61 = vpack.c.bf16 %v2902_v46, %v2890_v47  ;;  %v2482_v62 = vcvt.s32.f32 %v1714_v48  ;;  %v1918_v0 = vunpack.c.3.s8 %v11671_v43  ;;  %v2098_v3 = vunpack.c.2.s8 %v11675_v49 }
 0x194   : > { %3591 = vmatpush.bf16.msra.mxu1 %v3322_v50  ;;  %v3514_v1 = vpack.c.bf16 %v3094_v53, %v3082_v52  ;;  %v2494_v2 = vcvt.s32.f32 %v1726_v51  ;;  %v2110_v4 = vunpack.c.3.s8 %v11675_v49  ;;  %v2674_v6 = vcvt.s32.f32 %v1906_v63 }
 0x195   : > { %3609 = vmatpush.bf16.msra.mxu2 %v3418_v61  ;;  %v2686_v7 = vcvt.s32.f32 %v1918_v0  ;;  %v2290_v8 = vunpack.c.2.s8 %v11679_v54  ;;  %v2302_v9 = vunpack.c.3.s8 %v11679_v54  ;;  %v2866_v19 = vcvt.s32.f32 %v2098_v3 }
 0x196   : > { %v3214_v16 = vpack.c.bf16 %v2494_v2, %v2482_v62  ;;  %v2878_v20 = vcvt.s32.f32 %v2110_v4  ;;  %v11694_v29 = vperm.slane %v11646_v55, 1  ;;  %v11697_v30 = vperm.slane %v11646_v55, 2 }
 0x197   : > { %3627 = vmatpush.bf16.msra.mxu3 %v3514_v1  ;;  %v3310_v24 = vpack.c.bf16 %v2686_v7, %v2674_v6  ;;  %v3058_v25 = vcvt.s32.f32 %v2290_v8  ;;  %v3070_v26 = vcvt.s32.f32 %v2302_v9  ;;  %v11700_v31 = vperm.slane %v11646_v55, 3 }
 0x198   : > { %3574 = vmatpush.bf16.msra.mxu0 %v3214_v16  ;;  %v3406_v42 = vpack.c.bf16 %v2878_v20, %v2866_v19  ;;  %v1690_v47 = vunpack.c.0.s8 %v11668_v34  ;;  %v1702_v46 = vunpack.c.1.s8 %v11668_v34  ;;  %v1882_v48 = vunpack.c.0.s8 %v11671_v43  ;;  %v1450_v19 = vld [vmem:[%s11410_s3] sm:$0xff] }
 0x199   : > { %3592 = vmatpush.bf16.msra.mxu1 %v3310_v24  ;;  %v3502_v44 = vpack.c.bf16 %v3070_v26, %v3058_v25  ;;  %v1894_v52 = vunpack.c.1.s8 %v11671_v43  ;;  %v2074_v53 = vunpack.c.0.s8 %v11675_v49  ;;  %v2086_v51 = vunpack.c.1.s8 %v11675_v49  ;;  %v11739_v26 = vld [vmem:[%s11410_s3 + $0x180] sm:$0xff] }
 0x19a   : > { %3610 = vmatpush.bf16.msra.mxu2 %v3406_v42  ;;  %v2458_v62 = vcvt.s32.f32 %v1690_v47  ;;  %v2470_v63 = vcvt.s32.f32 %v1702_v46  ;;  %v2650_v0 = vcvt.s32.f32 %v1882_v48  ;;  %v2266_v1 = vunpack.c.0.s8 %v11679_v54  ;;  %v11746_v48 = vld [vmem:[%s11410_s3 + $0x300] sm:$0xff] }
 0x19b   : > { %3628 = vmatpush.bf16.msra.mxu3 %v3502_v44  ;;  %v2662_v4 = vcvt.s32.f32 %v1894_v52  ;;  %v2854_v7 = vcvt.s32.f32 %v2086_v51  ;;  %v2278_v49 = vunpack.c.1.s8 %v11679_v54  ;;  %v1666_v47 = vunpack.c.2.s8 %v1450_v19 }
 0x19c   : > { %v3202_v6 = vpack.c.bf16 %v2470_v63, %v2458_v62  ;;  %v3034_v42 = vcvt.s32.f32 %v2266_v1  ;;  %v1678_v46 = vunpack.c.3.s8 %v1450_v19  ;;  %v1870_v63 = vunpack.c.3.s8 %v11739_v26 }
 0x19d   : > { %v3298_v16 = vpack.c.bf16 %v2662_v4, %v2650_v0  ;;  %v3046_v44 = vcvt.s32.f32 %v2278_v49  ;;  %v2062_v4 = vunpack.c.3.s8 %v11746_v48 }
 0x19e   : > { %3575 = vmatpush.bf16.msra.mxu0 %v3202_v6  ;;  %v2446_v62 = vcvt.s32.f32 %v1678_v46  ;;  %v1642_v46 = vunpack.c.0.s8 %v1450_v19 }
 0x19f   : > { %3593 = vmatpush.bf16.msra.mxu1 %v3298_v16  ;;  %v3490_v51 = vpack.c.bf16 %v3046_v44, %v3034_v42  ;;  %v2830_v16 = vcvt.s32.f32 %v2062_v4  ;;  %v1846_v4 = vunpack.c.1.s8 %v11739_v26 }
 0x1a1   : > { %3629 = vmatpush.bf16.msra.mxu3 %v3490_v51 }
 0x1f3   : > { %v1311_v5 = vpop.xlane.xlu2 %1310 }
 0x1f4   : > { %v11687_v10 = vmul.f32 0.0024509805, %v1311_v5  ;;  %v1301_v11 = vpop.xlane.xlu0 %1300  ;;  %v2842_v5 = vcvt.s32.f32 %v2074_v53  ;;  %v1858_v53 = vunpack.c.2.s8 %v11739_v26 }
 0x1f5   : > { %v11689_v23 = vmul.f32 0.0024509805, %v1301_v11 }
 0x1f6   : > { %v1359_v28 = vsub.f32 %v11549_v12, %v11687_v10  ;;  %v1331_v35 = vpop.xlane.xlu1 %1330  ;;  %v1360_v36 = vsub.f32 %v11554_v13, %v11687_v10  ;;  %v1361_v37 = vsub.f32 %v11559_v14, %v11687_v10  ;;  %v1362_v38 = vsub.f32 %v11564_v15, %v11687_v10 }
 0x1f7   : > { %v1351_v39 = vsub.f32 %v11571_v17, %v11689_v23  ;;  %v1342_v40 = vmul.f32 0.0024509805, %v1331_v35  ;;  %v1345_v55 = vmul.f32 %v11689_v23, %v11689_v23  ;;  %v1347_v41 = vmul.f32 %v11687_v10, %v11687_v10 }
 0x1f8   : > { %v1352_v8 = vsub.f32 %v11576_v18, %v11689_v23  ;;  %v1353_v20 = vsub.f32 %v11585_v21, %v11689_v23  ;;  %v1354_v24 = vsub.f32 %v11590_v22, %v11689_v23 }
 0x1f9   : > { %v1348_v50 = vsub.f32 %v1342_v40, %v1345_v55 }
 0x1fb   : > { %v1341_v61 = vpop.xlane.xlu2 %1340  ;;  %v11721_v2 = vadd.f32 1e-05, %v1348_v50  ;;  %v2038_v50 = vunpack.c.1.s8 %v11746_v48 }
 0x1fc   : > { %v1344_v34 = vmul.f32 0.0024509805, %v1341_v61  ;;  %v1306_v3 = vpop.xlane.xlu0 %1305  ;;  %v2434_v61 = vcvt.s32.f32 %v1666_v47 }
 0x1fd   : > { %v11723_v43 = vmul.f32 0.0024509805, %v1306_v3  ;;  %10159 = vrsqrt.f32 %v11721_v2  ;;  %v2050_v3 = vunpack.c.2.s8 %v11746_v48  ;;  %vm1372_vm0 = vweird.f32 %v11721_v2 }
 0x1fe   : > { %v1350_v9 = vsub.f32 %v1344_v34, %v1347_v41  ;;  %v1336_v11 = vpop.xlane.xlu1 %1335  ;;  %v3394_v41 = vpack.c.bf16 %v2854_v7, %v2842_v5  ;;  %v2626_v34 = vcvt.s32.f32 %v1858_v53  ;;  %v11758_v5 = vld [vmem:[%s11410_s3 + $0x480] sm:$0xff]  ;;  %v3190_v49 = vpack.c.bf16 %v2446_v62, %v2434_v61 }
 0x1ff   : > { %v1355_v25 = vsub.f32 %v11603_v27, %v11723_v43  ;;  %v1343_v40 = vmul.f32 0.0024509805, %v1336_v11  ;;  %v1346_v55 = vmul.f32 %v11723_v43, %v11723_v43  ;;  %v2818_v11 = vcvt.s32.f32 %v2050_v3 }
 0x200   : > { %v11741_v35 = vadd.f32 1e-05, %v1350_v9  ;;  %3611 = vmatpush.bf16.msra.mxu2 %v3394_v41  ;;  %v2638_v9 = vcvt.s32.f32 %v1870_v63  ;;  %3576 = vmatpush.bf16.msra.mxu0 %v3190_v49  ;;  %v2242_v41 = vunpack.c.2.s8 %v11758_v5  ;;  %v2254_v42 = vunpack.c.3.s8 %v11758_v5 }
 0x201   : > { %v1349_v52 = vsub.f32 %v1343_v40, %v1346_v55  ;;  %v3382_v47 = vpack.c.bf16 %v2830_v16, %v2818_v11  ;;  %v1834_v53 = vunpack.c.0.s8 %v11739_v26  ;;  %v2410_v3 = vcvt.s32.f32 %v1642_v46 }
 0x202   : > { %10161 = vrsqrt.f32 %v11741_v35  ;;  %vm1392_vm2 = vweird.f32 %v11741_v35  ;;  %v3286_v55 = vpack.c.bf16 %v2638_v9, %v2626_v34  ;;  %v3010_v62 = vcvt.s32.f32 %v2242_v41 }
 0x203   : > { %v10160_v0 = vpop.eup %10159  ;;  %v11753_v1 = vadd.f32 1e-05, %v1349_v52  ;;  %v1654_v52 = vunpack.c.1.s8 %v1450_v19  ;;  %v3022_v63 = vcvt.s32.f32 %v2254_v42  ;;  %v2602_v9 = vcvt.s32.f32 %v1834_v53 }
 0x204   : > { %v1367_v6 = vmul.f32 %v10160_v0, %v11721_v2  ;;  %vm1373_vm1 = vweird.f32 %v10160_v0  ;;  %3594 = vmatpush.bf16.msra.mxu1 %v3286_v55  ;;  %3612 = vmatpush.bf16.msra.mxu2 %v3382_v47  ;;  %v2026_v11 = vunpack.c.0.s8 %v11746_v48  ;;  %v2806_v47 = vcvt.s32.f32 %v2038_v50  ;;  %v11793_v50 = vld [vmem:[%s11410_s3 + $0x128] sm:$0xff] }
 0x205   : > { %10163 = vrsqrt.f32 %v11753_v1  ;;  %v2422_v34 = vcvt.s32.f32 %v1654_v52  ;;  %v3478_v16 = vpack.c.bf16 %v3022_v63, %v3010_v62  ;;  %vm1374_vm5 = vmor %vm1372_vm0, %vm1373_vm1  ;;  %vm1382_vm6 = vweird.f32 %v11753_v1 }
 0x206   : > { %v1368_v40 = vmul.f32 %v10160_v0, %v1367_v6  ;;  %v2794_v42 = vcvt.s32.f32 %v2026_v11  ;;  %v2218_v46 = vunpack.c.0.s8 %v11758_v5 }
 0x207   : > { %v3178_v7 = vpack.c.bf16 %v2422_v34, %v2410_v3  ;;  %3630 = vmatpush.bf16.msra.mxu3 %v3478_v16 }
 0x208   : > { %v10162_v44 = vpop.eup %10161  ;;  %v1369_v51 = vmul.f32 0.5, %v1368_v40  ;;  %v2614_v40 = vcvt.s32.f32 %v1846_v4  ;;  %v3370_v62 = vpack.c.bf16 %v2806_v47, %v2794_v42  ;;  %v2986_v17 = vcvt.s32.f32 %v2218_v46 }
 0x209   : > { %v1387_v61 = vmul.f32 %v10162_v44, %v11741_v35  ;;  %vm1393_vm3 = vweird.f32 %v10162_v44  ;;  %3577 = vmatpush.bf16.msra.mxu0 %v3178_v7  ;;  %v14361_v46 = vsub.f32 %v11618_v33, %v11723_v43 }
 0x20a   : > { %v1370_v6 = vsub.f32 1.5, %v1369_v51  ;;  %v3274_v26 = vpack.c.bf16 %v2614_v40, %v2602_v9  ;;  %v2230_v51 = vunpack.c.1.s8 %v11758_v5  ;;  %vm1394_vm7 = vmor %vm1392_vm2, %vm1393_vm3  ;;  %3613 = vmatpush.bf16.msra.mxu2 %v3370_v62  ;;  %v11820_v9 = vld [vmem:[%s11410_s3 + $0x2a8] sm:$0xff]  ;;  %v1823_v40 = vunpack.c.3.s8 %v11793_v50 }
 0x20b   : > { %v1388_v49 = vmul.f32 %v10162_v44, %v1387_v61  ;;  %v10164_v19 = vpop.eup %10163 }
 0x20c   : > { %v1371_v54 = vmul.f32 %v10160_v0, %v1370_v6  ;;  %v1377_v41 = vmul.f32 %v10164_v19, %v11753_v1  ;;  %vm1383_vm4 = vweird.f32 %v10164_v19  ;;  %3595 = vmatpush.bf16.msra.mxu1 %v3274_v26  ;;  %v2591_v10 = vcvt.s32.f32 %v1823_v40 }
 0x20d   : > { %v1389_v55 = vmul.f32 0.5, %v1388_v49  ;;  %vm1384_vm8 = vmor %vm1382_vm6, %vm1383_vm4 }
 0x20e   : > { %v1375_v48 = vsel %vm1374_vm5, %v10160_v0, %v1371_v54  ;;  %v1378_v53 = vmul.f32 %v10164_v19, %v1377_v41 }
 0x20f   : > { %v1390_v52 = vsub.f32 1.5, %v1389_v55  ;;  %v1396_v2 = vmul.f32 %v1375_v48, %v1351_v39  ;;  %v1397_v61 = vmul.f32 %v1375_v48, %v1352_v8  ;;  %v1398_v7 = vmul.f32 %v1375_v48, %v1353_v20 }
 0x210   : > { %v1399_v54 = vmul.f32 %v1375_v48, %v1354_v24  ;;  %v1379_v5 = vmul.f32 0.5, %v1378_v53  ;;  %v2998_v20 = vcvt.s32.f32 %v2230_v51  ;;  %v1811_v24 = vunpack.c.2.s8 %v11793_v50  ;;  %v1583_v51 = vld [vmem:[%s11410_s3 + $0x428] sm:$0xff] }
 0x211   : > { %v1391_v0 = vmul.f32 %v10162_v44, %v1390_v52  ;;  %v1417_v39 = vmul.f32 %v11648_v56, %v1396_v2  ;;  %v1418_v18 = vmul.f32 %v11650_v57, %v1397_v61  ;;  %v1419_v8 = vmul.f32 %v11652_v58, %v1398_v7 }
 0x212   : > { %v1420_v21 = vmul.f32 %v11654_v59, %v1399_v54  ;;  %v1380_v23 = vsub.f32 1.5, %v1379_v5  ;;  %v3466_v16 = vpack.c.bf16 %v2998_v20, %v2986_v17  ;;  %v2579_v12 = vcvt.s32.f32 %v1811_v24 }
 0x213   : > { %v1395_v22 = vsel %vm1394_vm7, %v10162_v44, %v1391_v0  ;;  %v1438_v63 = vadd.f32 %v11657_v60, %v1417_v39  ;;  %v1439_v3 = vadd.f32 %v11694_v29, %v1418_v18  ;;  %v1440_v34 = vadd.f32 %v11697_v30, %v1419_v8  ;;  %v1631_v0 = vld [vmem:[%s11410_s3 + $0x5a8] sm:$0xff] }
 0x214   : > { %v1441_v4 = vadd.f32 %v11700_v31, %v1420_v21  ;;  %v1404_v6 = vmul.f32 %v1395_v22, %v1359_v28  ;;  %v1405_v35 = vmul.f32 %v1395_v22, %v1360_v36  ;;  %v1406_v44 = vmul.f32 %v1395_v22, %v1361_v37  ;;  %3631 = vmatpush.bf16.msra.mxu3 %v3466_v16 }
 0x215   : > { %v1407_v49 = vmul.f32 %v1395_v22, %v1362_v38  ;;  %v1381_v11 = vmul.f32 %v10164_v19, %v1380_v23  ;;  %v2003_v37 = vunpack.c.2.s8 %v11820_v9  ;;  %v2015_v38 = vunpack.c.3.s8 %v11820_v9 }
 0x216   : > { %v1425_v28 = vmul.f32 %v11648_v56, %v1404_v6  ;;  %v1426_v13 = vmul.f32 %v11650_v57, %v1405_v35  ;;  %v1427_v36 = vmul.f32 %v11652_v58, %v1406_v44  ;;  %v14362_v52 = vsub.f32 %v11636_v45, %v11723_v43 }
 0x217   : > { %v1428_v14 = vmul.f32 %v11654_v59, %v1407_v49  ;;  %v1385_v15 = vsel %vm1384_vm8, %v10164_v19, %v1381_v11  ;;  %v14360_v19 = vsub.f32 %v11613_v32, %v11723_v43  ;;  %v3263_v45 = vpack.c.bf16 %v2591_v10, %v2579_v12  ;;  %v1475_v49 = vld [vmem:[%s11410_s3 + $0xc8] sm:$0xff] }
 0x218   : > { %v1446_v55 = vadd.f32 %v11657_v60, %v1425_v28  ;;  %v1447_v41 = vadd.f32 %v11694_v29, %v1426_v13  ;;  %v1448_v26 = vadd.f32 %v11697_v30, %v1427_v36  ;;  %v1400_v1 = vmul.f32 %v1385_v15, %v1355_v25  ;;  %v1523_v12 = vld [vmem:[%s11410_s3 + $0x248] sm:$0xff] }
 0x219   : > { %v1449_v42 = vadd.f32 %v11700_v31, %v1428_v14  ;;  %v1401_v47 = vmul.f32 %v1385_v15, %v14360_v19  ;;  %v1402_v48 = vmul.f32 %v1385_v15, %v14361_v46  ;;  %v1403_v53 = vmul.f32 %v1385_v15, %v14362_v52  ;;  %3642 = vmatpush.bf16.msrb.mxu0 %v3263_v45  ;;  %v1571_v14 = vld [vmem:[%s11410_s3 + $0x3c8] sm:$0xff] }
 0x21a   : > { %v11849_v2 = vpack.c.bf16 %v1446_v55, %v1446_v55  ;;  %v11851_v61 = vpack.c.bf16 %v1447_v41, %v1447_v41  ;;  %v11853_v7 = vpack.c.bf16 %v1448_v26, %v1448_v26  ;;  %v1421_v32 = vmul.f32 %v11648_v56, %v1400_v1  ;;  %v1619_v55 = vld [vmem:[%s11410_s3 + $0x548] sm:$0xff] }
 0x21b   : > { %v11855_v27 = vpack.c.bf16 %v1449_v42, %v1449_v42  ;;  %v1422_v25 = vmul.f32 %v11650_v57, %v1401_v47  ;;  %v1423_v33 = vmul.f32 %v11652_v58, %v1402_v48  ;;  %v1424_v54 = vmul.f32 %v11654_v59, %v1403_v53 }
 0x21c   : > { %14363 = vst [vmem:[#allocation48_spill] sm:$0xff] %v11851_v61  ;;  %v2771_v43 = vcvt.s32.f32 %v2003_v37  ;;  %v2783_v5 = vcvt.s32.f32 %v2015_v38  ;;  %v2195_v62 = vunpack.c.2.s8 %v1583_v51  ;;  %v1442_v17 = vadd.f32 %v11657_v60, %v1421_v32 }
 0x21d   : > { %14364 = vst [vmem:[#allocation49_spill] sm:$0xff] %v11853_v7  ;;  %v1443_v39 = vadd.f32 %v11694_v29, %v1422_v25  ;;  %v1444_v18 = vadd.f32 %v11697_v30, %v1423_v33  ;;  %v1445_v8 = vadd.f32 %v11700_v31, %v1424_v54  ;;  %v2207_v57 = vunpack.c.3.s8 %v1583_v51 }
 0x21e   : > { %v3359_v56 = vpack.c.bf16 %v2783_v5, %v2771_v43  ;;  %v2963_v21 = vcvt.s32.f32 %v2195_v62  ;;  %v2387_v58 = vunpack.c.2.s8 %v1631_v0  ;;  %v11866_v22 = vpack.c.bf16 %v1442_v17, %v1438_v63 }
 0x21f   : > { %v11868_v59 = vpack.c.bf16 %v1443_v39, %v1439_v3  ;;  %v11870_v23 = vpack.c.bf16 %v1444_v18, %v1440_v34  ;;  %v11872_v20 = vpack.c.bf16 %v1445_v8, %v1441_v4  ;;  %v2975_v60 = vcvt.s32.f32 %v2207_v57 }
 0x220   : > { %3660 = vmatpush.bf16.msrb.mxu1 %v3359_v56  ;;  %v2399_v29 = vunpack.c.3.s8 %v1631_v0  ;;  %v3155_v30 = vcvt.s32.f32 %v2387_v58  ;;  %v1787_v31 = vunpack.c.0.s8 %v11793_v50  ;;  %3578 = vmatmul.bf16.vlgmr.msra.gmra.mxu0 %v11866_v22  ;;  %v1799_v24 = vunpack.c.1.s8 %v11793_v50 }
 0x221   : > { %3596 = vmatmul.bf16.vlgmr.msra.gmra.mxu1 %v11868_v59  ;;  %v1979_v63 = vunpack.c.0.s8 %v11820_v9  ;;  %v1991_v3 = vunpack.c.1.s8 %v11820_v9  ;;  %v2171_v34 = vunpack.c.0.s8 %v1583_v51  ;;  %3614 = vmatmul.bf16.vlgmr.msra.gmra.mxu2 %v11870_v23  ;;  %v3455_v4 = vpack.c.bf16 %v2975_v60, %v2963_v21  ;;  %v1463_v60 = vld [vmem:[%s11410_s3 + $0x68] sm:$0xff] }
 0x222   : > { %3632 = vmatmul.bf16.vlgmr.msra.gmra.mxu3 %v11872_v20  ;;  %v3167_v6 = vcvt.s32.f32 %v2399_v29  ;;  %v2555_v35 = vcvt.s32.f32 %v1787_v31  ;;  %v2183_v44 = vunpack.c.1.s8 %v1583_v51  ;;  %v2567_v11 = vcvt.s32.f32 %v1799_v24 }
 0x223   : > { %v2747_v16 = vcvt.s32.f32 %v1979_v63  ;;  %v2759_v40 = vcvt.s32.f32 %v1991_v3  ;;  %v2939_v50 = vcvt.s32.f32 %v2171_v34  ;;  %3678 = vmatpush.bf16.msrb.mxu2 %v3455_v4  ;;  %v2363_v13 = vunpack.c.0.s8 %v1631_v0  ;;  %v1511_v63 = vld [vmem:[%s11410_s3 + $0x1e8] sm:$0xff] }
 0x224   : > { %v3551_v28 = vpack.c.bf16 %v3167_v6, %v3155_v30  ;;  %v2951_v9 = vcvt.s32.f32 %v2183_v44  ;;  %v2375_v36 = vunpack.c.1.s8 %v1631_v0  ;;  %v3251_v15 = vpack.c.bf16 %v2567_v11, %v2555_v35  ;;  %v1559_v35 = vld [vmem:[%s11410_s3 + $0x368] sm:$0xff] }
 0x225   : > { %v3347_v10 = vpack.c.bf16 %v2759_v40, %v2747_v16  ;;  %v1763_v37 = vunpack.c.2.s8 %v1475_v49  ;;  %v1775_v38 = vunpack.c.3.s8 %v1475_v49  ;;  %v3131_v26 = vcvt.s32.f32 %v2363_v13 }
 0x226   : > { %3696 = vmatpush.bf16.msrb.mxu3 %v3551_v28  ;;  %v3443_v41 = vpack.c.bf16 %v2951_v9, %v2939_v50  ;;  %v3143_v42 = vcvt.s32.f32 %v2375_v36  ;;  %v1955_v1 = vunpack.c.2.s8 %v1523_v12  ;;  %3643 = vmatpush.bf16.msrb.mxu0 %v3251_v15  ;;  %v1967_v46 = vunpack.c.3.s8 %v1523_v12  ;;  %v1607_v9 = vld [vmem:[%s11410_s3 + $0x4e8] sm:$0xff] }
 0x227   : > { %3661 = vmatpush.bf16.msrb.mxu1 %v3347_v10  ;;  %v2531_v19 = vcvt.s32.f32 %v1763_v37  ;;  %v2543_v47 = vcvt.s32.f32 %v1775_v38  ;;  %v2147_v48 = vunpack.c.2.s8 %v1571_v14  ;;  %v2159_v51 = vunpack.c.3.s8 %v1571_v14 }
 0x228   : > { %3679 = vmatpush.bf16.msrb.mxu2 %v3443_v41  ;;  %v3539_v52 = vpack.c.bf16 %v3143_v42, %v3131_v26  ;;  %v2723_v53 = vcvt.s32.f32 %v1955_v1  ;;  %v2339_v32 = vunpack.c.2.s8 %v1619_v55  ;;  %v2735_v33 = vcvt.s32.f32 %v1967_v46 }
 0x229   : > { %v3239_v25 = vpack.c.bf16 %v2543_v47, %v2531_v19  ;;  %v2915_v54 = vcvt.s32.f32 %v2147_v48  ;;  %v2351_v0 = vunpack.c.3.s8 %v1619_v55  ;;  %v2927_v45 = vcvt.s32.f32 %v2159_v51 }
 0x22a   : > { %3697 = vmatpush.bf16.msrb.mxu3 %v3539_v52  ;;  %v3107_v43 = vcvt.s32.f32 %v2339_v32  ;;  %v1739_v5 = vunpack.c.0.s8 %v1475_v49  ;;  %v1751_v62 = vunpack.c.1.s8 %v1475_v49  ;;  %v3335_v17 = vpack.c.bf16 %v2735_v33, %v2723_v53 }
 0x22b   : > { %3644 = vmatpush.bf16.msrb.mxu0 %v3239_v25  ;;  %v3119_v39 = vcvt.s32.f32 %v2351_v0  ;;  %v1931_v18 = vunpack.c.0.s8 %v1523_v12  ;;  %v1943_v8 = vunpack.c.1.s8 %v1523_v12  ;;  %v3431_v56 = vpack.c.bf16 %v2927_v45, %v2915_v54  ;;  %v1451_v45 = vld [vmem:[%s11410_s3 + $0x8] sm:$0xff] }
 0x22c   : > { %v2507_v57 = vcvt.s32.f32 %v1739_v5  ;;  %v2519_v21 = vcvt.s32.f32 %v1751_v62  ;;  %v2123_v58 = vunpack.c.0.s8 %v1571_v14  ;;  %3662 = vmatpush.bf16.msrb.mxu1 %v3335_v17  ;;  %v2135_v24 = vunpack.c.1.s8 %v1571_v14 }
 0x22d   : > { %v3527_v29 = vpack.c.bf16 %v3119_v39, %v3107_v43  ;;  %v2699_v30 = vcvt.s32.f32 %v1931_v18  ;;  %v2711_v31 = vcvt.s32.f32 %v1943_v8  ;;  %3680 = vmatpush.bf16.msrb.mxu2 %v3431_v56  ;;  %v2315_v4 = vunpack.c.0.s8 %v1619_v55  ;;  %v1499_v39 = vld [vmem:[%s11410_s3 + $0x188] sm:$0xff] }
 0x22e   : > { %v3227_v3 = vpack.c.bf16 %v2519_v21, %v2507_v57  ;;  %v2891_v34 = vcvt.s32.f32 %v2123_v58  ;;  %v2327_v6 = vunpack.c.1.s8 %v1619_v55  ;;  %v2903_v49 = vcvt.s32.f32 %v2135_v24  ;;  %v1547_v21 = vld [vmem:[%s11410_s3 + $0x308] sm:$0xff] }
 0x22f   : > { %3698 = vmatpush.bf16.msrb.mxu3 %v3527_v29  ;;  %v3323_v44 = vpack.c.bf16 %v2711_v31, %v2699_v30  ;;  %v1715_v11 = vunpack.c.2.s8 %v1463_v60  ;;  %v1727_v16 = vunpack.c.3.s8 %v1463_v60  ;;  %v3083_v40 = vcvt.s32.f32 %v2315_v4 }
 0x230   : > { %3645 = vmatpush.bf16.msrb.mxu0 %v3227_v3  ;;  %v3095_v50 = vcvt.s32.f32 %v2327_v6  ;;  %v1907_v12 = vunpack.c.2.s8 %v1511_v63  ;;  %v1919_v28 = vunpack.c.3.s8 %v1511_v63  ;;  %v3419_v13 = vpack.c.bf16 %v2903_v49, %v2891_v34  ;;  %v1595_v34 = vld [vmem:[%s11410_s3 + $0x488] sm:$0xff] }
 0x231   : > { %3663 = vmatpush.bf16.msrb.mxu1 %v3323_v44  ;;  %3583 = vmatmul.bf16.gmra.mxu0 %v11849_v2  ;;  %v2483_v36 = vcvt.s32.f32 %v1715_v11  ;;  %v2495_v14 = vcvt.s32.f32 %v1727_v16  ;;  %v2099_v15 = vunpack.c.2.s8 %v1559_v35  ;;  %v2111_v55 = vunpack.c.3.s8 %v1559_v35 }
 0x232   : > { %v3515_v10 = vpack.c.bf16 %v3095_v50, %v3083_v40  ;;  %3601 = vmatmul.bf16.gmra.mxu1 %v11851_v61  ;;  %3619 = vmatmul.bf16.gmra.mxu2 %v11853_v7  ;;  %v2675_v37 = vcvt.s32.f32 %v1907_v12  ;;  %v2687_v38 = vcvt.s32.f32 %v1919_v28  ;;  %v2291_v42 = vunpack.c.2.s8 %v1607_v9 }
 0x233   : > { %3681 = vmatpush.bf16.msrb.mxu2 %v3419_v13  ;;  %3637 = vmatmul.bf16.gmra.mxu3 %v11855_v27  ;;  %v3215_v41 = vpack.c.bf16 %v2495_v14, %v2483_v36  ;;  %v2867_v26 = vcvt.s32.f32 %v2099_v15  ;;  %v2303_v1 = vunpack.c.3.s8 %v1607_v9  ;;  %v2879_v47 = vcvt.s32.f32 %v2111_v55 }
 0x234   : > { %3699 = vmatpush.bf16.msrb.mxu3 %v3515_v10  ;;  %v3311_v19 = vpack.c.bf16 %v2687_v38, %v2675_v37  ;;  %v1691_v46 = vunpack.c.0.s8 %v1463_v60  ;;  %v1703_v48 = vunpack.c.1.s8 %v1463_v60  ;;  %v3059_v52 = vcvt.s32.f32 %v2291_v42 }
 0x235   : > { %3646 = vmatpush.bf16.msrb.mxu0 %v3215_v41  ;;  %v3071_v53 = vcvt.s32.f32 %v2303_v1  ;;  %v1883_v51 = vunpack.c.0.s8 %v1511_v63  ;;  %v1895_v32 = vunpack.c.1.s8 %v1511_v63  ;;  %v3407_v25 = vpack.c.bf16 %v2879_v47, %v2867_v26 }
 0x236   : > { %3664 = vmatpush.bf16.msrb.mxu1 %v3311_v19  ;;  %v2459_v33 = vcvt.s32.f32 %v1691_v46  ;;  %v2471_v54 = vcvt.s32.f32 %v1703_v48  ;;  %v2075_v0 = vunpack.c.0.s8 %v1559_v35  ;;  %v2087_v17 = vunpack.c.1.s8 %v1559_v35  ;;  %v1488_v19 = vld [vmem:[%s11410_s3 + $0x130] sm:$0xff] }
 0x237   : > { %v3503_v43 = vpack.c.bf16 %v3071_v53, %v3059_v52  ;;  %v2651_v5 = vcvt.s32.f32 %v1883_v51  ;;  %v2663_v62 = vcvt.s32.f32 %v1895_v32  ;;  %3682 = vmatpush.bf16.msrb.mxu2 %v3407_v25  ;;  %v2267_v56 = vunpack.c.0.s8 %v1607_v9  ;;  %v1536_v53 = vld [vmem:[%s11410_s3 + $0x2b0] sm:$0xff] }
 0x238   : > { %v3203_v18 = vpack.c.bf16 %v2471_v54, %v2459_v33  ;;  %v2843_v8 = vcvt.s32.f32 %v2075_v0  ;;  %v2279_v57 = vunpack.c.1.s8 %v1607_v9  ;;  %v2855_v60 = vcvt.s32.f32 %v2087_v17  ;;  %v1584_v54 = vld [vmem:[%s11410_s3 + $0x430] sm:$0xff] }
 0x239   : > { %3700 = vmatpush.bf16.msrb.mxu3 %v3503_v43  ;;  %v3299_v58 = vpack.c.bf16 %v2663_v62, %v2651_v5  ;;  %v1667_v29 = vunpack.c.2.s8 %v1451_v45  ;;  %v1679_v30 = vunpack.c.3.s8 %v1451_v45  ;;  %v3035_v31 = vcvt.s32.f32 %v2267_v56 }
 0x23a   : > { %3647 = vmatpush.bf16.msrb.mxu0 %v3203_v18  ;;  %v3047_v24 = vcvt.s32.f32 %v2279_v57  ;;  %v1859_v63 = vunpack.c.2.s8 %v1499_v39  ;;  %v1871_v3 = vunpack.c.3.s8 %v1499_v39  ;;  %v3395_v4 = vpack.c.bf16 %v2855_v60, %v2843_v8  ;;  %v1632_v8 = vld [vmem:[%s11410_s3 + $0x5b0] sm:$0xff] }
 0x23b   : > { %3665 = vmatpush.bf16.msrb.mxu1 %v3299_v58  ;;  %v2435_v6 = vcvt.s32.f32 %v1667_v29  ;;  %v2447_v35 = vcvt.s32.f32 %v1679_v30  ;;  %v2051_v44 = vunpack.c.2.s8 %v1547_v21  ;;  %v2063_v40 = vunpack.c.3.s8 %v1547_v21 }
 0x23c   : > { %v3491_v49 = vpack.c.bf16 %v3047_v24, %v3035_v31  ;;  %v2627_v11 = vcvt.s32.f32 %v1859_v63  ;;  %v2639_v16 = vcvt.s32.f32 %v1871_v3  ;;  %3683 = vmatpush.bf16.msrb.mxu2 %v3395_v4  ;;  %v2243_v28 = vunpack.c.2.s8 %v1595_v34 }
 0x23d   : > { %v3191_v50 = vpack.c.bf16 %v2447_v35, %v2435_v6  ;;  %v2819_v12 = vcvt.s32.f32 %v2051_v44  ;;  %v2255_v9 = vunpack.c.3.s8 %v1595_v34  ;;  %v2831_v36 = vcvt.s32.f32 %v2063_v40 }
 0x23e   : > { %3701 = vmatpush.bf16.msrb.mxu3 %v3491_v49  ;;  %v3287_v13 = vpack.c.bf16 %v2639_v16, %v2627_v11  ;;  %v1643_v14 = vunpack.c.0.s8 %v1451_v45  ;;  %v1655_v15 = vunpack.c.1.s8 %v1451_v45  ;;  %v3011_v10 = vcvt.s32.f32 %v2243_v28 }
 0x23f   : > { %3648 = vmatpush.bf16.msrb.mxu0 %v3191_v50  ;;  %v3023_v37 = vcvt.s32.f32 %v2255_v9  ;;  %v1835_v38 = vunpack.c.0.s8 %v1499_v39  ;;  %v1847_v55 = vunpack.c.1.s8 %v1499_v39  ;;  %v3383_v41 = vpack.c.bf16 %v2831_v36, %v2819_v12 }
 0x240   : > { %3666 = vmatpush.bf16.msrb.mxu1 %v3287_v13  ;;  %v2411_v26 = vcvt.s32.f32 %v1643_v14  ;;  %v2423_v42 = vcvt.s32.f32 %v1655_v15  ;;  %v2027_v1 = vunpack.c.0.s8 %v1547_v21  ;;  %v2039_v52 = vunpack.c.1.s8 %v1547_v21  ;;  %v1476_v13 = vld [vmem:[%s11410_s3 + $0xd0] sm:$0xff] }
 0x241   : > { %v3479_v47 = vpack.c.bf16 %v3023_v37, %v3011_v10  ;;  %v2603_v46 = vcvt.s32.f32 %v1835_v38  ;;  %v2615_v48 = vcvt.s32.f32 %v1847_v55  ;;  %3684 = vmatpush.bf16.msrb.mxu2 %v3383_v41  ;;  %v2219_v25 = vunpack.c.0.s8 %v1595_v34  ;;  %v1524_v37 = vld [vmem:[%s11410_s3 + $0x250] sm:$0xff] }
 0x242   : > { %v3179_v51 = vpack.c.bf16 %v2423_v42, %v2411_v26  ;;  %v2795_v32 = vcvt.s32.f32 %v2027_v1  ;;  %v2231_v33 = vunpack.c.1.s8 %v1595_v34  ;;  %v2807_v45 = vcvt.s32.f32 %v2039_v52  ;;  %v1572_v42 = vld [vmem:[%s11410_s3 + $0x3d0] sm:$0xff] }
 0x243   : > { %3702 = vmatpush.bf16.msrb.mxu3 %v3479_v47  ;;  %v3275_v0 = vpack.c.bf16 %v2615_v48, %v2603_v46  ;;  %v1812_v43 = vunpack.c.2.s8 %v1488_v19  ;;  %v1824_v5 = vunpack.c.3.s8 %v1488_v19  ;;  %v2987_v62 = vcvt.s32.f32 %v2219_v25 }
 0x244   : > { %3649 = vmatpush.bf16.msrb.mxu0 %v3179_v51  ;;  %v2999_v17 = vcvt.s32.f32 %v2231_v33  ;;  %v2004_v39 = vunpack.c.2.s8 %v1536_v53  ;;  %v2016_v18 = vunpack.c.3.s8 %v1536_v53  ;;  %v3371_v56 = vpack.c.bf16 %v2807_v45, %v2795_v32  ;;  %v1620_v32 = vld [vmem:[%s11410_s3 + $0x550] sm:$0xff] }
 0x245   : > { %3667 = vmatpush.bf16.msrb.mxu1 %v3275_v0  ;;  %v2580_v57 = vcvt.s32.f32 %v1812_v43  ;;  %v2592_v21 = vcvt.s32.f32 %v1824_v5  ;;  %v2196_v58 = vunpack.c.2.s8 %v1584_v54  ;;  %v2208_v31 = vunpack.c.3.s8 %v1584_v54 }
 0x246   : > { %v3467_v60 = vpack.c.bf16 %v2999_v17, %v2987_v62  ;;  %v2772_v29 = vcvt.s32.f32 %v2004_v39  ;;  %v2784_v30 = vcvt.s32.f32 %v2016_v18  ;;  %3685 = vmatpush.bf16.msrb.mxu2 %v3371_v56  ;;  %v2388_v3 = vunpack.c.2.s8 %v1632_v8 }
 0x247   : > { %v3264_v24 = vpack.c.bf16 %v2592_v21, %v2580_v57  ;;  %v2964_v63 = vcvt.s32.f32 %v2196_v58  ;;  %3650 = vmatmul.bf16.vlgmr.msrb.gmra.mxu0 %v11866_v22  ;;  %v2400_v34 = vunpack.c.3.s8 %v1632_v8  ;;  %v2976_v6 = vcvt.s32.f32 %v2208_v31 }
 0x248   : > { %3703 = vmatpush.bf16.msrb.mxu3 %v3467_v60  ;;  %v3360_v4 = vpack.c.bf16 %v2784_v30, %v2772_v29  ;;  %3668 = vmatmul.bf16.vlgmr.msrb.gmra.mxu1 %v11868_v59  ;;  %v1788_v35 = vunpack.c.0.s8 %v1488_v19  ;;  %v1800_v44 = vunpack.c.1.s8 %v1488_v19  ;;  %v3156_v49 = vcvt.s32.f32 %v2388_v3 }
 0x249   : > { %3714 = vmatpush.bf16.msra.mxu0 %v3264_v24  ;;  %v3168_v11 = vcvt.s32.f32 %v2400_v34  ;;  %v1980_v16 = vunpack.c.0.s8 %v1536_v53  ;;  %v1992_v40 = vunpack.c.1.s8 %v1536_v53  ;;  %v3456_v50 = vpack.c.bf16 %v2976_v6, %v2964_v63  ;;  %3686 = vmatmul.bf16.vlgmr.msrb.gmra.mxu2 %v11870_v23 }
 0x24a   : > { %3732 = vmatpush.bf16.msra.mxu1 %v3360_v4  ;;  %v2556_v12 = vcvt.s32.f32 %v1788_v35  ;;  %v2568_v28 = vcvt.s32.f32 %v1800_v44  ;;  %v2172_v9 = vunpack.c.0.s8 %v1584_v54  ;;  %v2184_v10 = vunpack.c.1.s8 %v1584_v54  ;;  %v1464_v4 = vld [vmem:[%s11410_s3 + $0x70] sm:$0xff] }
 0x24b   : > { %3704 = vmatmul.bf16.vlgmr.msrb.gmra.mxu3 %v11872_v20  ;;  %v3552_v36 = vpack.c.bf16 %v3168_v11, %v3156_v49  ;;  %v2748_v14 = vcvt.s32.f32 %v1980_v16  ;;  %v2760_v15 = vcvt.s32.f32 %v1992_v40  ;;  %3750 = vmatpush.bf16.msra.mxu2 %v3456_v50  ;;  %v2364_v41 = vunpack.c.0.s8 %v1632_v8  ;;  %v1512_v11 = vld [vmem:[%s11410_s3 + $0x1f0] sm:$0xff] }
 0x24c   : > { %v3252_v38 = vpack.c.bf16 %v2568_v28, %v2556_v12  ;;  %v2940_v55 = vcvt.s32.f32 %v2172_v9  ;;  %v2376_v26 = vunpack.c.1.s8 %v1632_v8  ;;  %v2952_v19 = vcvt.s32.f32 %v2184_v10  ;;  %v1560_v28 = vld [vmem:[%s11410_s3 + $0x370] sm:$0xff] }
 0x24d   : > { %3768 = vmatpush.bf16.msra.mxu3 %v3552_v36  ;;  %v3348_v1 = vpack.c.bf16 %v2760_v15, %v2748_v14  ;;  %v1764_v47 = vunpack.c.2.s8 %v1476_v13  ;;  %v1776_v46 = vunpack.c.3.s8 %v1476_v13  ;;  %v3132_v48 = vcvt.s32.f32 %v2364_v41 }
 0x24e   : > { %3715 = vmatpush.bf16.msra.mxu0 %v3252_v38  ;;  %v3144_v52 = vcvt.s32.f32 %v2376_v26  ;;  %v1956_v53 = vunpack.c.2.s8 %v1524_v37  ;;  %v1968_v51 = vunpack.c.3.s8 %v1524_v37  ;;  %v3444_v25 = vpack.c.bf16 %v2952_v19, %v2940_v55  ;;  %v1608_v55 = vld [vmem:[%s11410_s3 + $0x4f0] sm:$0xff] }
 0x24f   : > { %3733 = vmatpush.bf16.msra.mxu1 %v3348_v1  ;;  %v2532_v33 = vcvt.s32.f32 %v1764_v47  ;;  %v2544_v54 = vcvt.s32.f32 %v1776_v46  ;;  %v2148_v0 = vunpack.c.2.s8 %v1572_v42  ;;  %v2160_v62 = vunpack.c.3.s8 %v1572_v42 }
 0x250   : > { %v3540_v45 = vpack.c.bf16 %v3144_v52, %v3132_v48  ;;  %v2724_v43 = vcvt.s32.f32 %v1956_v53  ;;  %v2736_v5 = vcvt.s32.f32 %v1968_v51  ;;  %3751 = vmatpush.bf16.msra.mxu2 %v3444_v25  ;;  %v2340_v18 = vunpack.c.2.s8 %v1620_v32 }
 0x251   : > { %v3240_v17 = vpack.c.bf16 %v2544_v54, %v2532_v33  ;;  %v2916_v39 = vcvt.s32.f32 %v2148_v0  ;;  %v2352_v8 = vunpack.c.3.s8 %v1620_v32  ;;  %v2928_v57 = vcvt.s32.f32 %v2160_v62 }
 0x252   : > { %3769 = vmatpush.bf16.msra.mxu3 %v3540_v45  ;;  %v3336_v56 = vpack.c.bf16 %v2736_v5, %v2724_v43  ;;  %v1740_v21 = vunpack.c.0.s8 %v1476_v13  ;;  %v1752_v58 = vunpack.c.1.s8 %v1476_v13  ;;  %v3108_v60 = vcvt.s32.f32 %v2340_v18 }
 0x253   : > { %3716 = vmatpush.bf16.msra.mxu0 %v3240_v17  ;;  %v3120_v29 = vcvt.s32.f32 %v2352_v8  ;;  %v1932_v30 = vunpack.c.0.s8 %v1524_v37  ;;  %v1944_v31 = vunpack.c.1.s8 %v1524_v37  ;;  %v3432_v24 = vpack.c.bf16 %v2928_v57, %v2916_v39 }
 0x254   : > { %3734 = vmatpush.bf16.msra.mxu1 %v3336_v56  ;;  %v2508_v63 = vcvt.s32.f32 %v1740_v21  ;;  %v2520_v3 = vcvt.s32.f32 %v1752_v58  ;;  %v2124_v34 = vunpack.c.0.s8 %v1572_v42  ;;  %v2136_v49 = vunpack.c.1.s8 %v1572_v42  ;;  %v1452_v56 = vld [vmem:[%s11410_s3 + $0x10] sm:$0xff] }
 0x255   : > { %v3528_v6 = vpack.c.bf16 %v3120_v29, %v3108_v60  ;;  %v2700_v35 = vcvt.s32.f32 %v1932_v30  ;;  %v2712_v44 = vcvt.s32.f32 %v1944_v31  ;;  %3752 = vmatpush.bf16.msra.mxu2 %v3432_v24  ;;  %v2316_v50 = vunpack.c.0.s8 %v1620_v32  ;;  %v1500_v29 = vld [vmem:[%s11410_s3 + $0x190] sm:$0xff] }
 0x256   : > { %v3228_v16 = vpack.c.bf16 %v2520_v3, %v2508_v63  ;;  %v2892_v40 = vcvt.s32.f32 %v2124_v34  ;;  %v2328_v12 = vunpack.c.1.s8 %v1620_v32  ;;  %v2904_v13 = vcvt.s32.f32 %v2136_v49  ;;  %v1548_v3 = vld [vmem:[%s11410_s3 + $0x310] sm:$0xff] }
 0x257   : > { %3770 = vmatpush.bf16.msra.mxu3 %v3528_v6  ;;  %v3324_v9 = vpack.c.bf16 %v2712_v44, %v2700_v35  ;;  %v1716_v36 = vunpack.c.2.s8 %v1464_v4  ;;  %v1728_v14 = vunpack.c.3.s8 %v1464_v4  ;;  %3655 = vmatmul.bf16.gmra.mxu0 %v11849_v2  ;;  %v3084_v15 = vcvt.s32.f32 %v2316_v50 }
 0x258   : > { %3717 = vmatpush.bf16.msra.mxu0 %v3228_v16  ;;  %v3096_v10 = vcvt.s32.f32 %v2328_v12  ;;  %v1908_v37 = vunpack.c.2.s8 %v1512_v11  ;;  %v1920_v38 = vunpack.c.3.s8 %v1512_v11  ;;  %3673 = vmatmul.bf16.gmra.mxu1 %v11851_v61  ;;  %v3420_v41 = vpack.c.bf16 %v2904_v13, %v2892_v40  ;;  %v11922_v40 = vld [vmem:[%s11410_s3 + $0x490] sm:$0xff] }
 0x259   : > { %3735 = vmatpush.bf16.msra.mxu1 %v3324_v9  ;;  %v2484_v26 = vcvt.s32.f32 %v1716_v36  ;;  %v2496_v42 = vcvt.s32.f32 %v1728_v14  ;;  %v2100_v1 = vunpack.c.2.s8 %v1560_v28  ;;  %v2112_v48 = vunpack.c.3.s8 %v1560_v28  ;;  %3691 = vmatmul.bf16.gmra.mxu2 %v11853_v7 }
 0x25a   : > { %v3516_v19 = vpack.c.bf16 %v3096_v10, %v3084_v15  ;;  %v2676_v47 = vcvt.s32.f32 %v1908_v37  ;;  %v2688_v46 = vcvt.s32.f32 %v1920_v38  ;;  %3753 = vmatpush.bf16.msra.mxu2 %v3420_v41  ;;  %v2292_v51 = vunpack.c.2.s8 %v1608_v55 }
 0x25b   : > { %v3216_v52 = vpack.c.bf16 %v2496_v42, %v2484_v26  ;;  %v2868_v53 = vcvt.s32.f32 %v2100_v1  ;;  %3709 = vmatmul.bf16.gmra.mxu3 %v11855_v27  ;;  %v2304_v32 = vunpack.c.3.s8 %v1608_v55  ;;  %v2880_v33 = vcvt.s32.f32 %v2112_v48 }
 0x25c   : > { %3771 = vmatpush.bf16.msra.mxu3 %v3516_v19  ;;  %v3312_v25 = vpack.c.bf16 %v2688_v46, %v2676_v47  ;;  %v1692_v54 = vunpack.c.0.s8 %v1464_v4  ;;  %v1704_v0 = vunpack.c.1.s8 %v1464_v4  ;;  %v3060_v45 = vcvt.s32.f32 %v2292_v51 }
 0x25d   : > { %3718 = vmatpush.bf16.msra.mxu0 %v3216_v52  ;;  %v3072_v43 = vcvt.s32.f32 %v2304_v32  ;;  %v1884_v5 = vunpack.c.0.s8 %v1512_v11  ;;  %v1896_v62 = vunpack.c.1.s8 %v1512_v11  ;;  %v3408_v17 = vpack.c.bf16 %v2880_v33, %v2868_v53  ;;  %v1489_v52 = vld [vmem:[%s11410_s3 + $0x138] sm:$0xff] }
 0x25e   : > { %3736 = vmatpush.bf16.msra.mxu1 %v3312_v25  ;;  %v2460_v39 = vcvt.s32.f32 %v1692_v54  ;;  %v2472_v18 = vcvt.s32.f32 %v1704_v0  ;;  %v2076_v8 = vunpack.c.0.s8 %v1560_v28  ;;  %v2088_v60 = vunpack.c.1.s8 %v1560_v28  ;;  %v1537_v33 = vld [vmem:[%s11410_s3 + $0x2b8] sm:$0xff] }
 0x25f   : > { %v3504_v57 = vpack.c.bf16 %v3072_v43, %v3060_v45  ;;  %v2652_v21 = vcvt.s32.f32 %v1884_v5  ;;  %v2664_v58 = vcvt.s32.f32 %v1896_v62  ;;  %3754 = vmatpush.bf16.msra.mxu2 %v3408_v17  ;;  %v2268_v24 = vunpack.c.0.s8 %v1608_v55  ;;  %v1585_v5 = vld [vmem:[%s11410_s3 + $0x438] sm:$0xff] }
 0x260   : > { %v3204_v30 = vpack.c.bf16 %v2472_v18, %v2460_v39  ;;  %v2844_v31 = vcvt.s32.f32 %v2076_v8  ;;  %v2280_v63 = vunpack.c.1.s8 %v1608_v55  ;;  %v2856_v4 = vcvt.s32.f32 %v2088_v60 }
 0x261   : > { %3772 = vmatpush.bf16.msra.mxu3 %v3504_v57  ;;  %v3300_v34 = vpack.c.bf16 %v2664_v58, %v2652_v21  ;;  %v1668_v6 = vunpack.c.2.s8 %v1452_v56  ;;  %v1680_v35 = vunpack.c.3.s8 %v1452_v56  ;;  %v3036_v44 = vcvt.s32.f32 %v2268_v24 }
 0x262   : > { %3719 = vmatpush.bf16.msra.mxu0 %v3204_v30  ;;  %v3048_v49 = vcvt.s32.f32 %v2280_v63  ;;  %v1860_v11 = vunpack.c.2.s8 %v1500_v29  ;;  %v1872_v16 = vunpack.c.3.s8 %v1500_v29  ;;  %v3396_v50 = vpack.c.bf16 %v2856_v4, %v2844_v31 }
 0x263   : > { %3737 = vmatpush.bf16.msra.mxu1 %v3300_v34  ;;  %v2436_v12 = vcvt.s32.f32 %v1668_v6  ;;  %v2448_v28 = vcvt.s32.f32 %v1680_v35  ;;  %v2052_v9 = vunpack.c.2.s8 %v1548_v3  ;;  %v2064_v15 = vunpack.c.3.s8 %v1548_v3 }
 0x264   : > { %v3492_v13 = vpack.c.bf16 %v3048_v49, %v3036_v44  ;;  %v2628_v36 = vcvt.s32.f32 %v1860_v11  ;;  %v2640_v14 = vcvt.s32.f32 %v1872_v16  ;;  %3755 = vmatpush.bf16.msra.mxu2 %v3396_v50  ;;  %v2244_v38 = vunpack.c.2.s8 %v11922_v40  ;;  %v1633_v50 = vld [vmem:[%s11410_s3 + $0x5b8] sm:$0xff] }
 0x265   : > { %v3192_v10 = vpack.c.bf16 %v2448_v28, %v2436_v12  ;;  %v2820_v37 = vcvt.s32.f32 %v2052_v9  ;;  %v2256_v55 = vunpack.c.3.s8 %v11922_v40  ;;  %v2832_v26 = vcvt.s32.f32 %v2064_v15 }
 0x266   : > { %3773 = vmatpush.bf16.msra.mxu3 %v3492_v13  ;;  %v3288_v41 = vpack.c.bf16 %v2640_v14, %v2628_v36  ;;  %v1644_v42 = vunpack.c.0.s8 %v1452_v56  ;;  %v1656_v1 = vunpack.c.1.s8 %v1452_v56  ;;  %v3012_v19 = vcvt.s32.f32 %v2244_v38 }
 0x267   : > { %3720 = vmatpush.bf16.msra.mxu0 %v3192_v10  ;;  %v3024_v47 = vcvt.s32.f32 %v2256_v55  ;;  %v1836_v46 = vunpack.c.0.s8 %v1500_v29  ;;  %v1848_v48 = vunpack.c.1.s8 %v1500_v29  ;;  %v3384_v53 = vpack.c.bf16 %v2832_v26, %v2820_v37  ;;  %v1477_v10 = vld [vmem:[%s11410_s3 + $0xd8] sm:$0xff] }
 0x268   : > { %3738 = vmatpush.bf16.msra.mxu1 %v3288_v41  ;;  %v2412_v51 = vcvt.s32.f32 %v1644_v42  ;;  %v2424_v32 = vcvt.s32.f32 %v1656_v1  ;;  %v2028_v25 = vunpack.c.0.s8 %v1548_v3  ;;  %v2040_v43 = vunpack.c.1.s8 %v1548_v3  ;;  %v1525_v26 = vld [vmem:[%s11410_s3 + $0x258] sm:$0xff] }
 0x269   : > { %v3480_v54 = vpack.c.bf16 %v3024_v47, %v3012_v19  ;;  %v2604_v0 = vcvt.s32.f32 %v1836_v46  ;;  %v2616_v45 = vcvt.s32.f32 %v1848_v48  ;;  %3756 = vmatpush.bf16.msra.mxu2 %v3384_v53  ;;  %v1813_v39 = vunpack.c.2.s8 %v1489_v52  ;;  %v1573_v46 = vld [vmem:[%s11410_s3 + $0x3d8] sm:$0xff] }
 0x26a   : > { %v3180_v62 = vpack.c.bf16 %v2424_v32, %v2412_v51  ;;  %v2796_v17 = vcvt.s32.f32 %v2028_v25  ;;  %v1825_v18 = vunpack.c.3.s8 %v1489_v52  ;;  %v2808_v56 = vcvt.s32.f32 %v2040_v43 }
 0x26b   : > { %3774 = vmatpush.bf16.msra.mxu3 %v3480_v54  ;;  %v3276_v8 = vpack.c.bf16 %v2616_v45, %v2604_v0  ;;  %v2005_v57 = vunpack.c.2.s8 %v1537_v33  ;;  %v2017_v21 = vunpack.c.3.s8 %v1537_v33  ;;  %v2581_v58 = vcvt.s32.f32 %v1813_v39 }
 0x26c   : > { %3721 = vmatpush.bf16.msra.mxu0 %v3180_v62  ;;  %v2593_v60 = vcvt.s32.f32 %v1825_v18  ;;  %v2197_v29 = vunpack.c.2.s8 %v1585_v5  ;;  %v2209_v30 = vunpack.c.3.s8 %v1585_v5  ;;  %v3372_v31 = vpack.c.bf16 %v2808_v56, %v2796_v17 }
 0x26d   : > { %3739 = vmatpush.bf16.msra.mxu1 %v3276_v8  ;;  %v2773_v24 = vcvt.s32.f32 %v2005_v57  ;;  %v2785_v63 = vcvt.s32.f32 %v2017_v21  ;;  %v2220_v3 = vunpack.c.0.s8 %v11922_v40  ;;  %v2232_v35 = vunpack.c.1.s8 %v11922_v40 }
 0x26e   : > { %v3265_v34 = vpack.c.bf16 %v2593_v60, %v2581_v58  ;;  %v2965_v4 = vcvt.s32.f32 %v2197_v29  ;;  %v2977_v6 = vcvt.s32.f32 %v2209_v30  ;;  %3757 = vmatpush.bf16.msra.mxu2 %v3372_v31  ;;  %v1789_v11 = vunpack.c.0.s8 %v1489_v52  ;;  %v1621_v31 = vld [vmem:[%s11410_s3 + $0x558] sm:$0xff] }
 0x26f   : > { %v3361_v44 = vpack.c.bf16 %v2785_v63, %v2773_v24  ;;  %v2988_v49 = vcvt.s32.f32 %v2220_v3  ;;  %v1801_v16 = vunpack.c.1.s8 %v1489_v52  ;;  %3722 = vmatmul.bf16.vlgmr.msra.gmra.mxu0 %v11866_v22  ;;  %v3000_v28 = vcvt.s32.f32 %v2232_v35 }
 0x270   : > { %3786 = vmatpush.bf16.msrb.mxu0 %v3265_v34  ;;  %v3457_v12 = vpack.c.bf16 %v2977_v6, %v2965_v4  ;;  %v1981_v9 = vunpack.c.0.s8 %v1537_v33  ;;  %v1993_v13 = vunpack.c.1.s8 %v1537_v33  ;;  %3740 = vmatmul.bf16.vlgmr.msra.gmra.mxu1 %v11868_v59  ;;  %v2557_v36 = vcvt.s32.f32 %v1789_v11 }
 0x271   : > { %3804 = vmatpush.bf16.msrb.mxu1 %v3361_v44  ;;  %v2569_v40 = vcvt.s32.f32 %v1801_v16  ;;  %v2173_v14 = vunpack.c.0.s8 %v1585_v5  ;;  %v2185_v15 = vunpack.c.1.s8 %v1585_v5  ;;  %v3468_v37 = vpack.c.bf16 %v3000_v28, %v2988_v49  ;;  %3758 = vmatmul.bf16.vlgmr.msra.gmra.mxu2 %v11870_v23  ;;  %v1465_v49 = vld [vmem:[%s11410_s3 + $0x78] sm:$0xff] }
 0x272   : > { %3822 = vmatpush.bf16.msrb.mxu2 %v3457_v12  ;;  %v2749_v38 = vcvt.s32.f32 %v1981_v9  ;;  %v2761_v55 = vcvt.s32.f32 %v1993_v13  ;;  %v2389_v41 = vunpack.c.2.s8 %v1633_v50  ;;  %v2401_v47 = vunpack.c.3.s8 %v1633_v50  ;;  %v1513_v28 = vld [vmem:[%s11410_s3 + $0x1f8] sm:$0xff] }
 0x273   : > { %v3253_v42 = vpack.c.bf16 %v2569_v40, %v2557_v36  ;;  %v2941_v1 = vcvt.s32.f32 %v2173_v14  ;;  %v2953_v19 = vcvt.s32.f32 %v2185_v15  ;;  %3775 = vmatpush.bf16.msra.mxu3 %v3468_v37  ;;  %v1765_v53 = vunpack.c.2.s8 %v1477_v10  ;;  %v1561_v14 = vld [vmem:[%s11410_s3 + $0x378] sm:$0xff] }
 0x274   : > { %v3349_v48 = vpack.c.bf16 %v2761_v55, %v2749_v38  ;;  %v3157_v52 = vcvt.s32.f32 %v2389_v41  ;;  %v1777_v51 = vunpack.c.3.s8 %v1477_v10  ;;  %v3169_v25 = vcvt.s32.f32 %v2401_v47 }
 0x275   : > { %3787 = vmatpush.bf16.msrb.mxu0 %v3253_v42  ;;  %v3445_v32 = vpack.c.bf16 %v2953_v19, %v2941_v1  ;;  %v1957_v33 = vunpack.c.2.s8 %v1525_v26  ;;  %v1969_v54 = vunpack.c.3.s8 %v1525_v26  ;;  %v2533_v0 = vcvt.s32.f32 %v1765_v53 }
 0x276   : > { %3805 = vmatpush.bf16.msrb.mxu1 %v3349_v48  ;;  %v2545_v45 = vcvt.s32.f32 %v1777_v51  ;;  %v2149_v43 = vunpack.c.2.s8 %v1573_v46  ;;  %v2161_v5 = vunpack.c.3.s8 %v1573_v46  ;;  %3776 = vmatmul.bf16.vlgmr.msra.gmra.mxu3 %v11872_v20  ;;  %v3553_v62 = vpack.c.bf16 %v3169_v25, %v3157_v52 }
 0x277   : > { %3823 = vmatpush.bf16.msrb.mxu2 %v3445_v32  ;;  %v2725_v17 = vcvt.s32.f32 %v1957_v33  ;;  %v2737_v39 = vcvt.s32.f32 %v1969_v54  ;;  %v2365_v18 = vunpack.c.0.s8 %v1633_v50  ;;  %v2377_v21 = vunpack.c.1.s8 %v1633_v50 }
 0x278   : > { %v3241_v8 = vpack.c.bf16 %v2545_v45, %v2533_v0  ;;  %v2917_v56 = vcvt.s32.f32 %v2149_v43  ;;  %v2929_v57 = vcvt.s32.f32 %v2161_v5  ;;  %3840 = vmatpush.bf16.msrb.mxu3 %v3553_v62  ;;  %v1741_v29 = vunpack.c.0.s8 %v1477_v10  ;;  %v1609_v62 = vld [vmem:[%s11410_s3 + $0x4f8] sm:$0xff] }
 0x279   : > { %v3337_v58 = vpack.c.bf16 %v2737_v39, %v2725_v17  ;;  %v3133_v60 = vcvt.s32.f32 %v2365_v18  ;;  %v1753_v30 = vunpack.c.1.s8 %v1477_v10  ;;  %v3145_v63 = vcvt.s32.f32 %v2377_v21 }
 0x27a   : > { %3788 = vmatpush.bf16.msrb.mxu0 %v3241_v8  ;;  %v3433_v24 = vpack.c.bf16 %v2929_v57, %v2917_v56  ;;  %v1933_v3 = vunpack.c.0.s8 %v1525_v26  ;;  %v1945_v34 = vunpack.c.1.s8 %v1525_v26  ;;  %v2509_v4 = vcvt.s32.f32 %v1741_v29 }
 0x27b   : > { %3806 = vmatpush.bf16.msrb.mxu1 %v3337_v58  ;;  %v2521_v6 = vcvt.s32.f32 %v1753_v30  ;;  %v2125_v35 = vunpack.c.0.s8 %v1573_v46  ;;  %v2137_v44 = vunpack.c.1.s8 %v1573_v46  ;;  %v3541_v11 = vpack.c.bf16 %v3145_v63, %v3133_v60  ;;  %v1453_v60 = vld [vmem:[%s11410_s3 + $0x18] sm:$0xff] }
 0x27c   : > { %3824 = vmatpush.bf16.msrb.mxu2 %v3433_v24  ;;  %v2701_v16 = vcvt.s32.f32 %v1933_v3  ;;  %v2713_v50 = vcvt.s32.f32 %v1945_v34  ;;  %v2341_v12 = vunpack.c.2.s8 %v1621_v31  ;;  %v2353_v40 = vunpack.c.3.s8 %v1621_v31  ;;  %v1501_v63 = vld [vmem:[%s11410_s3 + $0x198] sm:$0xff] }
 0x27d   : > { %v3229_v9 = vpack.c.bf16 %v2521_v6, %v2509_v4  ;;  %v2893_v13 = vcvt.s32.f32 %v2125_v35  ;;  %v2905_v36 = vcvt.s32.f32 %v2137_v44  ;;  %3841 = vmatpush.bf16.msrb.mxu3 %v3541_v11  ;;  %v1717_v37 = vunpack.c.2.s8 %v1465_v49  ;;  %v1549_v35 = vld [vmem:[%s11410_s3 + $0x318] sm:$0xff] }
 0x27e   : > { %v3325_v15 = vpack.c.bf16 %v2713_v50, %v2701_v16  ;;  %v3109_v10 = vcvt.s32.f32 %v2341_v12  ;;  %v1729_v38 = vunpack.c.3.s8 %v1465_v49  ;;  %v3121_v41 = vcvt.s32.f32 %v2353_v40 }
 0x27f   : > { %3789 = vmatpush.bf16.msrb.mxu0 %v3229_v9  ;;  %v3421_v55 = vpack.c.bf16 %v2905_v36, %v2893_v13  ;;  %v1909_v26 = vunpack.c.2.s8 %v1513_v28  ;;  %v1921_v42 = vunpack.c.3.s8 %v1513_v28  ;;  %v2485_v1 = vcvt.s32.f32 %v1717_v37 }
 0x280   : > { %3807 = vmatpush.bf16.msrb.mxu1 %v3325_v15  ;;  %v2497_v19 = vcvt.s32.f32 %v1729_v38  ;;  %v2101_v47 = vunpack.c.2.s8 %v1561_v14  ;;  %v2113_v46 = vunpack.c.3.s8 %v1561_v14  ;;  %3727 = vmatmul.bf16.gmra.mxu0 %v11849_v2  ;;  %v3529_v48 = vpack.c.bf16 %v3121_v41, %v3109_v10 }
 0x281   : > { %3825 = vmatpush.bf16.msrb.mxu2 %v3421_v55  ;;  %v2677_v52 = vcvt.s32.f32 %v1909_v26  ;;  %v2689_v53 = vcvt.s32.f32 %v1921_v42  ;;  %v2317_v51 = vunpack.c.0.s8 %v1621_v31  ;;  %3745 = vmatmul.bf16.gmra.mxu1 %v11851_v61  ;;  %v2329_v54 = vunpack.c.1.s8 %v1621_v31 }
 0x282   : > { %v3217_v32 = vpack.c.bf16 %v2497_v19, %v2485_v1  ;;  %v2869_v25 = vcvt.s32.f32 %v2101_v47  ;;  %v2881_v33 = vcvt.s32.f32 %v2113_v46  ;;  %3842 = vmatpush.bf16.msrb.mxu3 %v3529_v48  ;;  %v1693_v43 = vunpack.c.0.s8 %v1465_v49  ;;  %3763 = vmatmul.bf16.gmra.mxu2 %v11853_v7  ;;  %v1490_v48 = vld [vmem:[%s11410_s3 + $0x140] sm:$0xff] }
 0x283   : > { %v3313_v0 = vpack.c.bf16 %v2689_v53, %v2677_v52  ;;  %v3085_v45 = vcvt.s32.f32 %v2317_v51  ;;  %v1705_v5 = vunpack.c.1.s8 %v1465_v49  ;;  %v3097_v39 = vcvt.s32.f32 %v2329_v54 }
 0x284   : > { %3790 = vmatpush.bf16.msrb.mxu0 %v3217_v32  ;;  %v3409_v17 = vpack.c.bf16 %v2881_v33, %v2869_v25  ;;  %v1885_v18 = vunpack.c.0.s8 %v1513_v28  ;;  %v1897_v8 = vunpack.c.1.s8 %v1513_v28  ;;  %v2461_v56 = vcvt.s32.f32 %v1693_v43 }
 0x285   : > { %3808 = vmatpush.bf16.msrb.mxu1 %v3313_v0  ;;  %v2473_v57 = vcvt.s32.f32 %v1705_v5  ;;  %v2077_v21 = vunpack.c.0.s8 %v1561_v14  ;;  %v2089_v58 = vunpack.c.1.s8 %v1561_v14  ;;  %v3517_v29 = vpack.c.bf16 %v3097_v39, %v3085_v45  ;;  %v1538_v45 = vld [vmem:[%s11410_s3 + $0x2c0] sm:$0xff] }
 0x286   : > { %3826 = vmatpush.bf16.msrb.mxu2 %v3409_v17  ;;  %v2653_v30 = vcvt.s32.f32 %v1885_v18  ;;  %v2665_v31 = vcvt.s32.f32 %v1897_v8  ;;  %v2293_v24 = vunpack.c.2.s8 %v1609_v62  ;;  %3781 = vmatmul.bf16.gmra.mxu3 %v11855_v27  ;;  %v2305_v6 = vunpack.c.3.s8 %v1609_v62  ;;  %v1586_v39 = vld [vmem:[%s11410_s3 + $0x440] sm:$0xff] }
 0x287   : > { %v3205_v3 = vpack.c.bf16 %v2473_v57, %v2461_v56  ;;  %v2845_v34 = vcvt.s32.f32 %v2077_v21  ;;  %v2857_v4 = vcvt.s32.f32 %v2089_v58  ;;  %3843 = vmatpush.bf16.msrb.mxu3 %v3517_v29  ;;  %v1669_v11 = vunpack.c.2.s8 %v1453_v60  ;;  %v1597_v21 = vld [vmem:[%s11410_s3 + $0x498] sm:$0xff] }
 0x288   : > { %v3301_v44 = vpack.c.bf16 %v2665_v31, %v2653_v30  ;;  %v3061_v49 = vcvt.s32.f32 %v2293_v24  ;;  %v1681_v16 = vunpack.c.3.s8 %v1453_v60  ;;  %v3073_v12 = vcvt.s32.f32 %v2305_v6 }
 0x289   : > { %3791 = vmatpush.bf16.msrb.mxu0 %v3205_v3  ;;  %v3397_v50 = vpack.c.bf16 %v2857_v4, %v2845_v34  ;;  %v1861_v28 = vunpack.c.2.s8 %v1501_v63  ;;  %v1873_v9 = vunpack.c.3.s8 %v1501_v63  ;;  %v2437_v13 = vcvt.s32.f32 %v1669_v11 }
 0x28a   : > { %3809 = vmatpush.bf16.msrb.mxu1 %v3301_v44  ;;  %v2449_v36 = vcvt.s32.f32 %v1681_v16  ;;  %v2053_v40 = vunpack.c.2.s8 %v1549_v35  ;;  %v2065_v14 = vunpack.c.3.s8 %v1549_v35  ;;  %v3505_v15 = vpack.c.bf16 %v3073_v12, %v3061_v49 }
 0x28b   : > { %3827 = vmatpush.bf16.msrb.mxu2 %v3397_v50  ;;  %v2629_v10 = vcvt.s32.f32 %v1861_v28  ;;  %v2641_v37 = vcvt.s32.f32 %v1873_v9  ;;  %v2269_v38 = vunpack.c.0.s8 %v1609_v62  ;;  %v2281_v42 = vunpack.c.1.s8 %v1609_v62 }
 0x28c   : > { %v3193_v55 = vpack.c.bf16 %v2449_v36, %v2437_v13  ;;  %v2821_v41 = vcvt.s32.f32 %v2053_v40  ;;  %v2833_v26 = vcvt.s32.f32 %v2065_v14  ;;  %3844 = vmatpush.bf16.msrb.mxu3 %v3505_v15  ;;  %v1645_v47 = vunpack.c.0.s8 %v1453_v60  ;;  %v1478_v15 = vld [vmem:[%s11410_s3 + $0xe0] sm:$0xff] }
 0x28d   : > { %v3289_v1 = vpack.c.bf16 %v2641_v37, %v2629_v10  ;;  %v3037_v19 = vcvt.s32.f32 %v2269_v38  ;;  %v1657_v46 = vunpack.c.1.s8 %v1453_v60  ;;  %v3049_v53 = vcvt.s32.f32 %v2281_v42 }
 0x28e   : > { %3792 = vmatpush.bf16.msrb.mxu0 %v3193_v55  ;;  %v3385_v52 = vpack.c.bf16 %v2833_v26, %v2821_v41  ;;  %v1837_v51 = vunpack.c.0.s8 %v1501_v63  ;;  %v1849_v32 = vunpack.c.1.s8 %v1501_v63  ;;  %v2413_v25 = vcvt.s32.f32 %v1645_v47 }
 0x28f   : > { %3810 = vmatpush.bf16.msrb.mxu1 %v3289_v1  ;;  %v2425_v33 = vcvt.s32.f32 %v1657_v46  ;;  %v2029_v54 = vunpack.c.0.s8 %v1549_v35  ;;  %v2041_v0 = vunpack.c.1.s8 %v1549_v35  ;;  %v3493_v43 = vpack.c.bf16 %v3049_v53, %v3037_v19  ;;  %v1526_v19 = vld [vmem:[%s11410_s3 + $0x260] sm:$0xff] }
 0x290   : > { %3828 = vmatpush.bf16.msrb.mxu2 %v3385_v52  ;;  %v2605_v5 = vcvt.s32.f32 %v1837_v51  ;;  %v2617_v62 = vcvt.s32.f32 %v1849_v32  ;;  %v1814_v17 = vunpack.c.2.s8 %v1490_v48  ;;  %v1826_v57 = vunpack.c.3.s8 %v1490_v48  ;;  %v1574_v53 = vld [vmem:[%s11410_s3 + $0x3e0] sm:$0xff] }
 0x291   : > { %v3181_v18 = vpack.c.bf16 %v2425_v33, %v2413_v25  ;;  %v2797_v8 = vcvt.s32.f32 %v2029_v54  ;;  %v2809_v56 = vcvt.s32.f32 %v2041_v0  ;;  %3845 = vmatpush.bf16.msrb.mxu3 %v3493_v43  ;;  %v2006_v29 = vunpack.c.2.s8 %v1538_v45  ;;  %v1634_v54 = vld [vmem:[%s11410_s3 + $0x5c0] sm:$0xff] }
 0x292   : > { %v3277_v58 = vpack.c.bf16 %v2617_v62, %v2605_v5  ;;  %v2582_v60 = vcvt.s32.f32 %v1814_v17  ;;  %v2018_v30 = vunpack.c.3.s8 %v1538_v45  ;;  %v2594_v24 = vcvt.s32.f32 %v1826_v57 }
 0x293   : > { %3793 = vmatpush.bf16.msrb.mxu0 %v3181_v18  ;;  %v3373_v31 = vpack.c.bf16 %v2809_v56, %v2797_v8  ;;  %v2198_v63 = vunpack.c.2.s8 %v1586_v39  ;;  %v2210_v3 = vunpack.c.3.s8 %v1586_v39  ;;  %v2774_v34 = vcvt.s32.f32 %v2006_v29 }
 0x294   : > { %3811 = vmatpush.bf16.msrb.mxu1 %v3277_v58  ;;  %v2786_v4 = vcvt.s32.f32 %v2018_v30  ;;  %v2245_v6 = vunpack.c.2.s8 %v1597_v21  ;;  %v2257_v35 = vunpack.c.3.s8 %v1597_v21  ;;  %v3266_v44 = vpack.c.bf16 %v2594_v24, %v2582_v60 }
 0x295   : > { %3829 = vmatpush.bf16.msrb.mxu2 %v3373_v31  ;;  %v2966_v49 = vcvt.s32.f32 %v2198_v63  ;;  %v2978_v11 = vcvt.s32.f32 %v2210_v3  ;;  %v1790_v16 = vunpack.c.0.s8 %v1490_v48  ;;  %v1802_v9 = vunpack.c.1.s8 %v1490_v48 }
 0x296   : > { %v3362_v50 = vpack.c.bf16 %v2786_v4, %v2774_v34  ;;  %v3013_v12 = vcvt.s32.f32 %v2245_v6  ;;  %v3025_v28 = vcvt.s32.f32 %v2257_v35  ;;  %3794 = vmatmul.bf16.vlgmr.msrb.gmra.mxu0 %v11866_v22  ;;  %v1982_v40 = vunpack.c.0.s8 %v1538_v45 }
 0x297   : > { %3858 = vmatpush.bf16.msra.mxu0 %v3266_v44  ;;  %v3458_v13 = vpack.c.bf16 %v2978_v11, %v2966_v49  ;;  %v2558_v36 = vcvt.s32.f32 %v1790_v16  ;;  %v1994_v14 = vunpack.c.1.s8 %v1538_v45  ;;  %3812 = vmatmul.bf16.vlgmr.msrb.gmra.mxu1 %v11868_v59  ;;  %v2570_v37 = vcvt.s32.f32 %v1802_v9  ;;  %v1466_v44 = vld [vmem:[%s11410_s3 + $0x80] sm:$0xff] }
 0x298   : > { %3876 = vmatpush.bf16.msra.mxu1 %v3362_v50  ;;  %v3481_v10 = vpack.c.bf16 %v3025_v28, %v3013_v12  ;;  %v2174_v38 = vunpack.c.0.s8 %v1586_v39  ;;  %v2186_v55 = vunpack.c.1.s8 %v1586_v39  ;;  %3830 = vmatmul.bf16.vlgmr.msrb.gmra.mxu2 %v11870_v23  ;;  %v2750_v41 = vcvt.s32.f32 %v1982_v40 }
 0x299   : > { %3894 = vmatpush.bf16.msra.mxu2 %v3458_v13  ;;  %v2762_v26 = vcvt.s32.f32 %v1994_v14  ;;  %v2221_v42 = vunpack.c.0.s8 %v1597_v21  ;;  %v2233_v1 = vunpack.c.1.s8 %v1597_v21  ;;  %v3254_v47 = vpack.c.bf16 %v2570_v37, %v2558_v36  ;;  %v1514_v36 = vld [vmem:[%s11410_s3 + $0x200] sm:$0xff] }
 0x29a   : > { %3846 = vmatpush.bf16.msrb.mxu3 %v3481_v10  ;;  %v2942_v46 = vcvt.s32.f32 %v2174_v38  ;;  %v2954_v48 = vcvt.s32.f32 %v2186_v55  ;;  %v1766_v52 = vunpack.c.2.s8 %v1478_v15  ;;  %v1778_v33 = vunpack.c.3.s8 %v1478_v15  ;;  %v1562_v37 = vld [vmem:[%s11410_s3 + $0x380] sm:$0xff] }
 0x29b   : > { %v3350_v51 = vpack.c.bf16 %v2762_v26, %v2750_v41  ;;  %v2989_v32 = vcvt.s32.f32 %v2221_v42  ;;  %v3001_v25 = vcvt.s32.f32 %v2233_v1  ;;  %3859 = vmatpush.bf16.msra.mxu0 %v3254_v47  ;;  %v1958_v43 = vunpack.c.2.s8 %v1526_v19  ;;  %v1622_v42 = vld [vmem:[%s11410_s3 + $0x560] sm:$0xff] }
 0x29c   : > { %v3446_v0 = vpack.c.bf16 %v2954_v48, %v2942_v46  ;;  %v2534_v45 = vcvt.s32.f32 %v1766_v52  ;;  %v1970_v5 = vunpack.c.3.s8 %v1526_v19  ;;  %v2546_v17 = vcvt.s32.f32 %v1778_v33 }
 0x29d   : > { %3877 = vmatpush.bf16.msra.mxu1 %v3350_v51  ;;  %v3469_v62 = vpack.c.bf16 %v3001_v25, %v2989_v32  ;;  %v2150_v39 = vunpack.c.2.s8 %v1574_v53  ;;  %v2162_v18 = vunpack.c.3.s8 %v1574_v53  ;;  %v2726_v8 = vcvt.s32.f32 %v1958_v43 }
 0x29e   : > { %3895 = vmatpush.bf16.msra.mxu2 %v3446_v0  ;;  %v2738_v56 = vcvt.s32.f32 %v1970_v5  ;;  %v2390_v57 = vunpack.c.2.s8 %v1634_v54  ;;  %v2402_v21 = vunpack.c.3.s8 %v1634_v54  ;;  %v3242_v58 = vpack.c.bf16 %v2546_v17, %v2534_v45  ;;  %v11969_v0 = vpop.f32.mrf.mxu0  ;;  %v11971_v45 = vpop.f32.mrf.mxu1 }
 0x29f   : > { %3847 = vmatpush.bf16.msrb.mxu3 %v3469_v62  ;;  %v2918_v60 = vcvt.s32.f32 %v2150_v39  ;;  %v2930_v29 = vcvt.s32.f32 %v2162_v18  ;;  %v1742_v30 = vunpack.c.0.s8 %v1478_v15  ;;  %v1754_v3 = vunpack.c.1.s8 %v1478_v15 }
 0x2a0   : > { %v3338_v31 = vpack.c.bf16 %v2738_v56, %v2726_v8  ;;  %v3158_v24 = vcvt.s32.f32 %v2390_v57  ;;  %v3170_v63 = vcvt.s32.f32 %v2402_v21  ;;  %3860 = vmatpush.bf16.msra.mxu0 %v3242_v58  ;;  %v1934_v6 = vunpack.c.0.s8 %v1526_v19 }
 0x2a1   : > { %v3434_v34 = vpack.c.bf16 %v2930_v29, %v2918_v60  ;;  %v2510_v4 = vcvt.s32.f32 %v1742_v30  ;;  %v1946_v35 = vunpack.c.1.s8 %v1526_v19  ;;  %v2522_v11 = vcvt.s32.f32 %v1754_v3  ;;  %v1454_v29 = vld [vmem:[%s11410_s3 + $0x20] sm:$0xff] }
 0x2a2   : > { %3848 = vmatmul.bf16.vlgmr.msrb.gmra.mxu3 %v11872_v20  ;;  %3878 = vmatpush.bf16.msra.mxu1 %v3338_v31  ;;  %v3554_v49 = vpack.c.bf16 %v3170_v63, %v3158_v24  ;;  %v2126_v16 = vunpack.c.0.s8 %v1574_v53  ;;  %v2138_v50 = vunpack.c.1.s8 %v1574_v53  ;;  %v2702_v12 = vcvt.s32.f32 %v1934_v6 }
 0x2a3   : > { %3896 = vmatpush.bf16.msra.mxu2 %v3434_v34  ;;  %v2714_v28 = vcvt.s32.f32 %v1946_v35  ;;  %v2366_v9 = vunpack.c.0.s8 %v1634_v54  ;;  %v2378_v13 = vunpack.c.1.s8 %v1634_v54  ;;  %v3230_v40 = vpack.c.bf16 %v2522_v11, %v2510_v4  ;;  %v1502_v35 = vld [vmem:[%s11410_s3 + $0x1a0] sm:$0xff] }
 0x2a4   : > { %3912 = vmatpush.bf16.msra.mxu3 %v3554_v49  ;;  %v2894_v14 = vcvt.s32.f32 %v2126_v16  ;;  %v2906_v15 = vcvt.s32.f32 %v2138_v50  ;;  %v1718_v10 = vunpack.c.2.s8 %v1466_v44  ;;  %v1730_v26 = vunpack.c.3.s8 %v1466_v44  ;;  %v1550_v50 = vld [vmem:[%s11410_s3 + $0x320] sm:$0xff] }
 0x2a5   : > { %v3326_v38 = vpack.c.bf16 %v2714_v28, %v2702_v12  ;;  %v3134_v55 = vcvt.s32.f32 %v2366_v9  ;;  %v3146_v41 = vcvt.s32.f32 %v2378_v13  ;;  %3861 = vmatpush.bf16.msra.mxu0 %v3230_v40  ;;  %v1910_v47 = vunpack.c.2.s8 %v1514_v36 }
 0x2a6   : > { %v3422_v1 = vpack.c.bf16 %v2906_v15, %v2894_v14  ;;  %v2486_v19 = vcvt.s32.f32 %v1718_v10  ;;  %v1922_v46 = vunpack.c.3.s8 %v1514_v36  ;;  %v2498_v52 = vcvt.s32.f32 %v1730_v26  ;;  %3799 = vmatmul.bf16.gmra.mxu0 %v11849_v2 }
 0x2a7   : > { %3879 = vmatpush.bf16.msra.mxu1 %v3326_v38  ;;  %v3542_v48 = vpack.c.bf16 %v3146_v41, %v3134_v55  ;;  %v2102_v53 = vunpack.c.2.s8 %v1562_v37  ;;  %v2114_v51 = vunpack.c.3.s8 %v1562_v37  ;;  %v2678_v32 = vcvt.s32.f32 %v1910_v47  ;;  %v11979_v47 = vpop.f32.mrf.mxu0 }
 0x2a8   : > { %3897 = vmatpush.bf16.msra.mxu2 %v3422_v1  ;;  %v2690_v25 = vcvt.s32.f32 %v1922_v46  ;;  %v2342_v33 = vunpack.c.2.s8 %v1622_v42  ;;  %v2354_v54 = vunpack.c.3.s8 %v1622_v42  ;;  %3817 = vmatmul.bf16.gmra.mxu1 %v11851_v61  ;;  %v3218_v43 = vpack.c.bf16 %v2498_v52, %v2486_v19  ;;  %v11981_v46 = vpop.f32.mrf.mxu1 }
 0x2a9   : > { %3913 = vmatpush.bf16.msra.mxu3 %v3542_v48  ;;  %v2870_v5 = vcvt.s32.f32 %v2102_v53  ;;  %v2882_v62 = vcvt.s32.f32 %v2114_v51  ;;  %v1694_v17 = vunpack.c.0.s8 %v1466_v44  ;;  %3835 = vmatmul.bf16.gmra.mxu2 %v11853_v7  ;;  %v1706_v56 = vunpack.c.1.s8 %v1466_v44 }
 0x2aa   : > { %v3314_v39 = vpack.c.bf16 %v2690_v25, %v2678_v32  ;;  %v3110_v18 = vcvt.s32.f32 %v2342_v33  ;;  %v3122_v8 = vcvt.s32.f32 %v2354_v54  ;;  %3862 = vmatpush.bf16.msra.mxu0 %v3218_v43  ;;  %v1886_v58 = vunpack.c.0.s8 %v1514_v36 }
 0x2ab   : > { %v3410_v57 = vpack.c.bf16 %v2882_v62, %v2870_v5  ;;  %v2462_v21 = vcvt.s32.f32 %v1694_v17  ;;  %v1898_v60 = vunpack.c.1.s8 %v1514_v36  ;;  %v2474_v31 = vcvt.s32.f32 %v1706_v56  ;;  %v1610_v36 = vld [vmem:[%s11410_s3 + $0x500] sm:$0xff] }
 0x2ac   : > { %3880 = vmatpush.bf16.msra.mxu1 %v3314_v39  ;;  %v3530_v30 = vpack.c.bf16 %v3122_v8, %v3110_v18  ;;  %v2078_v24 = vunpack.c.0.s8 %v1562_v37  ;;  %v2090_v63 = vunpack.c.1.s8 %v1562_v37  ;;  %v2654_v3 = vcvt.s32.f32 %v1886_v58  ;;  %v1491_v39 = vld [vmem:[%s11410_s3 + $0x148] sm:$0xff] }
 0x2ad   : > { %3898 = vmatpush.bf16.msra.mxu2 %v3410_v57  ;;  %v2666_v34 = vcvt.s32.f32 %v1898_v60  ;;  %v2318_v4 = vunpack.c.0.s8 %v1622_v42  ;;  %v2330_v6 = vunpack.c.1.s8 %v1622_v42  ;;  %v3206_v44 = vpack.c.bf16 %v2474_v31, %v2462_v21  ;;  %v11985_v31 = vpop.f32.mrf.mxu2 }
 0x2ae   : > { %3914 = vmatpush.bf16.msra.mxu3 %v3530_v30  ;;  %v2846_v49 = vcvt.s32.f32 %v2078_v24  ;;  %v2858_v11 = vcvt.s32.f32 %v2090_v63  ;;  %v1670_v16 = vunpack.c.2.s8 %v1454_v29  ;;  %v1682_v13 = vunpack.c.3.s8 %v1454_v29  ;;  %v11987_v24 = vpop.f32.mrf.mxu3 }
 0x2af   : > { %v3302_v12 = vpack.c.bf16 %v2666_v34, %v2654_v3  ;;  %v3086_v28 = vcvt.s32.f32 %v2318_v4  ;;  %v3098_v9 = vcvt.s32.f32 %v2330_v6  ;;  %3863 = vmatpush.bf16.msra.mxu0 %v3206_v44  ;;  %v1862_v15 = vunpack.c.2.s8 %v1502_v35  ;;  %v1587_v6 = vld [vmem:[%s11410_s3 + $0x448] sm:$0xff] }
 0x2b0   : > { %v3398_v40 = vpack.c.bf16 %v2858_v11, %v2846_v49  ;;  %v2438_v14 = vcvt.s32.f32 %v1670_v16  ;;  %v1874_v10 = vunpack.c.3.s8 %v1502_v35  ;;  %v2450_v38 = vcvt.s32.f32 %v1682_v13  ;;  %v1598_v16 = vld [vmem:[%s11410_s3 + $0x4a0] sm:$0xff] }
 0x2b1   : > { %3881 = vmatpush.bf16.msra.mxu1 %v3302_v12  ;;  %v3518_v37 = vpack.c.bf16 %v3098_v9, %v3086_v28  ;;  %v2054_v55 = vunpack.c.2.s8 %v1550_v50  ;;  %v2066_v41 = vunpack.c.3.s8 %v1550_v50  ;;  %v2630_v26 = vcvt.s32.f32 %v1862_v15 }
 0x2b2   : > { %3899 = vmatpush.bf16.msra.mxu2 %v3398_v40  ;;  %3853 = vmatmul.bf16.gmra.mxu3 %v11855_v27  ;;  %v2642_v42 = vcvt.s32.f32 %v1874_v10  ;;  %v2294_v1 = vunpack.c.2.s8 %v1610_v36  ;;  %v2306_v19 = vunpack.c.3.s8 %v1610_v36  ;;  %v3194_v48 = vpack.c.bf16 %v2450_v38, %v2438_v14 }
 0x2b3   : > { %3915 = vmatpush.bf16.msra.mxu3 %v3518_v37  ;;  %v2822_v52 = vcvt.s32.f32 %v2054_v55  ;;  %v2834_v53 = vcvt.s32.f32 %v2066_v41  ;;  %v1646_v51 = vunpack.c.0.s8 %v1454_v29  ;;  %v1658_v54 = vunpack.c.1.s8 %v1454_v29  ;;  %v1539_v29 = vld [vmem:[%s11410_s3 + $0x2c8] sm:$0xff]  ;;  %v11991_v55 = vpop.f32.mrf.mxu0  ;;  %v11993_v41 = vpop.f32.mrf.mxu1 }
 0x2b4   : > { %v3290_v32 = vpack.c.bf16 %v2642_v42, %v2630_v26  ;;  %v3062_v25 = vcvt.s32.f32 %v2294_v1  ;;  %v3074_v33 = vcvt.s32.f32 %v2306_v19  ;;  %3864 = vmatpush.bf16.msra.mxu0 %v3194_v48  ;;  %v1838_v62 = vunpack.c.0.s8 %v1502_v35 }
 0x2b5   : > { %v3386_v43 = vpack.c.bf16 %v2834_v53, %v2822_v52  ;;  %v2414_v5 = vcvt.s32.f32 %v1646_v51  ;;  %v1850_v17 = vunpack.c.1.s8 %v1502_v35  ;;  %v2426_v8 = vcvt.s32.f32 %v1658_v54 }
 0x2b6   : > { %3882 = vmatpush.bf16.msra.mxu1 %v3290_v32  ;;  %v3506_v18 = vpack.c.bf16 %v3074_v33, %v3062_v25  ;;  %v2030_v56 = vunpack.c.0.s8 %v1550_v50  ;;  %v2042_v57 = vunpack.c.1.s8 %v1550_v50  ;;  %v2606_v21 = vcvt.s32.f32 %v1838_v62 }
 0x2b7   : > { %3900 = vmatpush.bf16.msra.mxu2 %v3386_v43  ;;  %v2618_v58 = vcvt.s32.f32 %v1850_v17  ;;  %v2270_v60 = vunpack.c.0.s8 %v1610_v36  ;;  %v2282_v30 = vunpack.c.1.s8 %v1610_v36  ;;  %v3182_v63 = vpack.c.bf16 %v2426_v8, %v2414_v5 }
 0x2b8   : > { %3916 = vmatpush.bf16.msra.mxu3 %v3506_v18  ;;  %v2798_v3 = vcvt.s32.f32 %v2030_v56  ;;  %v2810_v34 = vcvt.s32.f32 %v2042_v57  ;;  %v1815_v4 = vunpack.c.2.s8 %v1491_v39  ;;  %v1827_v11 = vunpack.c.3.s8 %v1491_v39  ;;  %v1479_v18 = vld [vmem:[%s11410_s3 + $0xe8] sm:$0xff] }
 0x2b9   : > { %v3278_v35 = vpack.c.bf16 %v2618_v58, %v2606_v21  ;;  %v3038_v44 = vcvt.s32.f32 %v2270_v60  ;;  %v3050_v49 = vcvt.s32.f32 %v2282_v30  ;;  %3865 = vmatpush.bf16.msra.mxu0 %v3182_v63  ;;  %v2007_v28 = vunpack.c.2.s8 %v1539_v29  ;;  %v1527_v21 = vld [vmem:[%s11410_s3 + $0x268] sm:$0xff]  ;;  %v12002_v58 = vpop.f32.mrf.mxu2  ;;  %v12004_v60 = vpop.f32.mrf.mxu3 }
 0x2ba   : > { %v3374_v50 = vpack.c.bf16 %v2810_v34, %v2798_v3  ;;  %v2583_v12 = vcvt.s32.f32 %v1815_v4  ;;  %v2019_v9 = vunpack.c.3.s8 %v1539_v29  ;;  %v2595_v36 = vcvt.s32.f32 %v1827_v11  ;;  %v1575_v34 = vld [vmem:[%s11410_s3 + $0x3e8] sm:$0xff] }
 0x2bb   : > { %3883 = vmatpush.bf16.msra.mxu1 %v3278_v35  ;;  %v3494_v13 = vpack.c.bf16 %v3050_v49, %v3038_v44  ;;  %v2199_v40 = vunpack.c.2.s8 %v1587_v6  ;;  %v2211_v14 = vunpack.c.3.s8 %v1587_v6  ;;  %v2775_v15 = vcvt.s32.f32 %v2007_v28 }
 0x2bc   : > { %3901 = vmatpush.bf16.msra.mxu2 %v3374_v50  ;;  %v2787_v10 = vcvt.s32.f32 %v2019_v9  ;;  %v2246_v37 = vunpack.c.2.s8 %v1598_v16  ;;  %v2258_v38 = vunpack.c.3.s8 %v1598_v16  ;;  %v3267_v26 = vpack.c.bf16 %v2595_v36, %v2583_v12  ;;  %3866 = vmatmul.bf16.vlgmr.msra.gmra.mxu0 %v11866_v22  ;;  %v3586_v50 = vpop.f32.mrf.mxu0  ;;  %v3604_v12 = vpop.f32.mrf.mxu1 }
 0x2bd   : > { %3917 = vmatpush.bf16.msra.mxu3 %v3494_v13  ;;  %v2967_v42 = vcvt.s32.f32 %v2199_v40  ;;  %v2979_v1 = vcvt.s32.f32 %v2211_v14  ;;  %v1791_v19 = vunpack.c.0.s8 %v1491_v39  ;;  %v1803_v51 = vunpack.c.1.s8 %v1491_v39 }
 0x2be   : > { %v3363_v48 = vpack.c.bf16 %v2787_v10, %v2775_v15  ;;  %v3014_v52 = vcvt.s32.f32 %v2246_v37  ;;  %v3026_v53 = vcvt.s32.f32 %v2258_v38  ;;  %3884 = vmatmul.bf16.vlgmr.msra.gmra.mxu1 %v11868_v59  ;;  %3930 = vmatpush.bf16.msrb.mxu0 %v3267_v26  ;;  %v1983_v33 = vunpack.c.0.s8 %v1539_v29 }
 0x2bf   : > { %v3459_v32 = vpack.c.bf16 %v2979_v1, %v2967_v42  ;;  %v2559_v25 = vcvt.s32.f32 %v1791_v19  ;;  %v1995_v54 = vunpack.c.1.s8 %v1539_v29  ;;  %3902 = vmatmul.bf16.vlgmr.msra.gmra.mxu2 %v11870_v23  ;;  %v2571_v5 = vcvt.s32.f32 %v1803_v51  ;;  %v12008_v42 = vld [vmem:[%s11410_s3 + $0x5c8] sm:$0xff] }
 0x2c0   : > { %3948 = vmatpush.bf16.msrb.mxu1 %v3363_v48  ;;  %v3482_v43 = vpack.c.bf16 %v3026_v53, %v3014_v52  ;;  %v2175_v62 = vunpack.c.0.s8 %v1587_v6  ;;  %v2187_v17 = vunpack.c.1.s8 %v1587_v6  ;;  %v2751_v8 = vcvt.s32.f32 %v1983_v33  ;;  %v12011_v33 = vld [vmem:[%s11413_s21] sm:$0xff] }
 0x2c1   : > { %3966 = vmatpush.bf16.msrb.mxu2 %v3459_v32  ;;  %v2763_v39 = vcvt.s32.f32 %v1995_v54  ;;  %v3598_v56 = vadd.f32 %v11971_v45, %v11969_v0  ;;  %v2222_v57 = vunpack.c.0.s8 %v1598_v16  ;;  %v3255_v30 = vpack.c.bf16 %v2571_v5, %v2559_v25 }
 0x2c2   : > { %3918 = vmatpush.bf16.msra.mxu3 %v3482_v43  ;;  %v2943_v29 = vcvt.s32.f32 %v2175_v62  ;;  %v2955_v63 = vcvt.s32.f32 %v2187_v17  ;;  %v2234_v3 = vunpack.c.1.s8 %v1598_v16  ;;  %v1767_v35 = vunpack.c.2.s8 %v1479_v18  ;;  %v1467_v17 = vld [vmem:[%s11410_s3 + $0x88] sm:$0xff] }
 0x2c3   : > { %v3351_v4 = vpack.c.bf16 %v2763_v39, %v2751_v8  ;;  %v2990_v6 = vcvt.s32.f32 %v2222_v57  ;;  %v1779_v44 = vunpack.c.3.s8 %v1479_v18  ;;  %3931 = vmatpush.bf16.msrb.mxu0 %v3255_v30  ;;  %v1959_v0 = vunpack.c.2.s8 %v1527_v21  ;;  %v12019_v30 = vpop.f32.mrf.mxu2 }
 0x2c4   : > { %v3447_v49 = vpack.c.bf16 %v2955_v63, %v2943_v29  ;;  %v3002_v11 = vcvt.s32.f32 %v2234_v3  ;;  %v1971_v45 = vunpack.c.3.s8 %v1527_v21  ;;  %v2535_v28 = vcvt.s32.f32 %v1767_v35  ;;  %v12021_v29 = vpop.f32.mrf.mxu3 }
 0x2c5   : > { %3949 = vmatpush.bf16.msrb.mxu1 %v3351_v4  ;;  %v2547_v9 = vcvt.s32.f32 %v1779_v44  ;;  %v2151_v13 = vunpack.c.2.s8 %v1575_v34  ;;  %v2163_v36 = vunpack.c.3.s8 %v1575_v34  ;;  %v2727_v40 = vcvt.s32.f32 %v1959_v0 }
 0x2c6   : > { %3967 = vmatpush.bf16.msrb.mxu2 %v3447_v49  ;;  %v3470_v16 = vpack.c.bf16 %v3002_v11, %v2990_v6  ;;  %v2739_v14 = vcvt.s32.f32 %v1971_v45  ;;  %v1743_v15 = vunpack.c.0.s8 %v1479_v18  ;;  %v1755_v26 = vunpack.c.1.s8 %v1479_v18  ;;  %v1563_v6 = vld [vmem:[%s11410_s3 + $0x388] sm:$0xff] }
 0x2c7   : > { %v3243_v10 = vpack.c.bf16 %v2547_v9, %v2535_v28  ;;  %v2919_v37 = vcvt.s32.f32 %v2151_v13  ;;  %v2931_v38 = vcvt.s32.f32 %v2163_v36  ;;  %v1935_v48 = vunpack.c.0.s8 %v1527_v21 }
 0x2c8   : > { %3919 = vmatpush.bf16.msra.mxu3 %v3470_v16  ;;  %v3339_v1 = vpack.c.bf16 %v2739_v14, %v2727_v40  ;;  %v2511_v19 = vcvt.s32.f32 %v1743_v15  ;;  %v1947_v52 = vunpack.c.1.s8 %v1527_v21  ;;  %v2523_v51 = vcvt.s32.f32 %v1755_v26  ;;  %v1515_v21 = vld [vmem:[%s11410_s3 + $0x208] sm:$0xff] }
 0x2c9   : > { %3932 = vmatpush.bf16.msrb.mxu0 %v3243_v10  ;;  %v3435_v53 = vpack.c.bf16 %v2931_v38, %v2919_v37  ;;  %v2127_v32 = vunpack.c.0.s8 %v1575_v34  ;;  %v2139_v25 = vunpack.c.1.s8 %v1575_v34  ;;  %v2703_v54 = vcvt.s32.f32 %v1935_v48 }
 0x2ca   : > { %3950 = vmatpush.bf16.msrb.mxu1 %v3339_v1  ;;  %v2715_v43 = vcvt.s32.f32 %v1947_v52  ;;  %v2391_v5 = vunpack.c.2.s8 %v12008_v42  ;;  %v2403_v62 = vunpack.c.3.s8 %v12008_v42  ;;  %v3231_v18 = vpack.c.bf16 %v2523_v51, %v2511_v19  ;;  %v1623_v1 = vld [vmem:[%s11410_s3 + $0x568] sm:$0xff] }
 0x2cb   : > { %3968 = vmatpush.bf16.msrb.mxu2 %v3435_v53  ;;  %3920 = vmatmul.bf16.vlgmr.msra.gmra.mxu3 %v11872_v20  ;;  %v2895_v8 = vcvt.s32.f32 %v2127_v32  ;;  %v2907_v39 = vcvt.s32.f32 %v2139_v25  ;;  %v3616_v57 = vadd.f32 %v11985_v31, %v3598_v56  ;;  %v12024_v4 = vperm.slane %v12011_v33, 0  ;;  %v3622_v51 = vpop.f32.mrf.mxu2 }
 0x2cc   : > { %v3327_v63 = vpack.c.bf16 %v2715_v43, %v2703_v54  ;;  %v3159_v3 = vcvt.s32.f32 %v2391_v5  ;;  %v3171_v34 = vcvt.s32.f32 %v2403_v62  ;;  %v1719_v49 = vunpack.c.2.s8 %v1467_v17  ;;  %3871 = vmatmul.bf16.gmra.mxu0 %v11849_v2  ;;  %v3640_v32 = vpop.f32.mrf.mxu3  ;;  %v12036_v5 = vld [vmem:[%s11420_s20] sm:$0xff] }
 0x2cd   : > { %3933 = vmatpush.bf16.msrb.mxu0 %v3231_v18  ;;  %v3423_v35 = vpack.c.bf16 %v2907_v39, %v2895_v8  ;;  %v3634_v44 = vadd.f32 %v11987_v24, %v3616_v57  ;;  %v1731_v31 = vunpack.c.3.s8 %v1467_v17  ;;  %v1911_v56 = vunpack.c.2.s8 %v1515_v21  ;;  %v1455_v39 = vld [vmem:[%s11410_s3 + $0x28] sm:$0xff] }
 0x2ce   : > { %3951 = vmatpush.bf16.msrb.mxu1 %v3327_v63  ;;  %v3555_v11 = vpack.c.bf16 %v3171_v34, %v3159_v3  ;;  %v1923_v0 = vunpack.c.3.s8 %v1515_v21  ;;  %v2487_v50 = vcvt.s32.f32 %v1719_v49  ;;  %v2103_v12 = vunpack.c.2.s8 %v1563_v6  ;;  %v1551_v49 = vld [vmem:[%s11410_s3 + $0x328] sm:$0xff] }
 0x2cf   : > { %3969 = vmatpush.bf16.msrb.mxu2 %v3423_v35  ;;  %v4462_v45 = vmul.f32 %v12024_v4, %v3634_v44  ;;  %v2115_v28 = vunpack.c.3.s8 %v1563_v6  ;;  %3889 = vmatmul.bf16.gmra.mxu1 %v11851_v61  ;;  %v2499_v9 = vcvt.s32.f32 %v1731_v31  ;;  %v2679_v24 = vcvt.s32.f32 %v1911_v56 }
 0x2d0   : > { %3984 = vmatpush.bf16.msrb.mxu3 %v3555_v11  ;;  %v2691_v13 = vcvt.s32.f32 %v1923_v0  ;;  %v2367_v36 = vunpack.c.0.s8 %v12008_v42  ;;  %3907 = vmatmul.bf16.gmra.mxu2 %v11853_v7  ;;  %v2871_v16 = vcvt.s32.f32 %v2103_v12  ;;  %v2379_v14 = vunpack.c.1.s8 %v12008_v42  ;;  %v12044_v0 = vpop.f32.mrf.mxu0 }
 0x2d1   : > { %v2883_v40 = vcvt.s32.f32 %v2115_v28  ;;  %v1695_v15 = vunpack.c.0.s8 %v1467_v17  ;;  %v3219_v10 = vpack.c.bf16 %v2499_v9, %v2487_v50  ;;  %v1707_v26 = vunpack.c.1.s8 %v1467_v17  ;;  %v12046_v50 = vpop.f32.mrf.mxu1 }
 0x2d2   : > { %v3315_v37 = vpack.c.bf16 %v2691_v13, %v2679_v24  ;;  %v3135_v38 = vcvt.s32.f32 %v2367_v36  ;;  %v3147_v48 = vcvt.s32.f32 %v2379_v14  ;;  %v1887_v53 = vunpack.c.0.s8 %v1515_v21 }
 0x2d3   : > { %v3411_v19 = vpack.c.bf16 %v2883_v40, %v2871_v16  ;;  %v2463_v52 = vcvt.s32.f32 %v1695_v15  ;;  %3934 = vmatpush.bf16.msrb.mxu0 %v3219_v10  ;;  %v2475_v25 = vcvt.s32.f32 %v1707_v26  ;;  %v1899_v54 = vunpack.c.1.s8 %v1515_v21 }
 0x2d4   : > { %3952 = vmatpush.bf16.msrb.mxu1 %v3315_v37  ;;  %v2079_v43 = vunpack.c.0.s8 %v1563_v6  ;;  %v2091_v42 = vunpack.c.1.s8 %v1563_v6  ;;  %v3543_v62 = vpack.c.bf16 %v3147_v48, %v3135_v38  ;;  %v2655_v17 = vcvt.s32.f32 %v1887_v53  ;;  %v1503_v6 = vld [vmem:[%s11410_s3 + $0x1a8] sm:$0xff] }
 0x2d5   : > { %3970 = vmatpush.bf16.msrb.mxu2 %v3411_v19  ;;  %v2343_v18 = vunpack.c.2.s8 %v1623_v1  ;;  %v2355_v8 = vunpack.c.3.s8 %v1623_v1  ;;  %v3207_v57 = vpack.c.bf16 %v2475_v25, %v2463_v52  ;;  %v2667_v63 = vcvt.s32.f32 %v1899_v54 }
 0x2d6   : > { %v2847_v3 = vcvt.s32.f32 %v2079_v43  ;;  %v2859_v34 = vcvt.s32.f32 %v2091_v42  ;;  %3985 = vmatpush.bf16.msrb.mxu3 %v3543_v62  ;;  %v12040_v21 = vperm.slane %v12036_v5, 0  ;;  %v1671_v56 = vunpack.c.2.s8 %v1455_v39 }
 0x2d7   : > { %v3111_v35 = vcvt.s32.f32 %v2343_v18  ;;  %v3123_v44 = vcvt.s32.f32 %v2355_v8  ;;  %3935 = vmatpush.bf16.msrb.mxu0 %v3207_v57  ;;  %v3303_v11 = vpack.c.bf16 %v2667_v63, %v2655_v17  ;;  %v1683_v9 = vunpack.c.3.s8 %v1455_v39  ;;  %v1492_v17 = vld [vmem:[%s11410_s3 + $0x150] sm:$0xff] }
 0x2d8   : > { %v3399_v31 = vpack.c.bf16 %v2859_v34, %v2847_v3  ;;  %v12049_v28 = vadd.f32 %v12040_v21, %v4462_v45  ;;  %v2439_v24 = vcvt.s32.f32 %v1671_v56  ;;  %v1863_v13 = vunpack.c.2.s8 %v1503_v6  ;;  %v12059_v63 = vld [vmem:[%s11410_s3 + $0x2d0] sm:$0xff] }
 0x2d9   : > { %v3531_v12 = vpack.c.bf16 %v3123_v44, %v3111_v35  ;;  %3953 = vmatpush.bf16.msrb.mxu1 %v3303_v11  ;;  %v1875_v36 = vunpack.c.3.s8 %v1503_v6  ;;  %v2055_v16 = vunpack.c.2.s8 %v1551_v49  ;;  %v3603_v40 = vadd.f32 %v11993_v41, %v11991_v55  ;;  %v1611_v41 = vld [vmem:[%s11410_s3 + $0x508] sm:$0xff]  ;;  %v12061_v44 = vpop.f32.mrf.mxu2  ;;  %v12063_v11 = vpop.f32.mrf.mxu3 }
 0x2da   : > { %14365 = vst [vmem:[#allocation50_spill] sm:$0xff] %v12049_v28  ;;  %3971 = vmatpush.bf16.msrb.mxu2 %v3399_v31  ;;  %4565 = vrot.lane.b32.xlu2 %v12049_v28, %s10934_s9  ;;  %v2451_v14 = vcvt.s32.f32 %v1683_v9  ;;  %v2067_v15 = vunpack.c.3.s8 %v1551_v49  ;;  %v2319_v45 = vunpack.c.0.s8 %v1623_v1  ;;  %v2631_v10 = vcvt.s32.f32 %v1863_v13  ;;  %v1588_v9 = vld [vmem:[%s11410_s3 + $0x450] sm:$0xff] }
 0x2db   : > { %3986 = vmatpush.bf16.msrb.mxu3 %v3531_v12  ;;  %v2643_v37 = vcvt.s32.f32 %v1875_v36  ;;  %v2823_v38 = vcvt.s32.f32 %v2055_v16  ;;  %v2331_v26 = vunpack.c.1.s8 %v1623_v1  ;;  %v1647_v53 = vunpack.c.0.s8 %v1455_v39 }
 0x2dc   : > { %3925 = vmatmul.bf16.gmra.mxu3 %v11855_v27  ;;  %v3195_v19 = vpack.c.bf16 %v2451_v14, %v2439_v24  ;;  %v2835_v48 = vcvt.s32.f32 %v2067_v15  ;;  %v3087_v52 = vcvt.s32.f32 %v2319_v45  ;;  %v1659_v25 = vunpack.c.1.s8 %v1455_v39  ;;  %v12066_v24 = vpop.f32.mrf.mxu0 }
 0x2dd   : > { %v3291_v51 = vpack.c.bf16 %v2643_v37, %v2631_v10  ;;  %v3099_v32 = vcvt.s32.f32 %v2331_v26  ;;  %v1839_v55 = vunpack.c.0.s8 %v1503_v6  ;;  %v2415_v43 = vcvt.s32.f32 %v1647_v53 }
 0x2de   : > { %3936 = vmatpush.bf16.msrb.mxu0 %v3195_v19  ;;  %v3387_v54 = vpack.c.bf16 %v2835_v48, %v2823_v38  ;;  %v1851_v42 = vunpack.c.1.s8 %v1503_v6  ;;  %v2031_v62 = vunpack.c.0.s8 %v1551_v49  ;;  %v2427_v18 = vcvt.s32.f32 %v1659_v25 }
 0x2df   : > { %3954 = vmatpush.bf16.msrb.mxu1 %v3291_v51  ;;  %v3519_v1 = vpack.c.bf16 %v3099_v32, %v3087_v52  ;;  %v2607_v8 = vcvt.s32.f32 %v1839_v55  ;;  %v2043_v57 = vunpack.c.1.s8 %v1551_v49  ;;  %v2295_v39 = vunpack.c.2.s8 %v1611_v41  ;;  %v12068_v49 = vpop.f32.mrf.mxu1 }
 0x2e0   : > { %3972 = vmatpush.bf16.msrb.mxu2 %v3387_v54  ;;  %v2619_v3 = vcvt.s32.f32 %v1851_v42  ;;  %v2799_v34 = vcvt.s32.f32 %v2031_v62  ;;  %v2307_v35 = vunpack.c.3.s8 %v1611_v41  ;;  %v3183_v6 = vpack.c.bf16 %v2427_v18, %v2415_v43 }
 0x2e1   : > { %3987 = vmatpush.bf16.msrb.mxu3 %v3519_v1  ;;  %v2811_v31 = vcvt.s32.f32 %v2043_v57  ;;  %v1816_v56 = vunpack.c.2.s8 %v1492_v17  ;;  %v1828_v12 = vunpack.c.3.s8 %v1492_v17  ;;  %v3063_v36 = vcvt.s32.f32 %v2295_v39  ;;  %v1480_v39 = vld [vmem:[%s11410_s3 + $0xf0] sm:$0xff] }
 0x2e2   : > { %v3279_v13 = vpack.c.bf16 %v2619_v3, %v2607_v8  ;;  %v3075_v16 = vcvt.s32.f32 %v2307_v35  ;;  %v2008_v14 = vunpack.c.2.s8 %v12059_v63  ;;  %3937 = vmatpush.bf16.msrb.mxu0 %v3183_v6  ;;  %v2020_v37 = vunpack.c.3.s8 %v12059_v63  ;;  %v12076_v8 = vld [vmem:[%s11410_s3 + $0x4a8] sm:$0xff] }
 0x2e3   : > { %v3375_v15 = vpack.c.bf16 %v2811_v31, %v2799_v34  ;;  %v2584_v45 = vcvt.s32.f32 %v1816_v56  ;;  %v2596_v10 = vcvt.s32.f32 %v1828_v12  ;;  %v2200_v19 = vunpack.c.2.s8 %v1588_v9  ;;  %v1528_v12 = vld [vmem:[%s11410_s3 + $0x270] sm:$0xff] }
 0x2e4   : > { %3955 = vmatpush.bf16.msrb.mxu1 %v3279_v13  ;;  %v3507_v38 = vpack.c.bf16 %v3075_v16, %v3063_v36  ;;  %v2776_v26 = vcvt.s32.f32 %v2008_v14  ;;  %v2212_v48 = vunpack.c.3.s8 %v1588_v9  ;;  %v2788_v53 = vcvt.s32.f32 %v2020_v37  ;;  %v12086_v13 = vpop.f32.mrf.mxu2  ;;  %v12088_v36 = vpop.f32.mrf.mxu3 }
 0x2e5   : > { %3973 = vmatpush.bf16.msrb.mxu2 %v3375_v15  ;;  %v3268_v52 = vpack.c.bf16 %v2596_v10, %v2584_v45  ;;  %v3621_v51 = vadd.f32 %v12019_v30, %v3603_v40  ;;  %v2271_v32 = vunpack.c.0.s8 %v1611_v41  ;;  %v2968_v25 = vcvt.s32.f32 %v2200_v19  ;;  %3938 = vmatmul.bf16.vlgmr.msrb.gmra.mxu0 %v11866_v22  ;;  %v12092_v10 = vld [vmem:[%s11410_s3 + $0x3f0] sm:$0xff] }
 0x2e6   : > { %3988 = vmatpush.bf16.msrb.mxu3 %v3507_v38  ;;  %v2980_v55 = vcvt.s32.f32 %v2212_v48  ;;  %v2283_v54 = vunpack.c.1.s8 %v1611_v41  ;;  %v1792_v43 = vunpack.c.0.s8 %v1492_v17  ;;  %v3364_v42 = vpack.c.bf16 %v2788_v53, %v2776_v26 }
 0x2e7   : > { %4002 = vmatpush.bf16.msra.mxu0 %v3268_v52  ;;  %v3639_v62 = vadd.f32 %v12021_v29, %v3621_v51  ;;  %v3039_v1 = vcvt.s32.f32 %v2271_v32  ;;  %v1804_v18 = vunpack.c.1.s8 %v1492_v17  ;;  %3956 = vmatmul.bf16.vlgmr.msrb.gmra.mxu1 %v11868_v59  ;;  %v1984_v41 = vunpack.c.0.s8 %v12059_v63  ;;  %v12096_v37 = vpop.f32.mrf.mxu1 }
 0x2e8   : > { %v3460_v30 = vpack.c.bf16 %v2980_v55, %v2968_v25  ;;  %v3051_v40 = vcvt.s32.f32 %v2283_v54  ;;  %v2560_v57 = vcvt.s32.f32 %v1792_v43  ;;  %3974 = vmatmul.bf16.vlgmr.msrb.gmra.mxu2 %v11870_v23  ;;  %4020 = vmatpush.bf16.msra.mxu1 %v3364_v42  ;;  %v1996_v29 = vunpack.c.1.s8 %v12059_v63  ;;  %v12094_v63 = vpop.f32.mrf.mxu0 }
 0x2e9   : > { %v4486_v3 = vmul.f32 %v12024_v4, %v3639_v62  ;;  %v2572_v34 = vcvt.s32.f32 %v1804_v18  ;;  %v2176_v17 = vunpack.c.0.s8 %v1588_v9  ;;  %v2752_v6 = vcvt.s32.f32 %v1984_v41 }
 0x2ea   : > { %4038 = vmatpush.bf16.msra.mxu2 %v3460_v30  ;;  %v3495_v35 = vpack.c.bf16 %v3051_v40, %v3039_v1  ;;  %v2188_v31 = vunpack.c.1.s8 %v1588_v9  ;;  %v2247_v56 = vunpack.c.2.s8 %v12076_v8  ;;  %v2764_v14 = vcvt.s32.f32 %v1996_v29 }
 0x2eb   : > { %v3256_v16 = vpack.c.bf16 %v2572_v34, %v2560_v57  ;;  %v2944_v15 = vcvt.s32.f32 %v2176_v17  ;;  %v2259_v45 = vunpack.c.3.s8 %v12076_v8  ;;  %v1768_v26 = vunpack.c.2.s8 %v1480_v39 }
 0x2ec   : > { %3989 = vmatpush.bf16.msrb.mxu3 %v3495_v35  ;;  %v2956_v9 = vcvt.s32.f32 %v2188_v31  ;;  %v3015_v38 = vcvt.s32.f32 %v2247_v56  ;;  %v1780_v19 = vunpack.c.3.s8 %v1480_v39  ;;  %v3352_v48 = vpack.c.bf16 %v2764_v14, %v2752_v6  ;;  %v12110_v56 = vld [vmem:[%s11410_s3 + $0x5d0] sm:$0xff] }
 0x2ed   : > { %4003 = vmatpush.bf16.msra.mxu0 %v3256_v16  ;;  %v3027_v52 = vcvt.s32.f32 %v2259_v45  ;;  %v1960_v53 = vunpack.c.2.s8 %v1528_v12  ;;  %v1972_v51 = vunpack.c.3.s8 %v1528_v12  ;;  %v2536_v25 = vcvt.s32.f32 %v1768_v26 }
 0x2ee   : > { %v3448_v32 = vpack.c.bf16 %v2956_v9, %v2944_v15  ;;  %v2548_v55 = vcvt.s32.f32 %v1780_v19  ;;  %v2152_v54 = vunpack.c.2.s8 %v12092_v10  ;;  %4021 = vmatpush.bf16.msra.mxu1 %v3352_v48  ;;  %v2164_v1 = vunpack.c.3.s8 %v12092_v10  ;;  %v12114_v15 = vld [vmem:[%s11410_s3 + $0x90] sm:$0xff] }
 0x2ef   : > { %v3483_v43 = vpack.c.bf16 %v3027_v52, %v3015_v38  ;;  %v2728_v42 = vcvt.s32.f32 %v1960_v53  ;;  %v2740_v62 = vcvt.s32.f32 %v1972_v51  ;;  %v12101_v40 = vadd.f32 %v12040_v21, %v4486_v3  ;;  %v3676_v45 = vpop.f32.mrf.mxu1  ;;  %v12117_v19 = vld [vmem:[%s11410_s3 + $0x210] sm:$0xff] }
 0x2f0   : > { %4039 = vmatpush.bf16.msra.mxu2 %v3448_v32  ;;  %v3244_v18 = vpack.c.bf16 %v2548_v55, %v2536_v25  ;;  %v2920_v30 = vcvt.s32.f32 %v2152_v54  ;;  %v3670_v57 = vadd.f32 %v12046_v50, %v12044_v0  ;;  %v2932_v34 = vcvt.s32.f32 %v2164_v1  ;;  %v12122_v51 = vld [vmem:[%s11410_s3 + $0x390] sm:$0xff]  ;;  %v12124_v32 = vpop.f32.mrf.mxu2  ;;  %v12126_v25 = vpop.f32.mrf.mxu3 }
 0x2f1   : > { %14366 = vst [vmem:[#allocation51_spill] sm:$0xff] %v12101_v40  ;;  %3990 = vmatpush.bf16.msrb.mxu3 %v3483_v43  ;;  %v3340_v41 = vpack.c.bf16 %v2740_v62, %v2728_v42  ;;  %v2223_v29 = vunpack.c.0.s8 %v12076_v8  ;;  %v2235_v17 = vunpack.c.1.s8 %v12076_v8  ;;  %4569 = vrot.lane.b32.xlu1 %v12101_v40, %s10934_s9  ;;  %v1744_v35 = vunpack.c.0.s8 %v1480_v39  ;;  %v3658_v8 = vpop.f32.mrf.mxu0 }
 0x2f2   : > { %4004 = vmatpush.bf16.msra.mxu0 %v3244_v18  ;;  %v1756_v6 = vunpack.c.1.s8 %v1480_v39  ;;  %v1936_v3 = vunpack.c.0.s8 %v1528_v12  ;;  %v1948_v31 = vunpack.c.1.s8 %v1528_v12  ;;  %v3436_v0 = vpack.c.bf16 %v2932_v34, %v2920_v30 }
 0x2f3   : > { %4022 = vmatpush.bf16.msra.mxu1 %v3340_v41  ;;  %v2991_v50 = vcvt.s32.f32 %v2223_v29  ;;  %v3003_v16 = vcvt.s32.f32 %v2235_v17  ;;  %v2128_v14 = vunpack.c.0.s8 %v12092_v10  ;;  %v2512_v9 = vcvt.s32.f32 %v1744_v35 }
 0x2f4   : > { %v2524_v38 = vcvt.s32.f32 %v1756_v6  ;;  %v2704_v26 = vcvt.s32.f32 %v1936_v3  ;;  %v2716_v39 = vcvt.s32.f32 %v1948_v31  ;;  %4040 = vmatpush.bf16.msra.mxu2 %v3436_v0  ;;  %v2140_v48 = vunpack.c.1.s8 %v12092_v10 }
 0x2f5   : > { %v3471_v12 = vpack.c.bf16 %v3003_v16, %v2991_v50  ;;  %v2896_v52 = vcvt.s32.f32 %v2128_v14  ;;  %v2392_v53 = vunpack.c.2.s8 %v12110_v56  ;;  %v2404_v43 = vunpack.c.3.s8 %v12110_v56  ;;  %3943 = vmatmul.bf16.gmra.mxu0 %v11849_v2 }
 0x2f6   : > { %v3232_v55 = vpack.c.bf16 %v2524_v38, %v2512_v9  ;;  %v3328_v54 = vpack.c.bf16 %v2716_v39, %v2704_v26  ;;  %v1720_v42 = vunpack.c.2.s8 %v12114_v15  ;;  %v2908_v62 = vcvt.s32.f32 %v2140_v48 }
 0x2f7   : > { %3991 = vmatpush.bf16.msrb.mxu3 %v3471_v12  ;;  %v3160_v10 = vcvt.s32.f32 %v2392_v53  ;;  %v1732_v1 = vunpack.c.3.s8 %v12114_v15  ;;  %v1912_v18 = vunpack.c.2.s8 %v12117_v19  ;;  %3961 = vmatmul.bf16.gmra.mxu1 %v11851_v61  ;;  %v3172_v30 = vcvt.s32.f32 %v2404_v43 }
 0x2f8   : > { %4005 = vmatpush.bf16.msra.mxu0 %v3232_v55  ;;  %4023 = vmatpush.bf16.msra.mxu1 %v3328_v54  ;;  %v2488_v41 = vcvt.s32.f32 %v1720_v42  ;;  %v1924_v34 = vunpack.c.3.s8 %v12117_v19  ;;  %v2104_v29 = vunpack.c.2.s8 %v12122_v51  ;;  %v3424_v17 = vpack.c.bf16 %v2908_v62, %v2896_v52  ;;  %v1624_v52 = vld [vmem:[%s11410_s3 + $0x570] sm:$0xff]  ;;  %v3694_v53 = vpop.f32.mrf.mxu2 }
 0x2f9   : > { %v2500_v35 = vcvt.s32.f32 %v1732_v1  ;;  %v2680_v6 = vcvt.s32.f32 %v1912_v18  ;;  %v2116_v3 = vunpack.c.3.s8 %v12122_v51  ;;  %3979 = vmatmul.bf16.gmra.mxu2 %v11853_v7  ;;  %v3556_v31 = vpack.c.bf16 %v3172_v30, %v3160_v10  ;;  %v1456_v54 = vld [vmem:[%s11410_s3 + $0x30] sm:$0xff] }
 0x2fa   : > { %3992 = vmatmul.bf16.vlgmr.msrb.gmra.mxu3 %v11872_v20  ;;  %v2692_v0 = vcvt.s32.f32 %v1924_v34  ;;  %v2872_v50 = vcvt.s32.f32 %v2104_v29  ;;  %v3688_v16 = vadd.f32 %v12061_v44, %v3670_v57  ;;  %4041 = vmatpush.bf16.msra.mxu2 %v3424_v17  ;;  %v12141_v45 = vperm.slane %v12011_v33, 1 }
 0x2fb   : > { %v3220_v14 = vpack.c.bf16 %v2500_v35, %v2488_v41  ;;  %v2884_v8 = vcvt.s32.f32 %v2116_v3  ;;  %v3672_v9 = vadd.f32 %v12068_v49, %v12066_v24  ;;  %4056 = vmatpush.bf16.msra.mxu3 %v3556_v31  ;;  %v2368_v39 = vunpack.c.0.s8 %v12110_v56  ;;  %v3712_v24 = vpop.f32.mrf.mxu3  ;;  %v1504_v41 = vld [vmem:[%s11410_s3 + $0x1b0] sm:$0xff] }
 0x2fc   : > { %v3316_v38 = vpack.c.bf16 %v2692_v0, %v2680_v6  ;;  %v3706_v26 = vadd.f32 %v12063_v11, %v3688_v16  ;;  %v2380_v12 = vunpack.c.1.s8 %v12110_v56  ;;  %v1696_v57 = vunpack.c.0.s8 %v12114_v15  ;;  %v1552_v6 = vld [vmem:[%s11410_s3 + $0x330] sm:$0xff] }
 0x2fd   : > { %4006 = vmatpush.bf16.msra.mxu0 %v3220_v14  ;;  %v3412_v44 = vpack.c.bf16 %v2884_v8, %v2872_v50  ;;  %v1708_v48 = vunpack.c.1.s8 %v12114_v15  ;;  %v1888_v33 = vunpack.c.0.s8 %v12117_v19  ;;  %v3136_v49 = vcvt.s32.f32 %v2368_v39 }
 0x2fe   : > { %4024 = vmatpush.bf16.msra.mxu1 %v3316_v38  ;;  %v12153_v11 = vmul.f32 %v12141_v45, %v3706_v26  ;;  %v3148_v55 = vcvt.s32.f32 %v2380_v12  ;;  %v1900_v56 = vunpack.c.1.s8 %v12117_v19  ;;  %v2464_v43 = vcvt.s32.f32 %v1696_v57 }
 0x2ff   : > { %4042 = vmatpush.bf16.msra.mxu2 %v3412_v44  ;;  %v2476_v42 = vcvt.s32.f32 %v1708_v48  ;;  %v2656_v15 = vcvt.s32.f32 %v1888_v33  ;;  %v2080_v62 = vunpack.c.0.s8 %v12122_v51  ;;  %v2092_v18 = vunpack.c.1.s8 %v12122_v51 }
 0x300   : > { %v3544_v10 = vpack.c.bf16 %v3148_v55, %v3136_v49  ;;  %v2668_v1 = vcvt.s32.f32 %v1900_v56  ;;  %v2344_v30 = vunpack.c.2.s8 %v1624_v52  ;;  %v2356_v17 = vunpack.c.3.s8 %v1624_v52 }
 0x301   : > { %v3208_v34 = vpack.c.bf16 %v2476_v42, %v2464_v43  ;;  %v2848_v29 = vcvt.s32.f32 %v2080_v62  ;;  %v1672_v35 = vunpack.c.2.s8 %v1456_v54  ;;  %v2860_v3 = vcvt.s32.f32 %v2092_v18 }
 0x302   : > { %4057 = vmatpush.bf16.msra.mxu3 %v3544_v10  ;;  %v3304_v19 = vpack.c.bf16 %v2668_v1, %v2656_v15  ;;  %v3112_v31 = vcvt.s32.f32 %v2344_v30  ;;  %v1684_v0 = vunpack.c.3.s8 %v1456_v54  ;;  %v3124_v50 = vcvt.s32.f32 %v2356_v17  ;;  %v12172_v30 = vld [vmem:[%s11410_s3 + $0x2d8] sm:$0xff]  ;;  %v12177_v17 = vpop.f32.mrf.mxu1 }
 0x303   : > { %4007 = vmatpush.bf16.msra.mxu0 %v3208_v34  ;;  %v2440_v16 = vcvt.s32.f32 %v1672_v35  ;;  %v1864_v14 = vunpack.c.2.s8 %v1504_v41  ;;  %v1876_v8 = vunpack.c.3.s8 %v1504_v41  ;;  %v3400_v38 = vpack.c.bf16 %v2860_v3, %v2848_v29 }
 0x304   : > { %4025 = vmatpush.bf16.msra.mxu1 %v3304_v19  ;;  %v2452_v51 = vcvt.s32.f32 %v1684_v0  ;;  %v2056_v26 = vunpack.c.2.s8 %v1552_v6  ;;  %v2068_v39 = vunpack.c.3.s8 %v1552_v6  ;;  %v3532_v12 = vpack.c.bf16 %v3124_v50, %v3112_v31 }
 0x305   : > { %v2632_v44 = vcvt.s32.f32 %v1864_v14  ;;  %v2644_v57 = vcvt.s32.f32 %v1876_v8  ;;  %v3690_v48 = vadd.f32 %v12086_v13, %v3672_v9  ;;  %4043 = vmatpush.bf16.msra.mxu2 %v3400_v38  ;;  %v3675_v49 = vadd.f32 %v12096_v37, %v12094_v63  ;;  %v12166_v9 = vld [vmem:[%s11410_s3 + $0x158] sm:$0xff]  ;;  %v12184_v8 = vld [vmem:[%s11410_s3 + $0x510] sm:$0xff] }
 0x306   : > { %v3196_v33 = vpack.c.bf16 %v2452_v51, %v2440_v16  ;;  %v2824_v53 = vcvt.s32.f32 %v2056_v26  ;;  %v2836_v24 = vcvt.s32.f32 %v2068_v39  ;;  %4058 = vmatpush.bf16.msra.mxu3 %v3532_v12  ;;  %v2320_v43 = vunpack.c.0.s8 %v1624_v52 }
 0x307   : > { %v3292_v55 = vpack.c.bf16 %v2644_v57, %v2632_v44  ;;  %v3708_v56 = vadd.f32 %v12088_v36, %v3690_v48  ;;  %v2332_v42 = vunpack.c.1.s8 %v1624_v52  ;;  %v1648_v62 = vunpack.c.0.s8 %v1456_v54 }
 0x308   : > { %4008 = vmatpush.bf16.msra.mxu0 %v3196_v33  ;;  %v3388_v15 = vpack.c.bf16 %v2836_v24, %v2824_v53  ;;  %v1660_v10 = vunpack.c.1.s8 %v1456_v54  ;;  %v1840_v13 = vunpack.c.0.s8 %v1504_v41  ;;  %v3088_v18 = vcvt.s32.f32 %v2320_v43  ;;  %v12175_v54 = vpop.f32.mrf.mxu0 }
 0x309   : > { %4026 = vmatpush.bf16.msra.mxu1 %v3292_v55  ;;  %v12169_v1 = vmul.f32 %v12141_v45, %v3708_v56  ;;  %v3100_v63 = vcvt.s32.f32 %v2332_v42  ;;  %v1852_v37 = vunpack.c.1.s8 %v1504_v41  ;;  %v2416_v36 = vcvt.s32.f32 %v1648_v62  ;;  %v1589_v41 = vld [vmem:[%s11410_s3 + $0x458] sm:$0xff] }
 0x30a   : > { %4044 = vmatpush.bf16.msra.mxu2 %v3388_v15  ;;  %v2428_v52 = vcvt.s32.f32 %v1660_v10  ;;  %v2608_v34 = vcvt.s32.f32 %v1840_v13  ;;  %v2032_v29 = vunpack.c.0.s8 %v1552_v6  ;;  %3997 = vmatmul.bf16.gmra.mxu3 %v11855_v27  ;;  %v2044_v3 = vunpack.c.1.s8 %v1552_v6 }
 0x30b   : > { %v3520_v35 = vpack.c.bf16 %v3100_v63, %v3088_v18  ;;  %v2620_v19 = vcvt.s32.f32 %v1852_v37  ;;  %v1817_v31 = vunpack.c.2.s8 %v12166_v9  ;;  %v1829_v16 = vunpack.c.3.s8 %v12166_v9  ;;  %v12192_v18 = vpop.f32.mrf.mxu2  ;;  %v12194_v63 = vpop.f32.mrf.mxu3 }
 0x30c   : > { %v3184_v0 = vpack.c.bf16 %v2428_v52, %v2416_v36  ;;  %v2800_v50 = vcvt.s32.f32 %v2032_v29  ;;  %v2009_v14 = vunpack.c.2.s8 %v12172_v30  ;;  %v2812_v51 = vcvt.s32.f32 %v2044_v3 }
 0x30d   : > { %4059 = vmatpush.bf16.msra.mxu3 %v3520_v35  ;;  %v3280_v38 = vpack.c.bf16 %v2620_v19, %v2608_v34  ;;  %v2585_v26 = vcvt.s32.f32 %v1817_v31  ;;  %v2021_v39 = vunpack.c.3.s8 %v12172_v30  ;;  %v2597_v12 = vcvt.s32.f32 %v1829_v16  ;;  %v1481_v19 = vld [vmem:[%s11410_s3 + $0xf8] sm:$0xff] }
 0x30e   : > { %4009 = vmatpush.bf16.msra.mxu0 %v3184_v0  ;;  %v2777_v6 = vcvt.s32.f32 %v2009_v14  ;;  %v2201_v44 = vunpack.c.2.s8 %v1589_v41  ;;  %v2213_v57 = vunpack.c.3.s8 %v1589_v41  ;;  %v3376_v48 = vpack.c.bf16 %v2812_v51, %v2800_v50  ;;  %v12207_v50 = vpop.f32.mrf.mxu1  ;;  %v1529_v51 = vld [vmem:[%s11410_s3 + $0x278] sm:$0xff] }
 0x30f   : > { %4027 = vmatpush.bf16.msra.mxu1 %v3280_v38  ;;  %v2789_v33 = vcvt.s32.f32 %v2021_v39  ;;  %v2296_v53 = vunpack.c.2.s8 %v12184_v8  ;;  %v2308_v24 = vunpack.c.3.s8 %v12184_v8  ;;  %v3269_v55 = vpack.c.bf16 %v2597_v12, %v2585_v26  ;;  %v1577_v12 = vld [vmem:[%s11410_s3 + $0x3f8] sm:$0xff] }
 0x310   : > { %v2969_v56 = vcvt.s32.f32 %v2201_v44  ;;  %v2981_v43 = vcvt.s32.f32 %v2213_v57  ;;  %v3693_v42 = vadd.f32 %v12124_v32, %v3675_v49  ;;  %4045 = vmatpush.bf16.msra.mxu2 %v3376_v48  ;;  %v1793_v13 = vunpack.c.0.s8 %v12166_v9  ;;  %v12205_v0 = vpop.f32.mrf.mxu0 }
 0x311   : > { %v3365_v15 = vpack.c.bf16 %v2789_v33, %v2777_v6  ;;  %v3064_v62 = vcvt.s32.f32 %v2296_v53  ;;  %v3076_v10 = vcvt.s32.f32 %v2308_v24  ;;  %4010 = vmatmul.bf16.vlgmr.msra.gmra.mxu0 %v11866_v22  ;;  %v1805_v52 = vunpack.c.1.s8 %v12166_v9 }
 0x312   : > { %4074 = vmatpush.bf16.msrb.mxu0 %v3269_v55  ;;  %v3461_v37 = vpack.c.bf16 %v2981_v43, %v2969_v56  ;;  %v3711_v36 = vadd.f32 %v12126_v25, %v3693_v42  ;;  %v1985_v32 = vunpack.c.0.s8 %v12172_v30  ;;  %4028 = vmatmul.bf16.vlgmr.msra.gmra.mxu1 %v11868_v59  ;;  %v2561_v34 = vcvt.s32.f32 %v1793_v13 }
 0x313   : > { %4092 = vmatpush.bf16.msrb.mxu1 %v3365_v15  ;;  %v3508_v49 = vpack.c.bf16 %v3076_v10, %v3064_v62  ;;  %v1997_v29 = vunpack.c.1.s8 %v12172_v30  ;;  %v2177_v35 = vunpack.c.0.s8 %v1589_v41  ;;  %v2573_v31 = vcvt.s32.f32 %v1805_v52  ;;  %4046 = vmatmul.bf16.vlgmr.msra.gmra.mxu2 %v11870_v23 }
 0x314   : > { %4110 = vmatpush.bf16.msrb.mxu2 %v3461_v37  ;;  %v12203_v3 = vmul.f32 %v12141_v45, %v3711_v36  ;;  %v2753_v25 = vcvt.s32.f32 %v1985_v32  ;;  %v2189_v9 = vunpack.c.1.s8 %v1589_v41  ;;  %v12210_v30 = vperm.slane %v12036_v5, 1  ;;  %v1600_v5 = vld [vmem:[%s11410_s3 + $0x4b0] sm:$0xff]  ;;  %v12224_v32 = vpop.f32.mrf.mxu2 }
 0x315   : > { %4060 = vmatpush.bf16.msra.mxu3 %v3508_v49  ;;  %v2765_v16 = vcvt.s32.f32 %v1997_v29  ;;  %v2945_v14 = vcvt.s32.f32 %v2177_v35  ;;  %v2272_v38 = vunpack.c.0.s8 %v12184_v8  ;;  %v3257_v45 = vpack.c.bf16 %v2573_v31, %v2561_v34  ;;  %v12226_v49 = vpop.f32.mrf.mxu3 }
 0x316   : > { %v2957_v26 = vcvt.s32.f32 %v2189_v9  ;;  %v2284_v41 = vunpack.c.1.s8 %v12184_v8  ;;  %v1769_v39 = vunpack.c.2.s8 %v1481_v19  ;;  %v12219_v44 = vadd.f32 %v12210_v30, %v12169_v1  ;;  %14368 = vst [vmem:[#allocation53_spill] sm:$0xff] %v12226_v49 }
 0x317   : > { %v3353_v6 = vpack.c.bf16 %v2765_v16, %v2753_v25  ;;  %v3040_v57 = vcvt.s32.f32 %v2272_v38  ;;  %v1781_v48 = vunpack.c.3.s8 %v1481_v19  ;;  %4075 = vmatpush.bf16.msrb.mxu0 %v3257_v45  ;;  %v1961_v55 = vunpack.c.2.s8 %v1529_v51 }
 0x318   : > { %14367 = vst [vmem:[#allocation52_spill] sm:$0xff] %v12219_v44  ;;  %v3449_v33 = vpack.c.bf16 %v2957_v26, %v2945_v14  ;;  %v3052_v53 = vcvt.s32.f32 %v2284_v41  ;;  %v2537_v24 = vcvt.s32.f32 %v1769_v39  ;;  %4576 = vrot.lane.b32.xlu0 %v12219_v44, %s10934_s9  ;;  %v1973_v56 = vunpack.c.3.s8 %v1529_v51  ;;  %v12229_v39 = vld [vmem:[%s11410_s3 + $0x98] sm:$0xff] }
 0x319   : > { %4093 = vmatpush.bf16.msrb.mxu1 %v3353_v6  ;;  %v2549_v8 = vcvt.s32.f32 %v1781_v48  ;;  %v2153_v43 = vunpack.c.2.s8 %v1577_v12  ;;  %v2165_v42 = vunpack.c.3.s8 %v1577_v12  ;;  %v2729_v1 = vcvt.s32.f32 %v1961_v55  ;;  %v12231_v6 = vpop.f32.mrf.mxu0 }
 0x31a   : > { %4111 = vmatpush.bf16.msrb.mxu2 %v3449_v33  ;;  %v3496_v15 = vpack.c.bf16 %v3052_v53, %v3040_v57  ;;  %v2248_v62 = vunpack.c.2.s8 %v1600_v5  ;;  %v2260_v10 = vunpack.c.3.s8 %v1600_v5  ;;  %v2741_v37 = vcvt.s32.f32 %v1973_v56  ;;  %v12233_v57 = vpop.f32.mrf.mxu1 }
 0x31b   : > { %v3245_v13 = vpack.c.bf16 %v2549_v8, %v2537_v24  ;;  %v2921_v36 = vcvt.s32.f32 %v2153_v43  ;;  %v2933_v52 = vcvt.s32.f32 %v2165_v42  ;;  %v1745_v35 = vunpack.c.0.s8 %v1481_v19  ;;  %v12239_v43 = vld [vmem:[%s11410_s3 + $0x398] sm:$0xff] }
 0x31c   : > { %4061 = vmatpush.bf16.msra.mxu3 %v3496_v15  ;;  %v3016_v34 = vcvt.s32.f32 %v2248_v62  ;;  %v3028_v29 = vcvt.s32.f32 %v2260_v10  ;;  %v1757_v31 = vunpack.c.1.s8 %v1481_v19  ;;  %v3341_v25 = vpack.c.bf16 %v2741_v37, %v2729_v1 }
 0x31d   : > { %4076 = vmatpush.bf16.msrb.mxu0 %v3245_v13  ;;  %v3437_v9 = vpack.c.bf16 %v2933_v52, %v2921_v36  ;;  %v1937_v16 = vunpack.c.0.s8 %v1529_v51  ;;  %v1949_v14 = vunpack.c.1.s8 %v1529_v51  ;;  %v2513_v45 = vcvt.s32.f32 %v1745_v35  ;;  %v1517_v51 = vld [vmem:[%s11410_s3 + $0x218] sm:$0xff] }
 0x31e   : > { %v3484_v38 = vpack.c.bf16 %v3028_v29, %v3016_v34  ;;  %v2525_v26 = vcvt.s32.f32 %v1757_v31  ;;  %v2129_v41 = vunpack.c.0.s8 %v1577_v12  ;;  %4094 = vmatpush.bf16.msrb.mxu1 %v3341_v25  ;;  %v2141_v33 = vunpack.c.1.s8 %v1577_v12  ;;  %v12245_v13 = vld [vmem:[%s11410_s3 + $0x5d8] sm:$0xff] }
 0x31f   : > { %4112 = vmatpush.bf16.msrb.mxu2 %v3437_v9  ;;  %v2705_v19 = vcvt.s32.f32 %v1937_v16  ;;  %v2717_v48 = vcvt.s32.f32 %v1949_v14  ;;  %v3742_v53 = vadd.f32 %v12177_v17, %v12175_v54  ;;  %v2224_v8 = vunpack.c.0.s8 %v1600_v5 }
 0x320   : > { %4062 = vmatpush.bf16.msra.mxu3 %v3484_v38  ;;  %v3233_v24 = vpack.c.bf16 %v2525_v26, %v2513_v45  ;;  %v2897_v55 = vcvt.s32.f32 %v2129_v41  ;;  %v2236_v56 = vunpack.c.1.s8 %v1600_v5  ;;  %v2909_v15 = vcvt.s32.f32 %v2141_v33  ;;  %v12252_v38 = vpop.f32.mrf.mxu2  ;;  %v12254_v45 = vpop.f32.mrf.mxu3 }
 0x321   : > { %v3329_v42 = vpack.c.bf16 %v2717_v48, %v2705_v19  ;;  %v1721_v1 = vunpack.c.2.s8 %v12229_v39  ;;  %v1733_v62 = vunpack.c.3.s8 %v12229_v39  ;;  %4015 = vmatmul.bf16.gmra.mxu0 %v11849_v2  ;;  %v2992_v12 = vcvt.s32.f32 %v2224_v8  ;;  %v3730_v48 = vpop.f32.mrf.mxu0 }
 0x322   : > { %4077 = vmatpush.bf16.msrb.mxu0 %v3233_v24  ;;  %v3004_v54 = vcvt.s32.f32 %v2236_v56  ;;  %v1913_v17 = vunpack.c.2.s8 %v1517_v51  ;;  %v1925_v10 = vunpack.c.3.s8 %v1517_v51  ;;  %4033 = vmatmul.bf16.gmra.mxu1 %v11851_v61  ;;  %v3425_v5 = vpack.c.bf16 %v2909_v15, %v2897_v55  ;;  %v3748_v33 = vpop.f32.mrf.mxu1 }
 0x323   : > { %4095 = vmatpush.bf16.msrb.mxu1 %v3329_v42  ;;  %v2489_v37 = vcvt.s32.f32 %v1721_v1  ;;  %v2501_v36 = vcvt.s32.f32 %v1733_v62  ;;  %v2105_v52 = vunpack.c.2.s8 %v12239_v43  ;;  %v2117_v31 = vunpack.c.3.s8 %v12239_v43  ;;  %4051 = vmatmul.bf16.gmra.mxu2 %v11853_v7 }
 0x324   : > { %v3472_v34 = vpack.c.bf16 %v3004_v54, %v2992_v12  ;;  %v2681_v29 = vcvt.s32.f32 %v1913_v17  ;;  %v2693_v35 = vcvt.s32.f32 %v1925_v10  ;;  %4113 = vmatpush.bf16.msrb.mxu2 %v3425_v5  ;;  %v2393_v16 = vunpack.c.2.s8 %v12245_v13  ;;  %v1457_v17 = vld [vmem:[%s11410_s3 + $0x38] sm:$0xff] }
 0x325   : > { %v3221_v25 = vpack.c.bf16 %v2501_v36, %v2489_v37  ;;  %v2873_v9 = vcvt.s32.f32 %v2105_v52  ;;  %v2405_v14 = vunpack.c.3.s8 %v12245_v13  ;;  %v2885_v41 = vcvt.s32.f32 %v2117_v31  ;;  %v1505_v37 = vld [vmem:[%s11410_s3 + $0x1b8] sm:$0xff] }
 0x326   : > { %4063 = vmatpush.bf16.msra.mxu3 %v3472_v34  ;;  %v3317_v26 = vpack.c.bf16 %v2693_v35, %v2681_v29  ;;  %v3760_v19 = vadd.f32 %v12192_v18, %v3742_v53  ;;  %v3161_v24 = vcvt.s32.f32 %v2393_v16  ;;  %v1697_v8 = vunpack.c.0.s8 %v12229_v39  ;;  %v1553_v52 = vld [vmem:[%s11410_s3 + $0x338] sm:$0xff] }
 0x327   : > { %4078 = vmatpush.bf16.msrb.mxu0 %v3221_v25  ;;  %v3173_v55 = vcvt.s32.f32 %v2405_v14  ;;  %v1709_v56 = vunpack.c.1.s8 %v12229_v39  ;;  %v3413_v42 = vpack.c.bf16 %v2885_v41, %v2873_v9  ;;  %v1889_v1 = vunpack.c.0.s8 %v1517_v51 }
 0x328   : > { %4096 = vmatpush.bf16.msrb.mxu1 %v3317_v26  ;;  %v12261_v15 = vadd.f32 %v12194_v63, %v3760_v19  ;;  %v1901_v18 = vunpack.c.1.s8 %v1517_v51  ;;  %v2465_v62 = vcvt.s32.f32 %v1697_v8  ;;  %v2081_v54 = vunpack.c.0.s8 %v12239_v43  ;;  %v12272_v26 = vld [vmem:[%s11410_s3 + $0x578] sm:$0xff]  ;;  %v3784_v41 = vpop.f32.mrf.mxu3 }
 0x329   : > { %4064 = vmatmul.bf16.vlgmr.msra.gmra.mxu3 %v11872_v20  ;;  %v3557_v53 = vpack.c.bf16 %v3173_v55, %v3161_v24  ;;  %v2477_v12 = vcvt.s32.f32 %v1709_v56  ;;  %4114 = vmatpush.bf16.msrb.mxu2 %v3413_v42  ;;  %v2657_v10 = vcvt.s32.f32 %v1889_v1  ;;  %v2093_v5 = vunpack.c.1.s8 %v12239_v43  ;;  %v3766_v43 = vpop.f32.mrf.mxu2 }
 0x32a   : > { %v2669_v39 = vcvt.s32.f32 %v1901_v18  ;;  %v2849_v36 = vcvt.s32.f32 %v2081_v54  ;;  %v2369_v51 = vunpack.c.0.s8 %v12245_v13  ;;  %v2381_v35 = vunpack.c.1.s8 %v12245_v13 }
 0x32b   : > { %4128 = vmatpush.bf16.msrb.mxu3 %v3557_v53  ;;  %v3209_v63 = vpack.c.bf16 %v2477_v12, %v2465_v62  ;;  %v2861_v29 = vcvt.s32.f32 %v2093_v5  ;;  %v1673_v31 = vunpack.c.2.s8 %v1457_v17  ;;  %v1685_v9 = vunpack.c.3.s8 %v1457_v17 }
 0x32c   : > { %v3305_v34 = vpack.c.bf16 %v2669_v39, %v2657_v10  ;;  %v3137_v25 = vcvt.s32.f32 %v2369_v51  ;;  %v1865_v16 = vunpack.c.2.s8 %v1505_v37  ;;  %v1877_v14 = vunpack.c.3.s8 %v1505_v37 }
 0x32d   : > { %4079 = vmatpush.bf16.msrb.mxu0 %v3209_v63  ;;  %v3401_v19 = vpack.c.bf16 %v2861_v29, %v2849_v36  ;;  %v3149_v48 = vcvt.s32.f32 %v2381_v35  ;;  %v2441_v33 = vcvt.s32.f32 %v1673_v31  ;;  %v2057_v24 = vunpack.c.2.s8 %v1553_v52  ;;  %v1494_v29 = vld [vmem:[%s11410_s3 + $0x160] sm:$0xff] }
 0x32e   : > { %4097 = vmatpush.bf16.msrb.mxu1 %v3305_v34  ;;  %v2453_v55 = vcvt.s32.f32 %v1685_v9  ;;  %v2633_v8 = vcvt.s32.f32 %v1865_v16  ;;  %v2645_v56 = vcvt.s32.f32 %v1877_v14  ;;  %v2069_v42 = vunpack.c.3.s8 %v1553_v52  ;;  %v1542_v16 = vld [vmem:[%s11410_s3 + $0x2e0] sm:$0xff] }
 0x32f   : > { %4115 = vmatpush.bf16.msrb.mxu2 %v3401_v19  ;;  %v3545_v13 = vpack.c.bf16 %v3149_v48, %v3137_v25  ;;  %v2825_v1 = vcvt.s32.f32 %v2057_v24  ;;  %v2345_v18 = vunpack.c.2.s8 %v12272_v26  ;;  %v2357_v53 = vunpack.c.3.s8 %v12272_v26  ;;  %v1590_v19 = vld [vmem:[%s11410_s3 + $0x460] sm:$0xff] }
 0x330   : > { %v3197_v62 = vpack.c.bf16 %v2453_v55, %v2441_v33  ;;  %v3293_v12 = vpack.c.bf16 %v2645_v56, %v2633_v8  ;;  %v2837_v54 = vcvt.s32.f32 %v2069_v42  ;;  %v1649_v5 = vunpack.c.0.s8 %v1457_v17  ;;  %v12279_v55 = vpop.f32.mrf.mxu0  ;;  %v12281_v8 = vpop.f32.mrf.mxu1 }
 0x331   : > { %4129 = vmatpush.bf16.msrb.mxu3 %v3545_v13  ;;  %v3113_v10 = vcvt.s32.f32 %v2345_v18  ;;  %v3125_v39 = vcvt.s32.f32 %v2357_v53  ;;  %v1661_v63 = vunpack.c.1.s8 %v1457_v17  ;;  %v1841_v51 = vunpack.c.0.s8 %v1505_v37 }
 0x332   : > { %4080 = vmatpush.bf16.msrb.mxu0 %v3197_v62  ;;  %4098 = vmatpush.bf16.msrb.mxu1 %v3293_v12  ;;  %v3389_v36 = vpack.c.bf16 %v2837_v54, %v2825_v1  ;;  %v1853_v34 = vunpack.c.1.s8 %v1505_v37  ;;  %v2417_v31 = vcvt.s32.f32 %v1649_v5  ;;  %v2033_v9 = vunpack.c.0.s8 %v1553_v52 }
 0x333   : > { %v3533_v35 = vpack.c.bf16 %v3125_v39, %v3113_v10  ;;  %v2429_v25 = vcvt.s32.f32 %v1661_v63  ;;  %v2609_v14 = vcvt.s32.f32 %v1841_v51  ;;  %v2045_v41 = vunpack.c.1.s8 %v1553_v52 }
 0x334   : > { %4116 = vmatpush.bf16.msrb.mxu2 %v3389_v36  ;;  %v2621_v43 = vcvt.s32.f32 %v1853_v34  ;;  %v2801_v17 = vcvt.s32.f32 %v2033_v9  ;;  %v1818_v33 = vunpack.c.2.s8 %v1494_v29  ;;  %v1830_v24 = vunpack.c.3.s8 %v1494_v29 }
 0x335   : > { %4130 = vmatpush.bf16.msrb.mxu3 %v3533_v35  ;;  %v3185_v48 = vpack.c.bf16 %v2429_v25, %v2417_v31  ;;  %v2813_v56 = vcvt.s32.f32 %v2045_v41  ;;  %v2010_v42 = vunpack.c.2.s8 %v1542_v16  ;;  %v2022_v13 = vunpack.c.3.s8 %v1542_v16  ;;  %v12289_v25 = vld [vmem:[%s11410_s3 + $0x518] sm:$0xff] }
 0x336   : > { %v3281_v37 = vpack.c.bf16 %v2621_v43, %v2609_v14  ;;  %v2586_v1 = vcvt.s32.f32 %v1818_v33  ;;  %v2598_v18 = vcvt.s32.f32 %v1830_v24  ;;  %v2202_v53 = vunpack.c.2.s8 %v1590_v19 }
 0x337   : > { %4081 = vmatpush.bf16.msrb.mxu0 %v3185_v48  ;;  %v2214_v62 = vunpack.c.3.s8 %v1590_v19  ;;  %v3377_v52 = vpack.c.bf16 %v2813_v56, %v2801_v17  ;;  %v2778_v12 = vcvt.s32.f32 %v2010_v42  ;;  %v2790_v54 = vcvt.s32.f32 %v2022_v13  ;;  %v1530_v56 = vld [vmem:[%s11410_s3 + $0x280] sm:$0xff] }
 0x338   : > { %4099 = vmatpush.bf16.msrb.mxu1 %v3281_v37  ;;  %v3747_v10 = vadd.f32 %v12233_v57, %v12231_v6  ;;  %v3270_v39 = vpack.c.bf16 %v2598_v18, %v2586_v1  ;;  %v2970_v5 = vcvt.s32.f32 %v2202_v53  ;;  %v2321_v36 = vunpack.c.0.s8 %v12272_v26  ;;  %v1482_v37 = vld [vmem:[%s11410_s3 + $0x100] sm:$0xff]  ;;  %v12301_v53 = vpop.f32.mrf.mxu2 }
 0x339   : > { %4069 = vmatmul.bf16.gmra.mxu3 %v11855_v27  ;;  %v2982_v63 = vcvt.s32.f32 %v2214_v62  ;;  %4117 = vmatpush.bf16.msrb.mxu2 %v3377_v52  ;;  %v3366_v51 = vpack.c.bf16 %v2790_v54, %v2778_v12  ;;  %v2333_v34 = vunpack.c.1.s8 %v12272_v26  ;;  %v1794_v35 = vunpack.c.0.s8 %v1494_v29  ;;  %v12298_v18 = vld [vmem:[%s11410_s3 + $0x400] sm:$0xff]  ;;  %v12303_v62 = vpop.f32.mrf.mxu3 }
 0x33a   : > { %v1806_v31 = vunpack.c.1.s8 %v1494_v29  ;;  %4082 = vmatmul.bf16.vlgmr.msrb.gmra.mxu0 %v11866_v22  ;;  %v3089_v57 = vcvt.s32.f32 %v2321_v36  ;;  %v1986_v9 = vunpack.c.0.s8 %v1542_v16  ;;  %v1998_v14 = vunpack.c.1.s8 %v1542_v16 }
 0x33b   : > { %4146 = vmatpush.bf16.msra.mxu0 %v3270_v39  ;;  %v3462_v6 = vpack.c.bf16 %v2982_v63, %v2970_v5  ;;  %4100 = vmatmul.bf16.vlgmr.msrb.gmra.mxu1 %v11868_v59  ;;  %v3101_v43 = vcvt.s32.f32 %v2333_v34  ;;  %v2562_v41 = vcvt.s32.f32 %v1794_v35  ;;  %v2178_v48 = vunpack.c.0.s8 %v1590_v19  ;;  %v12306_v39 = vpop.f32.mrf.mxu0  ;;  %v12308_v5 = vpop.f32.mrf.mxu1 }
 0x33c   : > { %4164 = vmatpush.bf16.msra.mxu1 %v3366_v51  ;;  %v2574_v26 = vcvt.s32.f32 %v1806_v31  ;;  %v2754_v29 = vcvt.s32.f32 %v1986_v9  ;;  %v2766_v17 = vcvt.s32.f32 %v1998_v14  ;;  %v2190_v33 = vunpack.c.1.s8 %v1590_v19  ;;  %4118 = vmatmul.bf16.vlgmr.msrb.gmra.mxu2 %v11870_v23 }
 0x33d   : > { %4182 = vmatpush.bf16.msra.mxu2 %v3462_v6  ;;  %v2297_v24 = vunpack.c.2.s8 %v12289_v25  ;;  %v3521_v42 = vpack.c.bf16 %v3101_v43, %v3089_v57  ;;  %v2946_v1 = vcvt.s32.f32 %v2178_v48  ;;  %v2309_v16 = vunpack.c.3.s8 %v12289_v25 }
 0x33e   : > { %v3258_v13 = vpack.c.bf16 %v2574_v26, %v2562_v41  ;;  %v3354_v52 = vpack.c.bf16 %v2766_v17, %v2754_v29  ;;  %v2958_v12 = vcvt.s32.f32 %v2190_v33  ;;  %v3765_v54 = vadd.f32 %v12252_v38, %v3747_v10 }
 0x33f   : > { %v3065_v19 = vcvt.s32.f32 %v2297_v24  ;;  %4131 = vmatpush.bf16.msrb.mxu3 %v3521_v42  ;;  %v3077_v63 = vcvt.s32.f32 %v2309_v16  ;;  %v1770_v36 = vunpack.c.2.s8 %v1482_v37  ;;  %v1782_v51 = vunpack.c.3.s8 %v1482_v37  ;;  %v12322_v16 = vld [vmem:[%s11410_s3 + $0x4b8] sm:$0xff] }
 0x340   : > { %4147 = vmatpush.bf16.msra.mxu0 %v3258_v13  ;;  %v1962_v34 = vunpack.c.2.s8 %v1530_v56  ;;  %4165 = vmatpush.bf16.msra.mxu1 %v3354_v52  ;;  %v3450_v35 = vpack.c.bf16 %v2958_v12, %v2946_v1  ;;  %v12311_v31 = vadd.f32 %v12254_v45, %v3765_v54  ;;  %v1974_v6 = vunpack.c.3.s8 %v1530_v56 }
 0x341   : > { %v2154_v57 = vunpack.c.2.s8 %v12298_v18  ;;  %v3509_v9 = vpack.c.bf16 %v3077_v63, %v3065_v19  ;;  %v2538_v38 = vcvt.s32.f32 %v1770_v36  ;;  %v2550_v10 = vcvt.s32.f32 %v1782_v51  ;;  %v1470_v19 = vld [vmem:[%s11410_s3 + $0xa0] sm:$0xff] }
 0x342   : > { %14369 = vst [vmem:[#allocation54_spill] sm:$0xff] %v12311_v31  ;;  %v2730_v14 = vcvt.s32.f32 %v1962_v34  ;;  %v12316_v43 = vadd.f32 %v11981_v46, %v11979_v47  ;;  %4183 = vmatpush.bf16.msra.mxu2 %v3450_v35  ;;  %v2742_v41 = vcvt.s32.f32 %v1974_v6  ;;  %v2166_v26 = vunpack.c.3.s8 %v12298_v18  ;;  %v1518_v6 = vld [vmem:[%s11410_s3 + $0x220] sm:$0xff] }
 0x343   : > { %v2922_v48 = vcvt.s32.f32 %v2154_v57  ;;  %4132 = vmatpush.bf16.msrb.mxu3 %v3509_v9  ;;  %v3246_v45 = vpack.c.bf16 %v2550_v10, %v2538_v38  ;;  %v2273_v29 = vunpack.c.0.s8 %v12289_v25  ;;  %v2285_v17 = vunpack.c.1.s8 %v12289_v25  ;;  %v12329_v57 = vpop.f32.mrf.mxu2  ;;  %v12331_v9 = vpop.f32.mrf.mxu3 }
 0x344   : > { %v1746_v33 = vunpack.c.0.s8 %v1482_v37  ;;  %v3342_v24 = vpack.c.bf16 %v2742_v41, %v2730_v14  ;;  %v2934_v42 = vcvt.s32.f32 %v2166_v26  ;;  %v1758_v13 = vunpack.c.1.s8 %v1482_v37  ;;  %v1566_v41 = vld [vmem:[%s11410_s3 + $0x3a0] sm:$0xff]  ;;  %v12335_v26 = vpop.f32.mrf.mxu0 }
 0x345   : > { %v1938_v1 = vunpack.c.0.s8 %v1530_v56  ;;  %4148 = vmatpush.bf16.msra.mxu0 %v3246_v45  ;;  %v3041_v47 = vcvt.s32.f32 %v2273_v29  ;;  %v3053_v46 = vcvt.s32.f32 %v2285_v17  ;;  %v1950_v12 = vunpack.c.1.s8 %v1530_v56 }
 0x346   : > { %v2514_v52 = vcvt.s32.f32 %v1746_v33  ;;  %4166 = vmatpush.bf16.msra.mxu1 %v3342_v24  ;;  %v3438_v54 = vpack.c.bf16 %v2934_v42, %v2922_v48  ;;  %v2526_v63 = vcvt.s32.f32 %v1758_v13  ;;  %v2130_v25 = vunpack.c.0.s8 %v12298_v18  ;;  %v12337_v48 = vpop.f32.mrf.mxu1 }
 0x347   : > { %v2706_v36 = vcvt.s32.f32 %v1938_v1  ;;  %v3497_v51 = vpack.c.bf16 %v3053_v46, %v3041_v47  ;;  %v2718_v34 = vcvt.s32.f32 %v1950_v12  ;;  %v2142_v37 = vunpack.c.1.s8 %v12298_v18 }
 0x348   : > { %v2249_v35 = vunpack.c.2.s8 %v12322_v16  ;;  %4184 = vmatpush.bf16.msra.mxu2 %v3438_v54  ;;  %v3234_v56 = vpack.c.bf16 %v2526_v63, %v2514_v52  ;;  %v2898_v38 = vcvt.s32.f32 %v2130_v25  ;;  %v2261_v10 = vunpack.c.3.s8 %v12322_v16 }
 0x349   : > { %v1722_v14 = vunpack.c.2.s8 %v1470_v19  ;;  %4133 = vmatpush.bf16.msrb.mxu3 %v3497_v51  ;;  %v3330_v18 = vpack.c.bf16 %v2718_v34, %v2706_v36  ;;  %v2910_v45 = vcvt.s32.f32 %v2142_v37  ;;  %v1734_v17 = vunpack.c.3.s8 %v1470_v19 }
 0x34a   : > { %v3017_v29 = vcvt.s32.f32 %v2249_v35  ;;  %4087 = vmatmul.bf16.gmra.mxu0 %v11849_v2  ;;  %v3029_v33 = vcvt.s32.f32 %v2261_v10  ;;  %v1914_v42 = vunpack.c.2.s8 %v1518_v6  ;;  %v1926_v13 = vunpack.c.3.s8 %v1518_v6 }
 0x34b   : > { %4149 = vmatpush.bf16.msra.mxu0 %v3234_v56  ;;  %v2490_v24 = vcvt.s32.f32 %v1722_v14  ;;  %4105 = vmatmul.bf16.gmra.mxu1 %v11851_v61  ;;  %v3426_v1 = vpack.c.bf16 %v2910_v45, %v2898_v38  ;;  %v2502_v47 = vcvt.s32.f32 %v1734_v17  ;;  %v2106_v46 = vunpack.c.2.s8 %v1566_v41  ;;  %v12346_v14 = vld [vmem:[%s11410_s3 + $0x5e0] sm:$0xff] }
 0x34c   : > { %4167 = vmatpush.bf16.msra.mxu1 %v3330_v18  ;;  %v2118_v52 = vunpack.c.3.s8 %v1566_v41  ;;  %v3485_v12 = vpack.c.bf16 %v3029_v33, %v3017_v29  ;;  %v2682_v54 = vcvt.s32.f32 %v1914_v42  ;;  %v2694_v63 = vcvt.s32.f32 %v1926_v13  ;;  %4123 = vmatmul.bf16.gmra.mxu2 %v11853_v7  ;;  %v3802_v42 = vpop.f32.mrf.mxu0 }
 0x34d   : > { %v3814_v36 = vadd.f32 %v12281_v8, %v12279_v55  ;;  %4185 = vmatpush.bf16.msra.mxu2 %v3426_v1  ;;  %v3222_v25 = vpack.c.bf16 %v2502_v47, %v2490_v24  ;;  %v2874_v51 = vcvt.s32.f32 %v2106_v46  ;;  %v2225_v37 = vunpack.c.0.s8 %v12322_v16  ;;  %v1458_v46 = vld [vmem:[%s11410_s3 + $0x40] sm:$0xff] }
 0x34e   : > { %v2886_v34 = vcvt.s32.f32 %v2118_v52  ;;  %4134 = vmatpush.bf16.msrb.mxu3 %v3485_v12  ;;  %v3318_v35 = vpack.c.bf16 %v2694_v63, %v2682_v54  ;;  %v2237_v56 = vunpack.c.1.s8 %v12322_v16  ;;  %v1698_v38 = vunpack.c.0.s8 %v1470_v19  ;;  %v3820_v16 = vpop.f32.mrf.mxu1  ;;  %v1506_v63 = vld [vmem:[%s11410_s3 + $0x1c0] sm:$0xff] }
 0x34f   : > { %v1710_v10 = vunpack.c.1.s8 %v1470_v19  ;;  %4150 = vmatpush.bf16.msra.mxu0 %v3222_v25  ;;  %v2993_v55 = vcvt.s32.f32 %v2225_v37  ;;  %v1890_v8 = vunpack.c.0.s8 %v1518_v6  ;;  %v1902_v45 = vunpack.c.1.s8 %v1518_v6  ;;  %v12353_v25 = vpop.f32.mrf.mxu2 }
 0x350   : > { %v3414_v18 = vpack.c.bf16 %v2886_v34, %v2874_v51  ;;  %4168 = vmatpush.bf16.msra.mxu1 %v3318_v35  ;;  %v3005_v29 = vcvt.s32.f32 %v2237_v56  ;;  %v2466_v17 = vcvt.s32.f32 %v1698_v38  ;;  %v2082_v24 = vunpack.c.0.s8 %v1566_v41  ;;  %v12355_v51 = vpop.f32.mrf.mxu3  ;;  %v1554_v38 = vld [vmem:[%s11410_s3 + $0x340] sm:$0xff] }
 0x351   : > { %v2478_v33 = vcvt.s32.f32 %v1710_v10  ;;  %v2658_v19 = vcvt.s32.f32 %v1890_v8  ;;  %v2670_v13 = vcvt.s32.f32 %v1902_v45  ;;  %v2094_v1 = vunpack.c.1.s8 %v1566_v41 }
 0x352   : > { %4186 = vmatpush.bf16.msra.mxu2 %v3414_v18  ;;  %v2394_v47 = vunpack.c.2.s8 %v12346_v14  ;;  %v3473_v52 = vpack.c.bf16 %v3005_v29, %v2993_v55  ;;  %v2850_v54 = vcvt.s32.f32 %v2082_v24  ;;  %v2406_v6 = vunpack.c.3.s8 %v12346_v14 }
 0x353   : > { %v3210_v12 = vpack.c.bf16 %v2478_v33, %v2466_v17  ;;  %v3306_v34 = vpack.c.bf16 %v2670_v13, %v2658_v19  ;;  %v2862_v37 = vcvt.s32.f32 %v2094_v1  ;;  %v3832_v56 = vadd.f32 %v12301_v53, %v3814_v36 }
 0x354   : > { %v3162_v35 = vcvt.s32.f32 %v2394_v47  ;;  %v3618_v41 = vadd.f32 %v12002_v58, %v12316_v43  ;;  %4135 = vmatpush.bf16.msrb.mxu3 %v3473_v52  ;;  %v3174_v10 = vcvt.s32.f32 %v2406_v6  ;;  %v1674_v18 = vunpack.c.2.s8 %v1458_v46 }
 0x355   : > { %4151 = vmatpush.bf16.msra.mxu0 %v3210_v12  ;;  %v1686_v55 = vunpack.c.3.s8 %v1458_v46  ;;  %4169 = vmatpush.bf16.msra.mxu1 %v3306_v34  ;;  %v3402_v8 = vpack.c.bf16 %v2862_v37, %v2850_v54  ;;  %v12362_v45 = vadd.f32 %v12303_v62, %v3832_v56  ;;  %v1866_v29 = vunpack.c.2.s8 %v1506_v63 }
 0x356   : > { %v1878_v17 = vunpack.c.3.s8 %v1506_v63  ;;  %v3558_v33 = vpack.c.bf16 %v3174_v10, %v3162_v35  ;;  %v2442_v24 = vcvt.s32.f32 %v1674_v18  ;;  %v2058_v53 = vunpack.c.2.s8 %v1554_v38  ;;  %v1626_v35 = vld [vmem:[%s11410_s3 + $0x580] sm:$0xff] }
 0x357   : > { %14370 = vst [vmem:[#allocation55_spill] sm:$0xff] %v12362_v45  ;;  %v2454_v42 = vcvt.s32.f32 %v1686_v55  ;;  %4136 = vmatmul.bf16.vlgmr.msrb.gmra.mxu3 %v11872_v20  ;;  %4187 = vmatpush.bf16.msra.mxu2 %v3402_v8  ;;  %v2634_v58 = vcvt.s32.f32 %v1866_v29  ;;  %v2070_v36 = vunpack.c.3.s8 %v1554_v38  ;;  %v12366_v16 = vadd.f32 %v12004_v60, %v3618_v41  ;;  %v3838_v60 = vpop.f32.mrf.mxu2  ;;  %v1495_v8 = vld [vmem:[%s11410_s3 + $0x168] sm:$0xff] }
 0x358   : > { %v2646_v43 = vcvt.s32.f32 %v1878_v17  ;;  %4200 = vmatpush.bf16.msra.mxu3 %v3558_v33  ;;  %v2826_v62 = vcvt.s32.f32 %v2058_v53  ;;  %v2370_v13 = vunpack.c.0.s8 %v12346_v14  ;;  %v2382_v52 = vunpack.c.1.s8 %v12346_v14  ;;  %v3856_v56 = vpop.f32.mrf.mxu3 }
 0x359   : > { %v3198_v19 = vpack.c.bf16 %v2454_v42, %v2442_v24  ;;  %v2838_v47 = vcvt.s32.f32 %v2070_v36  ;;  %v1650_v12 = vunpack.c.0.s8 %v1458_v46  ;;  %v1662_v6 = vunpack.c.1.s8 %v1458_v46  ;;  %v12373_v24 = vld [vmem:[%s11410_s3 + $0x2e8] sm:$0xff] }
 0x35a   : > { %v3294_v1 = vpack.c.bf16 %v2646_v43, %v2634_v58  ;;  %v3138_v54 = vcvt.s32.f32 %v2370_v13  ;;  %v1842_v34 = vunpack.c.0.s8 %v1506_v63  ;;  %v1854_v37 = vunpack.c.1.s8 %v1506_v63  ;;  %v12376_v58 = vld [vmem:[%s11410_s3 + $0x468] sm:$0xff] }
 0x35b   : > { %4152 = vmatpush.bf16.msra.mxu0 %v3198_v19  ;;  %v3390_v41 = vpack.c.bf16 %v2838_v47, %v2826_v62  ;;  %v3150_v10 = vcvt.s32.f32 %v2382_v52  ;;  %v2418_v18 = vcvt.s32.f32 %v1650_v12  ;;  %v2034_v55 = vunpack.c.0.s8 %v1554_v38 }
 0x35c   : > { %4170 = vmatpush.bf16.msra.mxu1 %v3294_v1  ;;  %v2430_v29 = vcvt.s32.f32 %v1662_v6  ;;  %v2610_v17 = vcvt.s32.f32 %v1842_v34  ;;  %v2622_v14 = vcvt.s32.f32 %v1854_v37  ;;  %v2046_v33 = vunpack.c.1.s8 %v1554_v38 }
 0x35d   : > { %4188 = vmatpush.bf16.msra.mxu2 %v3390_v41  ;;  %v3546_v46 = vpack.c.bf16 %v3150_v10, %v3138_v54  ;;  %v2802_v42 = vcvt.s32.f32 %v2034_v55  ;;  %v2346_v63 = vunpack.c.2.s8 %v1626_v35  ;;  %v2358_v53 = vunpack.c.3.s8 %v1626_v35 }
 0x35e   : > { %v3186_v43 = vpack.c.bf16 %v2430_v29, %v2418_v18  ;;  %v3282_v36 = vpack.c.bf16 %v2622_v14, %v2610_v17  ;;  %v2814_v19 = vcvt.s32.f32 %v2046_v33  ;;  %v1819_v62 = vunpack.c.2.s8 %v1495_v8  ;;  %v12386_v33 = vpop.f32.mrf.mxu0 }
 0x35f   : > { %4201 = vmatpush.bf16.msra.mxu3 %v3546_v46  ;;  %v3114_v13 = vcvt.s32.f32 %v2346_v63  ;;  %v3126_v1 = vcvt.s32.f32 %v2358_v53  ;;  %v1831_v47 = vunpack.c.3.s8 %v1495_v8  ;;  %v2011_v52 = vunpack.c.2.s8 %v12373_v24  ;;  %v12388_v46 = vpop.f32.mrf.mxu1 }
 0x360   : > { %4153 = vmatpush.bf16.msra.mxu0 %v3186_v43  ;;  %4171 = vmatpush.bf16.msra.mxu1 %v3282_v36  ;;  %v3378_v38 = vpack.c.bf16 %v2814_v19, %v2802_v42  ;;  %v2587_v12 = vcvt.s32.f32 %v1819_v62  ;;  %v2023_v54 = vunpack.c.3.s8 %v12373_v24  ;;  %v2203_v6 = vunpack.c.2.s8 %v12376_v58  ;;  %v1614_v19 = vld [vmem:[%s11410_s3 + $0x520] sm:$0xff] }
 0x361   : > { %v3534_v34 = vpack.c.bf16 %v3126_v1, %v3114_v13  ;;  %v2599_v37 = vcvt.s32.f32 %v1831_v47  ;;  %v2779_v60 = vcvt.s32.f32 %v2011_v52  ;;  %v2215_v56 = vunpack.c.3.s8 %v12376_v58  ;;  %v12400_v62 = vld [vmem:[%s11413_s21] sm:$0xff] }
 0x362   : > { %4189 = vmatpush.bf16.msra.mxu2 %v3378_v38  ;;  %v2791_v41 = vcvt.s32.f32 %v2023_v54  ;;  %v2971_v10 = vcvt.s32.f32 %v2203_v6  ;;  %v12384_v18 = vadd.f32 %v12337_v48, %v12335_v26  ;;  %v2322_v17 = vunpack.c.0.s8 %v1626_v35  ;;  %v1483_v1 = vld [vmem:[%s11410_s3 + $0x108] sm:$0xff] }
 0x363   : > { %4202 = vmatpush.bf16.msra.mxu3 %v3534_v34  ;;  %v3271_v55 = vpack.c.bf16 %v2599_v37, %v2587_v12  ;;  %v2983_v29 = vcvt.s32.f32 %v2215_v56  ;;  %v2334_v14 = vunpack.c.1.s8 %v1626_v35  ;;  %4154 = vmatmul.bf16.vlgmr.msra.gmra.mxu0 %v11866_v22  ;;  %v12393_v42 = vmul.f32 %v12024_v4, %v12366_v16  ;;  %v1531_v54 = vld [vmem:[%s11410_s3 + $0x288] sm:$0xff] }
 0x364   : > { %v3367_v63 = vpack.c.bf16 %v2791_v41, %v2779_v60  ;;  %v1795_v26 = vunpack.c.0.s8 %v1495_v8  ;;  %v1807_v48 = vunpack.c.1.s8 %v1495_v8  ;;  %4172 = vmatmul.bf16.vlgmr.msra.gmra.mxu1 %v11868_v59  ;;  %v3090_v35 = vcvt.s32.f32 %v2322_v17 }
 0x365   : > { %4218 = vmatpush.bf16.msrb.mxu0 %v3271_v55  ;;  %v3463_v53 = vpack.c.bf16 %v2983_v29, %v2971_v10  ;;  %v3102_v43 = vcvt.s32.f32 %v2334_v14  ;;  %v1987_v36 = vunpack.c.0.s8 %v12373_v24  ;;  %4190 = vmatmul.bf16.vlgmr.msra.gmra.mxu2 %v11870_v23  ;;  %v12403_v4 = vperm.slane %v12400_v62, 2  ;;  %v1579_v55 = vld [vmem:[%s11410_s3 + $0x408] sm:$0xff] }
 0x366   : > { %4236 = vmatpush.bf16.msrb.mxu1 %v3367_v63  ;;  %v2563_v16 = vcvt.s32.f32 %v1795_v26  ;;  %v2575_v8 = vcvt.s32.f32 %v1807_v48  ;;  %v1999_v13 = vunpack.c.1.s8 %v12373_v24  ;;  %v2179_v38 = vunpack.c.0.s8 %v12376_v58 }
 0x367   : > { %14371 = vst [vmem:[#allocation56_spill] sm:$0xff] %v12403_v4  ;;  %4254 = vmatpush.bf16.msrb.mxu2 %v3463_v53  ;;  %v3522_v47 = vpack.c.bf16 %v3102_v43, %v3090_v35  ;;  %v2755_v52 = vcvt.s32.f32 %v1987_v36  ;;  %v2191_v12 = vunpack.c.1.s8 %v12376_v58  ;;  %4141 = vmatmul.bf16.gmra.mxu3 %v11855_v27  ;;  %v2298_v37 = vunpack.c.2.s8 %v1614_v19 }
 0x368   : > { %v3259_v6 = vpack.c.bf16 %v2575_v8, %v2563_v16  ;;  %v2767_v34 = vcvt.s32.f32 %v1999_v13  ;;  %v2310_v60 = vunpack.c.3.s8 %v1614_v19  ;;  %v2947_v56 = vcvt.s32.f32 %v2179_v38  ;;  %v12412_v8 = vpop.f32.mrf.mxu2  ;;  %v12414_v13 = vpop.f32.mrf.mxu3 }
 0x369   : > { %4203 = vmatpush.bf16.msra.mxu3 %v3522_v47  ;;  %v2959_v41 = vcvt.s32.f32 %v2191_v12  ;;  %v1771_v24 = vunpack.c.2.s8 %v1483_v1  ;;  %v1783_v10 = vunpack.c.3.s8 %v1483_v1  ;;  %v3066_v17 = vcvt.s32.f32 %v2298_v37 }
 0x36a   : > { %4219 = vmatpush.bf16.msrb.mxu0 %v3259_v6  ;;  %v3355_v29 = vpack.c.bf16 %v2767_v34, %v2755_v52  ;;  %v3078_v14 = vcvt.s32.f32 %v2310_v60  ;;  %v1963_v63 = vunpack.c.2.s8 %v1531_v54  ;;  %v1975_v53 = vunpack.c.3.s8 %v1531_v54  ;;  %v12418_v6 = vpop.f32.mrf.mxu0  ;;  %v12420_v34 = vpop.f32.mrf.mxu1 }
 0x36b   : > { %v3451_v26 = vpack.c.bf16 %v2959_v41, %v2947_v56  ;;  %v2539_v58 = vcvt.s32.f32 %v1771_v24  ;;  %v2551_v48 = vcvt.s32.f32 %v1783_v10  ;;  %v2155_v36 = vunpack.c.2.s8 %v1579_v55 }
 0x36c   : > { %4237 = vmatpush.bf16.msrb.mxu1 %v3355_v29  ;;  %v3510_v35 = vpack.c.bf16 %v3078_v14, %v3066_v17  ;;  %v2731_v43 = vcvt.s32.f32 %v1963_v63  ;;  %v2167_v16 = vunpack.c.3.s8 %v1579_v55  ;;  %v2743_v52 = vcvt.s32.f32 %v1975_v53  ;;  %v12426_v14 = vld [vmem:[%s11410_s3 + $0x4c0] sm:$0xff] }
 0x36d   : > { %4255 = vmatpush.bf16.msrb.mxu2 %v3451_v26  ;;  %v3247_v47 = vpack.c.bf16 %v2551_v48, %v2539_v58  ;;  %v3837_v38 = vadd.f32 %v12353_v25, %v12384_v18  ;;  %v2274_v12 = vunpack.c.0.s8 %v1614_v19  ;;  %v2923_v37 = vcvt.s32.f32 %v2155_v36 }
 0x36e   : > { %4204 = vmatpush.bf16.msra.mxu3 %v3510_v35  ;;  %v2935_v60 = vcvt.s32.f32 %v2167_v16  ;;  %v2286_v56 = vunpack.c.1.s8 %v1614_v19  ;;  %v1747_v41 = vunpack.c.0.s8 %v1483_v1  ;;  %v3343_v24 = vpack.c.bf16 %v2743_v52, %v2731_v43  ;;  %v1519_v16 = vld [vmem:[%s11410_s3 + $0x228] sm:$0xff] }
 0x36f   : > { %4220 = vmatpush.bf16.msrb.mxu0 %v3247_v47  ;;  %v12423_v10 = vadd.f32 %v12355_v51, %v3837_v38  ;;  %v3042_v29 = vcvt.s32.f32 %v2274_v12  ;;  %v1759_v17 = vunpack.c.1.s8 %v1483_v1  ;;  %v1939_v26 = vunpack.c.0.s8 %v1531_v54  ;;  %v1471_v51 = vld [vmem:[%s11410_s3 + $0xa8] sm:$0xff] }
 0x370   : > { %v3439_v25 = vpack.c.bf16 %v2935_v60, %v2923_v37  ;;  %v3054_v18 = vcvt.s32.f32 %v2286_v56  ;;  %v2515_v63 = vcvt.s32.f32 %v1747_v41  ;;  %v12430_v58 = vmul.f32 %v12403_v4, %v12261_v15  ;;  %4238 = vmatpush.bf16.msrb.mxu1 %v3343_v24  ;;  %v1567_v15 = vld [vmem:[%s11410_s3 + $0x3a8] sm:$0xff] }
 0x371   : > { %14372 = vst [vmem:[#allocation57_spill] sm:$0xff] %v12423_v10  ;;  %v2527_v19 = vcvt.s32.f32 %v1759_v17  ;;  %v1951_v48 = vunpack.c.1.s8 %v1531_v54  ;;  %v2131_v53 = vunpack.c.0.s8 %v1579_v55  ;;  %v2707_v1 = vcvt.s32.f32 %v1939_v26  ;;  %v12440_v26 = vpop.f32.mrf.mxu2 }
 0x372   : > { %4256 = vmatpush.bf16.msrb.mxu2 %v3439_v25  ;;  %v3498_v35 = vpack.c.bf16 %v3054_v18, %v3042_v29  ;;  %v2143_v43 = vunpack.c.1.s8 %v1579_v55  ;;  %v2250_v36 = vunpack.c.2.s8 %v12426_v14  ;;  %v2262_v12 = vunpack.c.3.s8 %v12426_v14 }
 0x373   : > { %v3235_v47 = vpack.c.bf16 %v2527_v19, %v2515_v63  ;;  %v2719_v52 = vcvt.s32.f32 %v1951_v48  ;;  %v2899_v38 = vcvt.s32.f32 %v2131_v53  ;;  %4159 = vmatmul.bf16.gmra.mxu0 %v11849_v2  ;;  %v1723_v60 = vunpack.c.2.s8 %v1471_v51  ;;  %v12442_v19 = vpop.f32.mrf.mxu3 }
 0x374   : > { %4205 = vmatpush.bf16.msra.mxu3 %v3498_v35  ;;  %v2911_v37 = vcvt.s32.f32 %v2143_v43  ;;  %v3018_v54 = vcvt.s32.f32 %v2250_v36  ;;  %v1735_v56 = vunpack.c.3.s8 %v1471_v51  ;;  %4177 = vmatmul.bf16.gmra.mxu1 %v11851_v61  ;;  %v3030_v41 = vcvt.s32.f32 %v2262_v12  ;;  %v12444_v36 = vpop.f32.mrf.mxu0 }
 0x375   : > { %4221 = vmatpush.bf16.msrb.mxu0 %v3235_v47  ;;  %v3331_v55 = vpack.c.bf16 %v2719_v52, %v2707_v1  ;;  %v1915_v24 = vunpack.c.2.s8 %v1519_v16  ;;  %v1927_v29 = vunpack.c.3.s8 %v1519_v16  ;;  %4195 = vmatmul.bf16.gmra.mxu2 %v11853_v7  ;;  %v2491_v25 = vcvt.s32.f32 %v1723_v60  ;;  %v12446_v1 = vpop.f32.mrf.mxu1 }
 0x376   : > { %v3427_v17 = vpack.c.bf16 %v2911_v37, %v2899_v38  ;;  %v2503_v18 = vcvt.s32.f32 %v1735_v56  ;;  %v2107_v63 = vunpack.c.2.s8 %v1567_v15  ;;  %v3486_v48 = vpack.c.bf16 %v3030_v41, %v3018_v54 }
 0x377   : > { %4239 = vmatpush.bf16.msrb.mxu1 %v3331_v55  ;;  %v2683_v53 = vcvt.s32.f32 %v1915_v24  ;;  %v2695_v35 = vcvt.s32.f32 %v1927_v29  ;;  %v2119_v43 = vunpack.c.3.s8 %v1567_v15  ;;  %v3886_v38 = vadd.f32 %v12388_v46, %v12386_v33 }
 0x378   : > { %4257 = vmatpush.bf16.msrb.mxu2 %v3427_v17  ;;  %v3223_v47 = vpack.c.bf16 %v2503_v18, %v2491_v25  ;;  %v2875_v52 = vcvt.s32.f32 %v2107_v63  ;;  %v2226_v12 = vunpack.c.0.s8 %v12426_v14  ;;  %4206 = vmatpush.bf16.msra.mxu3 %v3486_v48  ;;  %v2238_v60 = vunpack.c.1.s8 %v12426_v14  ;;  %v12453_v17 = vld [vmem:[%s11410_s3 + $0x48] sm:$0xff] }
 0x379   : > { %v3319_v37 = vpack.c.bf16 %v2695_v35, %v2683_v53  ;;  %v2887_v54 = vcvt.s32.f32 %v2119_v43  ;;  %v1699_v56 = vunpack.c.0.s8 %v1471_v51  ;;  %v1711_v41 = vunpack.c.1.s8 %v1471_v51  ;;  %v12456_v63 = vld [vmem:[%s11410_s3 + $0x1c8] sm:$0xff] }
 0x37a   : > { %4222 = vmatpush.bf16.msrb.mxu0 %v3223_v47  ;;  %v2994_v55 = vcvt.s32.f32 %v2226_v12  ;;  %v1891_v24 = vunpack.c.0.s8 %v1519_v16  ;;  %v1903_v29 = vunpack.c.1.s8 %v1519_v16  ;;  %v3006_v46 = vcvt.s32.f32 %v2238_v60  ;;  %v12459_v43 = vld [vmem:[%s11410_s3 + $0x348] sm:$0xff] }
 0x37b   : > { %4240 = vmatpush.bf16.msrb.mxu1 %v3319_v37  ;;  %v3415_v33 = vpack.c.bf16 %v2887_v54, %v2875_v52  ;;  %v2467_v25 = vcvt.s32.f32 %v1699_v56  ;;  %v2083_v18 = vunpack.c.0.s8 %v1567_v15  ;;  %v2479_v48 = vcvt.s32.f32 %v1711_v41  ;;  %v12464_v37 = vld [vmem:[%s11410_s3 + $0x5e8] sm:$0xff] }
 0x37c   : > { %v2659_v53 = vcvt.s32.f32 %v1891_v24  ;;  %v2671_v14 = vcvt.s32.f32 %v1903_v29  ;;  %v2095_v35 = vunpack.c.1.s8 %v1567_v15  ;;  %v3474_v51 = vpack.c.bf16 %v3006_v46, %v2994_v55  ;;  %v3874_v55 = vpop.f32.mrf.mxu0 }
 0x37d   : > { %4258 = vmatpush.bf16.msrb.mxu2 %v3415_v33  ;;  %v2851_v47 = vcvt.s32.f32 %v2083_v18  ;;  %v1675_v16 = vunpack.c.2.s8 %v12453_v17  ;;  %v1687_v12 = vunpack.c.3.s8 %v12453_v17  ;;  %v3211_v52 = vpack.c.bf16 %v2479_v48, %v2467_v25  ;;  %v3892_v33 = vpop.f32.mrf.mxu1 }
 0x37e   : > { %v3307_v54 = vpack.c.bf16 %v2671_v14, %v2659_v53  ;;  %v2863_v60 = vcvt.s32.f32 %v2095_v35  ;;  %v1867_v56 = vunpack.c.2.s8 %v12456_v63  ;;  %4207 = vmatpush.bf16.msra.mxu3 %v3474_v51  ;;  %v1879_v15 = vunpack.c.3.s8 %v12456_v63  ;;  %v12472_v51 = vpop.f32.mrf.mxu2 }
 0x37f   : > { %v2443_v41 = vcvt.s32.f32 %v1675_v16  ;;  %v2455_v24 = vcvt.s32.f32 %v1687_v12  ;;  %v2059_v29 = vunpack.c.2.s8 %v12459_v43  ;;  %4223 = vmatpush.bf16.msrb.mxu0 %v3211_v52  ;;  %v2071_v44 = vunpack.c.3.s8 %v12459_v43  ;;  %v12474_v16 = vpop.f32.mrf.mxu3 }
 0x380   : > { %4241 = vmatpush.bf16.msrb.mxu1 %v3307_v54  ;;  %v3403_v46 = vpack.c.bf16 %v2863_v60, %v2851_v47  ;;  %v2635_v18 = vcvt.s32.f32 %v1867_v56  ;;  %v2395_v25 = vunpack.c.2.s8 %v12464_v37  ;;  %v2647_v53 = vcvt.s32.f32 %v1879_v15 }
 0x381   : > { %v3199_v48 = vpack.c.bf16 %v2455_v24, %v2443_v41  ;;  %v2827_v14 = vcvt.s32.f32 %v2059_v29  ;;  %v2407_v35 = vunpack.c.3.s8 %v12464_v37  ;;  %4208 = vmatmul.bf16.vlgmr.msra.gmra.mxu3 %v11872_v20  ;;  %v2839_v12 = vcvt.s32.f32 %v2071_v44 }
 0x382   : > { %4259 = vmatpush.bf16.msrb.mxu2 %v3403_v46  ;;  %v3163_v52 = vcvt.s32.f32 %v2395_v25  ;;  %v3904_v47 = vadd.f32 %v12412_v8, %v3886_v38  ;;  %v12479_v54 = vperm.slane %v12400_v62, 4  ;;  %v3295_v60 = vpack.c.bf16 %v2647_v53, %v2635_v18 }
 0x383   : > { %v3175_v56 = vcvt.s32.f32 %v2407_v35  ;;  %v12483_v41 = vadd.f32 %v12420_v34, %v12418_v6  ;;  %v1651_v24 = vunpack.c.0.s8 %v12453_v17  ;;  %4224 = vmatpush.bf16.msrb.mxu0 %v3199_v48  ;;  %v3391_v15 = vpack.c.bf16 %v2839_v12, %v2827_v14  ;;  %v1496_v6 = vld [vmem:[%s11410_s3 + $0x170] sm:$0xff] }
 0x384   : > { %v3922_v44 = vadd.f32 %v12414_v13, %v3904_v47  ;;  %v1663_v29 = vunpack.c.1.s8 %v12453_v17  ;;  %v1843_v8 = vunpack.c.0.s8 %v12456_v63  ;;  %4242 = vmatpush.bf16.msrb.mxu1 %v3295_v60  ;;  %v1855_v33 = vunpack.c.1.s8 %v12456_v63  ;;  %v1544_v17 = vld [vmem:[%s11410_s3 + $0x2f0] sm:$0xff] }
 0x385   : > { %v3559_v38 = vpack.c.bf16 %v3175_v56, %v3163_v52  ;;  %v2419_v55 = vcvt.s32.f32 %v1651_v24  ;;  %v2035_v46 = vunpack.c.0.s8 %v12459_v43  ;;  %v2047_v13 = vunpack.c.1.s8 %v12459_v43  ;;  %v1592_v60 = vld [vmem:[%s11410_s3 + $0x470] sm:$0xff] }
 0x386   : > { %4260 = vmatpush.bf16.msrb.mxu2 %v3391_v15  ;;  %v12493_v34 = vmul.f32 %v12479_v54, %v3922_v44  ;;  %v2431_v18 = vcvt.s32.f32 %v1663_v29  ;;  %v2611_v25 = vcvt.s32.f32 %v1843_v8  ;;  %v2623_v48 = vcvt.s32.f32 %v1855_v33  ;;  %v12501_v29 = vld [vmem:[%s11410_s3 + $0x588] sm:$0xff]  ;;  %v3910_v43 = vpop.f32.mrf.mxu2 }
 0x387   : > { %4272 = vmatpush.bf16.msrb.mxu3 %v3559_v38  ;;  %v2803_v53 = vcvt.s32.f32 %v2035_v46  ;;  %v2371_v14 = vunpack.c.0.s8 %v12464_v37  ;;  %v2383_v63 = vunpack.c.1.s8 %v12464_v37  ;;  %v2815_v12 = vcvt.s32.f32 %v2047_v13  ;;  %v3928_v8 = vpop.f32.mrf.mxu3 }
 0x388   : > { %v3187_v35 = vpack.c.bf16 %v2431_v18, %v2419_v55  ;;  %v1820_v52 = vunpack.c.2.s8 %v1496_v6  ;;  %v1832_v47 = vunpack.c.3.s8 %v1496_v6  ;;  %v3283_v56 = vpack.c.bf16 %v2623_v48, %v2611_v25 }
 0x389   : > { %v3139_v24 = vcvt.s32.f32 %v2371_v14  ;;  %v3151_v15 = vcvt.s32.f32 %v2383_v63  ;;  %v2012_v44 = vunpack.c.2.s8 %v1544_v17  ;;  %v3379_v38 = vpack.c.bf16 %v2815_v12, %v2803_v53 }
 0x38a   : > { %4225 = vmatpush.bf16.msrb.mxu0 %v3187_v35  ;;  %v2588_v33 = vcvt.s32.f32 %v1820_v52  ;;  %v2600_v46 = vcvt.s32.f32 %v1832_v47  ;;  %v2024_v40 = vunpack.c.3.s8 %v1544_v17  ;;  %4243 = vmatpush.bf16.msrb.mxu1 %v3283_v56  ;;  %v2204_v18 = vunpack.c.2.s8 %v1592_v60 }
 0x38b   : > { %v3547_v37 = vpack.c.bf16 %v3151_v15, %v3139_v24  ;;  %v2780_v55 = vcvt.s32.f32 %v2012_v44  ;;  %v2216_v13 = vunpack.c.3.s8 %v1592_v60  ;;  %4261 = vmatpush.bf16.msrb.mxu2 %v3379_v38  ;;  %v2347_v48 = vunpack.c.2.s8 %v12501_v29 }
 0x38c   : > { %v3272_v28 = vpack.c.bf16 %v2600_v46, %v2588_v33  ;;  %v2792_v25 = vcvt.s32.f32 %v2024_v40  ;;  %v2359_v14 = vunpack.c.3.s8 %v12501_v29  ;;  %v2972_v63 = vcvt.s32.f32 %v2204_v18 }
 0x38d   : > { %4273 = vmatpush.bf16.msrb.mxu3 %v3547_v37  ;;  %v2984_v43 = vcvt.s32.f32 %v2216_v13  ;;  %v1796_v35 = vunpack.c.0.s8 %v1496_v6  ;;  %v1808_v53 = vunpack.c.1.s8 %v1496_v6  ;;  %4226 = vmatmul.bf16.vlgmr.msrb.gmra.mxu0 %v11866_v22  ;;  %v3115_v52 = vcvt.s32.f32 %v2347_v48 }
 0x38e   : > { %4290 = vmatpush.bf16.msra.mxu0 %v3272_v28  ;;  %v3368_v12 = vpack.c.bf16 %v2792_v25, %v2780_v55  ;;  %v3127_v47 = vcvt.s32.f32 %v2359_v14  ;;  %v1988_v56 = vunpack.c.0.s8 %v1544_v17  ;;  %4244 = vmatmul.bf16.vlgmr.msrb.gmra.mxu1 %v11868_v59  ;;  %v2000_v44 = vunpack.c.1.s8 %v1544_v17  ;;  %v12511_v55 = vld [vmem:[%s11420_s20] sm:$0xff]  ;;  %v1532_v17 = vld [vmem:[%s11410_s3 + $0x290] sm:$0xff] }
 0x38f   : > { %v3464_v40 = vpack.c.bf16 %v2984_v43, %v2972_v63  ;;  %v2564_v24 = vcvt.s32.f32 %v1796_v35  ;;  %v2576_v15 = vcvt.s32.f32 %v1808_v53  ;;  %4262 = vmatmul.bf16.vlgmr.msrb.gmra.mxu2 %v11870_v23  ;;  %v2180_v38 = vunpack.c.0.s8 %v1592_v60  ;;  %v1580_v14 = vld [vmem:[%s11410_s3 + $0x410] sm:$0xff]  ;;  %v12529_v53 = vpop.f32.mrf.mxu0 }
 0x390   : > { %4308 = vmatpush.bf16.msra.mxu1 %v3368_v12  ;;  %v3535_v8 = vpack.c.bf16 %v3127_v47, %v3115_v52  ;;  %v2756_v6 = vcvt.s32.f32 %v1988_v56  ;;  %v2192_v28 = vunpack.c.1.s8 %v1592_v60  ;;  %v2768_v46 = vcvt.s32.f32 %v2000_v44  ;;  %v1484_v35 = vld [vmem:[%s11410_s3 + $0x110] sm:$0xff]  ;;  %v12534_v56 = vld [vmem:[%s11410_s3 + $0x528] sm:$0xff] }
 0x391   : > { %4326 = vmatpush.bf16.msra.mxu2 %v3464_v40  ;;  %v3260_v33 = vpack.c.bf16 %v2576_v15, %v2564_v24  ;;  %v3906_v37 = vadd.f32 %v12440_v26, %v12483_v41  ;;  %v12514_v18 = vperm.slane %v12511_v55, 4  ;;  %v2948_v13 = vcvt.s32.f32 %v2180_v38  ;;  %4213 = vmatmul.bf16.gmra.mxu3 %v11855_v27 }
 0x392   : > { %4274 = vmatpush.bf16.msrb.mxu3 %v3535_v8  ;;  %v2960_v25 = vcvt.s32.f32 %v2192_v28  ;;  %v3891_v48 = vadd.f32 %v12446_v1, %v12444_v36  ;;  %v2323_v60 = vunpack.c.0.s8 %v12501_v29  ;;  %v3356_v63 = vpack.c.bf16 %v2768_v46, %v2756_v6  ;;  %v12531_v36 = vpop.f32.mrf.mxu1 }
 0x393   : > { %4291 = vmatpush.bf16.msra.mxu0 %v3260_v33  ;;  %v3924_v26 = vadd.f32 %v12442_v19, %v3906_v37  ;;  %v12524_v41 = vadd.f32 %v12514_v18, %v12493_v34  ;;  %v2335_v43 = vunpack.c.1.s8 %v12501_v29  ;;  %v1964_v52 = vunpack.c.2.s8 %v1532_v17 }
 0x394   : > { %v3452_v1 = vpack.c.bf16 %v2960_v25, %v2948_v13  ;;  %v3091_v12 = vcvt.s32.f32 %v2323_v60  ;;  %v1976_v47 = vunpack.c.3.s8 %v1532_v17  ;;  %4309 = vmatpush.bf16.msra.mxu1 %v3356_v63  ;;  %v2156_v29 = vunpack.c.2.s8 %v1580_v14 }
 0x395   : > { %v4478_v19 = vmul.f32 %v12479_v54, %v3924_v26  ;;  %4601 = vrot.lane.b32.xlu0 %v12524_v41, %s10934_s9  ;;  %v3103_v34 = vcvt.s32.f32 %v2335_v43  ;;  %v2168_v40 = vunpack.c.3.s8 %v1580_v14  ;;  %v2732_v24 = vcvt.s32.f32 %v1964_v52 }
 0x396   : > { %4327 = vmatpush.bf16.msra.mxu2 %v3452_v1  ;;  %v2744_v15 = vcvt.s32.f32 %v1976_v47  ;;  %v1772_v44 = vunpack.c.2.s8 %v1484_v35  ;;  %v1784_v8 = vunpack.c.3.s8 %v1484_v35  ;;  %v2924_v38 = vcvt.s32.f32 %v2156_v29  ;;  %v12543_v29 = vpop.f32.mrf.mxu3 }
 0x397   : > { %v3523_v6 = vpack.c.bf16 %v3103_v34, %v3091_v12  ;;  %v2936_v28 = vcvt.s32.f32 %v2168_v40  ;;  %v2299_v33 = vunpack.c.2.s8 %v12534_v56  ;;  %v2311_v25 = vunpack.c.3.s8 %v12534_v56  ;;  %v12541_v34 = vpop.f32.mrf.mxu2 }
 0x398   : > { %v3344_v46 = vpack.c.bf16 %v2744_v15, %v2732_v24  ;;  %v2540_v37 = vcvt.s32.f32 %v1772_v44  ;;  %v2552_v13 = vcvt.s32.f32 %v1784_v8  ;;  %v1748_v26 = vunpack.c.0.s8 %v1484_v35 }
 0x399   : > { %4275 = vmatpush.bf16.msrb.mxu3 %v3523_v6  ;;  %v3440_v60 = vpack.c.bf16 %v2936_v28, %v2924_v38  ;;  %v3067_v63 = vcvt.s32.f32 %v2299_v33  ;;  %v1760_v43 = vunpack.c.1.s8 %v1484_v35  ;;  %v3079_v52 = vcvt.s32.f32 %v2311_v25  ;;  %v1472_v28 = vld [vmem:[%s11410_s3 + $0xb0] sm:$0xff]  ;;  %v12551_v25 = vpop.f32.mrf.mxu0 }
 0x39a   : > { %4310 = vmatpush.bf16.msra.mxu1 %v3344_v46  ;;  %v3248_v1 = vpack.c.bf16 %v2552_v13, %v2540_v37  ;;  %v1940_v12 = vunpack.c.0.s8 %v1532_v17  ;;  %v1952_v47 = vunpack.c.1.s8 %v1532_v17  ;;  %v2516_v40 = vcvt.s32.f32 %v1748_v26  ;;  %v1520_v33 = vld [vmem:[%s11410_s3 + $0x230] sm:$0xff] }
 0x39b   : > { %4328 = vmatpush.bf16.msra.mxu2 %v3440_v60  ;;  %v2528_v24 = vcvt.s32.f32 %v1760_v43  ;;  %v2132_v15 = vunpack.c.0.s8 %v1580_v14  ;;  %v2144_v44 = vunpack.c.1.s8 %v1580_v14  ;;  %v3511_v8 = vpack.c.bf16 %v3079_v52, %v3067_v63  ;;  %v12553_v60 = vpop.f32.mrf.mxu1  ;;  %v1568_v26 = vld [vmem:[%s11410_s3 + $0x3b0] sm:$0xff] }
 0x39c   : > { %4292 = vmatpush.bf16.msra.mxu0 %v3248_v1  ;;  %v2708_v6 = vcvt.s32.f32 %v1940_v12  ;;  %v2720_v35 = vcvt.s32.f32 %v1952_v47  ;;  %v3909_v38 = vadd.f32 %v12472_v51, %v3891_v48  ;;  %v12549_v13 = vadd.f32 %v12514_v18, %v4478_v19  ;;  %v12564_v12 = vld [vmem:[%s11410_s3 + $0x4c8] sm:$0xff] }
 0x39d   : > { %v3236_v46 = vpack.c.bf16 %v2528_v24, %v2516_v40  ;;  %v2900_v17 = vcvt.s32.f32 %v2132_v15  ;;  %v2912_v37 = vcvt.s32.f32 %v2144_v44  ;;  %4231 = vmatmul.bf16.gmra.mxu0 %v11849_v2  ;;  %4276 = vmatpush.bf16.msrb.mxu3 %v3511_v8  ;;  %v2275_v51 = vunpack.c.0.s8 %v12534_v56 }
 0x39e   : > { %v3332_v14 = vpack.c.bf16 %v2720_v35, %v2708_v6  ;;  %v3927_v63 = vadd.f32 %v12474_v16, %v3909_v38  ;;  %v2287_v48 = vunpack.c.1.s8 %v12534_v56  ;;  %4249 = vmatmul.bf16.gmra.mxu1 %v11851_v61  ;;  %4603 = vrot.lane.b32.xlu0 %v12549_v13, %s10934_s9  ;;  %v1724_v43 = vunpack.c.2.s8 %v1472_v28 }
 0x39f   : > { %v3428_v19 = vpack.c.bf16 %v2912_v37, %v2900_v17  ;;  %v1736_v1 = vunpack.c.3.s8 %v1472_v28  ;;  %v1916_v52 = vunpack.c.2.s8 %v1520_v33  ;;  %4267 = vmatmul.bf16.gmra.mxu2 %v11853_v7  ;;  %v3043_v47 = vcvt.s32.f32 %v2275_v51 }
 0x3a0   : > { %4293 = vmatpush.bf16.msra.mxu0 %v3236_v46  ;;  %4311 = vmatpush.bf16.msra.mxu1 %v3332_v14  ;;  %v4490_v16 = vmul.f32 %v12479_v54, %v3927_v63  ;;  %v3055_v56 = vcvt.s32.f32 %v2287_v48  ;;  %v1928_v40 = vunpack.c.3.s8 %v1520_v33  ;;  %v2492_v24 = vcvt.s32.f32 %v1724_v43  ;;  %v12572_v43 = vpop.f32.mrf.mxu3 }
 0x3a1   : > { %4329 = vmatpush.bf16.msra.mxu2 %v3428_v19  ;;  %v2504_v15 = vcvt.s32.f32 %v1736_v1  ;;  %v2684_v44 = vcvt.s32.f32 %v1916_v52  ;;  %v2108_v8 = vunpack.c.2.s8 %v1568_v26  ;;  %v2120_v38 = vunpack.c.3.s8 %v1568_v26  ;;  %v12570_v19 = vpop.f32.mrf.mxu2  ;;  %v12579_v45 = vpop.f32.mrf.mxu0 }
 0x3a2   : > { %v3499_v6 = vpack.c.bf16 %v3055_v56, %v3043_v47  ;;  %v2696_v35 = vcvt.s32.f32 %v1928_v40  ;;  %v2251_v17 = vunpack.c.2.s8 %v12564_v12  ;;  %v2263_v46 = vunpack.c.3.s8 %v12564_v12 }
 0x3a3   : > { %v3224_v37 = vpack.c.bf16 %v2504_v15, %v2492_v24  ;;  %v2876_v10 = vcvt.s32.f32 %v2108_v8  ;;  %v1700_v14 = vunpack.c.0.s8 %v1472_v28  ;;  %v2888_v63 = vcvt.s32.f32 %v2120_v38  ;;  %v1460_v8 = vld [vmem:[%s11410_s3 + $0x50] sm:$0xff] }
 0x3a4   : > { %4277 = vmatpush.bf16.msrb.mxu3 %v3499_v6  ;;  %v3320_v54 = vpack.c.bf16 %v2696_v35, %v2684_v44  ;;  %v3019_v51 = vcvt.s32.f32 %v2251_v17  ;;  %v1712_v48 = vunpack.c.1.s8 %v1472_v28  ;;  %v3031_v1 = vcvt.s32.f32 %v2263_v46  ;;  %v1508_v17 = vld [vmem:[%s11410_s3 + $0x1d0] sm:$0xff] }
 0x3a5   : > { %4294 = vmatpush.bf16.msra.mxu0 %v3224_v37  ;;  %v2468_v52 = vcvt.s32.f32 %v1700_v14  ;;  %v1892_v47 = vunpack.c.0.s8 %v1520_v33  ;;  %v1904_v56 = vunpack.c.1.s8 %v1520_v33  ;;  %v3416_v40 = vpack.c.bf16 %v2888_v63, %v2876_v10  ;;  %v12581_v37 = vpop.f32.mrf.mxu1  ;;  %v1556_v14 = vld [vmem:[%s11410_s3 + $0x350] sm:$0xff] }
 0x3a6   : > { %4312 = vmatpush.bf16.msra.mxu1 %v3320_v54  ;;  %v2480_v24 = vcvt.s32.f32 %v1712_v48  ;;  %v2084_v15 = vunpack.c.0.s8 %v1568_v26  ;;  %v2096_v44 = vunpack.c.1.s8 %v1568_v26  ;;  %v3487_v6 = vpack.c.bf16 %v3031_v1, %v3019_v51 }
 0x3a7   : > { %v2660_v35 = vcvt.s32.f32 %v1892_v47  ;;  %v2672_v28 = vcvt.s32.f32 %v1904_v56  ;;  %v12576_v38 = vadd.f32 %v12514_v18, %v4490_v16  ;;  %4330 = vmatpush.bf16.msra.mxu2 %v3416_v40  ;;  %v3958_v26 = vadd.f32 %v12531_v36, %v12529_v53  ;;  %v12591_v47 = vld [vmem:[%s11410_s3 + $0x5f0] sm:$0xff] }
 0x3a8   : > { %v3212_v33 = vpack.c.bf16 %v2480_v24, %v2468_v52  ;;  %v2852_v10 = vcvt.s32.f32 %v2084_v15  ;;  %v2864_v46 = vcvt.s32.f32 %v2096_v44  ;;  %4278 = vmatpush.bf16.msrb.mxu3 %v3487_v6  ;;  %v2227_v18 = vunpack.c.0.s8 %v12564_v12 }
 0x3a9   : > { %v3308_v54 = vpack.c.bf16 %v2672_v28, %v2660_v35  ;;  %4605 = vrot.lane.b32.xlu2 %v12576_v38, %s10934_s9  ;;  %v2239_v16 = vunpack.c.1.s8 %v12564_v12  ;;  %v1676_v63 = vunpack.c.2.s8 %v1460_v8  ;;  %v1688_v48 = vunpack.c.3.s8 %v1460_v8 }
 0x3aa   : > { %4295 = vmatpush.bf16.msra.mxu0 %v3212_v33  ;;  %v3404_v51 = vpack.c.bf16 %v2864_v46, %v2852_v10  ;;  %v1868_v1 = vunpack.c.2.s8 %v1508_v17  ;;  %v1880_v52 = vunpack.c.3.s8 %v1508_v17  ;;  %v2995_v53 = vcvt.s32.f32 %v2227_v18  ;;  %v12597_v18 = vpop.f32.mrf.mxu3 }
 0x3ab   : > { %4313 = vmatpush.bf16.msra.mxu1 %v3308_v54  ;;  %v3007_v36 = vcvt.s32.f32 %v2239_v16  ;;  %v2444_v56 = vcvt.s32.f32 %v1676_v63  ;;  %v2060_v40 = vunpack.c.2.s8 %v1556_v14  ;;  %v2456_v24 = vcvt.s32.f32 %v1688_v48  ;;  %v12595_v54 = vpop.f32.mrf.mxu2 }
 0x3ac   : > { %4331 = vmatpush.bf16.msra.mxu2 %v3404_v51  ;;  %v2636_v15 = vcvt.s32.f32 %v1868_v1  ;;  %v2648_v44 = vcvt.s32.f32 %v1880_v52  ;;  %v2072_v6 = vunpack.c.3.s8 %v1556_v14  ;;  %v2396_v28 = vunpack.c.2.s8 %v12591_v47  ;;  %v3946_v1 = vpop.f32.mrf.mxu0 }
 0x3ad   : > { %v3475_v35 = vpack.c.bf16 %v3007_v36, %v2995_v53  ;;  %v2828_v12 = vcvt.s32.f32 %v2060_v40  ;;  %v2408_v33 = vunpack.c.3.s8 %v12591_v47  ;;  %v3200_v10 = vpack.c.bf16 %v2456_v24, %v2444_v56  ;;  %v3964_v52 = vpop.f32.mrf.mxu1  ;;  %v1497_v24 = vld [vmem:[%s11410_s3 + $0x178] sm:$0xff] }
 0x3ae   : > { %v3296_v46 = vpack.c.bf16 %v2648_v44, %v2636_v15  ;;  %v2840_v49 = vcvt.s32.f32 %v2072_v6  ;;  %v1652_v4 = vunpack.c.0.s8 %v1460_v8  ;;  %v3164_v16 = vcvt.s32.f32 %v2396_v28 }
 0x3af   : > { %4279 = vmatpush.bf16.msrb.mxu3 %v3475_v35  ;;  %v3176_v63 = vcvt.s32.f32 %v2408_v33  ;;  %v1664_v51 = vunpack.c.1.s8 %v1460_v8  ;;  %v1844_v48 = vunpack.c.0.s8 %v1508_v17  ;;  %4296 = vmatpush.bf16.msra.mxu0 %v3200_v10  ;;  %v1856_v56 = vunpack.c.1.s8 %v1508_v17  ;;  %v1545_v35 = vld [vmem:[%s11410_s3 + $0x2f8] sm:$0xff] }
 0x3b0   : > { %4314 = vmatpush.bf16.msra.mxu1 %v3296_v46  ;;  %v3392_v53 = vpack.c.bf16 %v2840_v49, %v2828_v12  ;;  %v2420_v36 = vcvt.s32.f32 %v1652_v4  ;;  %v2036_v40 = vunpack.c.0.s8 %v1556_v14  ;;  %v2048_v31 = vunpack.c.1.s8 %v1556_v14  ;;  %v1593_v49 = vld [vmem:[%s11410_s3 + $0x478] sm:$0xff] }
 0x3b1   : > { %v3560_v15 = vpack.c.bf16 %v3176_v63, %v3164_v16  ;;  %v2432_v44 = vcvt.s32.f32 %v1664_v51  ;;  %v2612_v6 = vcvt.s32.f32 %v1844_v48  ;;  %v2624_v8 = vcvt.s32.f32 %v1856_v56 }
 0x3b2   : > { %4332 = vmatpush.bf16.msra.mxu2 %v3392_v53  ;;  %4280 = vmatmul.bf16.vlgmr.msrb.gmra.mxu3 %v11872_v20  ;;  %v2804_v28 = vcvt.s32.f32 %v2036_v40  ;;  %v3976_v33 = vadd.f32 %v12541_v34, %v3958_v26  ;;  %v12604_v10 = vperm.slane %v12400_v62, 5  ;;  %v2816_v17 = vcvt.s32.f32 %v2048_v31  ;;  %v4000_v56 = vpop.f32.mrf.mxu3 }
 0x3b3   : > { %4344 = vmatpush.bf16.msra.mxu3 %v3560_v15  ;;  %v3188_v4 = vpack.c.bf16 %v2432_v44, %v2420_v36  ;;  %v1821_v12 = vunpack.c.2.s8 %v1497_v24  ;;  %v1833_v46 = vunpack.c.3.s8 %v1497_v24  ;;  %v3284_v16 = vpack.c.bf16 %v2624_v8, %v2612_v6  ;;  %v3982_v31 = vpop.f32.mrf.mxu2 }
 0x3b4   : > { %v3994_v14 = vadd.f32 %v12543_v29, %v3976_v33  ;;  %v2013_v63 = vunpack.c.2.s8 %v1545_v35  ;;  %v2025_v51 = vunpack.c.3.s8 %v1545_v35  ;;  %v3380_v48 = vpack.c.bf16 %v2816_v17, %v2804_v28 }
 0x3b5   : > { %4297 = vmatpush.bf16.msra.mxu0 %v3188_v4  ;;  %v2589_v1 = vcvt.s32.f32 %v1821_v12  ;;  %v2601_v52 = vcvt.s32.f32 %v1833_v46  ;;  %v2205_v53 = vunpack.c.2.s8 %v1593_v49  ;;  %4315 = vmatpush.bf16.msra.mxu1 %v3284_v16  ;;  %v2217_v36 = vunpack.c.3.s8 %v1593_v49  ;;  %v12617_v16 = vld [vmem:[%s11410_s3 + $0x590] sm:$0xff] }
 0x3b6   : > { %v12609_v62 = vmul.f32 %v12604_v10, %v3994_v14  ;;  %v2781_v34 = vcvt.s32.f32 %v2013_v63  ;;  %v2793_v26 = vcvt.s32.f32 %v2025_v51  ;;  %4333 = vmatpush.bf16.msra.mxu2 %v3380_v48  ;;  %v3960_v15 = vadd.f32 %v12553_v60, %v12551_v25 }
 0x3b7   : > { %v3273_v40 = vpack.c.bf16 %v2601_v52, %v2589_v1  ;;  %v2973_v29 = vcvt.s32.f32 %v2205_v53  ;;  %v2372_v44 = vunpack.c.0.s8 %v12591_v47  ;;  %v2985_v8 = vcvt.s32.f32 %v2217_v36 }
 0x3b8   : > { %v3369_v6 = vpack.c.bf16 %v2793_v26, %v2781_v34  ;;  %v2384_v28 = vunpack.c.1.s8 %v12591_v47  ;;  %v1797_v33 = vunpack.c.0.s8 %v1497_v24  ;;  %4298 = vmatmul.bf16.vlgmr.msra.gmra.mxu0 %v11866_v22  ;;  %v1809_v17 = vunpack.c.1.s8 %v1497_v24  ;;  %4316 = vmatmul.bf16.vlgmr.msra.gmra.mxu1 %v11868_v59  ;;  %v1485_v24 = vld [vmem:[%s11410_s3 + $0x118] sm:$0xff] }
 0x3b9   : > { %4362 = vmatpush.bf16.msrb.mxu0 %v3273_v40  ;;  %v3140_v4 = vcvt.s32.f32 %v2372_v44  ;;  %v1989_v12 = vunpack.c.0.s8 %v1545_v35  ;;  %v2001_v46 = vunpack.c.1.s8 %v1545_v35  ;;  %v3465_v25 = vpack.c.bf16 %v2985_v8, %v2973_v29  ;;  %4334 = vmatmul.bf16.vlgmr.msra.gmra.mxu2 %v11870_v23  ;;  %v1533_v26 = vld [vmem:[%s11410_s3 + $0x298] sm:$0xff]  ;;  %v12629_v44 = vpop.f32.mrf.mxu0 }
 0x3ba   : > { %4380 = vmatpush.bf16.msrb.mxu1 %v3369_v6  ;;  %v3152_v60 = vcvt.s32.f32 %v2384_v28  ;;  %v2565_v14 = vcvt.s32.f32 %v1797_v33  ;;  %v2181_v63 = vunpack.c.0.s8 %v1593_v49  ;;  %v2577_v47 = vcvt.s32.f32 %v1809_v17  ;;  %v12627_v29 = vld [vmem:[%s11410_s3 + $0x418] sm:$0xff]  ;;  %v12631_v6 = vpop.f32.mrf.mxu1 }
 0x3bb   : > { %v2757_v51 = vcvt.s32.f32 %v1989_v12  ;;  %v2769_v48 = vcvt.s32.f32 %v2001_v46  ;;  %v2193_v1 = vunpack.c.1.s8 %v1593_v49  ;;  %4398 = vmatpush.bf16.msrb.mxu2 %v3465_v25  ;;  %v2348_v53 = vunpack.c.2.s8 %v12617_v16 }
 0x3bc   : > { %v3548_v35 = vpack.c.bf16 %v3152_v60, %v3140_v4  ;;  %v2949_v52 = vcvt.s32.f32 %v2181_v63  ;;  %v2360_v34 = vunpack.c.3.s8 %v12617_v16  ;;  %v3261_v36 = vpack.c.bf16 %v2577_v47, %v2565_v14 }
 0x3bd   : > { %v3357_v31 = vpack.c.bf16 %v2769_v48, %v2757_v51  ;;  %v2961_v56 = vcvt.s32.f32 %v2193_v1  ;;  %v3978_v40 = vadd.f32 %v12570_v19, %v3960_v15  ;;  %v3116_v49 = vcvt.s32.f32 %v2348_v53 }
 0x3be   : > { %4345 = vmatpush.bf16.msra.mxu3 %v3548_v35  ;;  %v3128_v8 = vcvt.s32.f32 %v2360_v34  ;;  %v1773_v28 = vunpack.c.2.s8 %v1485_v24  ;;  %v1785_v33 = vunpack.c.3.s8 %v1485_v24  ;;  %4363 = vmatpush.bf16.msrb.mxu0 %v3261_v36  ;;  %v1965_v12 = vunpack.c.2.s8 %v1533_v26 }
 0x3bf   : > { %4381 = vmatpush.bf16.msrb.mxu1 %v3357_v31  ;;  %v3453_v4 = vpack.c.bf16 %v2961_v56, %v2949_v52  ;;  %v3996_v17 = vadd.f32 %v12572_v43, %v3978_v40  ;;  %v1977_v46 = vunpack.c.3.s8 %v1533_v26  ;;  %v2157_v60 = vunpack.c.2.s8 %v12627_v29 }
 0x3c0   : > { %v3536_v25 = vpack.c.bf16 %v3128_v8, %v3116_v49  ;;  %v2541_v19 = vcvt.s32.f32 %v1773_v28  ;;  %v2553_v15 = vcvt.s32.f32 %v1785_v33  ;;  %v2733_v63 = vcvt.s32.f32 %v1965_v12  ;;  %v12652_v8 = vld [vmem:[%s11410_s3 + $0x530] sm:$0xff] }
 0x3c1   : > { %4399 = vmatpush.bf16.msrb.mxu2 %v3453_v4  ;;  %v12636_v14 = vmul.f32 %v12604_v10, %v3996_v17  ;;  %v2745_v47 = vcvt.s32.f32 %v1977_v46  ;;  %v2169_v51 = vunpack.c.3.s8 %v12627_v29  ;;  %v2925_v1 = vcvt.s32.f32 %v2157_v60  ;;  %v12658_v17 = vpop.f32.mrf.mxu0 }
 0x3c2   : > { %4346 = vmatpush.bf16.msra.mxu3 %v3536_v25  ;;  %v3249_v48 = vpack.c.bf16 %v2553_v15, %v2541_v19  ;;  %v12640_v43 = vperm.slane %v12511_v55, 5  ;;  %v3963_v35 = vadd.f32 %v12581_v37, %v12579_v45  ;;  %v2324_v34 = vunpack.c.0.s8 %v12617_v16  ;;  %v12654_v45 = vpop.f32.mrf.mxu2  ;;  %v12656_v37 = vpop.f32.mrf.mxu3  ;;  %v12666_v19 = vld [vmem:[%s11410_s3 + $0xb8] sm:$0xff] }
 0x3c3   : > { %v3345_v52 = vpack.c.bf16 %v2745_v47, %v2733_v63  ;;  %v2937_v53 = vcvt.s32.f32 %v2169_v51  ;;  %v2336_v36 = vunpack.c.1.s8 %v12617_v16  ;;  %4285 = vmatmul.bf16.gmra.mxu3 %v11855_v27  ;;  %v1749_v56 = vunpack.c.0.s8 %v1485_v24  ;;  %v1521_v47 = vld [vmem:[%s11410_s3 + $0x238] sm:$0xff] }
 0x3c4   : > { %4364 = vmatpush.bf16.msrb.mxu0 %v3249_v48  ;;  %v12649_v31 = vadd.f32 %v12640_v43, %v12609_v62  ;;  %v1761_v40 = vunpack.c.1.s8 %v1485_v24  ;;  %v1941_v49 = vunpack.c.0.s8 %v1533_v26  ;;  %v3092_v16 = vcvt.s32.f32 %v2324_v34  ;;  %v12660_v62 = vpop.f32.mrf.mxu1 }
 0x3c5   : > { %4382 = vmatpush.bf16.msrb.mxu1 %v3345_v52  ;;  %v3441_v28 = vpack.c.bf16 %v2937_v53, %v2925_v1  ;;  %v3104_v33 = vcvt.s32.f32 %v2336_v36  ;;  %v1953_v4 = vunpack.c.1.s8 %v1533_v26  ;;  %v2517_v24 = vcvt.s32.f32 %v1749_v56  ;;  %v12674_v53 = vld [vmem:[%s11410_s3 + $0x3b8] sm:$0xff] }
 0x3c6   : > { %4610 = vrot.lane.b32.xlu2 %v12649_v31, %s10934_s9  ;;  %v2529_v12 = vcvt.s32.f32 %v1761_v40  ;;  %v2709_v46 = vcvt.s32.f32 %v1941_v49  ;;  %v2133_v25 = vunpack.c.0.s8 %v12627_v29  ;;  %v2145_v26 = vunpack.c.1.s8 %v12627_v29 }
 0x3c7   : > { %4400 = vmatpush.bf16.msrb.mxu2 %v3441_v28  ;;  %v3524_v15 = vpack.c.bf16 %v3104_v33, %v3092_v16  ;;  %v2721_v60 = vcvt.s32.f32 %v1953_v4  ;;  %v2300_v63 = vunpack.c.2.s8 %v12652_v8  ;;  %v2312_v1 = vunpack.c.3.s8 %v12652_v8 }
 0x3c8   : > { %v3237_v51 = vpack.c.bf16 %v2529_v12, %v2517_v24  ;;  %v2901_v48 = vcvt.s32.f32 %v2133_v25  ;;  %v3981_v52 = vadd.f32 %v12595_v54, %v3963_v35  ;;  %4303 = vmatmul.bf16.gmra.mxu0 %v11849_v2  ;;  %v2913_v36 = vcvt.s32.f32 %v2145_v26  ;;  %4321 = vmatmul.bf16.gmra.mxu1 %v11851_v61 }
 0x3c9   : > { %4347 = vmatpush.bf16.msra.mxu3 %v3524_v15  ;;  %v3333_v34 = vpack.c.bf16 %v2721_v60, %v2709_v46  ;;  %v3068_v56 = vcvt.s32.f32 %v2300_v63  ;;  %v1725_v40 = vunpack.c.2.s8 %v12666_v19  ;;  %v3080_v29 = vcvt.s32.f32 %v2312_v1  ;;  %4339 = vmatmul.bf16.gmra.mxu2 %v11853_v7 }
 0x3ca   : > { %4365 = vmatpush.bf16.msrb.mxu0 %v3237_v51  ;;  %v3999_v49 = vadd.f32 %v12597_v18, %v3981_v52  ;;  %v1737_v28 = vunpack.c.3.s8 %v12666_v19  ;;  %v1917_v16 = vunpack.c.2.s8 %v1521_v47  ;;  %v3429_v54 = vpack.c.bf16 %v2913_v36, %v2901_v48  ;;  %v12686_v15 = vpop.f32.mrf.mxu2  ;;  %v12688_v18 = vpop.f32.mrf.mxu3 }
 0x3cb   : > { %4383 = vmatpush.bf16.msrb.mxu1 %v3333_v34  ;;  %v2493_v35 = vcvt.s32.f32 %v1725_v40  ;;  %v1929_v33 = vunpack.c.3.s8 %v1521_v47  ;;  %v2109_v4 = vunpack.c.2.s8 %v12674_v53  ;;  %v3512_v24 = vpack.c.bf16 %v3080_v29, %v3068_v56  ;;  %v12695_v48 = vpop.f32.mrf.mxu0 }
 0x3cc   : > { %v12684_v12 = vmul.f32 %v12604_v10, %v3999_v49  ;;  %v2505_v46 = vcvt.s32.f32 %v1737_v28  ;;  %v2685_v25 = vcvt.s32.f32 %v1917_v16  ;;  %4401 = vmatpush.bf16.msrb.mxu2 %v3429_v54  ;;  %v2121_v26 = vunpack.c.3.s8 %v12674_v53  ;;  %v12697_v1 = vpop.f32.mrf.mxu1 }
 0x3cd   : > { %v2697_v60 = vcvt.s32.f32 %v1929_v33  ;;  %v2877_v63 = vcvt.s32.f32 %v2109_v4  ;;  %v12693_v51 = vadd.f32 %v12210_v30, %v12153_v11  ;;  %4348 = vmatpush.bf16.msra.mxu3 %v3512_v24  ;;  %v12701_v52 = vadd.f32 %v12640_v43, %v12636_v14  ;;  %v1461_v24 = vld [vmem:[%s11410_s3 + $0x58] sm:$0xff] }
 0x3ce   : > { %v3225_v10 = vpack.c.bf16 %v2505_v46, %v2493_v35  ;;  %v2276_v34 = vunpack.c.0.s8 %v12652_v8  ;;  %v2288_v36 = vunpack.c.1.s8 %v12652_v8  ;;  %v2889_v40 = vcvt.s32.f32 %v2121_v26  ;;  %v12712_v8 = vld [vmem:[%s11410_s3 + $0x4d0] sm:$0xff]  ;;  %v1509_v26 = vld [vmem:[%s11410_s3 + $0x1d8] sm:$0xff] }
 0x3cf   : > { %14373 = vst [vmem:[#allocation58_spill] sm:$0xff] %v12693_v51  ;;  %v3321_v56 = vpack.c.bf16 %v2697_v60, %v2685_v25  ;;  %4574 = vrot.lane.b32.xlu2 %v12693_v51, %s10934_s9  ;;  %v1701_v11 = vunpack.c.0.s8 %v12666_v19  ;;  %v1713_v29 = vunpack.c.1.s8 %v12666_v19  ;;  %4612 = vrot.lane.b32.xlu1 %v12701_v52, %s10934_s9  ;;  %v1893_v28 = vunpack.c.0.s8 %v1521_v47 }
 0x3d0   : > { %14374 = vst [vmem:[#allocation59_spill] sm:$0xff] %v12701_v52  ;;  %4366 = vmatpush.bf16.msrb.mxu0 %v3225_v10  ;;  %v3044_v14 = vcvt.s32.f32 %v2276_v34  ;;  %v3056_v49 = vcvt.s32.f32 %v2288_v36  ;;  %v1905_v16 = vunpack.c.1.s8 %v1521_v47  ;;  %v3417_v54 = vpack.c.bf16 %v2889_v40, %v2877_v63 }
 0x3d1   : > { %4384 = vmatpush.bf16.msrb.mxu1 %v3321_v56  ;;  %v2469_v35 = vcvt.s32.f32 %v1701_v11  ;;  %v2481_v33 = vcvt.s32.f32 %v1713_v29  ;;  %v2085_v4 = vunpack.c.0.s8 %v12674_v53  ;;  %v2661_v46 = vcvt.s32.f32 %v1893_v28  ;;  %v12721_v56 = vld [vmem:[%s11410_s3 + $0x358] sm:$0xff] }
 0x3d2   : > { %v3500_v19 = vpack.c.bf16 %v3056_v49, %v3044_v14  ;;  %v2673_v25 = vcvt.s32.f32 %v1905_v16  ;;  %v2097_v60 = vunpack.c.1.s8 %v12674_v53  ;;  %4402 = vmatpush.bf16.msrb.mxu2 %v3417_v54  ;;  %v2252_v47 = vunpack.c.2.s8 %v12712_v8  ;;  %v12723_v14 = vpop.f32.mrf.mxu2  ;;  %v12725_v49 = vpop.f32.mrf.mxu3 }
 0x3d3   : > { %v3213_v10 = vpack.c.bf16 %v2481_v33, %v2469_v35  ;;  %v2853_v34 = vcvt.s32.f32 %v2085_v4  ;;  %v2264_v36 = vunpack.c.3.s8 %v12712_v8  ;;  %v1677_v11 = vunpack.c.2.s8 %v1461_v24  ;;  %v4018_v35 = vpop.f32.mrf.mxu0 }
 0x3d4   : > { %4349 = vmatpush.bf16.msra.mxu3 %v3500_v19  ;;  %v3309_v63 = vpack.c.bf16 %v2673_v25, %v2661_v46  ;;  %v2865_v40 = vcvt.s32.f32 %v2097_v60  ;;  %v1689_v29 = vunpack.c.3.s8 %v1461_v24  ;;  %v3020_v53 = vcvt.s32.f32 %v2252_v47  ;;  %v4036_v33 = vpop.f32.mrf.mxu1 }
 0x3d5   : > { %4367 = vmatpush.bf16.msrb.mxu0 %v3213_v10  ;;  %v3032_v28 = vcvt.s32.f32 %v2264_v36  ;;  %v1869_v16 = vunpack.c.2.s8 %v1509_v26  ;;  %v1881_v54 = vunpack.c.3.s8 %v1509_v26  ;;  %v2445_v51 = vcvt.s32.f32 %v1677_v11 }
 0x3d6   : > { %4385 = vmatpush.bf16.msrb.mxu1 %v3309_v63  ;;  %v3405_v4 = vpack.c.bf16 %v2865_v40, %v2853_v34  ;;  %v2457_v52 = vcvt.s32.f32 %v1689_v29  ;;  %v2061_v19 = vunpack.c.2.s8 %v12721_v56  ;;  %v2073_v7 = vunpack.c.3.s8 %v12721_v56 }
 0x3d7   : > { %v3488_v46 = vpack.c.bf16 %v3032_v28, %v3020_v53  ;;  %v2637_v25 = vcvt.s32.f32 %v1869_v16  ;;  %v2649_v60 = vcvt.s32.f32 %v1881_v54  ;;  %v12731_v47 = vadd.f32 %v12040_v21, %v12393_v42 }
 0x3d8   : > { %4403 = vmatpush.bf16.msrb.mxu2 %v3405_v4  ;;  %v3201_v61 = vpack.c.bf16 %v2457_v52, %v2445_v51  ;;  %v2829_v10 = vcvt.s32.f32 %v2061_v19  ;;  %v12735_v36 = vadd.f32 %v12640_v43, %v12684_v12  ;;  %v2841_v63 = vcvt.s32.f32 %v2073_v7 }
 0x3d9   : > { %4350 = vmatpush.bf16.msra.mxu3 %v3488_v46  ;;  %v3297_v34 = vpack.c.bf16 %v2649_v60, %v2637_v25  ;;  %v4030_v40 = vadd.f32 %v12631_v6, %v12629_v44  ;;  %v2228_v11 = vunpack.c.0.s8 %v12712_v8  ;;  %4567 = vrot.lane.b32.xlu1 %v12731_v47, %s10934_s9  ;;  %v2240_v21 = vunpack.c.1.s8 %v12712_v8  ;;  %v1641_v6 = vld [vmem:[%s11410_s3 + $0x5f8] sm:$0xff] }
 0x3da   : > { %4368 = vmatpush.bf16.msrb.mxu0 %v3201_v61  ;;  %v1653_v42 = vunpack.c.0.s8 %v1461_v24  ;;  %v1665_v51 = vunpack.c.1.s8 %v1461_v24  ;;  %v1845_v52 = vunpack.c.0.s8 %v1509_v26  ;;  %v3393_v43 = vpack.c.bf16 %v2841_v63, %v2829_v10  ;;  %4614 = vrot.lane.b32.xlu0 %v12735_v36, %s10934_s9  ;;  %v4054_v16 = vpop.f32.mrf.mxu2  ;;  %v4072_v8 = vpop.f32.mrf.mxu3  ;;  %v12754_v63 = vld [vmem:[%s11413_s21] sm:$0xff] }
 0x3db   : > { %4386 = vmatpush.bf16.msrb.mxu1 %v3297_v34  ;;  %v2996_v7 = vcvt.s32.f32 %v2228_v11  ;;  %v1857_v12 = vunpack.c.1.s8 %v1509_v26  ;;  %v2037_v44 = vunpack.c.0.s8 %v12721_v56  ;;  %v3008_v29 = vcvt.s32.f32 %v2240_v21  ;;  %v12748_v33 = vpop.f32.mrf.mxu0 }
 0x3dc   : > { %v2421_v61 = vcvt.s32.f32 %v1653_v42  ;;  %v2433_v53 = vcvt.s32.f32 %v1665_v51  ;;  %v2613_v28 = vcvt.s32.f32 %v1845_v52  ;;  %4404 = vmatpush.bf16.msrb.mxu2 %v3393_v43  ;;  %v2049_v54 = vunpack.c.1.s8 %v12721_v56  ;;  %v12750_v26 = vpop.f32.mrf.mxu1  ;;  %v1629_v56 = vld [vmem:[%s11410_s3 + $0x598] sm:$0xff] }
 0x3dd   : > { %v2625_v24 = vcvt.s32.f32 %v1857_v12  ;;  %v2805_v35 = vcvt.s32.f32 %v2037_v44  ;;  %v3476_v4 = vpack.c.bf16 %v3008_v29, %v2996_v7  ;;  %v2397_v46 = vunpack.c.2.s8 %v1641_v6 }
 0x3de   : > { %v3189_v19 = vpack.c.bf16 %v2433_v53, %v2421_v61  ;;  %v2409_v25 = vunpack.c.3.s8 %v1641_v6  ;;  %v2817_v10 = vcvt.s32.f32 %v2049_v54  ;;  %v4048_v34 = vadd.f32 %v12654_v45, %v4030_v40 }
 0x3df   : > { %v3285_v60 = vpack.c.bf16 %v2625_v24, %v2613_v28  ;;  %v12757_v11 = vperm.slane %v12754_v63, 6  ;;  %v3816_v21 = vadd.f32 %v12308_v5, %v12306_v39  ;;  %4351 = vmatpush.bf16.msra.mxu3 %v3476_v4  ;;  %v3165_v42 = vcvt.s32.f32 %v2397_v46  ;;  %v1617_v24 = vld [vmem:[%s11410_s3 + $0x538] sm:$0xff]  ;;  %v14376_v46 = vld [vmem:[#allocation56_spill] sm:$0xff] }
 0x3e0   : > { %4369 = vmatpush.bf16.msrb.mxu0 %v3189_v19  ;;  %v3177_v51 = vcvt.s32.f32 %v2409_v25  ;;  %v12764_v52 = vadd.f32 %v12210_v30, %v12203_v3  ;;  %v3381_v43 = vpack.c.bf16 %v2817_v10, %v2805_v35  ;;  %v4066_v45 = vadd.f32 %v12656_v37, %v4048_v34  ;;  %v10276_v10 = vld [vmem:[%s11420_s20] sm:$0xff] }
 0x3e1   : > { %4387 = vmatpush.bf16.msrb.mxu1 %v3285_v60  ;;  %v2373_v40 = vunpack.c.0.s8 %v1641_v6  ;;  %v2385_v7 = vunpack.c.1.s8 %v1641_v6  ;;  %v3834_v12 = vadd.f32 %v12329_v57, %v3816_v21  ;;  %v2349_v3 = vunpack.c.2.s8 %v1629_v56 }
 0x3e2   : > { %v3561_v39 = vpack.c.bf16 %v3177_v51, %v3165_v42  ;;  %4578 = vrot.lane.b32.xlu1 %v12764_v52, %s10934_s9  ;;  %v2361_v30 = vunpack.c.3.s8 %v1629_v56  ;;  %4405 = vmatpush.bf16.msrb.mxu2 %v3381_v43  ;;  %v4468_v5 = vmul.f32 %v12757_v11, %v4066_v45  ;;  %v12777_v44 = vperm.slane %v12511_v55, 2  ;;  %v12784_v29 = vpop.f32.mrf.mxu2  ;;  %v12786_v61 = vpop.f32.mrf.mxu3  ;;  %v1605_v51 = vld [vmem:[%s11410_s3 + $0x4d8] sm:$0xff] }
 0x3e3   : > { %4352 = vmatmul.bf16.vlgmr.msra.gmra.mxu3 %v11872_v20  ;;  %v3153_v37 = vcvt.s32.f32 %v2385_v7  ;;  %v3117_v57 = vcvt.s32.f32 %v2349_v3  ;;  %v12782_v6 = vperm.slane %v12511_v55, 6  ;;  %v3744_v53 = vadd.f32 %v12207_v50, %v12205_v0  ;;  %4370 = vmatmul.bf16.vlgmr.msrb.gmra.mxu0 %v11866_v22 }
 0x3e4   : > { %9352 = vmatpush.xpose.msk.msra.mxu0 %vm4706_vm9, %v12524_v41  ;;  %v3141_v41 = vcvt.s32.f32 %v2373_v40  ;;  %4416 = vmatpush.bf16.msrb.mxu3 %v3561_v39  ;;  %v4035_v16 = vadd.f32 %v12697_v1, %v12695_v48  ;;  %v2325_v8 = vunpack.c.0.s8 %v1629_v56  ;;  %v4103_v55 = vpop.f32.mrf.mxu1  ;;  %v12796_v54 = vperm.slane %v12754_v63, 3 }
 0x3e5   : > { %9354 = vmatpush.xpose.msk.msra.mxu1 %vm4706_vm9, %v12549_v13  ;;  %v3129_v13 = vcvt.s32.f32 %v2361_v30  ;;  %v3852_v35 = vadd.f32 %v12331_v9, %v3834_v12  ;;  %v12800_v4 = vadd.f32 %v12782_v6, %v4468_v5  ;;  %v2337_v0 = vunpack.c.1.s8 %v1629_v56  ;;  %4406 = vmatmul.bf16.vlgmr.msrb.gmra.mxu2 %v11870_v23  ;;  %v14377_v12 = vld [vmem:[#allocation53_spill] sm:$0xff] }
 0x3e6   : > { %9356 = vmatpush.xpose.msk.msra.mxu2 %vm4706_vm9, %v12576_v38  ;;  %v3549_v28 = vpack.c.bf16 %v3153_v37, %v3141_v41  ;;  %4388 = vmatmul.bf16.vlgmr.msrb.gmra.mxu1 %v11868_v59  ;;  %v4085_v38 = vpop.f32.mrf.mxu0  ;;  %v4032_v50 = vadd.f32 %v12660_v62, %v12658_v17  ;;  %v12807_v22 = vadd.f32 %v12777_v44, %v12430_v58  ;;  %v3093_v9 = vcvt.s32.f32 %v2325_v8 }
 0x3e7   : > { %v3537_v48 = vpack.c.bf16 %v3129_v13, %v3117_v57  ;;  %v4053_v59 = vadd.f32 %v12723_v14, %v4035_v16  ;;  %4619 = vrot.lane.b32.xlu0 %v12800_v4, %s10934_s9  ;;  %v3105_v23 = vcvt.s32.f32 %v2337_v0  ;;  %v2301_v1 = vunpack.c.2.s8 %v1617_v24 }
 0x3e8   : > { %4417 = vmatpush.bf16.msrb.mxu3 %v3549_v28  ;;  %v2313_v19 = vunpack.c.3.s8 %v1617_v24  ;;  %v3762_v58 = vadd.f32 %v12224_v32, %v3744_v53  ;;  %v4477_v62 = vmul.f32 %v12796_v54, %v3852_v35  ;;  %v4050_v14 = vadd.f32 %v12686_v15, %v4032_v50 }
 0x3e9   : > { %v4071_v17 = vadd.f32 %v12725_v49, %v4053_v59  ;;  %v12824_v34 = vperm.slane %v10276_v10, 3  ;;  %v2277_v56 = vunpack.c.0.s8 %v1617_v24  ;;  %v3525_v49 = vpack.c.bf16 %v3105_v23, %v3093_v9 }
 0x3ea   : > { %9364 = vmatpush.xpose.msk.msrb.mxu2 %vm4706_vm9, %v12649_v31  ;;  %4583 = vrot.lane.b32.xlu1 %v12807_v22, %s10934_s9  ;;  %v14375_v31 = vld [vmem:[#allocation54_spill] sm:$0xff]  ;;  %v3069_v21 = vcvt.s32.f32 %v2301_v1  ;;  %v3081_v32 = vcvt.s32.f32 %v2313_v19  ;;  %v2289_v42 = vunpack.c.1.s8 %v1617_v24  ;;  %v4121_v43 = vpop.f32.mrf.mxu2  ;;  %v4139_v15 = vpop.f32.mrf.mxu3  ;;  %v3780_v39 = vadd.f32 %v14377_v12, %v3762_v58 }
 0x3eb   : > { %v4488_v25 = vmul.f32 %v14376_v46, %v14375_v31  ;;  %v4492_v60 = vmul.f32 %v12757_v11, %v4071_v17  ;;  %v4068_v3 = vadd.f32 %v12688_v18, %v4050_v14  ;;  %v12833_v30 = vadd.f32 %v12824_v34, %v4477_v62 }
 0x3ec   : > { %4418 = vmatpush.bf16.msrb.mxu3 %v3537_v48  ;;  %v4106_v7 = vpop.f32.mrf.mxu1  ;;  %v2253_v41 = vunpack.c.2.s8 %v1605_v51  ;;  %v4104_v37 = vadd.f32 %v4103_v55, %v4085_v38  ;;  %v3513_v57 = vpack.c.bf16 %v3081_v32, %v3069_v21  ;;  %v3045_v13 = vcvt.s32.f32 %v2277_v56  ;;  %v14381_v56 = vld [vmem:[#allocation57_spill] sm:$0xff] }
 0x3ed   : > { %v12828_v45 = vadd.f32 %v12782_v6, %v4492_v60  ;;  %v12836_v5 = vadd.f32 %v12777_v44, %v4488_v25  ;;  %v3057_v53 = vcvt.s32.f32 %v2289_v42  ;;  %v2265_v28 = vunpack.c.3.s8 %v1605_v51 }
 0x3ee   : > { %v4088_v40 = vpop.f32.mrf.mxu0  ;;  %v4102_v18 = vadd.f32 %v12750_v26, %v12748_v33  ;;  %v4122_v16 = vadd.f32 %v4121_v43, %v4104_v37  ;;  %v4476_v8 = vmul.f32 %v14376_v46, %v3780_v39  ;;  %v4480_v24 = vmul.f32 %v12757_v11, %v4068_v3  ;;  %v14378_v11 = vld [vmem:[#allocation48_spill] sm:$0xff]  ;;  %v14382_v37 = vld [vmem:[#allocation50_spill] sm:$0xff] }
 0x3ef   : > { %4623 = vrot.lane.b32.xlu2 %v12828_v45, %s10934_s9  ;;  %4594 = vrot.lane.b32.xlu0 %v12833_v30, %s10934_s9  ;;  %v3021_v38 = vcvt.s32.f32 %v2253_v41  ;;  %v4445_v35 = vperm.slane %v12754_v63, 7  ;;  %v3501_v50 = vpack.c.bf16 %v3057_v53, %v3045_v13  ;;  %v3033_v48 = vcvt.s32.f32 %v2265_v28  ;;  %v14379_v63 = vld [vmem:[#allocation49_spill] sm:$0xff]  ;;  %v14383_v13 = vld [vmem:[#allocation51_spill] sm:$0xff] }
 0x3f0   : > { %4419 = vmatpush.bf16.msrb.mxu3 %v3525_v49  ;;  %v4120_v55 = vadd.f32 %v12784_v29, %v4102_v18  ;;  %v4140_v0 = vadd.f32 %v4139_v15, %v4122_v16  ;;  %v2229_v33 = vunpack.c.0.s8 %v1605_v51  ;;  %v2241_v26 = vunpack.c.1.s8 %v1605_v51  ;;  %v14384_v18 = vld [vmem:[#allocation59_spill] sm:$0xff]  ;;  %v4570_v16 = vpop.permute.xlu1 %4569 }
 0x3f1   : > { %v4509_v1 = vperm.slane %v10276_v10, 7  ;;  %v12854_v29 = vadd.f32 %v12782_v6, %v4480_v24  ;;  %v3489_v14 = vpack.c.bf16 %v3033_v48, %v3021_v38  ;;  %v12861_v31 = vadd.f32 %v12777_v44, %v4476_v8  ;;  %v14380_v6 = vld [vmem:[#allocation55_spill] sm:$0xff] }
 0x3f2   : > { %4587 = vrot.lane.b32.xlu1 %v12836_v5, %s10934_s9  ;;  %v4124_v59 = vpop.f32.mrf.mxu2  ;;  %v4142_v9 = vpop.f32.mrf.mxu3  ;;  %v4481_v23 = vmul.f32 %v4445_v35, %v4140_v0  ;;  %v4138_v58 = vadd.f32 %v12786_v61, %v4120_v55  ;;  %v3009_v46 = vcvt.s32.f32 %v2241_v26  ;;  %v4107_v25 = vadd.f32 %v4106_v7, %v4088_v40  ;;  %v14385_v55 = vld [vmem:[#allocation58_spill] sm:$0xff] }
 0x3f3   : > { %4357 = vmatmul.bf16.gmra.mxu3 %v11855_v27  ;;  %4375 = vmatmul.bf16.gmra.mxu0 %v11849_v2  ;;  %v2997_v2 = vcvt.s32.f32 %v2229_v33  ;;  %v4465_v60 = vmul.f32 %v12796_v54, %v14380_v6  ;;  %v12871_v61 = vpop.permute.xlu2 %4565  ;;  %v4489_v49 = vmul.f32 %v12796_v54, %v14381_v56  ;;  %v12878_v40 = vpop.permute.xlu0 %4576 }
 0x3f4   : > { %4420 = vmatpush.bf16.msrb.mxu3 %v3513_v57  ;;  %v4108_v17 = vpop.f32.mrf.mxu1  ;;  %v12858_v62 = vadd.f32 %v4509_v1, %v4481_v23  ;;  %v4469_v10 = vmul.f32 %v4445_v35, %v4138_v58  ;;  %v4125_v44 = vadd.f32 %v4124_v59, %v4107_v25 }
 0x3f5   : > { %4411 = vmatmul.bf16.gmra.mxu2 %v14379_v63  ;;  %v3477_v21 = vpack.c.bf16 %v3009_v46, %v2997_v2  ;;  %v12876_v15 = vadd.f32 %v12824_v34, %v4465_v60  ;;  %v12883_v39 = vadd.f32 %v12824_v34, %v4489_v49 }
 0x3f6   : > { %4393 = vmatmul.bf16.gmra.mxu1 %v14378_v11  ;;  %v4090_v19 = vpop.f32.mrf.mxu0  ;;  %v4143_v7 = vadd.f32 %v4142_v9, %v4125_v44  ;;  %v12880_v12 = vadd.f32 %v4509_v1, %v4469_v10  ;;  %v12918_v9 = vld [vmem:[%s11420_s20 + $0x8] sm:$0xf]  ;;  %s14387_s20 = sld [smem:[#allocation61_spill]] }
 0x3f7   : > { %4621 = vrot.lane.b32.xlu0 %v12854_v29, %s10934_s9  ;;  %4630 = vrot.lane.b32.xlu2 %v12858_v62, %s10934_s9  ;;  %v4510_v58 = vperm.slane %v12918_v9, 0 }
 0x3f8   : > { %4421 = vmatpush.bf16.msrb.mxu3 %v3501_v50  ;;  %v4493_v54 = vmul.f32 %v4445_v35, %v4143_v7  ;;  %v12910_v50 = vld [vmem:[%s11413_s21 + $0x8] sm:$0xf] }
 0x3f9   : > { %v4446_v26 = vperm.slane %v12910_v50, 0 }
 0x3fa   : > { %4585 = vrot.lane.b32.xlu1 %v12861_v31, %s10934_s9  ;;  %v4126_v32 = vpop.f32.mrf.mxu2  ;;  %v4144_v42 = vpop.f32.mrf.mxu3 }
 0x3fb   : > { %v14386_v42 = vld [vmem:[#allocation52_spill] sm:$0xff] }
 0x3fc   : > { %4422 = vmatpush.bf16.msrb.mxu3 %v3489_v14  ;;  %v4173_v43 = vpop.f32.mrf.mxu1 }
 0x3fe   : > { %v4155_v51 = vpop.f32.mrf.mxu0 }
 0x3ff   : > { %4592 = vrot.lane.b32.xlu0 %v12876_v15, %s10934_s9  ;;  %4628 = vrot.lane.b32.xlu2 %v12880_v12, %s10934_s9  ;;  %v4174_v8 = vadd.f32 %v4173_v43, %v4155_v51 }
 0x400   : > { %4423 = vmatpush.bf16.msrb.mxu3 %v3477_v21 }
 0x402   : > { %4596 = vrot.lane.b32.xlu1 %v12883_v39, %s10934_s9  ;;  %v4191_v41 = vpop.f32.mrf.mxu2 }
 0x403   : > { %4424 = vmatmul.bf16.vlgmr.msrb.gmra.mxu3 %v11872_v20  ;;  %v4606_v3 = vpop.permute.xlu2 %4605  ;;  %9353 = vmatmul.msk.f32.vlgmr.msra.gmra.mxu0 %vm4706_vm9, %v14382_v37  ;;  %v12899_v20 = vadd.f32 %v4509_v1, %v4493_v54  ;;  %v4192_v0 = vadd.f32 %v4191_v41, %v4174_v8 }
 0x404   : > { %9362 = vmatpush.xpose.msk.msrb.mxu1 %vm4706_vm9, %v4606_v3  ;;  %v4209_v34 = vpop.f32.mrf.mxu3  ;;  %v4175_v53 = vpop.f32.mrf.mxu1 }
 0x405   : > { %9357 = vmatmul.msk.f32.vlgmr.msra.gmra.mxu2 %vm4706_vm9, %v14383_v13  ;;  %v4210_v33 = vadd.f32 %v4209_v34, %v4192_v0 }
 0x406   : > { %9355 = vmatmul.msk.f32.vlgmr.msra.gmra.mxu1 %vm4706_vm9, %v12731_v47  ;;  %v4157_v57 = vpop.f32.mrf.mxu0 }
 0x407   : > { %v4602_v28 = vpop.permute.xlu0 %4601  ;;  %4632 = vrot.lane.b32.xlu2 %v12899_v20, %s10934_s9  ;;  %v4470_v63 = vmul.f32 %v4446_v26, %v4210_v33  ;;  %v4176_v54 = vadd.f32 %v4175_v53, %v4157_v57  ;;  %v4511_v57 = vperm.slane %v12918_v9, 1 }
 0x408   : > { %9358 = vmatpush.xpose.msk.msra.mxu3 %vm4706_vm9, %v4602_v28 }
 0x40a   : > { %v4193_v47 = vpop.f32.mrf.mxu2 }
 0x40c   : > { %9366 = vmatpush.xpose.msk.msrb.mxu3 %vm4706_vm9, %v14384_v18  ;;  %v4211_v24 = vpop.f32.mrf.mxu3  ;;  %v4178_v35 = vpop.f32.mrf.mxu1 }
 0x40d   : > { %9365 = vmatmul.msk.f32.vlgmr.msrb.gmra.mxu2 %vm4706_vm9, %v14385_v55 }
 0x40e   : > { %9363 = vmatmul.msk.f32.vlgmr.msrb.gmra.mxu1 %vm4706_vm9, %v4570_v16  ;;  %v4160_v38 = vpop.f32.mrf.mxu0 }
 0x40f   : > { %v4179_v59 = vadd.f32 %v4178_v35, %v4160_v38  ;;  %v4447_v35 = vperm.slane %v12910_v50, 1 }
 0x410   : > { %v4604_v48 = vpop.permute.xlu0 %4603 }
 0x411   : > { %9360 = vmatpush.xpose.msk.msrb.mxu0 %vm4706_vm9, %v4604_v48 }
 0x412   : > { %v4196_v23 = vpop.f32.mrf.mxu2 }
 0x413   : > { %4429 = vmatmul.bf16.gmra.mxu3 %v11855_v27  ;;  %v4197_v11 = vadd.f32 %v4196_v23, %v4179_v59  ;;  %v12921_v27 = vadd.f32 %v4510_v58, %v4470_v63 }
 0x414   : > { %v4214_v19 = vpop.f32.mrf.mxu3  ;;  %v4180_v17 = vpop.f32.mrf.mxu1 }
 0x415   : > { %9368 = vmatpush.xpose.msk.msra.mxu0 %vm4706_vm9, %v12735_v36  ;;  %v4215_v14 = vadd.f32 %v4214_v19, %v4197_v11 }
 0x416   : > { %v4162_v1 = vpop.f32.mrf.mxu0 }
 0x417   : > { %v4494_v2 = vmul.f32 %v4446_v26, %v4215_v14 }
 0x419   : > { %v12923_v46 = vadd.f32 %v4510_v58, %v4494_v2 }
 0x41a   : > { %v4198_v25 = vpop.f32.mrf.mxu2 }
 0x41b   : > { %v10103_v36 = vpack.i.bf16 %v12923_v46, %v12921_v27 }
 0x41c   : > { %v4216_v60 = vpop.f32.mrf.mxu3  ;;  %v4245_v10 = vpop.f32.mrf.mxu1 }
 0x41d   : > { %10104 = vrot.lane.b32.xlu0 %v10103_v36, %s10934_s9 }
 0x41e   : > { %v4227_v6 = vpop.f32.mrf.mxu0 }
 0x41f   : > { %v4246_v16 = vadd.f32 %v4245_v10, %v4227_v6 }
 0x420   : > { %v4611_v44 = vpop.permute.xlu2 %4610 }
 0x421   : > { %9370 = vmatpush.xpose.msk.msra.mxu1 %vm4706_vm9, %v4611_v44 }
 0x422   : > { %v4263_v56 = vpop.f32.mrf.mxu2 }
 0x423   : > { %9359 = vmatmul.msk.f32.vlgmr.msra.gmra.mxu3 %vm4706_vm9, %v12871_v61  ;;  %v4194_v61 = vadd.f32 %v4193_v47, %v4176_v54  ;;  %v4264_v33 = vadd.f32 %v4263_v56, %v4246_v16 }
 0x424   : > { %v4247_v21 = vpop.f32.mrf.mxu1 }
 0x425   : > { %9378 = vmatpush.xpose.msk.msrb.mxu1 %vm4706_vm9, %v12854_v29  ;;  %v4212_v13 = vadd.f32 %v4211_v24, %v4194_v61 }
 0x426   : > { %v4229_v49 = vpop.f32.mrf.mxu0 }
 0x427   : > { %v4248_v34 = vadd.f32 %v4247_v21, %v4229_v49  ;;  %v4482_v55 = vmul.f32 %v4446_v26, %v4212_v13 }
 0x429   : > { %v4575_v32 = vpop.permute.xlu2 %4574  ;;  %v12940_v47 = vadd.f32 %v4510_v58, %v4482_v55 }
 0x42a   : > { %9371 = vmatmul.msk.f32.vlgmr.msra.gmra.mxu1 %vm4706_vm9, %v4575_v32  ;;  %v4265_v51 = vpop.f32.mrf.mxu2 }
 0x42b   : > { %9367 = vmatmul.msk.f32.vlgmr.msrb.gmra.mxu3 %vm4706_vm9, %v14386_v42  ;;  %v4266_v28 = vadd.f32 %v4265_v51, %v4248_v34 }
 0x42c   : > { %v4250_v7 = vpop.f32.mrf.mxu1 }
 0x42e   : > { %v4232_v43 = vpop.f32.mrf.mxu0 }
 0x42f   : > { %v4251_v59 = vadd.f32 %v4250_v7, %v4232_v43 }
 0x432   : > { %9379 = vmatmul.msk.f32.vlgmr.msrb.gmra.mxu1 %vm4706_vm9, %v12861_v31  ;;  %v4268_v29 = vpop.f32.mrf.mxu2 }
 0x433   : > { %v4269_v1 = vadd.f32 %v4268_v29, %v4251_v59 }
 0x434   : > { %v4252_v37 = vpop.f32.mrf.mxu1 }
 0x435   : > { %v4281_v3 = vpop.f32.mrf.mxu3 }
 0x436   : > { %v4234_v41 = vpop.f32.mrf.mxu0  ;;  %v4282_v11 = vadd.f32 %v4281_v3, %v4264_v33 }
 0x438   : > { %v4471_v58 = vmul.f32 %v4447_v35, %v4282_v11 }
 0x43a   : > { %v4270_v18 = vpop.f32.mrf.mxu2 }
 0x43c   : > { %v4317_v48 = vpop.f32.mrf.mxu1 }
 0x43d   : > { %v4283_v8 = vpop.f32.mrf.mxu3 }
 0x43e   : > { %v4299_v38 = vpop.f32.mrf.mxu0  ;;  %v4284_v0 = vadd.f32 %v4283_v8, %v4266_v28 }
 0x43f   : > { %v4318_v31 = vadd.f32 %v4317_v48, %v4299_v38 }
 0x440   : > { %v4483_v53 = vmul.f32 %v4447_v35, %v4284_v0 }
 0x441   : > { %v4613_v23 = vpop.permute.xlu1 %4612 }
 0x442   : > { %v12942_v24 = vadd.f32 %v4511_v57, %v4483_v53  ;;  %9372 = vmatpush.xpose.msk.msra.mxu2 %vm4706_vm9, %v4613_v23  ;;  %v4335_v19 = vpop.f32.mrf.mxu2 }
 0x443   : > { %v4336_v17 = vadd.f32 %v4335_v19, %v4318_v31 }
 0x444   : > { %v10108_v26 = vpack.i.bf16 %v12940_v47, %v12942_v24  ;;  %v12959_v60 = vpop.f32.mrf.mxu1 }
 0x445   : > { %9373 = vmatmul.msk.f32.vlgmr.msra.gmra.mxu2 %vm4706_vm9, %v12878_v40 }
 0x446   : > { %9380 = vmatpush.xpose.msk.msrb.mxu2 %vm4706_vm9, %v12828_v45  ;;  %v4286_v63 = vpop.f32.mrf.mxu3  ;;  %10109 = vrot.lane.b32.xlu1 %v10108_v26, %s10934_s9  ;;  %v4535_v45 = vadd.f32 %v4511_v57, %v4471_v58  ;;  %v12957_v36 = vpop.f32.mrf.mxu0  ;;  %v4683_v26 = vld [vmem:[%s14387_s20 + $0x8] sm:$0xff] }
 0x447   : > { %v4287_v14 = vadd.f32 %v4286_v63, %v4269_v1  ;;  %v4682_v1 = vld [vmem:[%s14387_s20] sm:$0xff] }
 0x449   : > { %v4495_v2 = vmul.f32 %v4447_v35, %v4287_v14  ;;  %v4624_v25 = vpop.permute.xlu2 %4623 }
 0x44a   : > { %9388 = vmatpush.xpose.msk.msra.mxu2 %vm4706_vm9, %v12880_v12  ;;  %9386 = vmatpush.xpose.msk.msra.mxu1 %vm4706_vm9, %v4624_v25  ;;  %v12961_v10 = vpop.f32.mrf.mxu2 }
 0x44b   : > { %v12955_v6 = vadd.f32 %v4511_v57, %v4495_v2  ;;  %v4568_v40 = vpop.permute.xlu1 %4567 }
 0x44c   : > { %v4615_v44 = vpop.permute.xlu0 %4614  ;;  %9361 = vmatmul.msk.f32.vlgmr.msrb.gmra.mxu0 %vm4706_vm9, %v4568_v40  ;;  %v4322_v21 = vpop.f32.mrf.mxu1 }
 0x44d   : > { %v10113_v12 = vpack.i.bf16 %v12955_v6, %v4535_v45  ;;  %9374 = vmatpush.xpose.msk.msra.mxu3 %vm4706_vm9, %v4615_v44  ;;  %9376 = vmatpush.xpose.msk.msrb.mxu0 %vm4706_vm9, %v12800_v4 }
 0x44e   : > { %v4288_v56 = vpop.f32.mrf.mxu3  ;;  %9381 = vmatmul.msk.f32.vlgmr.msrb.gmra.mxu2 %vm4706_vm9, %v12836_v5  ;;  %v4304_v49 = vpop.f32.mrf.mxu0 }
 0x44f   : > { %10114 = vrot.lane.b32.xlu2 %v10113_v12, %s10934_s9  ;;  %v4323_v42 = vadd.f32 %v4322_v21, %v4304_v49  ;;  %v4688_v49 = vld [vmem:[%s14387_s20 + $0x30] sm:$0xff] }
 0x451   : > { %v4631_v51 = vpop.permute.xlu2 %4630 }
 0x452   : > { %v4340_v43 = vpop.f32.mrf.mxu2  ;;  %9396 = vmatpush.xpose.msk.msrb.mxu2 %vm4706_vm9, %v4631_v51 }
 0x453   : > { %v4341_v4 = vadd.f32 %v4340_v43, %v4323_v42 }
 0x454   : > { %v4579_v32 = vpop.permute.xlu1 %4578  ;;  %9369 = vmatmul.msk.f32.vlgmr.msra.gmra.mxu0 %vm4706_vm9, %v12764_v52  ;;  %v4324_v54 = vpop.f32.mrf.mxu1 }
 0x455   : > { %9375 = vmatmul.msk.f32.vlgmr.msra.gmra.mxu3 %vm4706_vm9, %v4579_v32 }
 0x456   : > { %9389 = vmatmul.msk.f32.vlgmr.msra.gmra.mxu2 %vm4706_vm9, %v12876_v15  ;;  %v4306_v7 = vpop.f32.mrf.mxu0 }
 0x457   : > { %5612 = vmatpush.msra.mxu2 %v12923_v46 }
 0x459   : > { %v4620_v5 = vpop.permute.xlu0 %4619  ;;  %v4629_v52 = vpop.permute.xlu2 %4628 }
 0x45a   : > { %9382 = vmatpush.xpose.msk.msrb.mxu3 %vm4706_vm9, %v4620_v5  ;;  %9394 = vmatpush.xpose.msk.msrb.mxu1 %vm4706_vm9, %v4629_v52  ;;  %v4342_v3 = vpop.f32.mrf.mxu2 }
 0x45c   : > { %v4584_v29 = vpop.permute.xlu1 %4583  ;;  %9377 = vmatmul.msk.f32.vlgmr.msrb.gmra.mxu0 %vm4706_vm9, %v12807_v22 }
 0x45d   : > { %9383 = vmatmul.msk.f32.vlgmr.msrb.gmra.mxu3 %vm4706_vm9, %v4584_v29  ;;  %v4685_v29 = vld [vmem:[%s14387_s20 + $0x18] sm:$0xff] }
 0x45e   : > { %9390 = vmatpush.xpose.msk.msra.mxu3 %vm4706_vm9, %v12858_v62 }
 0x460   : > { %v4371_v46 = vpop.f32.mrf.mxu0 }
 0x461   : > { %v4595_v15 = vpop.permute.xlu0 %4594  ;;  %v4633_v34 = vpop.permute.xlu2 %4632 }
 0x462   : > { %9397 = vmatmul.msk.f32.vlgmr.msrb.gmra.mxu2 %vm4706_vm9, %v4595_v15  ;;  %9398 = vmatpush.xpose.msk.msrb.mxu3 %vm4706_vm9, %v4633_v34 }
 0x463   : > { %v4389_v41 = vpop.f32.mrf.mxu1  ;;  %5704 = vmatpush.msrb.mxu2 %v4535_v45  ;;  %v4684_v45 = vld [vmem:[%s14387_s20 + $0x10] sm:$0xff] }
 0x464   : > { %v4588_v61 = vpop.permute.xlu1 %4587  ;;  %v4390_v37 = vadd.f32 %v4389_v41, %v4371_v46  ;;  %v4689_v46 = vld [vmem:[%s14387_s20 + $0x38] sm:$0xff] }
 0x465   : > { %9387 = vmatmul.msk.f32.vlgmr.msra.gmra.mxu1 %vm4706_vm9, %v4588_v61  ;;  %9391 = vmatmul.msk.f32.vlgmr.msra.gmra.mxu3 %vm4706_vm9, %v12833_v30 }
 0x466   : > { %v4353_v62 = vpop.f32.mrf.mxu3  ;;  %5589 = vmatpush.msra.mxu1 %v12940_v47 }
 0x467   : > { %v12991_v22 = vadd.f32 %v4353_v62, %v4336_v17 }
 0x468   : > { %v4407_v13 = vpop.f32.mrf.mxu2  ;;  %v12994_v16 = vpop.f32.mrf.mxu0 }
 0x469   : > { %v4622_v28 = vpop.permute.xlu0 %4621  ;;  %v4408_v18 = vadd.f32 %v4407_v13, %v4390_v37  ;;  %v4687_v37 = vld [vmem:[%s14387_s20 + $0x28] sm:$0xff] }
 0x46a   : > { %9384 = vmatpush.xpose.msk.msra.mxu0 %vm4706_vm9, %v4622_v28 }
 0x46b   : > { %v12996_v8 = vpop.f32.mrf.mxu1 }
 0x46c   : > { %v4586_v38 = vpop.permute.xlu1 %4585 }
 0x46d   : > { %9385 = vmatmul.msk.f32.vlgmr.msra.gmra.mxu0 %vm4706_vm9, %v4586_v38 }
 0x46e   : > { %9392 = vmatpush.xpose.msk.msrb.mxu0 %vm4706_vm9, %v12899_v20  ;;  %v13000_v55 = vpop.f32.mrf.mxu3 }
 0x470   : > { %v13004_v30 = vpop.f32.mrf.mxu2  ;;  %v4376_v0 = vpop.f32.mrf.mxu0 }
 0x471   : > { %v4593_v35 = vpop.permute.xlu0 %4592 }
 0x472   : > { %5566 = vmatpush.msra.mxu0 %v12921_v27  ;;  %9395 = vmatmul.msk.f32.vlgmr.msrb.gmra.mxu1 %vm4706_vm9, %v4593_v35  ;;  %v4686_v35 = vld [vmem:[%s14387_s20 + $0x20] sm:$0xff] }
 0x473   : > { %v4394_v48 = vpop.f32.mrf.mxu1 }
 0x474   : > { %v4597_v33 = vpop.permute.xlu1 %4596  ;;  %v4395_v31 = vadd.f32 %v4394_v48, %v4376_v0 }
 0x475   : > { %9399 = vmatmul.msk.f32.vlgmr.msrb.gmra.mxu3 %vm4706_vm9, %v4597_v33  ;;  %9393 = vmatmul.msk.f32.vlgmr.msrb.gmra.mxu0 %vm4706_vm9, %v12883_v39 }
 0x476   : > { %v4358_v57 = vpop.f32.mrf.mxu3 }
 0x477   : > { %v13010_v20 = vadd.f32 %v4358_v57, %v4341_v4  ;;  %v4695_v57 = vld [vmem:[%s14387_s20 + $0x68] sm:$0xff] }
 0x478   : > { %v4412_v53 = vpop.f32.mrf.mxu2  ;;  %v4378_v27 = vpop.f32.mrf.mxu0 }
 0x479   : > { %v4413_v59 = vadd.f32 %v4412_v53, %v4395_v31 }
 0x47b   : > { %v4396_v47 = vpop.f32.mrf.mxu1 }
 0x47e   : > { %v4360_v23 = vpop.f32.mrf.mxu3 }
 0x480   : > { %v4414_v11 = vpop.f32.mrf.mxu2  ;;  %v4728_v19 = vpop.f32.mrf.mxu0 }
 0x481   : > { %v13018_v39 = vadd.f32 %v4728_v19, %v4682_v1  ;;  %v4696_v19 = vld [vmem:[%s14387_s20 + $0x70] sm:$0xff] }
 0x483   : > { %v4752_v17 = vpop.f32.mrf.mxu1  ;;  %v5284_v2 = vsel %vm5283_vm10, %v13018_v39, -inf }
 0x484   : > { %v13020_v63 = vadd.f32 %v4752_v17, %v4683_v26  ;;  %5285 = vmax.xlane.f32.xlu0 %v5284_v2  ;;  %v4694_v17 = vld [vmem:[%s14387_s20 + $0x60] sm:$0xff] }
 0x486   : > { %v4425_v58 = vpop.f32.mrf.mxu3  ;;  %v5287_v14 = vsel %vm5283_vm10, %v13020_v63, -inf }
 0x487   : > { %v13026_v25 = vadd.f32 %v4425_v58, %v4408_v18  ;;  %5288 = vmax.xlane.f32.xlu2 %v5287_v14  ;;  %v4700_v58 = vld [vmem:[%s14387_s20 + $0x90] sm:$0xff] }
 0x488   : > { %v4776_v40 = vpop.f32.mrf.mxu2 }
 0x489   : > { %v13031_v44 = vadd.f32 %v4776_v40, %v4684_v45 }
 0x48b   : > { %v5290_v56 = vsel %vm5283_vm10, %v13031_v44, -inf  ;;  %v4848_v34 = vpop.f32.mrf.mxu1 }
 0x48c   : > { %5291 = vmax.xlane.f32.xlu0 %v5290_v56  ;;  %v13064_v62 = vadd.f32 %v4848_v34, %v4687_v37  ;;  %v4692_v34 = vld [vmem:[%s14387_s20 + $0x50] sm:$0xff] }
 0x48e   : > { %v13033_v12 = vpop.f32.mrf.mxu3  ;;  %v5299_v28 = vsel %vm5283_vm10, %v13064_v62, -inf }
 0x48f   : > { %v10105_v32 = vpop.permute.xlu0 %10104 }
 0x490   : > { %v4872_v21 = vpop.f32.mrf.mxu2  ;;  %v10107_v51 = vunpack.i.h.bf16 %v10105_v32  ;;  %v10106_v43 = vunpack.i.l.bf16 %v10105_v32 }
 0x491   : > { %v13040_v42 = vadd.f32 %v4872_v21, %v4688_v49 }
 0x492   : > { %5635 = vmatpush.msra.mxu3 %v10106_v43  ;;  %5681 = vmatpush.msrb.mxu1 %v10107_v51  ;;  %v4691_v43 = vld [vmem:[%s14387_s20 + $0x48] sm:$0xff] }
 0x493   : > { %v5302_v4 = vsel %vm5283_vm10, %v13040_v42, -inf }
 0x494   : > { %5303 = vmax.xlane.f32.xlu1 %v5302_v4  ;;  %5727 = vmatpush.msrb.mxu3 %v12942_v24  ;;  %v4697_v4 = vld [vmem:[%s14387_s20 + $0x78] sm:$0xff] }
 0x496   : > { %v4430_v5 = vpop.f32.mrf.mxu3 }
 0x497   : > { %v13045_v7 = vadd.f32 %v4430_v5, %v4413_v59  ;;  %v4690_v59 = vld [vmem:[%s14387_s20 + $0x40] sm:$0xff]  ;;  %v4699_v5 = vld [vmem:[%s14387_s20 + $0x88] sm:$0xff] }
 0x49e   : > { %v4432_v54 = vpop.f32.mrf.mxu3 }
 0x4a6   : > { %v4800_v52 = vpop.f32.mrf.mxu3 }
 0x4a7   : > { %v13050_v3 = vadd.f32 %v4800_v52, %v4685_v29  ;;  %v4944_v38 = vpop.f32.mrf.mxu1 }
 0x4a8   : > { %v13122_v54 = vadd.f32 %v4944_v38, %v4691_v43 }
 0x4a9   : > { %v5293_v15 = vsel %vm5283_vm10, %v13050_v3, -inf }
 0x4aa   : > { %5294 = vmax.xlane.f32.xlu2 %v5293_v15 }
 0x4ae   : > { %v4896_v24 = vpop.f32.mrf.mxu3 }
 0x4af   : > { %v13057_v41 = vadd.f32 %v4896_v24, %v4689_v46  ;;  %v5040_v53 = vpop.f32.mrf.mxu1 }
 0x4b0   : > { %v13084_v27 = vadd.f32 %v5040_v53, %v4695_v57 }
 0x4b1   : > { %v5305_v61 = vsel %vm5283_vm10, %v13057_v41, -inf }
 0x4b2   : > { %5306 = vmax.xlane.f32.xlu1 %v5305_v61  ;;  %v5323_v26 = vsel %vm5283_vm10, %v13084_v27, -inf  ;;  %v5311_v61 = vsel %vm5283_vm10, %v13122_v54, -inf }
 0x4b8   : > { %v13066_v13 = vpop.permute.xlu1 %10109 }
 0x4b9   : > { %v10112_v18 = vunpack.i.h.bf16 %v13066_v13 }
 0x4ba   : > { %5300 = vmax.xlane.f32.xlu1 %v5299_v28 }
 0x4bb   : > { %5658 = vmatpush.msrb.mxu0 %v10112_v18  ;;  %v4698_v18 = vld [vmem:[%s14387_s20 + $0x80] sm:$0xff] }
 0x4c8   : > { %v4968_v0 = vpop.f32.mrf.mxu2 }
 0x4c9   : > { %v4824_v48 = vpop.f32.mrf.mxu0  ;;  %v13137_v28 = vadd.f32 %v4968_v0, %v4692_v34  ;;  %v4703_v0 = vld [vmem:[%s14387_s20 + $0xa8] sm:$0xff] }
 0x4ca   : > { %v13074_v33 = vadd.f32 %v4824_v48, %v4686_v35 }
 0x4cb   : > { %v5314_v48 = vsel %vm5283_vm10, %v13137_v28, -inf }
 0x4cc   : > { %v5296_v31 = vsel %vm5283_vm10, %v13074_v33, -inf }
 0x4cd   : > { %5297 = vmax.xlane.f32.xlu2 %v5296_v31  ;;  %v4693_v31 = vld [vmem:[%s14387_s20 + $0x58] sm:$0xff] }
 0x4d1   : > { %v4920_v47 = vpop.f32.mrf.mxu0  ;;  %v5064_v23 = vpop.f32.mrf.mxu2 }
 0x4d2   : > { %v13086_v11 = vadd.f32 %v4920_v47, %v4690_v59  ;;  %v13101_v14 = vadd.f32 %v5064_v23, %v4696_v19 }
 0x4d4   : > { %v5308_v1 = vsel %vm5283_vm10, %v13086_v11, -inf  ;;  %v5326_v21 = vsel %vm5283_vm10, %v13101_v14, -inf }
 0x4d5   : > { %5309 = vmax.xlane.f32.xlu1 %v5308_v1  ;;  %5324 = vmax.xlane.f32.xlu2 %v5323_v26  ;;  %v13158_v1 = vpop.permute.xlu2 %10114 }
 0x4d8   : > { %v4992_v2 = vpop.f32.mrf.mxu3 }
 0x4d9   : > { %v5016_v45 = vpop.f32.mrf.mxu0  ;;  %v5160_v40 = vpop.f32.mrf.mxu2  ;;  %v13154_v47 = vadd.f32 %v4992_v2, %v4693_v31 }
 0x4da   : > { %v13103_v56 = vadd.f32 %v5016_v45, %v4694_v17  ;;  %v13105_v49 = vadd.f32 %v5160_v40, %v4700_v58  ;;  %v4701_v17 = vld [vmem:[%s14387_s20 + $0x98] sm:$0xff] }
 0x4db   : > { %v5317_v19 = vsel %vm5283_vm10, %v13154_v47, -inf  ;;  %v4705_v58 = vld [vmem:[%s14387_s20 + $0xb8] sm:$0xff] }
 0x4dc   : > { %v5320_v32 = vsel %vm5283_vm10, %v13103_v56, -inf  ;;  %v5338_v51 = vsel %vm5283_vm10, %v13105_v49, -inf }
 0x4dd   : > { %5327 = vmax.xlane.f32.xlu2 %v5326_v21  ;;  %5321 = vmax.xlane.f32.xlu0 %v5320_v32 }
 0x4de   : > { %5339 = vmax.xlane.f32.xlu1 %v5338_v51 }
 0x4e0   : > { %v5088_v29 = vpop.f32.mrf.mxu3 }
 0x4e1   : > { %v13124_v15 = vadd.f32 %v5088_v29, %v4697_v4 }
 0x4e2   : > { %v5136_v52 = vpop.f32.mrf.mxu1 }
 0x4e3   : > { %v13126_v46 = vadd.f32 %v5136_v52, %v4699_v5  ;;  %v5329_v24 = vsel %vm5283_vm10, %v13124_v15, -inf  ;;  %v4704_v52 = vld [vmem:[%s14387_s20 + $0xb0] sm:$0xff] }
 0x4e5   : > { %v5335_v37 = vsel %vm5283_vm10, %v13126_v46, -inf  ;;  %5312 = vmax.xlane.f32.xlu0 %v5311_v61  ;;  %5330 = vmax.xlane.f32.xlu2 %v5329_v24  ;;  %v5256_v24 = vpop.f32.mrf.mxu2 }
 0x4e6   : > { %5336 = vmax.xlane.f32.xlu1 %v5335_v37  ;;  %v13183_v37 = vadd.f32 %v5256_v24, %v4704_v52 }
 0x4e8   : > { %v5184_v53 = vpop.f32.mrf.mxu3 }
 0x4e9   : > { %v13170_v45 = vadd.f32 %v5184_v53, %v4701_v17 }
 0x4ea   : > { %v5112_v38 = vpop.f32.mrf.mxu0 }
 0x4eb   : > { %v13142_v35 = vadd.f32 %v5112_v38, %v4698_v18  ;;  %v5341_v5 = vsel %vm5283_vm10, %v13170_v45, -inf }
 0x4ed   : > { %5315 = vmax.xlane.f32.xlu0 %v5314_v48  ;;  %v5332_v57 = vsel %vm5283_vm10, %v13142_v35, -inf }
 0x4ee   : > { %5333 = vmax.xlane.f32.xlu2 %v5332_v57 }
 0x4ef   : > { %v5232_v59 = vpop.f32.mrf.mxu1 }
 0x4f0   : > { %v13156_v23 = vadd.f32 %v5232_v59, %v4703_v0 }
 0x4f2   : > { %v5347_v26 = vsel %vm5283_vm10, %v13156_v23, -inf }
 0x4f3   : > { %5348 = vmax.xlane.f32.xlu1 %v5347_v26 }
 0x4f5   : > { %5318 = vmax.xlane.f32.xlu0 %v5317_v19 }
 0x4f7   : > { %v5286_v32 = vpop.xlane.xlu0 %5285 }
 0x4f8   : > { %v5280_v2 = vpop.f32.mrf.mxu3  ;;  %v5356_v4 = vsub.f32 %v13018_v39, %v5286_v32  ;;  %v5350_v39 = vsel %vm5283_vm10, %v13183_v37, -inf }
 0x4f9   : > { %v13172_v40 = vadd.f32 %v5280_v2, %v4705_v58 }
 0x4fa   : > { %v5289_v21 = vpop.xlane.xlu2 %5288  ;;  %v5380_v29 = vmul.f32 1.442695, %v5356_v4 }
 0x4fb   : > { %v5353_v51 = vsel %vm5283_vm10, %v13172_v40, -inf  ;;  %v5357_v43 = vsub.f32 %v13020_v63, %v5289_v21 }
 0x4fc   : > { %5354 = vmax.xlane.f32.xlu1 %v5353_v51  ;;  %10165 = vpow2.f32 %v5380_v29 }
 0x4fd   : > { %5342 = vmax.xlane.f32.xlu0 %v5341_v5  ;;  %v5382_v61 = vmul.f32 1.442695, %v5357_v43 }
 0x4ff   : > { %10167 = vpow2.f32 %v5382_v61  ;;  %v5292_v34 = vpop.xlane.xlu0 %5291 }
 0x500   : > { %v5358_v63 = vsub.f32 %v13031_v44, %v5292_v34 }
 0x502   : > { %v5384_v18 = vmul.f32 1.442695, %v5358_v63  ;;  %v13188_v38 = vpop.eup %10165 }
 0x503   : > { %v5428_v48 = vsel %vm5283_vm10, %v13188_v38, 0.0 }
 0x504   : > { %10169 = vpow2.f32 %v5384_v18  ;;  %5429 = vadd.xlane.f32.xlu1 %v5428_v48 }
 0x505   : > { %5351 = vmax.xlane.f32.xlu0 %v5350_v39  ;;  %v13192_v31 = vpop.eup %10167 }
 0x506   : > { %v5431_v44 = vsel %vm5283_vm10, %v13192_v31, 0.0 }
 0x507   : > { %v5304_v57 = vpop.xlane.xlu1 %5303 }
 0x508   : > { %v5362_v0 = vsub.f32 %v13040_v42, %v5304_v57 }
 0x50a   : > { %v5392_v53 = vmul.f32 1.442695, %v5362_v0  ;;  %v13197_v59 = vpop.eup %10169 }
 0x50b   : > { %v5434_v26 = vsel %vm5283_vm10, %v13197_v59, 0.0 }
 0x50c   : > { %10171 = vpow2.f32 %v5392_v53  ;;  %5435 = vadd.xlane.f32.xlu2 %v5434_v26 }
 0x50d   : > { %5432 = vadd.xlane.f32.xlu0 %v5431_v44 }
 0x512   : > { %v13201_v19 = vpop.eup %10171 }
 0x513   : > { %v5446_v17 = vsel %vm5283_vm10, %v13201_v19, 0.0 }
 0x514   : > { %5447 = vadd.xlane.f32.xlu2 %v5446_v17 }
 0x51d   : > { %v5295_v58 = vpop.xlane.xlu2 %5294 }
 0x51e   : > { %v5359_v42 = vsub.f32 %v13050_v3, %v5295_v58 }
 0x520   : > { %v5386_v2 = vmul.f32 1.442695, %v5359_v42 }
 0x522   : > { %10173 = vpow2.f32 %v5386_v2 }
 0x525   : > { %v5307_v21 = vpop.xlane.xlu1 %5306 }
 0x526   : > { %v5363_v32 = vsub.f32 %v13057_v41, %v5307_v21 }
 0x528   : > { %v13207_v51 = vpop.eup %10173  ;;  %v5394_v43 = vmul.f32 1.442695, %v5363_v32 }
 0x529   : > { %v5437_v4 = vsel %vm5283_vm10, %v13207_v51, 0.0 }
 0x52a   : > { %5438 = vadd.xlane.f32.xlu0 %v5437_v4  ;;  %10175 = vpow2.f32 %v5394_v43 }
 0x52d   : > { %v5301_v5 = vpop.xlane.xlu1 %5300 }
 0x52e   : > { %v5361_v29 = vsub.f32 %v13064_v62, %v5301_v5 }
 0x530   : > { %v13212_v52 = vpop.eup %10175  ;;  %v5390_v24 = vmul.f32 1.442695, %v5361_v29 }
 0x531   : > { %v5449_v3 = vsel %vm5283_vm10, %v13212_v52, 0.0 }
 0x532   : > { %10177 = vpow2.f32 %v5390_v24  ;;  %5450 = vadd.xlane.f32.xlu2 %v5449_v3 }
 0x538   : > { %v13216_v41 = vpop.eup %10177 }
 0x539   : > { %v5443_v61 = vsel %vm5283_vm10, %v13216_v41, 0.0 }
 0x53a   : > { %5444 = vadd.xlane.f32.xlu2 %v5443_v61 }
 0x540   : > { %v5298_v34 = vpop.xlane.xlu2 %5297 }
 0x541   : > { %v5360_v63 = vsub.f32 %v13074_v33, %v5298_v34 }
 0x543   : > { %v5388_v39 = vmul.f32 1.442695, %v5360_v63 }
 0x545   : > { %10179 = vpow2.f32 %v5388_v39 }
 0x548   : > { %v5310_v62 = vpop.xlane.xlu1 %5309  ;;  %v5325_v18 = vpop.xlane.xlu2 %5324 }
 0x549   : > { %v5364_v48 = vsub.f32 %v13086_v11, %v5310_v62  ;;  %v5369_v57 = vsub.f32 %v13084_v27, %v5325_v18 }
 0x54b   : > { %v13223_v0 = vpop.eup %10179  ;;  %v5396_v44 = vmul.f32 1.442695, %v5364_v48  ;;  %v5406_v53 = vmul.f32 1.442695, %v5369_v57 }
 0x54c   : > { %v5440_v26 = vsel %vm5283_vm10, %v13223_v0, 0.0 }
 0x54d   : > { %10181 = vpow2.f32 %v5396_v44  ;;  %5441 = vadd.xlane.f32.xlu0 %v5440_v26 }
 0x54e   : > { %10183 = vpow2.f32 %v5406_v53 }
 0x550   : > { %v5328_v17 = vpop.xlane.xlu2 %5327  ;;  %v5322_v33 = vpop.xlane.xlu0 %5321 }
 0x551   : > { %v5368_v58 = vsub.f32 %v13103_v56, %v5322_v33  ;;  %v5370_v27 = vsub.f32 %v13101_v14, %v5328_v17  ;;  %v5340_v43 = vpop.xlane.xlu1 %5339 }
 0x552   : > { %v5374_v57 = vsub.f32 %v13105_v49, %v5340_v43 }
 0x553   : > { %v13228_v42 = vpop.eup %10181  ;;  %v5404_v2 = vmul.f32 1.442695, %v5368_v58  ;;  %v5408_v4 = vmul.f32 1.442695, %v5370_v27 }
 0x554   : > { %v13230_v11 = vpop.eup %10183  ;;  %v5452_v21 = vsel %vm5283_vm10, %v13228_v42, 0.0  ;;  %v5416_v49 = vmul.f32 1.442695, %v5374_v57 }
 0x555   : > { %v5467_v32 = vsel %vm5283_vm10, %v13230_v11, 0.0  ;;  %5453 = vadd.xlane.f32.xlu2 %v5452_v21  ;;  %10185 = vpow2.f32 %v5404_v2 }
 0x556   : > { %5468 = vadd.xlane.f32.xlu0 %v5467_v32  ;;  %10187 = vpow2.f32 %v5408_v4 }
 0x558   : > { %v5313_v5 = vpop.xlane.xlu0 %5312  ;;  %v5331_v56 = vpop.xlane.xlu2 %5330 }
 0x559   : > { %v5365_v29 = vsub.f32 %v13122_v54, %v5313_v5  ;;  %v5371_v24 = vsub.f32 %v13124_v15, %v5331_v56  ;;  %v5337_v39 = vpop.xlane.xlu1 %5336 }
 0x55a   : > { %v5373_v53 = vsub.f32 %v13126_v46, %v5337_v39 }
 0x55b   : > { %v5398_v3 = vmul.f32 1.442695, %v5365_v29  ;;  %v5410_v61 = vmul.f32 1.442695, %v5371_v24  ;;  %v13239_v14 = vpop.eup %10185 }
 0x55c   : > { %v5464_v34 = vsel %vm5283_vm10, %v13239_v14, 0.0  ;;  %v13244_v48 = vpop.eup %10187  ;;  %v5414_v58 = vmul.f32 1.442695, %v5373_v53 }
 0x55d   : > { %10189 = vpow2.f32 %v5398_v3  ;;  %5465 = vadd.xlane.f32.xlu2 %v5464_v34 }
 0x55e   : > { %10191 = vpow2.f32 %v5410_v61 }
 0x560   : > { %v5316_v63 = vpop.xlane.xlu0 %5315 }
 0x561   : > { %v5366_v62 = vsub.f32 %v13137_v28, %v5316_v63  ;;  %v5334_v18 = vpop.xlane.xlu2 %5333  ;;  %v5470_v28 = vsel %vm5283_vm10, %v13244_v48, 0.0 }
 0x562   : > { %v5372_v54 = vsub.f32 %v13142_v35, %v5334_v18  ;;  %v4392_v18 = vadd.f32 %v12996_v8, %v12994_v16  ;;  %v4702_v16 = vld [vmem:[%s14387_s20 + $0xa0] sm:$0xff]  ;;  %v5208_v8 = vpop.f32.mrf.mxu0 }
 0x563   : > { %v13247_v15 = vpop.eup %10189  ;;  %v5400_v44 = vmul.f32 1.442695, %v5366_v62 }
 0x564   : > { %v5412_v26 = vmul.f32 1.442695, %v5372_v54  ;;  %v5455_v17 = vsel %vm5283_vm10, %v13247_v15, 0.0  ;;  %v13253_v33 = vpop.eup %10191  ;;  %v4410_v53 = vadd.f32 %v13004_v30, %v4392_v18  ;;  %v13299_v30 = vadd.f32 %v5208_v8, %v4702_v16 }
 0x565   : > { %10193 = vpow2.f32 %v5400_v44  ;;  %5456 = vadd.xlane.f32.xlu1 %v5455_v17  ;;  %5471 = vadd.xlane.f32.xlu2 %v5470_v28  ;;  %v5473_v35 = vsel %vm5283_vm10, %v13253_v33, 0.0  ;;  %v4320_v44 = vadd.f32 %v12959_v60, %v12957_v36 }
 0x566   : > { %10195 = vpow2.f32 %v5412_v26  ;;  %5474 = vadd.xlane.f32.xlu0 %v5473_v35  ;;  %v5349_v27 = vpop.xlane.xlu1 %5348  ;;  %v4448_v35 = vperm.slane %v12910_v50, 2  ;;  %v4428_v36 = vadd.f32 %v13033_v12, %v4410_v53 }
 0x567   : > { %10197 = vpow2.f32 %v5416_v49  ;;  %v5377_v26 = vsub.f32 %v13156_v23, %v5349_v27  ;;  %v4338_v28 = vadd.f32 %v12961_v10, %v4320_v44  ;;  %v4449_v10 = vperm.slane %v12910_v50, 3 }
 0x568   : > { %v5319_v46 = vpop.xlane.xlu0 %5318  ;;  %10199 = vpow2.f32 %v5414_v58  ;;  %v4512_v27 = vperm.slane %v12918_v9, 2  ;;  %v4472_v12 = vmul.f32 %v4448_v35, %v12991_v22 }
 0x569   : > { %v5367_v2 = vsub.f32 %v13154_v47, %v5319_v46  ;;  %v5422_v60 = vmul.f32 1.442695, %v5377_v26  ;;  %v4356_v58 = vadd.f32 %v13000_v55, %v4338_v28  ;;  %v4496_v46 = vmul.f32 %v4448_v35, %v13010_v20 }
 0x56a   : > { %v5344_v55 = vsel %vm5283_vm10, %v13299_v30, -inf }
 0x56b   : > { %v13260_v21 = vpop.eup %10193  ;;  %v5402_v32 = vmul.f32 1.442695, %v5367_v2  ;;  %v4484_v20 = vmul.f32 %v4448_v35, %v4356_v58  ;;  %v4560_v50 = vadd.f32 %v4512_v27, %v4496_v46 }
 0x56c   : > { %v13262_v43 = vpop.eup %10195  ;;  %v5458_v4 = vsel %vm5283_vm10, %v13260_v21, 0.0 }
 0x56d   : > { %10201 = vpow2.f32 %v5402_v32  ;;  %5459 = vadd.xlane.f32.xlu1 %v5458_v4  ;;  %v5476_v5 = vsel %vm5283_vm10, %v13262_v43, 0.0  ;;  %v13268_v29 = vpop.eup %10197  ;;  %v4485_v4 = vmul.f32 %v4449_v10, %v4428_v36  ;;  %v10117_v36 = vunpack.i.h.bf16 %v13158_v1 }
 0x56e   : > { %5477 = vadd.xlane.f32.xlu0 %v5476_v5  ;;  %v13271_v24 = vpop.eup %10199  ;;  %v5482_v63 = vsel %vm5283_vm10, %v13268_v29, 0.0 }
 0x56f   : > { %v13273_v3 = vpop.xlane.xlu1 %5354  ;;  %v5479_v62 = vsel %vm5283_vm10, %v13271_v24, 0.0 }
 0x570   : > { %v5343_v56 = vpop.xlane.xlu0 %5342  ;;  %v5379_v8 = vsub.f32 %v13172_v40, %v13273_v3 }
 0x571   : > { %v5375_v47 = vsub.f32 %v13170_v45, %v5343_v56  ;;  %v4513_v56 = vperm.slane %v12918_v9, 3 }
 0x573   : > { %v13275_v61 = vpop.eup %10201  ;;  %v5418_v34 = vmul.f32 1.442695, %v5375_v47  ;;  %v13313_v47 = vadd.f32 %v4512_v27, %v4472_v12  ;;  %v13315_v22 = vadd.f32 %v4513_v56, %v4485_v4 }
 0x574   : > { %v5461_v39 = vsel %vm5283_vm10, %v13275_v61, 0.0 }
 0x575   : > { %10203 = vpow2.f32 %v5418_v34  ;;  %5483 = vadd.xlane.f32.xlu1 %v5482_v63  ;;  %5462 = vadd.xlane.f32.xlu2 %v5461_v39  ;;  %v10118_v18 = vpack.i.bf16 %v4560_v50, %v13313_v47 }
 0x576   : > { %5480 = vadd.xlane.f32.xlu0 %v5479_v62  ;;  %v4548_v62 = vadd.f32 %v4512_v27, %v4484_v20 }
 0x577   : > { %v5430_v54 = vpop.xlane.xlu1 %5429 }
 0x578   : > { %v5352_v45 = vpop.xlane.xlu0 %5351  ;;  %10205 = vrcp.f32 %v5430_v54 }
 0x579   : > { %v5378_v5 = vsub.f32 %v13183_v37, %v5352_v45  ;;  %v10116_v45 = vunpack.i.l.bf16 %v13158_v1 }
 0x57b   : > { %v13285_v57 = vpop.eup %10203  ;;  %v5424_v34 = vmul.f32 1.442695, %v5378_v5 }
 0x57c   : > { %v5485_v17 = vsel %vm5283_vm10, %v13285_v57, 0.0 }
 0x57d   : > { %5486 = vadd.xlane.f32.xlu1 %v5485_v17 }
 0x57e   : > { %v10206_v49 = vpop.eup %10205 }
 0x57f   : > { %v5436_v2 = vpop.xlane.xlu2 %5435  ;;  %v5524_v32 = vmul.f32 %v10206_v49, %v13188_v38 }
 0x580   : > { %v5433_v23 = vpop.xlane.xlu0 %5432 }
 0x581   : > { %10207 = vrcp.f32 %v5433_v23  ;;  %9400 = vmatmul.msk.f32.vlgmr.msra.gmra.mxu0 %vm5283_vm10, %v5524_v32  ;;  %v4473_v23 = vmul.f32 %v4449_v10, %v13026_v25 }
 0x582   : > { %10209 = vrcp.f32 %v5436_v2  ;;  %5750 = vmatpush.msra.mxu0 %v12955_v6  ;;  %v10123_v6 = vpack.i.bf16 %v4548_v62, %v13315_v22 }
 0x583   : > { %10211 = vpow2.f32 %v5422_v60  ;;  %v5426_v60 = vmul.f32 1.442695, %v5379_v8  ;;  %v4537_v46 = vadd.f32 %v4513_v56, %v4473_v23 }
 0x585   : > { %5345 = vmax.xlane.f32.xlu1 %v5344_v55 }
 0x587   : > { %v10208_v38 = vpop.eup %10207  ;;  %v5448_v54 = vpop.xlane.xlu2 %5447 }
 0x588   : > { %v10210_v63 = vpop.eup %10209  ;;  %v5525_v37 = vmul.f32 %v10208_v38, %v13192_v31  ;;  %10213 = vrcp.f32 %v5448_v54  ;;  %v10111_v31 = vunpack.i.l.bf16 %v13066_v13 }
 0x589   : > { %v13318_v39 = vpop.eup %10211  ;;  %v5526_v9 = vmul.f32 %v10210_v63, %v13197_v59  ;;  %10215 = vpow2.f32 %v5424_v34  ;;  %v4497_v59 = vmul.f32 %v4449_v10, %v13045_v7 }
 0x58a   : > { %9401 = vmatmul.msk.f32.vlgmr.msra.gmra.mxu1 %vm5283_vm10, %v5525_v37  ;;  %10119 = vrot.lane.b32.xlu0 %v10118_v18, %s10934_s9  ;;  %v5491_v44 = vsel %vm5283_vm10, %v13318_v39, 0.0 }
 0x58b   : > { %5773 = vmatpush.msra.mxu1 %v10116_v45  ;;  %9402 = vmatmul.msk.f32.vlgmr.msra.gmra.mxu2 %vm5283_vm10, %v5526_v9  ;;  %v13335_v28 = vadd.f32 %v4513_v56, %v4497_v59 }
 0x58c   : > { %5796 = vmatpush.msra.mxu2 %v10111_v31 }
 0x58d   : > { %10124 = vrot.lane.b32.xlu2 %v10123_v6, %s10934_s9  ;;  %5492 = vadd.xlane.f32.xlu1 %v5491_v44 }
 0x58e   : > { %v10214_v53 = vpop.eup %10213 }
 0x58f   : > { %v13332_v26 = vpop.eup %10215  ;;  %v5530_v17 = vmul.f32 %v10214_v53, %v13201_v19 }
 0x590   : > { %v5494_v13 = vsel %vm5283_vm10, %v13332_v26, 0.0 }
 0x593   : > { %9406 = vmatmul.msk.f32.vlgmr.msrb.gmra.mxu2 %vm5283_vm10, %v5530_v17 }
 0x594   : > { %5888 = vmatpush.msrb.mxu2 %v4560_v50 }
 0x595   : > { %4677 = vrot.lane.b32.xlu2 %v13335_v28, %s10934_s9  ;;  %5495 = vadd.xlane.f32.xlu1 %v5494_v13 }
 0x59d   : > { %v5439_v16 = vpop.xlane.xlu0 %5438 }
 0x59e   : > { %10217 = vrcp.f32 %v5439_v16 }
 0x5a4   : > { %v10218_v7 = vpop.eup %10217 }
 0x5a5   : > { %v5527_v19 = vmul.f32 %v10218_v7, %v13207_v51  ;;  %v5451_v35 = vpop.xlane.xlu2 %5450 }
 0x5a6   : > { %10219 = vrcp.f32 %v5451_v35 }
 0x5a7   : > { %9403 = vmatmul.msk.f32.vlgmr.msra.gmra.mxu3 %vm5283_vm10, %v5527_v19  ;;  %10221 = vpow2.f32 %v5426_v60 }
 0x5a8   : > { %5819 = vmatpush.msra.mxu3 %v10117_v36 }
 0x5ac   : > { %v10220_v49 = vpop.eup %10219 }
 0x5ad   : > { %v5531_v58 = vmul.f32 %v10220_v49, %v13212_v52  ;;  %v5445_v2 = vpop.xlane.xlu2 %5444  ;;  %v13351_v40 = vpop.eup %10221 }
 0x5ae   : > { %10223 = vrcp.f32 %v5445_v2  ;;  %4673 = vrot.lane.b32.xlu1 %v4537_v46, %s10934_s9  ;;  %v5497_v3 = vsel %vm5283_vm10, %v13351_v40, 0.0 }
 0x5af   : > { %9407 = vmatmul.msk.f32.vlgmr.msrb.gmra.mxu3 %vm5283_vm10, %v5531_v58 }
 0x5b4   : > { %v10224_v1 = vpop.eup %10223  ;;  %5498 = vadd.xlane.f32.xlu0 %v5497_v3 }
 0x5b5   : > { %v5529_v51 = vmul.f32 %v10224_v1, %v13216_v41 }
 0x5b7   : > { %9405 = vmatmul.msk.f32.vlgmr.msrb.gmra.mxu1 %vm5283_vm10, %v5529_v51 }
 0x5b8   : > { %5865 = vmatpush.msrb.mxu1 %v4548_v62 }
 0x5c0   : > { %v5442_v25 = vpop.xlane.xlu0 %5441 }
 0x5c1   : > { %10225 = vrcp.f32 %v5442_v25 }
 0x5c7   : > { %v10226_v52 = vpop.eup %10225 }
 0x5c8   : > { %v5528_v10 = vmul.f32 %v10226_v52, %v13223_v0  ;;  %v5454_v27 = vpop.xlane.xlu2 %5453 }
 0x5c9   : > { %10227 = vrcp.f32 %v5454_v27  ;;  %v5469_v4 = vpop.xlane.xlu0 %5468 }
 0x5ca   : > { %9404 = vmatmul.msk.f32.vlgmr.msrb.gmra.mxu0 %vm5283_vm10, %v5528_v10 }
 0x5cb   : > { %5842 = vmatpush.msrb.mxu0 %v13313_v47 }
 0x5cf   : > { %v10228_v32 = vpop.eup %10227 }
 0x5d0   : > { %v5532_v41 = vmul.f32 %v10228_v32, %v13228_v42  ;;  %v5466_v12 = vpop.xlane.xlu2 %5465 }
 0x5d1   : > { %10229 = vrcp.f32 %v5466_v12 }
 0x5d2   : > { %9408 = vmatmul.msk.f32.vlgmr.msra.gmra.mxu0 %vm5283_vm10, %v5532_v41 }
 0x5d7   : > { %v10230_v5 = vpop.eup %10229 }
 0x5d8   : > { %v5457_v55 = vpop.xlane.xlu1 %5456  ;;  %v5536_v20 = vmul.f32 %v10230_v5, %v13239_v14  ;;  %v5472_v56 = vpop.xlane.xlu2 %5471 }
 0x5d9   : > { %10231 = vrcp.f32 %v5457_v55  ;;  %v5475_v0 = vpop.xlane.xlu0 %5474 }
 0x5da   : > { %9412 = vmatmul.msk.f32.vlgmr.msrb.gmra.mxu0 %vm5283_vm10, %v5536_v20  ;;  %10233 = vrcp.f32 %v5469_v4 }
 0x5df   : > { %v10232_v50 = vpop.eup %10231 }
 0x5e0   : > { %v5533_v38 = vmul.f32 %v10232_v50, %v13247_v15  ;;  %v5460_v47 = vpop.xlane.xlu1 %5459  ;;  %v10234_v42 = vpop.eup %10233 }
 0x5e1   : > { %10235 = vrcp.f32 %v5460_v47  ;;  %v5478_v34 = vpop.xlane.xlu0 %5477  ;;  %v5537_v37 = vmul.f32 %v10234_v42, %v13230_v11 }
 0x5e2   : > { %9409 = vmatmul.msk.f32.vlgmr.msra.gmra.mxu1 %vm5283_vm10, %v5533_v38  ;;  %10237 = vrcp.f32 %v5472_v56 }
 0x5e3   : > { %10239 = vrcp.f32 %v5478_v34 }
 0x5e7   : > { %v10236_v63 = vpop.eup %10235 }
 0x5e8   : > { %v5534_v14 = vmul.f32 %v10236_v63, %v13260_v21  ;;  %v5484_v62 = vpop.xlane.xlu1 %5483  ;;  %v5463_v45 = vpop.xlane.xlu2 %5462 }
 0x5e9   : > { %10241 = vrcp.f32 %v5463_v45  ;;  %v10238_v15 = vpop.eup %10237  ;;  %v5481_v53 = vpop.xlane.xlu0 %5480 }
 0x5ea   : > { %9410 = vmatmul.msk.f32.vlgmr.msra.gmra.mxu2 %vm5283_vm10, %v5534_v14  ;;  %9413 = vmatmul.msk.f32.vlgmr.msrb.gmra.mxu1 %vm5283_vm10, %v5537_v37  ;;  %v10240_v18 = vpop.eup %10239  ;;  %10243 = vrcp.f32 %v5484_v62  ;;  %v5538_v54 = vmul.f32 %v10238_v15, %v13244_v48 }
 0x5eb   : > { %5980 = vmatpush.msra.mxu2 %v4537_v46  ;;  %v5540_v59 = vmul.f32 %v10240_v18, %v13262_v43  ;;  %10245 = vrcp.f32 %v5475_v0  ;;  %v6188_v18 = vld [vmem:[%s11423_s25 + $0xe0] sm:$0xff] }
 0x5ec   : > { %10247 = vrcp.f32 %v5481_v53 }
 0x5ef   : > { %v10242_v9 = vpop.eup %10241 }
 0x5f0   : > { %v10125_v6 = vpop.permute.xlu2 %10124  ;;  %v5487_v31 = vpop.xlane.xlu1 %5486  ;;  %v5535_v11 = vmul.f32 %v10242_v9, %v13275_v61  ;;  %v6184_v9 = vld [vmem:[%s11423_s25 + $0xc0] sm:$0xff] }
 0x5f1   : > { %v10127_v21 = vunpack.i.h.bf16 %v10125_v6  ;;  %v10126_v44 = vunpack.i.l.bf16 %v10125_v6  ;;  %v10244_v17 = vpop.eup %10243  ;;  %v6348_v6 = vunpack.c.3.s8 %v6188_v18 }
 0x5f2   : > { %9414 = vmatmul.msk.f32.vlgmr.msrb.gmra.mxu2 %vm5283_vm10, %v5538_v54  ;;  %9411 = vmatmul.msk.f32.vlgmr.msra.gmra.mxu3 %vm5283_vm10, %v5535_v11  ;;  %v5542_v48 = vmul.f32 %v10244_v17, %v13268_v29  ;;  %v10246_v43 = vpop.eup %10245  ;;  %v6344_v54 = vunpack.c.2.s8 %v6188_v18  ;;  %v6340_v11 = vunpack.c.1.s8 %v6188_v18 }
 0x5f3   : > { %5934 = vmatpush.msra.mxu0 %v10127_v21  ;;  %6072 = vmatpush.msrb.mxu2 %v10126_v44  ;;  %v10248_v7 = vpop.eup %10247  ;;  %v5539_v36 = vmul.f32 %v10246_v43, %v13253_v33  ;;  %v6328_v21 = vunpack.c.2.s8 %v6184_v9  ;;  %v6332_v44 = vunpack.c.3.s8 %v6184_v9  ;;  %v6604_v53 = vcvt.s32.f32 %v6348_v6 }
 0x5f4   : > { %9416 = vmatmul.msk.f32.vlgmr.msra.gmra.mxu0 %vm5283_vm10, %v5540_v59  ;;  %v6600_v59 = vcvt.s32.f32 %v6344_v54  ;;  %v6320_v43 = vunpack.c.0.s8 %v6184_v9 }
 0x5f5   : > { %6026 = vmatpush.msrb.mxu0 %v13335_v28  ;;  %v5541_v28 = vmul.f32 %v10248_v7, %v13271_v24 }
 0x5f8   : > { %v5346_v61 = vpop.xlane.xlu1 %5345  ;;  %v4678_v29 = vpop.permute.xlu2 %4677 }
 0x5f9   : > { %v5376_v13 = vsub.f32 %v13299_v30, %v5346_v61  ;;  %v6796_v61 = vpack.c.bf16 %v6604_v53, %v6600_v59 }
 0x5fa   : > { %9418 = vmatmul.msk.f32.vlgmr.msra.gmra.mxu2 %vm5283_vm10, %v5542_v48  ;;  %v6596_v48 = vcvt.s32.f32 %v6340_v11 }
 0x5fb   : > { %v5420_v16 = vmul.f32 1.442695, %v5376_v13  ;;  %v6204_v13 = vld [vmem:[%s11423_s25 + $0x160] sm:$0xff] }
 0x5fc   : > { %v10120_v8 = vpop.permute.xlu0 %10119 }
 0x5fd   : > { %10249 = vpow2.f32 %v5420_v16  ;;  %v10122_v19 = vunpack.i.h.bf16 %v10120_v8  ;;  %v10121_v35 = vunpack.i.l.bf16 %v10120_v8  ;;  %v6324_v16 = vunpack.c.1.s8 %v6184_v9 }
 0x5fe   : > { %10251 = vrcp.f32 %v5487_v31  ;;  %v13398_v52 = vpop.f32.mrf.mxu0  ;;  %v6336_v31 = vunpack.c.0.s8 %v6188_v18  ;;  %v6584_v8 = vcvt.s32.f32 %v6328_v21  ;;  %v6400_v9 = vunpack.c.0.s8 %v6204_v13  ;;  %v6200_v21 = vld [vmem:[%s11423_s25 + $0x140] sm:$0xff] }
 0x5ff   : > { %5911 = vmatpush.msrb.mxu3 %v10121_v35  ;;  %5957 = vmatpush.msra.mxu1 %v10122_v19  ;;  %v6588_v19 = vcvt.s32.f32 %v6332_v44  ;;  %v6196_v44 = vld [vmem:[%s11423_s25 + $0x120] sm:$0xff]  ;;  %v6392_v59 = vunpack.c.2.s8 %v6200_v21  ;;  %v6396_v53 = vunpack.c.3.s8 %v6200_v21 }
 0x600   : > { %v5493_v60 = vpop.xlane.xlu1 %5492  ;;  %9415 = vmatmul.msk.f32.vlgmr.msrb.gmra.mxu3 %vm5283_vm10, %v5539_v36  ;;  %9417 = vmatmul.msk.f32.vlgmr.msra.gmra.mxu1 %vm5283_vm10, %v5541_v28  ;;  %v6592_v17 = vcvt.s32.f32 %v6336_v31  ;;  %v6180_v36 = vld [vmem:[%s11423_s25 + $0xa0] sm:$0xff]  ;;  %v6408_v28 = vunpack.c.2.s8 %v6204_v13  ;;  %v6656_v31 = vcvt.s32.f32 %v6400_v9 }
 0x601   : > { %6003 = vmatpush.msra.mxu3 %v13315_v22 }
 0x602   : > { %v6792_v7 = vpack.c.bf16 %v6596_v48, %v6592_v17  ;;  %v6384_v17 = vunpack.c.0.s8 %v6200_v21  ;;  %v6388_v48 = vunpack.c.1.s8 %v6200_v21 }
 0x603   : > { %v10250_v30 = vpop.eup %10249  ;;  %6095 = vmatpush.msrb.mxu3 %v4678_v29  ;;  %v6576_v29 = vcvt.s32.f32 %v6320_v43 }
 0x604   : > { %v10252_v23 = vpop.eup %10251  ;;  %v5488_v49 = vsel %vm5283_vm10, %v10250_v30, 0.0 }
 0x605   : > { %5489 = vadd.xlane.f32.xlu2 %v5488_v49  ;;  %v5543_v33 = vmul.f32 %v10252_v23, %v13285_v57  ;;  %v6664_v23 = vcvt.s32.f32 %v6408_v28 }
 0x608   : > { %v5496_v58 = vpop.xlane.xlu1 %5495  ;;  %9419 = vmatmul.msk.f32.vlgmr.msra.gmra.mxu3 %vm5283_vm10, %v5543_v33  ;;  %v6788_v33 = vpack.c.bf16 %v6588_v19, %v6584_v8  ;;  %v6380_v8 = vunpack.c.3.s8 %v6196_v44 }
 0x609   : > { %10253 = vrcp.f32 %v5496_v58  ;;  %v6312_v58 = vunpack.c.2.s8 %v6180_v36 }
 0x60a   : > { %10255 = vrcp.f32 %v5493_v60  ;;  %v6412_v60 = vunpack.c.3.s8 %v6204_v13  ;;  %v6636_v28 = vcvt.s32.f32 %v6380_v8 }
 0x60c   : > { %v6668_v49 = vcvt.s32.f32 %v6412_v60  ;;  %v6368_v60 = vunpack.c.0.s8 %v6196_v44 }
 0x60e   : > { %v13394_v25 = vpop.f32.mrf.mxu2 }
 0x60f   : > { %v10254_v24 = vpop.eup %10253 }
 0x610   : > { %v5546_v46 = vmul.f32 %v10254_v24, %v13332_v26  ;;  %v10256_v2 = vpop.eup %10255  ;;  %v13396_v26 = vpop.f32.mrf.mxu1  ;;  %v6316_v24 = vunpack.c.3.s8 %v6180_v36 }
 0x611   : > { %v5545_v22 = vmul.f32 %v10256_v2, %v13318_v39 }
 0x612   : > { %9422 = vmatmul.msk.f32.vlgmr.msrb.gmra.mxu2 %vm5283_vm10, %v5546_v46  ;;  %v6828_v46 = vpack.c.bf16 %v6668_v49, %v6664_v23 }
 0x614   : > { %6908 = vmatpush.bf16.msra.mxu2 %v6828_v46 }
 0x616   : > { %v13400_v10 = vpop.f32.mrf.mxu2 }
 0x620   : > { %v4674_v1 = vpop.permute.xlu1 %4673 }
 0x621   : > { %6049 = vmatpush.msrb.mxu1 %v4674_v1  ;;  %v6568_v1 = vcvt.s32.f32 %v6312_v58 }
 0x622   : > { %9421 = vmatmul.msk.f32.vlgmr.msrb.gmra.mxu1 %vm5283_vm10, %v5545_v22 }
 0x623   : > { %6890 = vmatpush.bf16.msra.mxu1 %v6796_v61 }
 0x627   : > { %v5499_v51 = vpop.xlane.xlu0 %5498  ;;  %6891 = vmatpush.bf16.msra.mxu1 %v6792_v7  ;;  %v6640_v7 = vcvt.s32.f32 %v6384_v17 }
 0x628   : > { %10257 = vrcp.f32 %v5499_v51  ;;  %v6572_v51 = vcvt.s32.f32 %v6316_v24 }
 0x62a   : > { %v5637_v32 = vpop.f32.mrf.mxu3 }
 0x62b   : > { %6892 = vmatpush.bf16.msra.mxu1 %v6788_v33  ;;  %v6624_v33 = vcvt.s32.f32 %v6368_v60 }
 0x62e   : > { %v10258_v57 = vpop.eup %10257 }
 0x62f   : > { %v5547_v3 = vmul.f32 %v10258_v57, %v13351_v40  ;;  %v6304_v57 = vunpack.c.0.s8 %v6180_v36 }
 0x631   : > { %9423 = vmatmul.msk.f32.vlgmr.msrb.gmra.mxu3 %vm5283_vm10, %v5547_v3  ;;  %v6308_v3 = vunpack.c.1.s8 %v6180_v36 }
 0x632   : > { %v13407_v5 = vpop.f32.mrf.mxu3 }
 0x634   : > { %v13402_v39 = vpop.f32.mrf.mxu1 }
 0x647   : > { %v5660_v27 = vpop.f32.mrf.mxu0 }
 0x648   : > { %v10138_v35 = vpack.i.bf16 %v5660_v27, %v5637_v32  ;;  %v6176_v27 = vld [vmem:[%s11423_s25 + $0x80] sm:$0xff] }
 0x649   : > { %v6296_v32 = vunpack.c.2.s8 %v6176_v27  ;;  %v6292_v18 = vunpack.c.1.s8 %v6176_v27 }
 0x64b   : > { %v6548_v6 = vcvt.s32.f32 %v6292_v18 }
 0x64f   : > { %v13405_v40 = vpop.f32.mrf.mxu0 }
 0x657   : > { %v13409_v20 = vpop.f32.mrf.mxu0 }
 0x65f   : > { %v5775_v41 = vpop.f32.mrf.mxu1 }
 0x667   : > { %v13417_v63 = vpop.f32.mrf.mxu1 }
 0x66d   : > { %v5798_v12 = vpop.f32.mrf.mxu2 }
 0x66e   : > { %v10143_v4 = vpack.i.bf16 %v5798_v12, %v5775_v41  ;;  %v6780_v41 = vpack.c.bf16 %v6572_v51, %v6568_v1  ;;  %v6560_v12 = vcvt.s32.f32 %v6304_v57  ;;  %v6220_v57 = vld [vmem:[%s11423_s25 + $0x1e0] sm:$0xff] }
 0x670   : > { %10144 = vrot.lane.b32.xlu0 %v10143_v4, %s10934_s9  ;;  %v6564_v4 = vcvt.s32.f32 %v6308_v3 }
 0x671   : > { %v5936_v38 = vpop.f32.mrf.mxu0 }
 0x675   : > { %v13411_v0 = vpop.f32.mrf.mxu3  ;;  %v13415_v34 = vpop.f32.mrf.mxu2 }
 0x678   : > { %v5490_v55 = vpop.xlane.xlu2 %5489 }
 0x679   : > { %10259 = vrcp.f32 %v5490_v55  ;;  %v6300_v55 = vunpack.c.3.s8 %v6176_v27 }
 0x67d   : > { %v13419_v37 = vpop.f32.mrf.mxu2  ;;  %v5959_v14 = vpop.f32.mrf.mxu1 }
 0x67f   : > { %v10260_v50 = vpop.eup %10259 }
 0x680   : > { %v5544_v56 = vmul.f32 %v10260_v50, %v10250_v30  ;;  %v6580_v30 = vcvt.s32.f32 %v6324_v16  ;;  %v6376_v16 = vunpack.c.2.s8 %v6196_v44 }
 0x682   : > { %9420 = vmatmul.msk.f32.vlgmr.msrb.gmra.mxu0 %vm5283_vm10, %v5544_v56  ;;  %v6784_v22 = vpack.c.bf16 %v6580_v30, %v6576_v29  ;;  %v6372_v29 = vunpack.c.1.s8 %v6196_v44  ;;  %v6192_v30 = vld [vmem:[%s11423_s25 + $0x100] sm:$0xff] }
 0x683   : > { %v5913_v47 = vpop.f32.mrf.mxu3  ;;  %v6360_v23 = vunpack.c.2.s8 %v6192_v30  ;;  %v6364_v24 = vunpack.c.3.s8 %v6192_v30  ;;  %v6352_v3 = vunpack.c.0.s8 %v6192_v30 }
 0x684   : > { %v10128_v42 = vpack.i.bf16 %v5936_v38, %v5913_v47  ;;  %6893 = vmatpush.bf16.msra.mxu1 %v6784_v22  ;;  %v6776_v38 = vpack.c.bf16 %v6564_v4, %v6560_v12  ;;  %v6552_v47 = vcvt.s32.f32 %v6296_v32  ;;  %v6628_v58 = vcvt.s32.f32 %v6372_v29 }
 0x685   : > { %v6616_v22 = vcvt.s32.f32 %v6360_v23  ;;  %v6620_v1 = vcvt.s32.f32 %v6364_v24  ;;  %v6472_v32 = vunpack.c.2.s8 %v6220_v57  ;;  %v6608_v12 = vcvt.s32.f32 %v6352_v3  ;;  %v6164_v24 = vld [vmem:[%s11423_s25 + $0x20] sm:$0xff] }
 0x686   : > { %10129 = vrot.lane.b32.xlu1 %v10128_v42, %s10934_s9  ;;  %v6556_v42 = vcvt.s32.f32 %v6300_v55  ;;  %v6808_v46 = vpack.c.bf16 %v6628_v58, %v6624_v33  ;;  %v6464_v55 = vunpack.c.0.s8 %v6220_v57 }
 0x687   : > { %v6804_v51 = vpack.c.bf16 %v6620_v1, %v6616_v22 }
 0x688   : > { %6894 = vmatpush.bf16.msra.mxu1 %v6780_v41  ;;  %v6476_v41 = vunpack.c.3.s8 %v6220_v57  ;;  %v6720_v18 = vcvt.s32.f32 %v6464_v55 }
 0x68b   : > { %v13427_v2 = vpop.f32.mrf.mxu3 }
 0x68c   : > { %6895 = vmatpush.bf16.msra.mxu1 %v6776_v38  ;;  %v6216_v38 = vld [vmem:[%s11423_s25 + $0x1c0] sm:$0xff] }
 0x68d   : > { %v6460_v21 = vunpack.c.3.s8 %v6216_v38  ;;  %v6452_v8 = vunpack.c.1.s8 %v6216_v38 }
 0x695   : > { %v6074_v62 = vpop.f32.mrf.mxu2 }
 0x69f   : > { %v6051_v45 = vpop.f32.mrf.mxu1 }
 0x6a0   : > { %v10133_v15 = vpack.i.bf16 %v6074_v62, %v6051_v45  ;;  %v6772_v62 = vpack.c.bf16 %v6556_v42, %v6552_v47  ;;  %v10153_v45 = vpack.i.bf16 %v13411_v0, %v13402_v39  ;;  %v6648_v39 = vcvt.s32.f32 %v6392_v59 }
 0x6a1   : > { %v6652_v0 = vcvt.s32.f32 %v6396_v53  ;;  %v6728_v47 = vcvt.s32.f32 %v6472_v32  ;;  %v6732_v42 = vcvt.s32.f32 %v6476_v41  ;;  %v6248_v41 = vunpack.c.2.s8 %v6164_v24 }
 0x6a2   : > { %10134 = vrot.lane.b32.xlu1 %v10133_v15, %s10934_s9  ;;  %6896 = vmatpush.bf16.msra.mxu1 %v6772_v62  ;;  %v6288_v15 = vunpack.c.0.s8 %v6176_v27  ;;  %v6356_v27 = vunpack.c.1.s8 %v6192_v30  ;;  %v6708_v30 = vcvt.s32.f32 %v6452_v8 }
 0x6a3   : > { %v6820_v19 = vpack.c.bf16 %v6652_v0, %v6648_v39  ;;  %v6168_v0 = vld [vmem:[%s11423_s25 + $0x40] sm:$0xff] }
 0x6a4   : > { %v6544_v54 = vcvt.s32.f32 %v6288_v15  ;;  %v6612_v4 = vcvt.s32.f32 %v6356_v27  ;;  %v6264_v23 = vunpack.c.2.s8 %v6168_v0  ;;  %v6256_v58 = vunpack.c.0.s8 %v6168_v0 }
 0x6a5   : > { %v6260_v1 = vunpack.c.1.s8 %v6168_v0 }
 0x6a6   : > { %v6768_v61 = vpack.c.bf16 %v6548_v6, %v6544_v54  ;;  %v6800_v15 = vpack.c.bf16 %v6612_v4, %v6608_v12  ;;  %v6860_v6 = vpack.c.bf16 %v6732_v42, %v6728_v47  ;;  %v6504_v47 = vcvt.s32.f32 %v6248_v41 }
 0x6a7   : > { %v6516_v32 = vcvt.s32.f32 %v6260_v1 }
 0x6a8   : > { %6897 = vmatpush.bf16.msra.mxu1 %v6768_v61  ;;  %6926 = vmatpush.bf16.msra.mxu3 %v6860_v6  ;;  %v6716_v61 = vcvt.s32.f32 %v6460_v21  ;;  %v6240_v21 = vunpack.c.0.s8 %v6164_v24 }
 0x6aa   : > { %10139 = vrot.lane.b32.xlu1 %v10138_v35, %s10934_s9  ;;  %v6632_v35 = vcvt.s32.f32 %v6376_v16 }
 0x6ac   : > { %v6812_v49 = vpack.c.bf16 %v6636_v28, %v6632_v35 }
 0x6b4   : > { %v6097_v50 = vpop.f32.mrf.mxu3 }
 0x6b5   : > { %v10148_v56 = vpack.i.bf16 %v6097_v50, %v5959_v14  ;;  %v6404_v14 = vunpack.c.1.s8 %v6204_v13  ;;  %v6644_v13 = vcvt.s32.f32 %v6388_v48  ;;  %v6468_v50 = vunpack.c.1.s8 %v6220_v57 }
 0x6b6   : > { %v6512_v57 = vcvt.s32.f32 %v6256_v58  ;;  %v6221_v58 = vld [vmem:[%s11423_s25 + $0x1e8] sm:$0xff] }
 0x6b7   : > { %10149 = vrot.lane.b32.xlu1 %v10148_v56, %s10934_s9  ;;  %v6660_v11 = vcvt.s32.f32 %v6404_v14  ;;  %v6816_v36 = vpack.c.bf16 %v6644_v13, %v6640_v7  ;;  %v6172_v56 = vld [vmem:[%s11423_s25 + $0x60] sm:$0xff]  ;;  %v6724_v9 = vcvt.s32.f32 %v6468_v50  ;;  %v6456_v14 = vunpack.c.2.s8 %v6216_v38 }
 0x6b8   : > { %v6280_v62 = vunpack.c.2.s8 %v6172_v56  ;;  %v6276_v39 = vunpack.c.1.s8 %v6172_v56  ;;  %v6448_v13 = vunpack.c.0.s8 %v6216_v38  ;;  %v6252_v50 = vunpack.c.3.s8 %v6164_v24 }
 0x6b9   : > { %v6824_v43 = vpack.c.bf16 %v6660_v11, %v6656_v31  ;;  %v6856_v53 = vpack.c.bf16 %v6724_v9, %v6720_v18  ;;  %v6712_v17 = vcvt.s32.f32 %v6456_v14  ;;  %v6752_v38 = vpack.c.bf16 %v6516_v32, %v6512_v57  ;;  %v6173_v32 = vld [vmem:[%s11423_s25 + $0x68] sm:$0xff] }
 0x6ba   : > { %v6536_v31 = vcvt.s32.f32 %v6280_v62  ;;  %v6532_v60 = vcvt.s32.f32 %v6276_v39  ;;  %v6704_v29 = vcvt.s32.f32 %v6448_v13  ;;  %v6508_v42 = vcvt.s32.f32 %v6252_v50  ;;  %v6189_v50 = vld [vmem:[%s11423_s25 + $0xe8] sm:$0xff] }
 0x6bb   : > { %6909 = vmatpush.bf16.msra.mxu2 %v6824_v43  ;;  %v6272_v43 = vunpack.c.0.s8 %v6172_v56  ;;  %6927 = vmatpush.bf16.msra.mxu3 %v6856_v53  ;;  %v6477_v1 = vunpack.c.3.s8 %v6221_v58 }
 0x6bc   : > { %v6748_v14 = vpack.c.bf16 %v6508_v42, %v6504_v47  ;;  %v6469_v47 = vunpack.c.1.s8 %v6221_v58 }
 0x6bd   : > { %v6528_v28 = vcvt.s32.f32 %v6272_v43  ;;  %v6496_v43 = vcvt.s32.f32 %v6240_v21 }
 0x6bf   : > { %10154 = vrot.lane.b32.xlu1 %v10153_v45, %s10934_s9  ;;  %6910 = vmatpush.bf16.msra.mxu2 %v6820_v19  ;;  %v6284_v45 = vunpack.c.3.s8 %v6172_v56  ;;  %v6212_v19 = vld [vmem:[%s11423_s25 + $0x1a0] sm:$0xff]  ;;  %s14389_s9 = scalar_lea.vmem [#allocation13], %s11391_s2 }
 0x6c0   : > { %v6440_v33 = vunpack.c.2.s8 %v6212_v19  ;;  %v6432_v4 = vunpack.c.0.s8 %v6212_v19  ;;  %v6436_v55 = vunpack.c.1.s8 %v6212_v19  ;;  %v6208_v56 = vld [vmem:[%s11423_s25 + $0x180] sm:$0xff] }
 0x6c1   : > { %v6540_v11 = vcvt.s32.f32 %v6284_v45  ;;  %v6424_v62 = vunpack.c.2.s8 %v6208_v56  ;;  %v6428_v45 = vunpack.c.3.s8 %v6208_v56  ;;  %v6420_v53 = vunpack.c.1.s8 %v6208_v56 }
 0x6c2   : > { %v6696_v27 = vcvt.s32.f32 %v6440_v33  ;;  %v6688_v18 = vcvt.s32.f32 %v6432_v4  ;;  %v6692_v9 = vcvt.s32.f32 %v6436_v55  ;;  %v6733_v55 = vcvt.s32.f32 %v6477_v1 }
 0x6c3   : > { %6911 = vmatpush.bf16.msra.mxu2 %v6816_v36  ;;  %v6764_v48 = vpack.c.bf16 %v6540_v11, %v6536_v31  ;;  %v6852_v36 = vpack.c.bf16 %v6716_v61, %v6712_v17  ;;  %v6684_v6 = vcvt.s32.f32 %v6428_v45 }
 0x6c4   : > { %v6840_v31 = vpack.c.bf16 %v6692_v9, %v6688_v18  ;;  %v6281_v18 = vunpack.c.2.s8 %v6173_v32  ;;  %v6285_v9 = vunpack.c.3.s8 %v6173_v32 }
 0x6c5   : > { %6872 = vmatpush.bf16.msra.mxu0 %v6764_v48  ;;  %6928 = vmatpush.bf16.msra.mxu3 %v6852_v36 }
 0x6c6   : > { %v6537_v21 = vcvt.s32.f32 %v6281_v18  ;;  %v6213_v18 = vld [vmem:[%s11423_s25 + $0x1a8] sm:$0xff] }
 0x6c7   : > { %6912 = vmatpush.bf16.msra.mxu2 %v6812_v49  ;;  %v6268_v49 = vunpack.c.3.s8 %v6168_v0  ;;  %v6160_v0 = vld [vmem:[%s11423_s25] sm:$0xff] }
 0x6c8   : > { %v6232_v13 = vunpack.c.2.s8 %v6160_v0  ;;  %v6236_v8 = vunpack.c.3.s8 %v6160_v0 }
 0x6c9   : > { %v6524_v22 = vcvt.s32.f32 %v6268_v49 }
 0x6cb   : > { %6913 = vmatpush.bf16.msra.mxu2 %v6808_v46  ;;  %v6520_v46 = vcvt.s32.f32 %v6264_v23  ;;  %v6492_v23 = vcvt.s32.f32 %v6236_v8 }
 0x6cd   : > { %v6756_v3 = vpack.c.bf16 %v6524_v22, %v6520_v46  ;;  %v6473_v22 = vunpack.c.2.s8 %v6221_v58 }
 0x6cf   : > { %6914 = vmatpush.bf16.msra.mxu2 %v6804_v51  ;;  %v6848_v51 = vpack.c.bf16 %v6708_v30, %v6704_v29  ;;  %v6488_v30 = vcvt.s32.f32 %v6232_v13  ;;  %v6729_v4 = vcvt.s32.f32 %v6473_v22  ;;  %v6185_v22 = vld [vmem:[%s11423_s25 + $0xc8] sm:$0xff] }
 0x6d1   : > { %6929 = vmatpush.bf16.msra.mxu3 %v6848_v51  ;;  %v6740_v49 = vpack.c.bf16 %v6492_v23, %v6488_v30  ;;  %v6337_v30 = vunpack.c.0.s8 %v6189_v50  ;;  %v6341_v23 = vunpack.c.1.s8 %v6189_v50 }
 0x6d3   : > { %6915 = vmatpush.bf16.msra.mxu2 %v6800_v15 }
 0x6e2   : > { %v10145_v54 = vpop.permute.xlu0 %10144 }
 0x6e3   : > { %v10147_v44 = vunpack.i.h.bf16 %v10145_v54  ;;  %v10146_v59 = vunpack.i.l.bf16 %v10145_v54  ;;  %v6680_v54 = vcvt.s32.f32 %v6424_v62  ;;  %v6201_v62 = vld [vmem:[%s11423_s25 + $0x148] sm:$0xff] }
 0x6e5   : > { %v6152_v16 = vsel %vm4706_vm9, %v13407_v5, %v10147_v44  ;;  %v6151_v7 = vsel %vm4706_vm9, %v13400_v10, %v10146_v59  ;;  %v6760_v5 = vpack.c.bf16 %v6532_v60, %v6528_v28  ;;  %v6444_v10 = vunpack.c.3.s8 %v6212_v19 }
 0x6e6   : > { %v13446_v35 = vpack.c.bf16 %v6152_v16, %v6151_v7  ;;  %v6836_v11 = vpack.c.bf16 %v6684_v6, %v6680_v54  ;;  %v6244_v44 = vunpack.c.1.s8 %v6164_v24  ;;  %v6416_v59 = vunpack.c.0.s8 %v6208_v56 }
 0x6e7   : > { %6873 = vmatpush.bf16.msra.mxu0 %v6760_v5  ;;  %v6700_v12 = vcvt.s32.f32 %v6444_v10  ;;  %v6676_v7 = vcvt.s32.f32 %v6420_v53  ;;  %v6224_v5 = vunpack.c.0.s8 %v6160_v0  ;;  %v6205_v10 = vld [vmem:[%s11423_s25 + $0x168] sm:$0xff]  ;;  %v6725_v6 = vcvt.s32.f32 %v6469_v47 }
 0x6e8   : > { %6898 = vmatmul.bf16.vlgmr.msra.gmra.mxu1 %v13446_v35  ;;  %v6500_v39 = vcvt.s32.f32 %v6244_v44  ;;  %v6672_v16 = vcvt.s32.f32 %v6416_v59  ;;  %v6409_v24 = vunpack.c.2.s8 %v6205_v10  ;;  %v6413_v46 = vunpack.c.3.s8 %v6205_v10 }
 0x6e9   : > { %v6844_v15 = vpack.c.bf16 %v6700_v12, %v6696_v27  ;;  %v6480_v33 = vcvt.s32.f32 %v6224_v5  ;;  %v6401_v57 = vunpack.c.0.s8 %v6205_v10  ;;  %v6465_v27 = vunpack.c.0.s8 %v6221_v58 }
 0x6ea   : > { %v6744_v28 = vpack.c.bf16 %v6500_v39, %v6496_v43  ;;  %v6832_v29 = vpack.c.bf16 %v6676_v7, %v6672_v16  ;;  %v6665_v41 = vcvt.s32.f32 %v6409_v24  ;;  %v6669_v12 = vcvt.s32.f32 %v6413_v46  ;;  %v6169_v46 = vld [vmem:[%s11423_s25 + $0x48] sm:$0xff] }
 0x6eb   : > { %6874 = vmatpush.bf16.msra.mxu0 %v6756_v3  ;;  %6930 = vmatpush.bf16.msra.mxu3 %v6844_v15  ;;  %v6405_v3 = vunpack.c.1.s8 %v6205_v10  ;;  %v6657_v56 = vcvt.s32.f32 %v6401_v57  ;;  %v6721_v42 = vcvt.s32.f32 %v6465_v27  ;;  %v6861_v15 = vpack.c.bf16 %v6733_v55, %v6729_v4  ;;  %v6197_v27 = vld [vmem:[%s11423_s25 + $0x128] sm:$0xff] }
 0x6ec   : > { %v6829_v45 = vpack.c.bf16 %v6669_v12, %v6665_v41  ;;  %v6541_v44 = vcvt.s32.f32 %v6285_v9  ;;  %v6393_v59 = vunpack.c.2.s8 %v6201_v62  ;;  %v6397_v53 = vunpack.c.3.s8 %v6201_v62 }
 0x6ed   : > { %v6385_v5 = vunpack.c.0.s8 %v6201_v62  ;;  %v6593_v58 = vcvt.s32.f32 %v6337_v30  ;;  %v6597_v24 = vcvt.s32.f32 %v6341_v23  ;;  %v6265_v12 = vunpack.c.2.s8 %v6169_v46 }
 0x6ee   : > { %6980 = vmatpush.bf16.msrb.mxu2 %v6829_v45  ;;  %v6765_v39 = vpack.c.bf16 %v6541_v44, %v6537_v21  ;;  %v6653_v16 = vcvt.s32.f32 %v6397_v53  ;;  %v6269_v4 = vunpack.c.3.s8 %v6169_v46  ;;  %v6377_v45 = vunpack.c.2.s8 %v6197_v27 }
 0x6ef   : > { %6875 = vmatpush.bf16.msra.mxu0 %v6752_v38  ;;  %6931 = vmatpush.bf16.msra.mxu3 %v6840_v31  ;;  %v6661_v38 = vcvt.s32.f32 %v6405_v3  ;;  %v6345_v31 = vunpack.c.2.s8 %v6189_v50  ;;  %v6641_v1 = vcvt.s32.f32 %v6385_v5  ;;  %v6793_v41 = vpack.c.bf16 %v6597_v24, %v6593_v58  ;;  %v6181_v58 = vld [vmem:[%s11423_s25 + $0xa8] sm:$0xff] }
 0x6f0   : > { %v6633_v21 = vcvt.s32.f32 %v6377_v45  ;;  %v6433_v23 = vunpack.c.0.s8 %v6213_v18 }
 0x6f1   : > { %v6825_v54 = vpack.c.bf16 %v6661_v38, %v6657_v56  ;;  %v6329_v56 = vunpack.c.2.s8 %v6185_v22  ;;  %v6333_v38 = vunpack.c.3.s8 %v6185_v22 }
 0x6f3   : > { %6876 = vmatpush.bf16.msra.mxu0 %v6748_v14  ;;  %6932 = vmatpush.bf16.msra.mxu3 %v6836_v11  ;;  %v6217_v14 = vld [vmem:[%s11423_s25 + $0x1c8] sm:$0xff]  ;;  %v6349_v11 = vunpack.c.3.s8 %v6189_v50 }
 0x6f4   : > { %v6457_v43 = vunpack.c.2.s8 %v6217_v14  ;;  %v6461_v7 = vunpack.c.3.s8 %v6217_v14  ;;  %6981 = vmatpush.bf16.msrb.mxu2 %v6825_v54  ;;  %v6453_v57 = vunpack.c.1.s8 %v6217_v14 }
 0x6f6   : > { %v6713_v8 = vcvt.s32.f32 %v6457_v43  ;;  %v6709_v50 = vcvt.s32.f32 %v6453_v57 }
 0x6f7   : > { %6877 = vmatpush.bf16.msra.mxu0 %v6744_v28  ;;  %6933 = vmatpush.bf16.msra.mxu3 %v6832_v29  ;;  %v6273_v28 = vunpack.c.0.s8 %v6173_v32  ;;  %v6277_v29 = vunpack.c.1.s8 %v6173_v32 }
 0x6f8   : > { %v10130_v17 = vpop.permute.xlu1 %10129 }
 0x6f9   : > { %v10132_v48 = vunpack.i.h.bf16 %v10130_v17  ;;  %v10131_v61 = vunpack.i.l.bf16 %v10130_v17  ;;  %v6857_v17 = vpack.c.bf16 %v6725_v6, %v6721_v42  ;;  %v6533_v10 = vcvt.s32.f32 %v6277_v29 }
 0x6fa   : > { %v6521_v42 = vcvt.s32.f32 %v6265_v12  ;;  %v6585_v6 = vcvt.s32.f32 %v6329_v56 }
 0x6fb   : > { %v6155_v19 = vsel %vm4706_vm9, %v13417_v63, %v10132_v48  ;;  %v6154_v36 = vsel %vm4706_vm9, %v13409_v20, %v10131_v61  ;;  %v6228_v63 = vunpack.c.1.s8 %v6160_v0  ;;  %6878 = vmatpush.bf16.msra.mxu0 %v6740_v49  ;;  %6998 = vmatpush.bf16.msrb.mxu3 %v6861_v15  ;;  %v6601_v48 = vcvt.s32.f32 %v6345_v31 }
 0x6fc   : > { %v13456_v60 = vpack.c.bf16 %v6155_v19, %v6154_v36  ;;  %v6605_v61 = vcvt.s32.f32 %v6349_v11  ;;  %v6649_v0 = vcvt.s32.f32 %v6393_v59  ;;  %v6717_v36 = vcvt.s32.f32 %v6461_v7 }
 0x6fd   : > { %v6484_v20 = vcvt.s32.f32 %v6228_v63  ;;  %v6389_v63 = vunpack.c.1.s8 %v6201_v62  ;;  %v6525_v62 = vcvt.s32.f32 %v6269_v4  ;;  %v6381_v15 = vunpack.c.3.s8 %v6197_v27 }
 0x6fe   : > { %6916 = vmatmul.bf16.vlgmr.msra.gmra.mxu2 %v13456_v60  ;;  %v6797_v13 = vpack.c.bf16 %v6605_v61, %v6601_v48  ;;  %v6821_v19 = vpack.c.bf16 %v6653_v16, %v6649_v0  ;;  %v6853_v49 = vpack.c.bf16 %v6717_v36, %v6713_v8  ;;  %v6589_v11 = vcvt.s32.f32 %v6333_v38 }
 0x6ff   : > { %v6736_v51 = vpack.c.bf16 %v6484_v20, %v6480_v33  ;;  %6999 = vmatpush.bf16.msrb.mxu3 %v6857_v17  ;;  %v6449_v33 = vunpack.c.0.s8 %v6217_v14  ;;  %v6529_v20 = vcvt.s32.f32 %v6273_v28  ;;  %v6757_v31 = vpack.c.bf16 %v6525_v62, %v6521_v42 }
 0x700   : > { %6962 = vmatpush.bf16.msrb.mxu1 %v6797_v13  ;;  %6982 = vmatpush.bf16.msrb.mxu2 %v6821_v19  ;;  %v6637_v44 = vcvt.s32.f32 %v6381_v15  ;;  %v6441_v17 = vunpack.c.2.s8 %v6213_v18  ;;  %v6445_v48 = vunpack.c.3.s8 %v6213_v18  ;;  %v6789_v43 = vpack.c.bf16 %v6589_v11, %v6585_v6 }
 0x701   : > { %6879 = vmatpush.bf16.msra.mxu0 %v6736_v51  ;;  %v6645_v51 = vcvt.s32.f32 %v6389_v63  ;;  %v6705_v3 = vcvt.s32.f32 %v6449_v33  ;;  %v6761_v32 = vpack.c.bf16 %v6533_v10, %v6529_v20  ;;  %v6257_v0 = vunpack.c.0.s8 %v6169_v46 }
 0x702   : > { %v6697_v16 = vcvt.s32.f32 %v6441_v17  ;;  %v6701_v7 = vcvt.s32.f32 %v6445_v48  ;;  %v6261_v13 = vunpack.c.1.s8 %v6169_v46  ;;  %v6321_v8 = vunpack.c.0.s8 %v6185_v22 }
 0x703   : > { %7000 = vmatpush.bf16.msrb.mxu3 %v6853_v49  ;;  %v6817_v55 = vpack.c.bf16 %v6645_v51, %v6641_v1  ;;  %v6849_v54 = vpack.c.bf16 %v6709_v50, %v6705_v3  ;;  %v6369_v19 = vunpack.c.0.s8 %v6197_v27  ;;  %v6373_v36 = vunpack.c.1.s8 %v6197_v27  ;;  %v6165_v49 = vld [vmem:[%s11423_s25 + $0x28] sm:$0xff] }
 0x704   : > { %6963 = vmatpush.bf16.msrb.mxu1 %v6793_v41  ;;  %v6845_v28 = vpack.c.bf16 %v6701_v7, %v6697_v16  ;;  %v6517_v29 = vcvt.s32.f32 %v6261_v13  ;;  %v6577_v30 = vcvt.s32.f32 %v6321_v8  ;;  %v6437_v10 = vunpack.c.1.s8 %v6213_v18  ;;  %v6209_v50 = vld [vmem:[%s11423_s25 + $0x188] sm:$0xff] }
 0x705   : > { %6944 = vmatpush.bf16.msrb.mxu0 %v6765_v39  ;;  %6983 = vmatpush.bf16.msrb.mxu2 %v6817_v55  ;;  %v6813_v39 = vpack.c.bf16 %v6637_v44, %v6633_v21  ;;  %v6625_v33 = vcvt.s32.f32 %v6369_v19  ;;  %v6629_v20 = vcvt.s32.f32 %v6373_v36  ;;  %v6689_v1 = vcvt.s32.f32 %v6433_v23 }
 0x706   : > { %v6693_v3 = vcvt.s32.f32 %v6437_v10  ;;  %v6249_v27 = vunpack.c.2.s8 %v6165_v49  ;;  %v6253_v4 = vunpack.c.3.s8 %v6165_v49  ;;  %v6313_v55 = vunpack.c.2.s8 %v6181_v58 }
 0x707   : > { %7001 = vmatpush.bf16.msrb.mxu3 %v6849_v54  ;;  %v6809_v57 = vpack.c.bf16 %v6629_v20, %v6625_v33  ;;  %v6317_v42 = vunpack.c.3.s8 %v6181_v58  ;;  %v6245_v11 = vunpack.c.1.s8 %v6165_v49  ;;  %v6417_v8 = vunpack.c.0.s8 %v6209_v50 }
 0x708   : > { %6964 = vmatpush.bf16.msrb.mxu1 %v6789_v43  ;;  %v6841_v38 = vpack.c.bf16 %v6693_v3, %v6689_v1  ;;  %v6509_v62 = vcvt.s32.f32 %v6253_v4  ;;  %v6569_v45 = vcvt.s32.f32 %v6313_v55  ;;  %v6305_v43 = vunpack.c.0.s8 %v6181_v58 }
 0x709   : > { %6945 = vmatpush.bf16.msrb.mxu0 %v6761_v32  ;;  %6984 = vmatpush.bf16.msrb.mxu2 %v6813_v39  ;;  %v6193_v32 = vld [vmem:[%s11423_s25 + $0x108] sm:$0xff]  ;;  %v6501_v48 = vcvt.s32.f32 %v6245_v11  ;;  %v6309_v39 = vunpack.c.1.s8 %v6181_v58 }
 0x70a   : > { %v6361_v15 = vunpack.c.2.s8 %v6193_v32  ;;  %v6365_v18 = vunpack.c.3.s8 %v6193_v32  ;;  %v6353_v7 = vunpack.c.0.s8 %v6193_v32  ;;  %v6357_v13 = vunpack.c.1.s8 %v6193_v32 }
 0x70b   : > { %7002 = vmatpush.bf16.msrb.mxu3 %v6845_v28  ;;  %v6561_v19 = vcvt.s32.f32 %v6305_v43  ;;  %v6565_v36 = vcvt.s32.f32 %v6309_v39  ;;  %v6421_v28 = vunpack.c.1.s8 %v6209_v50 }
 0x70c   : > { %v6617_v6 = vcvt.s32.f32 %v6361_v15  ;;  %v6613_v23 = vcvt.s32.f32 %v6357_v13 }
 0x70d   : > { %6946 = vmatpush.bf16.msrb.mxu0 %v6757_v31  ;;  %6985 = vmatpush.bf16.msrb.mxu2 %v6809_v57  ;;  %v6621_v31 = vcvt.s32.f32 %v6365_v18  ;;  %v6677_v33 = vcvt.s32.f32 %v6421_v28 }
 0x70f   : > { %7003 = vmatpush.bf16.msrb.mxu3 %v6841_v38  ;;  %v6805_v17 = vpack.c.bf16 %v6621_v31, %v6617_v6 }
 0x711   : > { %6986 = vmatpush.bf16.msrb.mxu2 %v6805_v17 }
 0x714   : > { %v10135_v47 = vpop.permute.xlu1 %10134 }
 0x715   : > { %v10137_v9 = vunpack.i.h.bf16 %v10135_v47  ;;  %v10136_v14 = vunpack.i.l.bf16 %v10135_v47  ;;  %v6505_v47 = vcvt.s32.f32 %v6249_v27 }
 0x717   : > { %v6157_v59 = vsel %vm4706_vm9, %v13419_v37, %v10136_v14  ;;  %v6158_v53 = vsel %vm4706_vm9, %v13427_v2, %v10137_v9  ;;  %v6513_v37 = vcvt.s32.f32 %v6257_v0  ;;  %v6325_v2 = vunpack.c.1.s8 %v6185_v22  ;;  %v13488_v0 = vld [vmem:[%s11423_s25 + $0x8] sm:$0xff] }
 0x718   : > { %v13473_v61 = vpack.c.bf16 %v6158_v53, %v6157_v59  ;;  %v6429_v9 = vunpack.c.3.s8 %v6209_v50  ;;  %v6241_v14 = vunpack.c.0.s8 %v6165_v49  ;;  %v6749_v54 = vpack.c.bf16 %v6509_v62, %v6505_v47 }
 0x719   : > { %v6581_v63 = vcvt.s32.f32 %v6325_v2  ;;  %v6753_v22 = vpack.c.bf16 %v6517_v29, %v6513_v37  ;;  %v6177_v37 = vld [vmem:[%s11423_s25 + $0x88] sm:$0xff]  ;;  %v13492_v29 = vld [vmem:[%s11423_s25 + $0x170] sm:$0xff]  ;;  %v6673_v49 = vcvt.s32.f32 %v6417_v8  ;;  %v6237_v20 = vunpack.c.3.s8 %v13488_v0 }
 0x71a   : > { %6934 = vmatmul.bf16.vlgmr.msra.gmra.mxu3 %v13473_v61  ;;  %v6685_v59 = vcvt.s32.f32 %v6429_v9  ;;  %v6497_v53 = vcvt.s32.f32 %v6241_v14  ;;  %v6297_v10 = vunpack.c.2.s8 %v6177_v37  ;;  %v6410_v1 = vunpack.c.2.s8 %v13492_v29 }
 0x71b   : > { %v6785_v51 = vpack.c.bf16 %v6581_v63, %v6577_v30  ;;  %6947 = vmatpush.bf16.msrb.mxu0 %v6753_v22  ;;  %v6609_v30 = vcvt.s32.f32 %v6353_v7  ;;  %v6777_v63 = vpack.c.bf16 %v6565_v36, %v6561_v19  ;;  %v6301_v22 = vunpack.c.3.s8 %v6177_v37 }
 0x71c   : > { %v10140_v5 = vpop.permute.xlu1 %10139  ;;  %v6745_v2 = vpack.c.bf16 %v6501_v48, %v6497_v53  ;;  %v6833_v27 = vpack.c.bf16 %v6677_v33, %v6673_v49  ;;  %v6493_v32 = vcvt.s32.f32 %v6237_v20  ;;  %v6414_v55 = vunpack.c.3.s8 %v13492_v29  ;;  %v6218_v33 = vld [vmem:[%s11423_s25 + $0x1d0] sm:$0xff] }
 0x71d   : > { %v10142_v24 = vunpack.i.h.bf16 %v10140_v5  ;;  %v10141_v46 = vunpack.i.l.bf16 %v10140_v5  ;;  %6965 = vmatpush.bf16.msrb.mxu1 %v6785_v51  ;;  %v6233_v5 = vunpack.c.2.s8 %v13488_v0  ;;  %v13498_v51 = vld [vmem:[%s11423_s25 + $0x1f0] sm:$0xff]  ;;  %v6557_v4 = vcvt.s32.f32 %v6301_v22 }
 0x71e   : > { %v6474_v62 = vunpack.c.2.s8 %v13498_v51  ;;  %v6225_v14 = vunpack.c.0.s8 %v13488_v0  ;;  %v6289_v6 = vunpack.c.0.s8 %v6177_v37  ;;  %v6293_v31 = vunpack.c.1.s8 %v6177_v37 }
 0x71f   : > { %v6149_v41 = vsel %vm4706_vm9, %v13396_v26, %v10142_v24  ;;  %v6148_v12 = vsel %vm4706_vm9, %v13398_v52, %v10141_v46  ;;  %v6573_v26 = vcvt.s32.f32 %v6317_v42  ;;  %v6425_v52 = vunpack.c.2.s8 %v6209_v50  ;;  %6948 = vmatpush.bf16.msrb.mxu0 %v6749_v54 }
 0x720   : > { %v13484_v56 = vpack.c.bf16 %v6149_v41, %v6148_v12  ;;  %v6801_v24 = vpack.c.bf16 %v6613_v23, %v6609_v30  ;;  %v6489_v46 = vcvt.s32.f32 %v6233_v5  ;;  %v6028_v41 = vpop.f32.mrf.mxu0  ;;  %v6553_v12 = vcvt.s32.f32 %v6297_v10 }
 0x721   : > { %v6781_v21 = vpack.c.bf16 %v6573_v26, %v6569_v45  ;;  %v6681_v44 = vcvt.s32.f32 %v6425_v52  ;;  %v6666_v50 = vcvt.s32.f32 %v6410_v1  ;;  %v6670_v26 = vcvt.s32.f32 %v6414_v55 }
 0x722   : > { %6880 = vmatmul.bf16.vlgmr.msra.gmra.mxu0 %v13484_v56  ;;  %6987 = vmatpush.bf16.msrb.mxu2 %v6801_v24  ;;  %v6741_v42 = vpack.c.bf16 %v6493_v32, %v6489_v46  ;;  %v6773_v18 = vpack.c.bf16 %v6557_v4, %v6553_v12  ;;  %v6478_v52 = vunpack.c.3.s8 %v13498_v51  ;;  %v6730_v9 = vcvt.s32.f32 %v6474_v62 }
 0x723   : > { %6966 = vmatpush.bf16.msrb.mxu1 %v6781_v21  ;;  %v6837_v16 = vpack.c.bf16 %v6685_v59, %v6681_v44  ;;  %6949 = vmatpush.bf16.msrb.mxu0 %v6745_v2  ;;  %v6229_v54 = vunpack.c.1.s8 %v13488_v0  ;;  %v6402_v11 = vunpack.c.0.s8 %v13492_v29  ;;  %v6481_v44 = vcvt.s32.f32 %v6225_v14 }
 0x724   : > { %v6734_v21 = vcvt.s32.f32 %v6478_v52  ;;  %v6406_v53 = vunpack.c.1.s8 %v13492_v29  ;;  %v6545_v48 = vcvt.s32.f32 %v6289_v6  ;;  %v6549_v43 = vcvt.s32.f32 %v6293_v31  ;;  %v6190_v29 = vld [vmem:[%s11423_s25 + $0xf0] sm:$0xff] }
 0x725   : > { %7004 = vmatpush.bf16.msrb.mxu3 %v6837_v16  ;;  %v6485_v59 = vcvt.s32.f32 %v6229_v54  ;;  %v6658_v39 = vcvt.s32.f32 %v6402_v11  ;;  %v6466_v0 = vunpack.c.0.s8 %v13498_v51  ;;  %v6174_v16 = vld [vmem:[%s11423_s25 + $0x70] sm:$0xff]  ;;  %v6470_v36 = vunpack.c.1.s8 %v13498_v51 }
 0x726   : > { %v6862_v8 = vpack.c.bf16 %v6734_v21, %v6730_v9  ;;  %v6769_v2 = vpack.c.bf16 %v6549_v43, %v6545_v48  ;;  %v6662_v19 = vcvt.s32.f32 %v6406_v53  ;;  %v6282_v49 = vunpack.c.2.s8 %v6174_v16  ;;  %v6170_v54 = vld [vmem:[%s11423_s25 + $0x50] sm:$0xff] }
 0x727   : > { %6967 = vmatpush.bf16.msrb.mxu1 %v6777_v63  ;;  %6950 = vmatpush.bf16.msrb.mxu0 %v6741_v42  ;;  %v6737_v37 = vpack.c.bf16 %v6485_v59, %v6481_v44  ;;  %v6722_v28 = vcvt.s32.f32 %v6466_v0  ;;  %v6286_v5 = vunpack.c.3.s8 %v6174_v16  ;;  %v6202_v63 = vld [vmem:[%s11423_s25 + $0x150] sm:$0xff]  ;;  %v6726_v24 = vcvt.s32.f32 %v6470_v36 }
 0x728   : > { %v6538_v46 = vcvt.s32.f32 %v6282_v49  ;;  %v6346_v1 = vunpack.c.2.s8 %v6190_v29  ;;  %v6394_v51 = vunpack.c.2.s8 %v6202_v63  ;;  %v6462_v12 = vunpack.c.3.s8 %v6218_v33  ;;  %v6186_v21 = vld [vmem:[%s11423_s25 + $0xd0] sm:$0xff] }
 0x729   : > { %v10150_v58 = vpop.permute.xlu1 %10149  ;;  %7005 = vmatpush.bf16.msrb.mxu3 %v6833_v27  ;;  %v6542_v22 = vcvt.s32.f32 %v6286_v5  ;;  %v6278_v62 = vunpack.c.1.s8 %v6174_v16  ;;  %v6342_v9 = vunpack.c.1.s8 %v6190_v29  ;;  %v6386_v14 = vunpack.c.0.s8 %v6202_v63 }
 0x72a   : > { %v10152_v57 = vunpack.i.h.bf16 %v10150_v58  ;;  %v10151_v3 = vunpack.i.l.bf16 %v10150_v58  ;;  %v6826_v58 = vpack.c.bf16 %v6662_v19, %v6658_v39  ;;  %v6602_v32 = vcvt.s32.f32 %v6346_v1 }
 0x72b   : > { %6968 = vmatpush.bf16.msrb.mxu1 %v6773_v18  ;;  %6951 = vmatpush.bf16.msrb.mxu0 %v6737_v37  ;;  %v6766_v27 = vpack.c.bf16 %v6542_v22, %v6538_v46  ;;  %v6650_v4 = vcvt.s32.f32 %v6394_v51  ;;  %v6718_v42 = vcvt.s32.f32 %v6462_v12  ;;  %v6338_v18 = vunpack.c.0.s8 %v6190_v29 }
 0x72c   : > { %v6159_v38 = vsel %vm4706_vm9, %v6028_v41, %v10152_v57  ;;  %v6156_v47 = vsel %vm4706_vm9, %v13415_v34, %v10151_v3  ;;  %v6830_v34 = vpack.c.bf16 %v6670_v26, %v6666_v50  ;;  %v6398_v57 = vunpack.c.3.s8 %v6202_v63 }
 0x72d   : > { %v13505_v45 = vpack.c.bf16 %v6159_v38, %v6159_v38  ;;  %v13507_v15 = vpack.c.bf16 %v6156_v47, %v6156_v47  ;;  %7070 = vmatpush.bf16.msra.mxu3 %v6862_v8  ;;  %v6458_v3 = vunpack.c.2.s8 %v6218_v33  ;;  %v6274_v38 = vunpack.c.0.s8 %v6174_v16  ;;  %v6198_v16 = vld [vmem:[%s11423_s25 + $0x130] sm:$0xff] }
 0x72e   : > { %7052 = vmatpush.bf16.msra.mxu2 %v6830_v34  ;;  %v6654_v55 = vcvt.s32.f32 %v6398_v57  ;;  %v6534_v6 = vcvt.s32.f32 %v6278_v62  ;;  %v6594_v31 = vcvt.s32.f32 %v6338_v18  ;;  %v6390_v11 = vunpack.c.1.s8 %v6202_v63 }
 0x72f   : > { %6921 = vmatmul.bf16.gmra.mxu2 %v13507_v15  ;;  %6939 = vmatmul.bf16.gmra.mxu3 %v13505_v45  ;;  %v6714_v50 = vcvt.s32.f32 %v6458_v3  ;;  %v6530_v52 = vcvt.s32.f32 %v6274_v38  ;;  %v6598_v44 = vcvt.s32.f32 %v6342_v9  ;;  %v6642_v59 = vcvt.s32.f32 %v6386_v14 }
 0x730   : > { %6969 = vmatpush.bf16.msrb.mxu1 %v6769_v2  ;;  %7016 = vmatpush.bf16.msra.mxu0 %v6766_v27  ;;  %v6822_v26 = vpack.c.bf16 %v6654_v55, %v6650_v4  ;;  %v6450_v53 = vunpack.c.0.s8 %v6218_v33  ;;  %v6646_v43 = vcvt.s32.f32 %v6390_v11  ;;  %v6266_v39 = vunpack.c.2.s8 %v6170_v54  ;;  %v6214_v2 = vld [vmem:[%s11423_s25 + $0x1b0] sm:$0xff] }
 0x731   : > { %v10155_v17 = vpop.permute.xlu1 %10154  ;;  %v6854_v34 = vpack.c.bf16 %v6718_v42, %v6714_v50  ;;  %v6762_v48 = vpack.c.bf16 %v6534_v6, %v6530_v52  ;;  %v6270_v0 = vunpack.c.3.s8 %v6170_v54  ;;  %v6330_v37 = vunpack.c.2.s8 %v6186_v21  ;;  %v6166_v4 = vld [vmem:[%s11423_s25 + $0x30] sm:$0xff] }
 0x732   : > { %v10157_v7 = vunpack.i.h.bf16 %v10155_v17  ;;  %v10156_v13 = vunpack.i.l.bf16 %v10155_v17  ;;  %7053 = vmatpush.bf16.msra.mxu2 %v6826_v58  ;;  %v6454_v17 = vunpack.c.1.s8 %v6218_v33  ;;  %v6818_v19 = vpack.c.bf16 %v6646_v43, %v6642_v59  ;;  %v6182_v42 = vld [vmem:[%s11423_s25 + $0xb0] sm:$0xff] }
 0x733   : > { %v6522_v36 = vcvt.s32.f32 %v6266_v39  ;;  %v6378_v49 = vunpack.c.2.s8 %v6198_v16  ;;  %v6382_v5 = vunpack.c.3.s8 %v6198_v16  ;;  %v6442_v58 = vunpack.c.2.s8 %v6214_v2  ;;  %v6194_v6 = vld [vmem:[%s11423_s25 + $0x110] sm:$0xff] }
 0x734   : > { %v6153_v30 = vsel %vm4706_vm9, %v13405_v40, %v10157_v7  ;;  %v6150_v23 = vsel %vm4706_vm9, %v13394_v25, %v10156_v13  ;;  %v6350_v40 = vunpack.c.3.s8 %v6190_v29  ;;  %v6858_v25 = vpack.c.bf16 %v6726_v24, %v6722_v28  ;;  %7017 = vmatpush.bf16.msra.mxu0 %v6762_v48  ;;  %v6210_v59 = vld [vmem:[%s11423_s25 + $0x190] sm:$0xff] }
 0x735   : > { %v13526_v20 = vpack.c.bf16 %v6153_v30, %v6153_v30  ;;  %v13528_v10 = vpack.c.bf16 %v6150_v23, %v6150_v23  ;;  %v6794_v7 = vpack.c.bf16 %v6598_v44, %v6594_v31  ;;  %v6706_v13 = vcvt.s32.f32 %v6450_v53 }
 0x736   : > { %v6606_v41 = vcvt.s32.f32 %v6350_v40  ;;  %7071 = vmatpush.bf16.msra.mxu3 %v6858_v25  ;;  %7054 = vmatpush.bf16.msra.mxu2 %v6822_v26  ;;  %v6710_v8 = vcvt.s32.f32 %v6454_v17  ;;  %v6526_v28 = vcvt.s32.f32 %v6270_v0  ;;  %v6334_v29 = vunpack.c.3.s8 %v6186_v21 }
 0x737   : > { %6885 = vmatmul.bf16.gmra.mxu0 %v13528_v10  ;;  %6903 = vmatmul.bf16.gmra.mxu1 %v13526_v20  ;;  %v6586_v23 = vcvt.s32.f32 %v6330_v37  ;;  %v6446_v24 = vunpack.c.3.s8 %v6214_v2  ;;  %v6634_v46 = vcvt.s32.f32 %v6378_v49  ;;  %v6638_v22 = vcvt.s32.f32 %v6382_v5 }
 0x738   : > { %v6798_v47 = vpack.c.bf16 %v6606_v41, %v6602_v32  ;;  %v6850_v30 = vpack.c.bf16 %v6710_v8, %v6706_v13  ;;  %v6758_v63 = vpack.c.bf16 %v6526_v28, %v6522_v36  ;;  %v6590_v33 = vcvt.s32.f32 %v6334_v29 }
 0x739   : > { %v6258_v1 = vunpack.c.0.s8 %v6170_v54  ;;  %v6262_v40 = vunpack.c.1.s8 %v6170_v54  ;;  %v6698_v51 = vcvt.s32.f32 %v6442_v58  ;;  %v6702_v57 = vcvt.s32.f32 %v6446_v24 }
 0x73a   : > { %7034 = vmatpush.bf16.msra.mxu1 %v6798_v47  ;;  %7072 = vmatpush.bf16.msra.mxu3 %v6854_v34  ;;  %v6790_v25 = vpack.c.bf16 %v6590_v33, %v6586_v23  ;;  %v6322_v3 = vunpack.c.0.s8 %v6186_v21  ;;  %v6814_v27 = vpack.c.bf16 %v6638_v22, %v6634_v46  ;;  %v6326_v12 = vunpack.c.1.s8 %v6186_v21  ;;  %v6162_v46 = vld [vmem:[%s11423_s25 + $0x10] sm:$0xff] }
 0x73b   : > { %7055 = vmatpush.bf16.msra.mxu2 %v6818_v19  ;;  %7018 = vmatpush.bf16.msra.mxu0 %v6758_v63  ;;  %v6514_v32 = vcvt.s32.f32 %v6258_v1  ;;  %v6518_v41 = vcvt.s32.f32 %v6262_v40  ;;  %v6846_v55 = vpack.c.bf16 %v6702_v57, %v6698_v51  ;;  %v6370_v38 = vunpack.c.0.s8 %v6198_v16  ;;  %v6178_v51 = vld [vmem:[%s11423_s25 + $0x90] sm:$0xff] }
 0x73c   : > { %v6578_v50 = vcvt.s32.f32 %v6322_v3  ;;  %v6374_v47 = vunpack.c.1.s8 %v6198_v16  ;;  %v6582_v18 = vcvt.s32.f32 %v6326_v12  ;;  %v6434_v26 = vunpack.c.0.s8 %v6214_v2 }
 0x73d   : > { %v6754_v62 = vpack.c.bf16 %v6518_v41, %v6514_v32  ;;  %v6438_v52 = vunpack.c.1.s8 %v6214_v2  ;;  %v6626_v9 = vcvt.s32.f32 %v6370_v38  ;;  %v6250_v54 = vunpack.c.2.s8 %v6166_v4 }
 0x73e   : > { %7035 = vmatpush.bf16.msra.mxu1 %v6794_v7  ;;  %7073 = vmatpush.bf16.msra.mxu3 %v6850_v30  ;;  %v6630_v14 = vcvt.s32.f32 %v6374_v47  ;;  %v6254_v34 = vunpack.c.3.s8 %v6166_v4  ;;  %v6786_v31 = vpack.c.bf16 %v6582_v18, %v6578_v50  ;;  %v6690_v11 = vcvt.s32.f32 %v6434_v26  ;;  %v6207_v50 = vld [vmem:[%s11423_s25 + $0x178] sm:$0xff] }
 0x73f   : > { %6988 = vmatmul.bf16.vlgmr.msrb.gmra.mxu2 %v13456_v60  ;;  %7006 = vmatmul.bf16.vlgmr.msrb.gmra.mxu3 %v13473_v61  ;;  %v6694_v21 = vcvt.s32.f32 %v6438_v52  ;;  %v6314_v44 = vunpack.c.2.s8 %v6182_v42  ;;  %v6506_v17 = vcvt.s32.f32 %v6250_v54  ;;  %v6318_v43 = vunpack.c.3.s8 %v6182_v42  ;;  %v6223_v18 = vld [vmem:[%s11423_s25 + $0x1f8] sm:$0xff] }
 0x740   : > { %7056 = vmatpush.bf16.msra.mxu2 %v6814_v27  ;;  %7019 = vmatpush.bf16.msra.mxu0 %v6754_v62  ;;  %v6810_v53 = vpack.c.bf16 %v6630_v14, %v6626_v9  ;;  %v6510_v48 = vcvt.s32.f32 %v6254_v34  ;;  %v6362_v16 = vunpack.c.2.s8 %v6194_v6  ;;  %v6366_v7 = vunpack.c.3.s8 %v6194_v6 }
 0x741   : > { %v6842_v39 = vpack.c.bf16 %v6694_v21, %v6690_v11  ;;  %v6570_v0 = vcvt.s32.f32 %v6314_v44  ;;  %v6574_v8 = vcvt.s32.f32 %v6318_v43  ;;  %v6426_v37 = vunpack.c.2.s8 %v6210_v59 }
 0x742   : > { %7036 = vmatpush.bf16.msra.mxu1 %v6790_v25  ;;  %7074 = vmatpush.bf16.msra.mxu3 %v6846_v55  ;;  %v6750_v13 = vpack.c.bf16 %v6510_v48, %v6506_v17  ;;  %v6430_v2 = vunpack.c.3.s8 %v6210_v59  ;;  %v6618_v19 = vcvt.s32.f32 %v6362_v16  ;;  %v6622_v36 = vcvt.s32.f32 %v6366_v7 }
 0x743   : > { %v6242_v28 = vunpack.c.0.s8 %v6166_v4  ;;  %v6246_v29 = vunpack.c.1.s8 %v6166_v4  ;;  %v6782_v30 = vpack.c.bf16 %v6574_v8, %v6570_v0  ;;  %v6682_v23 = vcvt.s32.f32 %v6426_v37 }
 0x744   : > { %7057 = vmatpush.bf16.msra.mxu2 %v6810_v53  ;;  %7020 = vmatpush.bf16.msra.mxu0 %v6750_v13  ;;  %v6686_v49 = vcvt.s32.f32 %v6430_v2  ;;  %v6306_v5 = vunpack.c.0.s8 %v6182_v42  ;;  %v6806_v63 = vpack.c.bf16 %v6622_v36, %v6618_v19  ;;  %v6310_v24 = vunpack.c.1.s8 %v6182_v42  ;;  %v6175_v19 = vld [vmem:[%s11423_s25 + $0x78] sm:$0xff] }
 0x745   : > { %v6498_v33 = vcvt.s32.f32 %v6242_v28  ;;  %v6502_v58 = vcvt.s32.f32 %v6246_v29  ;;  %v6354_v40 = vunpack.c.0.s8 %v6194_v6  ;;  %v6358_v25 = vunpack.c.1.s8 %v6194_v6 }
 0x746   : > { %7037 = vmatpush.bf16.msra.mxu1 %v6786_v31  ;;  %7075 = vmatpush.bf16.msra.mxu3 %v6842_v39  ;;  %v6838_v22 = vpack.c.bf16 %v6686_v49, %v6682_v23  ;;  %v6562_v1 = vcvt.s32.f32 %v6306_v5  ;;  %v6566_v3 = vcvt.s32.f32 %v6310_v24  ;;  %v6418_v27 = vunpack.c.0.s8 %v6210_v59  ;;  %v6191_v23 = vld [vmem:[%s11423_s25 + $0xf8] sm:$0xff] }
 0x747   : > { %6952 = vmatmul.bf16.vlgmr.msrb.gmra.mxu0 %v13484_v56  ;;  %6970 = vmatmul.bf16.vlgmr.msrb.gmra.mxu1 %v13446_v35  ;;  %v6746_v57 = vpack.c.bf16 %v6502_v58, %v6498_v33  ;;  %v6422_v32 = vunpack.c.1.s8 %v6210_v59  ;;  %v6610_v41 = vcvt.s32.f32 %v6354_v40  ;;  %v6614_v12 = vcvt.s32.f32 %v6358_v25 }
 0x748   : > { %7058 = vmatpush.bf16.msra.mxu2 %v6806_v63  ;;  %v6234_v4 = vunpack.c.2.s8 %v6162_v46  ;;  %v6238_v55 = vunpack.c.3.s8 %v6162_v46  ;;  %v6778_v38 = vpack.c.bf16 %v6566_v3, %v6562_v1  ;;  %v6674_v47 = vcvt.s32.f32 %v6418_v27  ;;  %v6203_v1 = vld [vmem:[%s11423_s25 + $0x158] sm:$0xff] }
 0x749   : > { %7021 = vmatpush.bf16.msra.mxu0 %v6746_v57  ;;  %v6678_v42 = vcvt.s32.f32 %v6422_v32  ;;  %v6298_v62 = vunpack.c.2.s8 %v6178_v51  ;;  %v6802_v26 = vpack.c.bf16 %v6614_v12, %v6610_v41  ;;  %v6302_v14 = vunpack.c.3.s8 %v6178_v51  ;;  %v6219_v3 = vld [vmem:[%s11423_s25 + $0x1d8] sm:$0xff] }
 0x74a   : > { %7038 = vmatpush.bf16.msra.mxu1 %v6782_v30  ;;  %7076 = vmatpush.bf16.msra.mxu3 %v6838_v22  ;;  %v6490_v52 = vcvt.s32.f32 %v6234_v4  ;;  %v6494_v9 = vcvt.s32.f32 %v6238_v55  ;;  %v6411_v6 = vunpack.c.2.s8 %v6207_v50  ;;  %v6415_v31 = vunpack.c.3.s8 %v6207_v50 }
 0x74b   : > { %v6834_v54 = vpack.c.bf16 %v6678_v42, %v6674_v47  ;;  %v6554_v34 = vcvt.s32.f32 %v6298_v62  ;;  %v6558_v21 = vcvt.s32.f32 %v6302_v14  ;;  %v6475_v44 = vunpack.c.2.s8 %v6223_v18 }
 0x74c   : > { %7059 = vmatpush.bf16.msra.mxu2 %v6802_v26  ;;  %v6742_v11 = vpack.c.bf16 %v6494_v9, %v6490_v52  ;;  %v6479_v59 = vunpack.c.3.s8 %v6223_v18  ;;  %v6667_v53 = vcvt.s32.f32 %v6411_v6  ;;  %v6671_v17 = vcvt.s32.f32 %v6415_v31 }
 0x74d   : > { %v6226_v48 = vunpack.c.0.s8 %v6162_v46  ;;  %v6230_v43 = vunpack.c.1.s8 %v6162_v46  ;;  %v6774_v39 = vpack.c.bf16 %v6558_v21, %v6554_v34  ;;  %v6731_v0 = vcvt.s32.f32 %v6475_v44 }
 0x74e   : > { %7039 = vmatpush.bf16.msra.mxu1 %v6778_v38  ;;  %7077 = vmatpush.bf16.msra.mxu3 %v6834_v54  ;;  %v6735_v16 = vcvt.s32.f32 %v6479_v59  ;;  %v6290_v7 = vunpack.c.0.s8 %v6178_v51  ;;  %v6831_v13 = vpack.c.bf16 %v6671_v17, %v6667_v53  ;;  %v6294_v2 = vunpack.c.1.s8 %v6178_v51  ;;  %v6171_v53 = vld [vmem:[%s11423_s25 + $0x58] sm:$0xff] }
 0x74f   : > { %6993 = vmatmul.bf16.gmra.mxu2 %v13507_v15  ;;  %7011 = vmatmul.bf16.gmra.mxu3 %v13505_v45  ;;  %v6482_v8 = vcvt.s32.f32 %v6226_v48  ;;  %v6486_v37 = vcvt.s32.f32 %v6230_v43  ;;  %v6403_v29 = vunpack.c.0.s8 %v6207_v50  ;;  %v6407_v30 = vunpack.c.1.s8 %v6207_v50 }
 0x750   : > { %7022 = vmatpush.bf16.msra.mxu0 %v6742_v11  ;;  %v6863_v36 = vpack.c.bf16 %v6735_v16, %v6731_v0  ;;  %v6546_v28 = vcvt.s32.f32 %v6290_v7  ;;  %7124 = vmatpush.bf16.msrb.mxu2 %v6831_v13  ;;  %v6550_v5 = vcvt.s32.f32 %v6294_v2  ;;  %v6467_v63 = vunpack.c.0.s8 %v6223_v18  ;;  %v6187_v0 = vld [vmem:[%s11423_s25 + $0xd8] sm:$0xff] }
 0x751   : > { %v6738_v49 = vpack.c.bf16 %v6486_v37, %v6482_v8  ;;  %v6471_v33 = vunpack.c.1.s8 %v6223_v18  ;;  %v6659_v58 = vcvt.s32.f32 %v6403_v29  ;;  %v6663_v24 = vcvt.s32.f32 %v6407_v30 }
 0x752   : > { %7040 = vmatpush.bf16.msra.mxu1 %v6774_v39  ;;  %7142 = vmatpush.bf16.msrb.mxu3 %v6863_v36  ;;  %v6283_v46 = vunpack.c.2.s8 %v6175_v19  ;;  %v6287_v22 = vunpack.c.3.s8 %v6175_v19  ;;  %v6770_v40 = vpack.c.bf16 %v6550_v5, %v6546_v28  ;;  %v6723_v25 = vcvt.s32.f32 %v6467_v63  ;;  %v6199_v28 = vld [vmem:[%s11423_s25 + $0x138] sm:$0xff] }
 0x753   : > { %v6727_v51 = vcvt.s32.f32 %v6471_v33  ;;  %v6347_v57 = vunpack.c.2.s8 %v6191_v23  ;;  %v6827_v27 = vpack.c.bf16 %v6663_v24, %v6659_v58  ;;  %v6351_v12 = vunpack.c.3.s8 %v6191_v23  ;;  %v6215_v5 = vld [vmem:[%s11423_s25 + $0x1b8] sm:$0xff] }
 0x754   : > { %7023 = vmatpush.bf16.msra.mxu0 %v6738_v49  ;;  %v6539_v32 = vcvt.s32.f32 %v6283_v46  ;;  %v6543_v41 = vcvt.s32.f32 %v6287_v22  ;;  %v6395_v50 = vunpack.c.2.s8 %v6203_v1  ;;  %v6399_v38 = vunpack.c.3.s8 %v6203_v1 }
 0x755   : > { %v6859_v4 = vpack.c.bf16 %v6727_v51, %v6723_v25  ;;  %v6603_v55 = vcvt.s32.f32 %v6347_v57  ;;  %7125 = vmatpush.bf16.msrb.mxu2 %v6827_v27  ;;  %v6607_v42 = vcvt.s32.f32 %v6351_v12  ;;  %v6459_v62 = vunpack.c.2.s8 %v6219_v3 }
 0x756   : > { %7041 = vmatpush.bf16.msra.mxu1 %v6770_v40  ;;  %v6767_v47 = vpack.c.bf16 %v6543_v41, %v6539_v32  ;;  %v6463_v18 = vunpack.c.3.s8 %v6219_v3  ;;  %v6651_v26 = vcvt.s32.f32 %v6395_v50  ;;  %v6655_v52 = vcvt.s32.f32 %v6399_v38 }
 0x757   : > { %6957 = vmatmul.bf16.gmra.mxu0 %v13528_v10  ;;  %6975 = vmatmul.bf16.gmra.mxu1 %v13526_v20  ;;  %v6275_v9 = vunpack.c.0.s8 %v6175_v19  ;;  %v6279_v14 = vunpack.c.1.s8 %v6175_v19  ;;  %v6799_v54 = vpack.c.bf16 %v6607_v42, %v6603_v55  ;;  %v6715_v34 = vcvt.s32.f32 %v6459_v62 }
 0x758   : > { %7143 = vmatpush.bf16.msrb.mxu3 %v6859_v4  ;;  %7088 = vmatpush.bf16.msrb.mxu0 %v6767_v47  ;;  %v6719_v6 = vcvt.s32.f32 %v6463_v18  ;;  %v6339_v31 = vunpack.c.0.s8 %v6191_v23  ;;  %v6823_v11 = vpack.c.bf16 %v6655_v52, %v6651_v26  ;;  %v6343_v59 = vunpack.c.1.s8 %v6191_v23  ;;  %v6167_v26 = vld [vmem:[%s11423_s25 + $0x38] sm:$0xff] }
 0x759   : > { %v6531_v21 = vcvt.s32.f32 %v6275_v9  ;;  %v6535_v44 = vcvt.s32.f32 %v6279_v14  ;;  %v6387_v43 = vunpack.c.0.s8 %v6203_v1  ;;  %v6391_v39 = vunpack.c.1.s8 %v6203_v1 }
 0x75a   : > { %7106 = vmatpush.bf16.msrb.mxu1 %v6799_v54  ;;  %v6855_v17 = vpack.c.bf16 %v6719_v6, %v6715_v34  ;;  %v6595_v48 = vcvt.s32.f32 %v6339_v31  ;;  %7126 = vmatpush.bf16.msrb.mxu2 %v6823_v11  ;;  %v6599_v7 = vcvt.s32.f32 %v6343_v59  ;;  %v6451_v13 = vunpack.c.0.s8 %v6219_v3  ;;  %v6183_v34 = vld [vmem:[%s11423_s25 + $0xb8] sm:$0xff] }
 0x75b   : > { %v6763_v16 = vpack.c.bf16 %v6535_v44, %v6531_v21  ;;  %v6455_v8 = vunpack.c.1.s8 %v6219_v3  ;;  %v6643_v37 = vcvt.s32.f32 %v6387_v43  ;;  %v6647_v2 = vcvt.s32.f32 %v6391_v39 }
 0x75c   : > { %7144 = vmatpush.bf16.msrb.mxu3 %v6855_v17  ;;  %v6267_v19 = vunpack.c.2.s8 %v6171_v53  ;;  %v6271_v36 = vunpack.c.3.s8 %v6171_v53  ;;  %v6795_v29 = vpack.c.bf16 %v6599_v7, %v6595_v48  ;;  %v6707_v30 = vcvt.s32.f32 %v6451_v13  ;;  %v6195_v48 = vld [vmem:[%s11423_s25 + $0x118] sm:$0xff] }
 0x75d   : > { %v6711_v23 = vcvt.s32.f32 %v6455_v8  ;;  %v6331_v49 = vunpack.c.2.s8 %v6187_v0  ;;  %7089 = vmatpush.bf16.msrb.mxu0 %v6763_v16  ;;  %v6819_v63 = vpack.c.bf16 %v6647_v2, %v6643_v37  ;;  %v6335_v24 = vunpack.c.3.s8 %v6187_v0  ;;  %v6211_v7 = vld [vmem:[%s11423_s25 + $0x198] sm:$0xff] }
 0x75e   : > { %v6523_v33 = vcvt.s32.f32 %v6267_v19  ;;  %v6527_v58 = vcvt.s32.f32 %v6271_v36  ;;  %7107 = vmatpush.bf16.msrb.mxu1 %v6795_v29  ;;  %v6379_v1 = vunpack.c.2.s8 %v6199_v28  ;;  %v6383_v40 = vunpack.c.3.s8 %v6199_v28 }
 0x75f   : > { %7060 = vmatmul.bf16.vlgmr.msra.gmra.mxu2 %v13456_v60  ;;  %7078 = vmatmul.bf16.vlgmr.msra.gmra.mxu3 %v13473_v61  ;;  %v6851_v46 = vpack.c.bf16 %v6711_v23, %v6707_v30  ;;  %v6587_v22 = vcvt.s32.f32 %v6331_v49  ;;  %v6591_v51 = vcvt.s32.f32 %v6335_v24  ;;  %v6443_v57 = vunpack.c.2.s8 %v6215_v5 }
 0x760   : > { %7127 = vmatpush.bf16.msrb.mxu2 %v6819_v63  ;;  %v6759_v25 = vpack.c.bf16 %v6527_v58, %v6523_v33  ;;  %v6447_v3 = vunpack.c.3.s8 %v6215_v5  ;;  %v6635_v27 = vcvt.s32.f32 %v6379_v1  ;;  %v6639_v32 = vcvt.s32.f32 %v6383_v40 }
 0x761   : > { %7145 = vmatpush.bf16.msrb.mxu3 %v6851_v46  ;;  %v6259_v41 = vunpack.c.0.s8 %v6171_v53  ;;  %v6263_v12 = vunpack.c.1.s8 %v6171_v53  ;;  %v6791_v4 = vpack.c.bf16 %v6591_v51, %v6587_v22  ;;  %v6699_v55 = vcvt.s32.f32 %v6443_v57 }
 0x762   : > { %7090 = vmatpush.bf16.msrb.mxu0 %v6759_v25  ;;  %v6703_v50 = vcvt.s32.f32 %v6447_v3  ;;  %v6323_v38 = vunpack.c.0.s8 %v6187_v0  ;;  %v6815_v47 = vpack.c.bf16 %v6639_v32, %v6635_v27  ;;  %v6327_v18 = vunpack.c.1.s8 %v6187_v0  ;;  %v6163_v27 = vld [vmem:[%s11423_s25 + $0x18] sm:$0xff] }
 0x763   : > { %v6515_v42 = vcvt.s32.f32 %v6259_v41  ;;  %v6519_v62 = vcvt.s32.f32 %v6263_v12  ;;  %7108 = vmatpush.bf16.msrb.mxu1 %v6791_v4  ;;  %v6371_v14 = vunpack.c.0.s8 %v6199_v28  ;;  %v6375_v54 = vunpack.c.1.s8 %v6199_v28 }
 0x764   : > { %v6847_v52 = vpack.c.bf16 %v6703_v50, %v6699_v55  ;;  %v6579_v9 = vcvt.s32.f32 %v6323_v38  ;;  %v6583_v31 = vcvt.s32.f32 %v6327_v18  ;;  %v6435_v11 = vunpack.c.0.s8 %v6215_v5  ;;  %7128 = vmatpush.bf16.msrb.mxu2 %v6815_v47  ;;  %v6179_v55 = vld [vmem:[%s11423_s25 + $0x98] sm:$0xff]  ;;  %s14388_s25 = scalar_lea.vmem [#allocation12], %s11391_s2 }
 0x765   : > { %v6755_v6 = vpack.c.bf16 %v6519_v62, %v6515_v42  ;;  %v6439_v21 = vunpack.c.1.s8 %v6215_v5  ;;  %v6627_v44 = vcvt.s32.f32 %v6371_v14  ;;  %v6631_v59 = vcvt.s32.f32 %v6375_v54 }
 0x766   : > { %7146 = vmatpush.bf16.msrb.mxu3 %v6847_v52  ;;  %v6251_v53 = vunpack.c.2.s8 %v6167_v26  ;;  %v6255_v17 = vunpack.c.3.s8 %v6167_v26  ;;  %v6787_v43 = vpack.c.bf16 %v6583_v31, %v6579_v9  ;;  %v6691_v39 = vcvt.s32.f32 %v6435_v11 }
 0x767   : > { %7024 = vmatmul.bf16.vlgmr.msra.gmra.mxu0 %v13484_v56  ;;  %7042 = vmatmul.bf16.vlgmr.msra.gmra.mxu1 %v13446_v35  ;;  %v6695_v0 = vcvt.s32.f32 %v6439_v21  ;;  %v6315_v16 = vunpack.c.2.s8 %v6183_v34  ;;  %v6811_v13 = vpack.c.bf16 %v6631_v59, %v6627_v44  ;;  %v6319_v2 = vunpack.c.3.s8 %v6183_v34 }
 0x768   : > { %7091 = vmatpush.bf16.msrb.mxu0 %v6755_v6  ;;  %v6507_v8 = vcvt.s32.f32 %v6251_v53  ;;  %v6511_v37 = vcvt.s32.f32 %v6255_v17  ;;  %7109 = vmatpush.bf16.msrb.mxu1 %v6787_v43  ;;  %v6363_v28 = vunpack.c.2.s8 %v6195_v48  ;;  %v6367_v29 = vunpack.c.3.s8 %v6195_v48 }
 0x769   : > { %v6843_v19 = vpack.c.bf16 %v6695_v0, %v6691_v39  ;;  %v6571_v36 = vcvt.s32.f32 %v6315_v16  ;;  %7129 = vmatpush.bf16.msrb.mxu2 %v6811_v13  ;;  %v6575_v23 = vcvt.s32.f32 %v6319_v2  ;;  %v6427_v49 = vunpack.c.2.s8 %v6211_v7 }
 0x76a   : > { %v6751_v30 = vpack.c.bf16 %v6511_v37, %v6507_v8  ;;  %v6431_v5 = vunpack.c.3.s8 %v6211_v7  ;;  %v6619_v63 = vcvt.s32.f32 %v6363_v28  ;;  %v6623_v33 = vcvt.s32.f32 %v6367_v29 }
 0x76b   : > { %7147 = vmatpush.bf16.msrb.mxu3 %v6843_v19  ;;  %v6243_v58 = vunpack.c.0.s8 %v6167_v26  ;;  %v6247_v24 = vunpack.c.1.s8 %v6167_v26  ;;  %v6783_v46 = vpack.c.bf16 %v6575_v23, %v6571_v36  ;;  %v6683_v22 = vcvt.s32.f32 %v6427_v49 }
 0x76c   : > { %7092 = vmatpush.bf16.msrb.mxu0 %v6751_v30  ;;  %v6687_v1 = vcvt.s32.f32 %v6431_v5  ;;  %v6307_v40 = vunpack.c.0.s8 %v6183_v34  ;;  %v6807_v25 = vpack.c.bf16 %v6623_v33, %v6619_v63  ;;  %v6311_v3 = vunpack.c.1.s8 %v6183_v34 }
 0x76d   : > { %v6499_v51 = vcvt.s32.f32 %v6243_v58  ;;  %v6503_v57 = vcvt.s32.f32 %v6247_v24  ;;  %7110 = vmatpush.bf16.msrb.mxu1 %v6783_v46  ;;  %v6355_v12 = vunpack.c.0.s8 %v6195_v48  ;;  %v6359_v4 = vunpack.c.1.s8 %v6195_v48 }
 0x76e   : > { %v6839_v32 = vpack.c.bf16 %v6687_v1, %v6683_v22  ;;  %v6563_v41 = vcvt.s32.f32 %v6307_v40  ;;  %7130 = vmatpush.bf16.msrb.mxu2 %v6807_v25  ;;  %v6567_v38 = vcvt.s32.f32 %v6311_v3  ;;  %v6419_v47 = vunpack.c.0.s8 %v6211_v7 }
 0x76f   : > { %7065 = vmatmul.bf16.gmra.mxu2 %v13507_v15  ;;  %7083 = vmatmul.bf16.gmra.mxu3 %v13505_v45  ;;  %v6747_v50 = vpack.c.bf16 %v6503_v57, %v6499_v51  ;;  %v6423_v42 = vunpack.c.1.s8 %v6211_v7  ;;  %v6611_v62 = vcvt.s32.f32 %v6355_v12  ;;  %v6615_v18 = vcvt.s32.f32 %v6359_v4 }
 0x770   : > { %7148 = vmatpush.bf16.msrb.mxu3 %v6839_v32  ;;  %v6235_v26 = vunpack.c.2.s8 %v6163_v27  ;;  %v6239_v52 = vunpack.c.3.s8 %v6163_v27  ;;  %v6779_v9 = vpack.c.bf16 %v6567_v38, %v6563_v41  ;;  %v6675_v14 = vcvt.s32.f32 %v6419_v47 }
 0x771   : > { %7093 = vmatpush.bf16.msrb.mxu0 %v6747_v50  ;;  %v6679_v54 = vcvt.s32.f32 %v6423_v42  ;;  %v6299_v34 = vunpack.c.2.s8 %v6179_v55  ;;  %v6803_v6 = vpack.c.bf16 %v6615_v18, %v6611_v62  ;;  %v6303_v21 = vunpack.c.3.s8 %v6179_v55 }
 0x772   : > { %v6491_v31 = vcvt.s32.f32 %v6235_v26  ;;  %v6495_v11 = vcvt.s32.f32 %v6239_v52  ;;  %7111 = vmatpush.bf16.msrb.mxu1 %v6779_v9  ;;  %v6227_v53 = vunpack.c.0.s8 %v6163_v27  ;;  %v6231_v17 = vunpack.c.1.s8 %v6163_v27 }
 0x773   : > { %v6835_v44 = vpack.c.bf16 %v6679_v54, %v6675_v14  ;;  %v6555_v59 = vcvt.s32.f32 %v6299_v34  ;;  %7131 = vmatpush.bf16.msrb.mxu2 %v6803_v6  ;;  %v6559_v43 = vcvt.s32.f32 %v6303_v21  ;;  %v6291_v39 = vunpack.c.0.s8 %v6179_v55 }
 0x774   : > { %v6743_v48 = vpack.c.bf16 %v6495_v11, %v6491_v31  ;;  %v6295_v0 = vunpack.c.1.s8 %v6179_v55  ;;  %v6483_v16 = vcvt.s32.f32 %v6227_v53  ;;  %v6487_v7 = vcvt.s32.f32 %v6231_v17 }
 0x775   : > { %7149 = vmatpush.bf16.msrb.mxu3 %v6835_v44  ;;  %v6775_v13 = vpack.c.bf16 %v6559_v43, %v6555_v59  ;;  %v6547_v8 = vcvt.s32.f32 %v6291_v39 }
 0x776   : > { %7094 = vmatpush.bf16.msrb.mxu0 %v6743_v48  ;;  %v6551_v37 = vcvt.s32.f32 %v6295_v0  ;;  %v6739_v2 = vpack.c.bf16 %v6487_v7, %v6483_v16 }
 0x777   : > { %7029 = vmatmul.bf16.gmra.mxu0 %v13528_v10  ;;  %7047 = vmatmul.bf16.gmra.mxu1 %v13526_v20 }
 0x778   : > { %7112 = vmatpush.bf16.msrb.mxu1 %v6775_v13  ;;  %v6771_v19 = vpack.c.bf16 %v6551_v37, %v6547_v8 }
 0x77a   : > { %7095 = vmatpush.bf16.msrb.mxu0 %v6739_v2 }
 0x77c   : > { %7113 = vmatpush.bf16.msrb.mxu1 %v6771_v19 }
 0x77f   : > { %7132 = vmatmul.bf16.vlgmr.msrb.gmra.mxu2 %v13456_v60  ;;  %7150 = vmatmul.bf16.vlgmr.msrb.gmra.mxu3 %v13473_v61  ;;  %v6899_v60 = vpop.f32.mrf.mxu1 }
 0x781   : > { %v6917_v36 = vpop.f32.mrf.mxu2 }
 0x787   : > { %7096 = vmatmul.bf16.vlgmr.msrb.gmra.mxu0 %v13484_v56  ;;  %7114 = vmatmul.bf16.vlgmr.msrb.gmra.mxu1 %v13446_v35  ;;  %v6901_v49 = vpop.f32.mrf.mxu1 }
 0x789   : > { %v6919_v35 = vpop.f32.mrf.mxu2 }
 0x78f   : > { %7137 = vmatmul.bf16.gmra.mxu2 %v13507_v15  ;;  %7155 = vmatmul.bf16.gmra.mxu3 %v13505_v45 }
 0x797   : > { %7101 = vmatmul.bf16.gmra.mxu0 %v13528_v10  ;;  %7119 = vmatmul.bf16.gmra.mxu1 %v13526_v20 }
 0x79d   : > { %v6935_v29 = vpop.f32.mrf.mxu3 }
 0x79f   : > { %v6881_v28 = vpop.f32.mrf.mxu0 }
 0x7a0   : > { %v6900_v61 = vadd.f32 %v6899_v60, %v6881_v28  ;;  %v7160_v28 = vld [vmem:[%s14388_s25] sm:$0xf] }
 0x7a2   : > { %v6918_v30 = vadd.f32 %v6917_v36, %v6900_v61 }
 0x7a4   : > { %v13582_v23 = vadd.f32 %v6935_v29, %v6918_v30  ;;  %v13594_v30 = vperm.slane %v7160_v28, 1 }
 0x7a5   : > { %v6937_v15 = vpop.f32.mrf.mxu3 }
 0x7a7   : > { %v6883_v56 = vpop.f32.mrf.mxu0 }
 0x7a8   : > { %v6902_v5 = vadd.f32 %v6901_v49, %v6883_v56  ;;  %v13596_v56 = vperm.slane %v7160_v28, 0 }
 0x7aa   : > { %v6920_v63 = vadd.f32 %v6919_v35, %v6902_v5  ;;  %v13598_v35 = vperm.slane %v7160_v28, 2 }
 0x7ac   : > { %v13584_v33 = vadd.f32 %v6937_v15, %v6920_v63  ;;  %v7182_v63 = vld [vmem:[%s14389_s9] sm:$0xf] }
 0x7b2   : > { %v6922_v45 = vpop.f32.mrf.mxu2  ;;  %v6940_v10 = vpop.f32.mrf.mxu3 }
 0x7b4   : > { %v6886_v58 = vpop.f32.mrf.mxu0  ;;  %v6904_v20 = vpop.f32.mrf.mxu1 }
 0x7b5   : > { %v6905_v24 = vadd.f32 %v6904_v20, %v6886_v58  ;;  %v7170_v58 = vmul.f32 %v13596_v56, %v13582_v23  ;;  %v13607_v20 = vperm.slane %v7182_v63, 0 }
 0x7b7   : > { %v6923_v46 = vadd.f32 %v6922_v45, %v6905_v24  ;;  %v13603_v45 = vperm.slane %v7182_v63, 1 }
 0x7b9   : > { %v13586_v22 = vadd.f32 %v6940_v10, %v6923_v46  ;;  %v13610_v46 = vperm.slane %v7182_v63, 2 }
 0x7ba   : > { %v6924_v1 = vpop.f32.mrf.mxu2  ;;  %v6942_v40 = vpop.f32.mrf.mxu3 }
 0x7bc   : > { %v6888_v25 = vpop.f32.mrf.mxu0  ;;  %v6906_v51 = vpop.f32.mrf.mxu1 }
 0x7c2   : > { %v6989_v57 = vpop.f32.mrf.mxu2  ;;  %v7007_v3 = vpop.f32.mrf.mxu3 }
 0x7c4   : > { %v6953_v27 = vpop.f32.mrf.mxu0  ;;  %v6971_v32 = vpop.f32.mrf.mxu1 }
 0x7c5   : > { %v6972_v41 = vadd.f32 %v6971_v32, %v6953_v27  ;;  %v7192_v27 = vadd.f32 %v13607_v20, %v7170_v58 }
 0x7c7   : > { %v6990_v12 = vadd.f32 %v6989_v57, %v6972_v41 }
 0x7c9   : > { %v7008_v4 = vadd.f32 %v7007_v3, %v6990_v12  ;;  %v10277_v12 = vld [vmem:[%s14357_s23 + $0x8] sm:$0xff] }
 0x7ca   : > { %v6991_v55 = vpop.f32.mrf.mxu2  ;;  %v7009_v50 = vpop.f32.mrf.mxu3 }
 0x7cb   : > { %v7171_v15 = vmul.f32 %v13594_v30, %v7008_v4 }
 0x7cc   : > { %v6955_v38 = vpop.f32.mrf.mxu0  ;;  %v6973_v47 = vpop.f32.mrf.mxu1 }
 0x7cd   : > { %v6974_v42 = vadd.f32 %v6973_v47, %v6955_v38  ;;  %v7193_v25 = vadd.f32 %v13603_v45, %v7171_v15  ;;  %v7174_v38 = vmul.f32 %v13596_v56, %v13584_v33 }
 0x7cf   : > { %v6992_v62 = vadd.f32 %v6991_v55, %v6974_v42  ;;  %v13619_v4 = vadd.f32 %v10277_v12, %v7193_v25 }
 0x7d1   : > { %v7010_v18 = vadd.f32 %v7009_v50, %v6992_v62  ;;  %v13621_v50 = vperm.slane %v7160_v28, 3  ;;  %v10278_v62 = vld [vmem:[%s14357_s23] sm:$0xff] }
 0x7d2   : > { %v6994_v26 = vpop.f32.mrf.mxu2  ;;  %v7012_v52 = vpop.f32.mrf.mxu3  ;;  %v10282_v28 = vld [vmem:[%s14357_s23 + $0x20] sm:$0xff] }
 0x7d3   : > { %v7175_v23 = vmul.f32 %v13594_v30, %v7010_v18  ;;  %v13629_v18 = vadd.f32 %v10278_v62, %v7192_v27 }
 0x7d4   : > { %v6958_v9 = vpop.f32.mrf.mxu0  ;;  %v6976_v14 = vpop.f32.mrf.mxu1 }
 0x7d5   : > { %v6977_v54 = vadd.f32 %v6976_v14, %v6958_v9  ;;  %v13636_v14 = vperm.slane %v7182_v63, 3  ;;  %v7197_v33 = vadd.f32 %v13603_v45, %v7175_v23 }
 0x7d7   : > { %v6995_v34 = vadd.f32 %v6994_v26, %v6977_v54  ;;  %v10279_v26 = vld [vmem:[%s14357_s23 + $0x10] sm:$0xff] }
 0x7d9   : > { %v13588_v6 = vadd.f32 %v7012_v52, %v6995_v34 }
 0x7da   : > { %v6996_v31 = vpop.f32.mrf.mxu2  ;;  %v7014_v11 = vpop.f32.mrf.mxu3 }
 0x7dc   : > { %v6960_v21 = vpop.f32.mrf.mxu0  ;;  %v6978_v44 = vpop.f32.mrf.mxu1 }
 0x7dd   : > { %v7237_v21 = vmul.f32 %v13619_v4, %v13619_v4  ;;  %v7196_v44 = vadd.f32 %v13607_v20, %v7174_v38 }
 0x7e2   : > { %v7061_v59 = vpop.f32.mrf.mxu2  ;;  %v7079_v53 = vpop.f32.mrf.mxu3 }
 0x7e4   : > { %v7025_v17 = vpop.f32.mrf.mxu0  ;;  %v7043_v48 = vpop.f32.mrf.mxu1 }
 0x7e5   : > { %v7044_v2 = vadd.f32 %v7043_v48, %v7025_v17  ;;  %v7218_v48 = vadd.f32 %v13619_v4, %v13629_v18 }
 0x7e7   : > { %v7062_v36 = vadd.f32 %v7061_v59, %v7044_v2  ;;  %v10281_v2 = vld [vmem:[%s14357_s23 + $0x18] sm:$0xff] }
 0x7e9   : > { %v7080_v5 = vadd.f32 %v7079_v53, %v7062_v36 }
 0x7ea   : > { %v7063_v43 = vpop.f32.mrf.mxu2  ;;  %v7081_v39 = vpop.f32.mrf.mxu3 }
 0x7eb   : > { %v7172_v24 = vmul.f32 %v13598_v35, %v7080_v5 }
 0x7ec   : > { %v7027_v0 = vpop.f32.mrf.mxu0  ;;  %v7045_v16 = vpop.f32.mrf.mxu1 }
 0x7ed   : > { %v7046_v49 = vadd.f32 %v7045_v16, %v7027_v0  ;;  %v7194_v32 = vadd.f32 %v13610_v46, %v7172_v24  ;;  %v7236_v0 = vmul.f32 %v13629_v18, %v13629_v18  ;;  %v7179_v24 = vmul.f32 %v13594_v30, %v13588_v6 }
 0x7ef   : > { %v7064_v10 = vadd.f32 %v7063_v43, %v7046_v49  ;;  %v13634_v52 = vadd.f32 %v10279_v26, %v7194_v32  ;;  %v7248_v36 = vadd.f32 %v7237_v21, %v7236_v0 }
 0x7f1   : > { %v7082_v57 = vadd.f32 %v7081_v39, %v7064_v10  ;;  %v7238_v16 = vmul.f32 %v13634_v52, %v13634_v52 }
 0x7f2   : > { %v7066_v7 = vpop.f32.mrf.mxu2  ;;  %v13590_v13 = vpop.f32.mrf.mxu3 }
 0x7f3   : > { %v7176_v47 = vmul.f32 %v13598_v35, %v7082_v57  ;;  %v7249_v58 = vadd.f32 %v7248_v36, %v7238_v16 }
 0x7f4   : > { %v7030_v8 = vpop.f32.mrf.mxu0  ;;  %v7048_v37 = vpop.f32.mrf.mxu1 }
 0x7f5   : > { %v7049_v42 = vadd.f32 %v7048_v37, %v7030_v8  ;;  %v7198_v59 = vadd.f32 %v13610_v46, %v7176_v47  ;;  %v10280_v8 = vld [vmem:[%s14357_s23 + $0x28] sm:$0xff] }
 0x7f6   : > { %v13654_v37 = vadd.f32 %v10280_v8, %v7197_v33 }
 0x7f7   : > { %v7067_v53 = vadd.f32 %v7066_v7, %v7049_v42 }
 0x7f9   : > { %v7085_v5 = vadd.f32 %v13590_v13, %v7067_v53  ;;  %v7241_v13 = vmul.f32 %v13654_v37, %v13654_v37 }
 0x7fa   : > { %v7068_v19 = vpop.f32.mrf.mxu2  ;;  %v7086_v60 = vpop.f32.mrf.mxu3 }
 0x7fb   : > { %v7219_v60 = vadd.f32 %v7218_v48, %v13634_v52  ;;  %v7180_v27 = vmul.f32 %v13598_v35, %v7085_v5 }
 0x7fc   : > { %v7032_v61 = vpop.f32.mrf.mxu0  ;;  %v7050_v29 = vpop.f32.mrf.mxu1 }
 0x7fd   : > { %v13665_v61 = vadd.f32 %v10282_v28, %v7196_v44  ;;  %v10283_v29 = vld [vmem:[%s14357_s23 + $0x30] sm:$0xff]  ;;  %v7202_v62 = vadd.f32 %v13610_v46, %v7180_v27 }
 0x7fe   : > { %v13670_v49 = vadd.f32 %v10283_v29, %v7198_v59  ;;  %v10286_v59 = vld [vmem:[%s14357_s23 + $0x40] sm:$0xff] }
 0x7ff   : > { %v7240_v23 = vmul.f32 %v13665_v61, %v13665_v61 }
 0x800   : > { %v7242_v12 = vmul.f32 %v13670_v49, %v13670_v49 }
 0x801   : > { %v7253_v47 = vadd.f32 %v7241_v13, %v7240_v23  ;;  %v9875_v13 = vld [vmem:[%s11470_s5 + $0x70] sm:$0xff]  ;;  %v9866_v23 = vld [vmem:[%s11470_s5 + $0x28] sm:$0xff] }
 0x802   : > { %v7133_v1 = vpop.f32.mrf.mxu2  ;;  %v7151_v51 = vpop.f32.mrf.mxu3 }
 0x803   : > { %v7254_v33 = vadd.f32 %v7253_v47, %v7242_v12  ;;  %v9874_v12 = vld [vmem:[%s11470_s5 + $0x68] sm:$0xff] }
 0x804   : > { %v7097_v40 = vpop.f32.mrf.mxu0  ;;  %v7115_v3 = vpop.f32.mrf.mxu1 }
 0x805   : > { %v7116_v41 = vadd.f32 %v7115_v3, %v7097_v40  ;;  %v7178_v3 = vmul.f32 %v13596_v56, %v13586_v22  ;;  %v10284_v22 = vld [vmem:[%s14357_s23 + $0x38] sm:$0xff] }
 0x807   : > { %v7134_v55 = vadd.f32 %v7133_v1, %v7116_v41  ;;  %v7223_v41 = vadd.f32 %v13654_v37, %v13665_v61  ;;  %v7200_v42 = vadd.f32 %v13607_v20, %v7178_v3  ;;  %v9883_v3 = vld [vmem:[%s11470_s5 + $0xb0] sm:$0xff] }
 0x809   : > { %v7152_v9 = vadd.f32 %v7151_v51, %v7134_v55  ;;  %v7201_v55 = vadd.f32 %v13603_v45, %v7179_v24  ;;  %v7224_v35 = vadd.f32 %v7223_v41, %v13670_v49  ;;  %v13712_v53 = vadd.f32 %v10286_v59, %v7200_v42  ;;  %v9868_v24 = vld [vmem:[%s11470_s5 + $0x38] sm:$0xff]  ;;  %v9891_v41 = vld [vmem:[%s11470_s5 + $0xf0] sm:$0xff]  ;;  %v9865_v42 = vld [vmem:[%s11470_s5 + $0x20] sm:$0xff] }
 0x80a   : > { %v7135_v54 = vpop.f32.mrf.mxu2  ;;  %v7153_v11 = vpop.f32.mrf.mxu3  ;;  %7639 = vmatpush.bf16.msra.mxu0 %v9868_v24 }
 0x80b   : > { %v7173_v31 = vmul.f32 %v13621_v50, %v7152_v9 }
 0x80c   : > { %v7099_v34 = vpop.f32.mrf.mxu0  ;;  %v7117_v17 = vpop.f32.mrf.mxu1 }
 0x80d   : > { %v7195_v43 = vadd.f32 %v13636_v14, %v7173_v31  ;;  %v7118_v39 = vadd.f32 %v7117_v17, %v7099_v34  ;;  %v10285_v31 = vld [vmem:[%s14357_s23 + $0x48] sm:$0xff]  ;;  %v10287_v17 = vld [vmem:[%s14357_s23 + $0x50] sm:$0xff] }
 0x80e   : > { %v13717_v48 = vadd.f32 %v10287_v17, %v7202_v62  ;;  %v9873_v62 = vld [vmem:[%s11470_s5 + $0x60] sm:$0xff]  ;;  %v9863_v17 = vld [vmem:[%s11470_s5 + $0x10] sm:$0xff] }
 0x80f   : > { %v7136_v7 = vadd.f32 %v7135_v54, %v7118_v39  ;;  %v13659_v19 = vadd.f32 %v10281_v2, %v7195_v43 }
 0x810   : > { %v7246_v2 = vmul.f32 %v13717_v48, %v13717_v48 }
 0x811   : > { %v7154_v63 = vadd.f32 %v7153_v11, %v7136_v7  ;;  %v7220_v15 = vadd.f32 %v7219_v60, %v13659_v19  ;;  %v7239_v10 = vmul.f32 %v13659_v19, %v13659_v19  ;;  %v13706_v11 = vadd.f32 %v10285_v31, %v7201_v55  ;;  %v9882_v55 = vld [vmem:[%s11470_s5 + $0xa8] sm:$0xff]  ;;  %v9864_v31 = vld [vmem:[%s11470_s5 + $0x18] sm:$0xff] }
 0x812   : > { %v7138_v1 = vpop.f32.mrf.mxu2  ;;  %v7156_v51 = vpop.f32.mrf.mxu3 }
 0x813   : > { %v7177_v25 = vmul.f32 %v13621_v50, %v7154_v63  ;;  %7221 = vadd.xlane.f32.xlu2 %v7220_v15  ;;  %v7250_v57 = vadd.f32 %v7249_v58, %v7239_v10  ;;  %v7228_v0 = vadd.f32 %v13706_v11, %v13712_v53  ;;  %v7245_v7 = vmul.f32 %v13706_v11, %v13706_v11 }
 0x814   : > { %v7102_v40 = vpop.f32.mrf.mxu0  ;;  %v7120_v32 = vpop.f32.mrf.mxu1 }
 0x815   : > { %v7199_v6 = vadd.f32 %v13636_v14, %v7177_v25  ;;  %v7121_v30 = vadd.f32 %v7120_v32, %v7102_v40  ;;  %7251 = vadd.xlane.f32.xlu1 %v7250_v57  ;;  %v7229_v16 = vadd.f32 %v7228_v0, %v13717_v48  ;;  %v9884_v40 = vld [vmem:[%s11470_s5 + $0xb8] sm:$0xff]  ;;  %v9867_v57 = vld [vmem:[%s11470_s5 + $0x30] sm:$0xff] }
 0x816   : > { %v9892_v25 = vld [vmem:[%s11470_s5 + $0xf8] sm:$0xff]  ;;  %7675 = vmatpush.bf16.msra.mxu2 %v9884_v40  ;;  %7640 = vmatpush.bf16.msra.mxu0 %v9867_v57  ;;  %v9886_v40 = vld [vmem:[%s11470_s5 + $0xc8] sm:$0xff] }
 0x817   : > { %v7139_v38 = vadd.f32 %v7138_v1, %v7121_v30  ;;  %v13695_v56 = vadd.f32 %v10284_v22, %v7199_v6  ;;  %v9876_v1 = vld [vmem:[%s11470_s5 + $0x78] sm:$0xff]  ;;  %7693 = vmatpush.bf16.msra.mxu3 %v9892_v25 }
 0x818   : > { %7657 = vmatpush.bf16.msra.mxu1 %v9876_v1 }
 0x819   : > { %v7157_v26 = vadd.f32 %v7156_v51, %v7139_v38  ;;  %v7225_v9 = vadd.f32 %v7224_v35, %v13695_v56  ;;  %v7243_v45 = vmul.f32 %v13695_v56, %v13695_v56  ;;  %v9890_v35 = vld [vmem:[%s11470_s5 + $0xe8] sm:$0xff] }
 0x81a   : > { %v7140_v54 = vpop.f32.mrf.mxu2  ;;  %v7158_v20 = vpop.f32.mrf.mxu3  ;;  %7676 = vmatpush.bf16.msra.mxu2 %v9883_v3  ;;  %7641 = vmatpush.bf16.msra.mxu0 %v9866_v23 }
 0x81b   : > { %v7181_v21 = vmul.f32 %v13621_v50, %v7157_v26  ;;  %7226 = vadd.xlane.f32.xlu0 %v7225_v9  ;;  %v7255_v46 = vadd.f32 %v7254_v33, %v7243_v45  ;;  %v10288_v50 = vld [vmem:[%s14357_s23 + $0x58] sm:$0xff]  ;;  %7694 = vmatpush.bf16.msra.mxu3 %v9891_v41  ;;  %v9881_v26 = vld [vmem:[%s11470_s5 + $0xa0] sm:$0xff]  ;;  %s14390_s23 = scalar_lea.vmem [#allocation15], %s11391_s2 }
 0x81c   : > { %v7104_v34 = vpop.f32.mrf.mxu0  ;;  %v7122_v44 = vpop.f32.mrf.mxu1  ;;  %7658 = vmatpush.bf16.msra.mxu1 %v9875_v13  ;;  %v9889_v33 = vld [vmem:[%s11470_s5 + $0xe0] sm:$0xff] }
 0x81d   : > { %v7203_v43 = vadd.f32 %v13636_v14, %v7181_v21  ;;  %7256 = vadd.xlane.f32.xlu2 %v7255_v46  ;;  %v7244_v14 = vmul.f32 %v13712_v53, %v13712_v53  ;;  %v9872_v21 = vld [vmem:[%s11470_s5 + $0x58] sm:$0xff] }
 0x81e   : > { %7677 = vmatpush.bf16.msra.mxu2 %v9882_v55  ;;  %7642 = vmatpush.bf16.msra.mxu0 %v9865_v42  ;;  %v9880_v46 = vld [vmem:[%s11470_s5 + $0x98] sm:$0xff] }
 0x81f   : > { %v13723_v39 = vadd.f32 %v10288_v50, %v7203_v43  ;;  %v7258_v36 = vadd.f32 %v7245_v7, %v7244_v14  ;;  %7695 = vmatpush.bf16.msra.mxu3 %v9890_v35  ;;  %v9888_v44 = vld [vmem:[%s11470_s5 + $0xd8] sm:$0xff]  ;;  %v9871_v43 = vld [vmem:[%s11470_s5 + $0x50] sm:$0xff] }
 0x820   : > { %7659 = vmatpush.bf16.msra.mxu1 %v9874_v12  ;;  %v9887_v7 = vld [vmem:[%s11470_s5 + $0xd0] sm:$0xff]  ;;  %v7217_v35 = vld [vmem:[%s14391_s1] sm:$0xf] }
 0x821   : > { %v7230_v8 = vadd.f32 %v7229_v16, %v13723_v39  ;;  %v7247_v60 = vmul.f32 %v13723_v39, %v13723_v39  ;;  %v7259_v28 = vadd.f32 %v7258_v36, %v7246_v2  ;;  %v9879_v16 = vld [vmem:[%s11470_s5 + $0x90] sm:$0xff]  ;;  %v9862_v36 = vld [vmem:[%s11470_s5 + $0x8] sm:$0xff] }
 0x822   : > { %7678 = vmatpush.bf16.msra.mxu2 %v9881_v26  ;;  %7643 = vmatpush.bf16.msra.mxu0 %v9864_v31  ;;  %v7351_v31 = vperm.slane %v7217_v35, 0 }
 0x823   : > { %v7260_v29 = vadd.f32 %v7259_v28, %v7247_v60  ;;  %7696 = vmatpush.bf16.msra.mxu3 %v9889_v33  ;;  %v9870_v28 = vld [vmem:[%s11470_s5 + $0x48] sm:$0xff] }
 0x824   : > { %7660 = vmatpush.bf16.msra.mxu1 %v9873_v62 }
 0x825   : > { %7231 = vadd.xlane.f32.xlu2 %v7230_v8 }
 0x826   : > { %7679 = vmatpush.bf16.msra.mxu2 %v9880_v46  ;;  %7644 = vmatpush.bf16.msra.mxu0 %v9863_v17 }
 0x827   : > { %7697 = vmatpush.bf16.msra.mxu3 %v9888_v44  ;;  %v7352_v44 = vperm.slane %v7217_v35, 1 }
 0x828   : > { %7661 = vmatpush.bf16.msra.mxu1 %v9872_v21 }
 0x82a   : > { %7680 = vmatpush.bf16.msra.mxu2 %v9879_v16  ;;  %7645 = vmatpush.bf16.msra.mxu0 %v9862_v36 }
 0x82b   : > { %7698 = vmatpush.bf16.msra.mxu3 %v9887_v7 }
 0x82c   : > { %7662 = vmatpush.bf16.msra.mxu1 %v9871_v43 }
 0x82d   : > { %7261 = vadd.xlane.f32.xlu2 %v7260_v29 }
 0x82f   : > { %7699 = vmatpush.bf16.msra.mxu3 %v9886_v40 }
 0x830   : > { %7663 = vmatpush.bf16.msra.mxu1 %v9870_v28 }
 0x886   : > { %v7222_v5 = vpop.xlane.xlu2 %7221 }
 0x887   : > { %v13737_v63 = vmul.f32 0.0024509805, %v7222_v5 }
 0x888   : > { %v7252_v15 = vpop.xlane.xlu1 %7251 }
 0x889   : > { %v7263_v10 = vmul.f32 0.0024509805, %v7252_v15  ;;  %v7266_v58 = vmul.f32 %v13737_v63, %v13737_v63  ;;  %v7272_v24 = vsub.f32 %v13629_v18, %v13737_v63  ;;  %v7273_v25 = vsub.f32 %v13619_v4, %v13737_v63 }
 0x88a   : > { %v7275_v3 = vsub.f32 %v13659_v19, %v13737_v63 }
 0x88b   : > { %v7269_v51 = vsub.f32 %v7263_v10, %v7266_v58  ;;  %v9878_v10 = vld [vmem:[%s11470_s5 + $0x88] sm:$0xff]  ;;  %v7216_v58 = vld [vmem:[%s14390_s23] sm:$0xf] }
 0x88c   : > { %v13793_v41 = vperm.slane %v7216_v58, 0  ;;  %7681 = vmatpush.bf16.msra.mxu2 %v9878_v10  ;;  %v13806_v42 = vperm.slane %v7216_v58, 2  ;;  %v13808_v62 = vperm.slane %v7216_v58, 3 }
 0x88d   : > { %v7284_v27 = vadd.f32 1e-05, %v7269_v51  ;;  %v7274_v51 = vsub.f32 %v13634_v52, %v13737_v63 }
 0x88e   : > { %v7227_v32 = vpop.xlane.xlu0 %7226 }
 0x88f   : > { %v13749_v6 = vmul.f32 0.0024509805, %v7227_v32  ;;  %10261 = vrsqrt.f32 %v7284_v27  ;;  %vm7293_vm12 = vweird.f32 %v7284_v27  ;;  %v9869_v32 = vld [vmem:[%s11470_s5 + $0x40] sm:$0xff] }
 0x890   : > { %v7257_v30 = vpop.xlane.xlu2 %7256  ;;  %7664 = vmatpush.bf16.msra.mxu1 %v9869_v32 }
 0x891   : > { %v7267_v38 = vmul.f32 %v13749_v6, %v13749_v6  ;;  %v7264_v22 = vmul.f32 0.0024509805, %v7257_v30  ;;  %v13795_v30 = vperm.slane %v7216_v58, 1  ;;  %v7276_v63 = vsub.f32 %v13665_v61, %v13749_v6 }
 0x893   : > { %v7270_v47 = vsub.f32 %v7264_v22, %v7267_v38  ;;  %v9877_v22 = vld [vmem:[%s11470_s5 + $0x80] sm:$0xff] }
 0x894   : > { %7682 = vmatpush.bf16.msra.mxu2 %v9877_v22 }
 0x895   : > { %v10262_v9 = vpop.eup %10261  ;;  %v13760_v45 = vadd.f32 1e-05, %v7270_v47  ;;  %v9885_v47 = vld [vmem:[%s11470_s5 + $0xc0] sm:$0xff] }
 0x896   : > { %v7288_v54 = vmul.f32 %v10262_v9, %v7284_v27  ;;  %vm7294_vm11 = vweird.f32 %v10262_v9  ;;  %v9861_v27 = vld [vmem:[%s11470_s5] sm:$0xff]  ;;  %7700 = vmatpush.bf16.msra.mxu3 %v9885_v47  ;;  %s14392_s5 = scalar_lea.vmem [#allocation18], %s11388_s0  ;;  %s14393_s0 = scalar_lea.vmem [#allocation21], %s11391_s2 }
 0x897   : > { %10263 = vrsqrt.f32 %v13760_v45  ;;  %vm7295_vm13 = vmor %vm7293_vm12, %vm7294_vm11  ;;  %vm7303_vm15 = vweird.f32 %v13760_v45  ;;  %7646 = vmatpush.bf16.msra.mxu0 %v9861_v27  ;;  %vm7903_vm12 = vcmask 261120   ;;  %s14394_s2 = sld [smem:[#allocation43_spill]] }
 0x898   : > { %v7232_v34 = vpop.xlane.xlu2 %7231  ;;  %v7289_v20 = vmul.f32 %v10262_v9, %v7288_v54  ;;  %v7277_v54 = vsub.f32 %v13654_v37, %v13749_v6 }
 0x899   : > { %v13770_v0 = vmul.f32 0.0024509805, %v7232_v34  ;;  %v7278_v34 = vsub.f32 %v13670_v49, %v13749_v6 }
 0x89a   : > { %v7290_v59 = vmul.f32 0.5, %v7289_v20 }
 0x89b   : > { %v7268_v5 = vmul.f32 %v13770_v0, %v13770_v0  ;;  %v7281_v22 = vsub.f32 %v13706_v11, %v13770_v0 }
 0x89c   : > { %v7291_v50 = vsub.f32 1.5, %v7290_v59 }
 0x89d   : > { %v10264_v8 = vpop.eup %10263  ;;  %p9595_p5 = scmp.ge.s32.totalorder %s14394_s2, 7 }
 0x89e   : > { %v7292_v14 = vmul.f32 %v10262_v9, %v7291_v50  ;;  %v7298_v2 = vmul.f32 %v10264_v8, %v13760_v45  ;;  %vm7304_vm14 = vweird.f32 %v10264_v8  ;;  %v7279_v45 = vsub.f32 %v13695_v56, %v13749_v6  ;;  %s14395_s27 = sld [smem:[#allocation76_spill]] (!%p9595_p5) }
 0x89f   : > { %vm7305_vm0 = vmor %vm7303_vm15, %vm7304_vm14  ;;  %v7353_v6 = vperm.slane %v7217_v35, 2 }
 0x8a0   : > { %v7262_v60 = vpop.xlane.xlu2 %7261  ;;  %v7299_v29 = vmul.f32 %v10264_v8, %v7298_v2  ;;  %v7296_v1 = vsel %vm7295_vm13, %v10262_v9, %v7292_v14  ;;  %v7354_v14 = vperm.slane %v7217_v35, 3  ;;  %v7282_v35 = vsub.f32 %v13717_v48, %v13770_v0 }
 0x8a1   : > { %v7265_v15 = vmul.f32 0.0024509805, %v7262_v60  ;;  %v7317_v23 = vmul.f32 %v7296_v1, %v7272_v24  ;;  %v7318_v12 = vmul.f32 %v7296_v1, %v7273_v25  ;;  %v7319_v26 = vmul.f32 %v7296_v1, %v7274_v51 }
 0x8a2   : > { %v7300_v57 = vmul.f32 0.5, %v7299_v29  ;;  %v7320_v9 = vmul.f32 %v7296_v1, %v7275_v3 }
 0x8a3   : > { %v7271_v13 = vsub.f32 %v7265_v15, %v7268_v5  ;;  %v7338_v20 = vmul.f32 %v13793_v41, %v7317_v23  ;;  %v7339_v46 = vmul.f32 %v13795_v30, %v7318_v12  ;;  %v7340_v16 = vmul.f32 %v13806_v42, %v7319_v26 }
 0x8a4   : > { %v7301_v55 = vsub.f32 1.5, %v7300_v57  ;;  %v7341_v7 = vmul.f32 %v13808_v62, %v7320_v9 }
 0x8a5   : > { %v13797_v38 = vadd.f32 1e-05, %v7271_v13  ;;  %v7359_v29 = vadd.f32 %v7351_v31, %v7338_v20  ;;  %v7360_v10 = vadd.f32 %v7352_v44, %v7339_v46  ;;  %v7361_v24 = vadd.f32 %v7353_v6, %v7340_v16 }
 0x8a6   : > { %v7302_v33 = vmul.f32 %v10264_v8, %v7301_v55  ;;  %v7362_v40 = vadd.f32 %v7354_v14, %v7341_v7  ;;  %v7280_v55 = vsub.f32 %v13712_v53, %v13770_v0 }
 0x8a7   : > { %10265 = vrsqrt.f32 %v13797_v38  ;;  %vm7313_vm2 = vweird.f32 %v13797_v38 }
 0x8a8   : > { %v7306_v21 = vsel %vm7305_vm0, %v10264_v8, %v7302_v33 }
 0x8a9   : > { %v7321_v59 = vmul.f32 %v7306_v21, %v7276_v63  ;;  %v7322_v17 = vmul.f32 %v7306_v21, %v7277_v54  ;;  %v7323_v43 = vmul.f32 %v7306_v21, %v7278_v34  ;;  %v7324_v50 = vmul.f32 %v7306_v21, %v7279_v45 }
 0x8aa   : > { %v7283_v63 = vsub.f32 %v13723_v39, %v13770_v0 }
 0x8ab   : > { %v7342_v2 = vmul.f32 %v13793_v41, %v7321_v59  ;;  %v7343_v8 = vmul.f32 %v13795_v30, %v7322_v17  ;;  %v7344_v60 = vmul.f32 %v13806_v42, %v7323_v43  ;;  %v7345_v36 = vmul.f32 %v13808_v62, %v7324_v50 }
 0x8ad   : > { %v10266_v28 = vpop.eup %10265  ;;  %v7363_v15 = vadd.f32 %v7351_v31, %v7342_v2  ;;  %v7364_v58 = vadd.f32 %v7352_v44, %v7343_v8  ;;  %v7365_v1 = vadd.f32 %v7353_v6, %v7344_v60  ;;  %v7366_v25 = vadd.f32 %v7354_v14, %v7345_v36 }
 0x8ae   : > { %v7308_v5 = vmul.f32 %v10266_v28, %v13797_v38  ;;  %vm7314_vm1 = vweird.f32 %v10266_v28 }
 0x8af   : > { %v7371_v57 = vpack.c.bf16 %v7363_v15, %v7359_v29  ;;  %v7372_v13 = vpack.c.bf16 %v7364_v58, %v7360_v10  ;;  %v7373_v3 = vpack.c.bf16 %v7365_v1, %v7361_v24  ;;  %v7374_v27 = vpack.c.bf16 %v7366_v25, %v7362_v40  ;;  %vm7315_vm3 = vmor %vm7313_vm2, %vm7314_vm1 }
 0x8b0   : > { %v7309_v51 = vmul.f32 %v10266_v28, %v7308_v5 }
 0x8b1   : > { %7647 = vmatmul.bf16.vlgmr.msra.gmra.mxu0 %v7371_v57  ;;  %7665 = vmatmul.bf16.vlgmr.msra.gmra.mxu1 %v7372_v13 }
 0x8b2   : > { %v7310_v32 = vmul.f32 0.5, %v7309_v51  ;;  %7683 = vmatmul.bf16.vlgmr.msra.gmra.mxu2 %v7373_v3  ;;  %7701 = vmatmul.bf16.vlgmr.msra.gmra.mxu3 %v7374_v27 }
 0x8b4   : > { %v7311_v23 = vsub.f32 1.5, %v7310_v32 }
 0x8b6   : > { %v7312_v12 = vmul.f32 %v10266_v28, %v7311_v23 }
 0x8b8   : > { %v7316_v47 = vsel %vm7315_vm3, %v10266_v28, %v7312_v12 }
 0x8b9   : > { %v7325_v26 = vmul.f32 %v7316_v47, %v7280_v55  ;;  %v7326_v9 = vmul.f32 %v7316_v47, %v7281_v22  ;;  %v7327_v33 = vmul.f32 %v7316_v47, %v7282_v35  ;;  %v7328_v54 = vmul.f32 %v7316_v47, %v7283_v63 }
 0x8bb   : > { %v7346_v38 = vmul.f32 %v13793_v41, %v7325_v26  ;;  %v7347_v34 = vmul.f32 %v13795_v30, %v7326_v9  ;;  %v7348_v45 = vmul.f32 %v13806_v42, %v7327_v33  ;;  %v7349_v21 = vmul.f32 %v13808_v62, %v7328_v54  ;;  %v10158_v41 = vld [vmem:[%s14392_s5] ss:$0 sm:$0xff] }
 0x8bd   : > { %v7367_v20 = vadd.f32 %v7351_v31, %v7346_v38  ;;  %v7368_v46 = vadd.f32 %v7352_v44, %v7347_v34  ;;  %v7369_v59 = vadd.f32 %v7353_v6, %v7348_v45  ;;  %v7370_v17 = vadd.f32 %v7354_v14, %v7349_v21 }
 0x8bf   : > { %v7375_v43 = vpack.c.bf16 %v7367_v20, %v7367_v20  ;;  %v7376_v0 = vpack.c.bf16 %v7368_v46, %v7368_v46  ;;  %v7377_v50 = vpack.c.bf16 %v7369_v59, %v7369_v59  ;;  %v7378_v16 = vpack.c.bf16 %v7370_v17, %v7370_v17 }
 0x8c1   : > { %7652 = vmatmul.bf16.gmra.mxu0 %v7375_v43  ;;  %7670 = vmatmul.bf16.gmra.mxu1 %v7376_v0 }
 0x8c2   : > { %7688 = vmatmul.bf16.gmra.mxu2 %v7377_v50  ;;  %7706 = vmatmul.bf16.gmra.mxu3 %v7378_v16 }
 0x92e   : > { %v7648_v7 = vpop.f32.mrf.mxu0  ;;  %v7666_v2 = vpop.f32.mrf.mxu1 }
 0x92f   : > { %v7649_v30 = vadd.f32 %v10158_v41, %v7648_v7 }
 0x931   : > { %v7667_v42 = vadd.f32 %v7666_v2, %v7649_v30 }
 0x935   : > { %v7684_v8 = vpop.f32.mrf.mxu2  ;;  %v7702_v31 = vpop.f32.mrf.mxu3 }
 0x936   : > { %v7685_v62 = vadd.f32 %v7684_v8, %v7667_v42  ;;  %v7650_v58 = vpop.f32.mrf.mxu0  ;;  %v7668_v40 = vpop.f32.mrf.mxu1 }
 0x937   : > { %v7651_v1 = vadd.f32 %v10158_v41, %v7650_v58 }
 0x938   : > { %v13842_v44 = vadd.f32 %v7702_v31, %v7685_v62 }
 0x939   : > { %v7669_v51 = vadd.f32 %v7668_v40, %v7651_v1 }
 0x93a   : > { %v13845_v6 = vmul.f32 0.70710677, %v13842_v44 }
 0x93c   : > { %v7717_v14 = vmul.f32 %v13845_v6, %v13845_v6 }
 0x93d   : > { %v7686_v25 = vpop.f32.mrf.mxu2  ;;  %v7704_v27 = vpop.f32.mrf.mxu3 }
 0x93e   : > { %v13849_v60 = vmin.f32 %v7717_v14, 16.0  ;;  %v7687_v3 = vadd.f32 %v7686_v25, %v7669_v51  ;;  %v7653_v2 = vpop.f32.mrf.mxu0  ;;  %v7671_v42 = vpop.f32.mrf.mxu1 }
 0x93f   : > { %v7654_v14 = vadd.f32 %v10158_v41, %v7653_v2 }
 0x940   : > { %v7730_v36 = vmul.f32 3.8918573e-05, %v13849_v60  ;;  %v7719_v57 = vmul.f32 2.1237322e-06, %v13849_v60  ;;  %v13856_v32 = vadd.f32 %v7704_v27, %v7687_v3 }
 0x942   : > { %v7731_v28 = vadd.f32 0.001143296, %v7730_v36  ;;  %v7720_v23 = vadd.f32 0.00028619796, %v7719_v57  ;;  %v13860_v55 = vmul.f32 0.70710677, %v13856_v32 }
 0x944   : > { %v7732_v29 = vmul.f32 %v7731_v28, %v13849_v60  ;;  %v7757_v22 = vmul.f32 %v13860_v55, %v13860_v55  ;;  %v7721_v35 = vmul.f32 %v7720_v23, %v13849_v60 }
 0x945   : > { %v7689_v36 = vpop.f32.mrf.mxu2  ;;  %v7707_v28 = vpop.f32.mrf.mxu3 }
 0x946   : > { %v7733_v5 = vadd.f32 0.014752088, %v7732_v29  ;;  %v7758_v47 = vmin.f32 %v7757_v22, 16.0  ;;  %v7722_v33 = vadd.f32 0.0036580483, %v7721_v35  ;;  %v7655_v25 = vpop.f32.mrf.mxu0  ;;  %v7673_v51 = vpop.f32.mrf.mxu1 }
 0x947   : > { %v9581_v51 = vld [vmem:[%s11446_s29 + $0x28] sm:$0xf] }
 0x948   : > { %v7734_v15 = vmul.f32 %v7733_v5, %v13849_v60  ;;  %v7759_v26 = vmul.f32 2.1237322e-06, %v7758_v47  ;;  %v7770_v9 = vmul.f32 3.8918573e-05, %v7758_v47  ;;  %v7723_v21 = vmul.f32 %v7722_v33, %v13849_v60 }
 0x949   : > { %v7672_v5 = vadd.f32 %v7671_v42, %v7654_v14 }
 0x94a   : > { %v7735_v10 = vadd.f32 0.112945676, %v7734_v15  ;;  %v7760_v54 = vadd.f32 0.00028619796, %v7759_v26  ;;  %v7771_v38 = vadd.f32 0.001143296, %v7770_v9 }
 0x94b   : > { %v7724_v43 = vadd.f32 0.05243302, %v7723_v21  ;;  %v7690_v1 = vadd.f32 %v7689_v36, %v7672_v5 }
 0x94c   : > { %v7736_v24 = vmul.f32 %v7735_v10, %v13849_v60  ;;  %v7761_v34 = vmul.f32 %v7760_v54, %v7758_v47  ;;  %v7772_v45 = vmul.f32 %v7771_v38, %v7758_v47 }
 0x94d   : > { %v7725_v30 = vmul.f32 %v7724_v43, %v13849_v60  ;;  %v13867_v40 = vadd.f32 %v7707_v28, %v7690_v1  ;;  %v7691_v41 = vpop.f32.mrf.mxu2  ;;  %v7709_v27 = vpop.f32.mrf.mxu3 }
 0x94e   : > { %v7737_v13 = vadd.f32 0.4994258, %v7736_v24  ;;  %v7762_v20 = vadd.f32 0.0036580483, %v7761_v34  ;;  %v7773_v46 = vadd.f32 0.014752088, %v7772_v45 }
 0x94f   : > { %v7726_v15 = vadd.f32 0.18741608, %v7725_v30 }
 0x950   : > { %v7738_v12 = vmul.f32 %v7737_v13, %v13849_v60  ;;  %v7774_v17 = vmul.f32 %v7773_v46, %v7758_v47  ;;  %v7763_v50 = vmul.f32 %v7762_v20, %v7758_v47 }
 0x951   : > { %v7727_v57 = vmul.f32 %v7726_v15, %v13849_v60 }
 0x952   : > { %v7739_v63 = vadd.f32 1.0, %v7738_v12  ;;  %v7775_v16 = vadd.f32 0.112945676, %v7774_v17  ;;  %v7764_v62 = vadd.f32 0.05243302, %v7763_v50 }
 0x953   : > { %v13871_v12 = vmul.f32 0.70710677, %v13867_v40  ;;  %v7728_v9 = vadd.f32 1.1283791, %v7727_v57  ;;  %v9900_v57 = vld [vmem:[%s11446_s29 + $0x34] sm:$0xf0] }
 0x954   : > { %10267 = vrcp.f32 %v7739_v63  ;;  %v7776_v7 = vmul.f32 %v7775_v16, %v7758_v47  ;;  %v7765_v58 = vmul.f32 %v7764_v62, %v7758_v47  ;;  %v7751_v23 = vand.u32 2147483648, %v7739_v63 }
 0x955   : > { %vm7745_vm5 = vweird.f32 %v7739_v63  ;;  %v7749_v22 = vand.u32 2147483647, %v7739_v63  ;;  %v7797_v35 = vmul.f32 %v13871_v12, %v13871_v12  ;;  %v9582_v27 = vor.u32 %v9900_v57, %v9581_v51 }
 0x956   : > { %v7777_v31 = vadd.f32 0.4994258, %v7776_v7  ;;  %v7766_v3 = vadd.f32 0.18741608, %v7765_v58  ;;  %v7752_v60 = vor.u32 1.1754944e-38, %v7751_v23 }
 0x957   : > { %v13875_v34 = vmin.f32 %v7797_v35, 16.0  ;;  %vm7750_vm7 = vcmp.eq.f32.partialorder %v7749_v22, 8.507059e+37  ;;  %v9583_v23 = vld [vmem:[%s11446_s29 + $0x38] sm:$0xf0]  ;;  %v9573_v35 = vld [vmem:[%s11446_s29 + $0x20] sm:$0xf]  ;;  %7952 = vmatpush.bf16.msrb.mxu2 %v9582_v27 }
 0x958   : > { %v7778_v29 = vmul.f32 %v7777_v31, %v7758_v47  ;;  %v7767_v54 = vmul.f32 %v7766_v3, %v7758_v47 }
 0x959   : > { %v7799_v20 = vmul.f32 2.1237322e-06, %v13875_v34  ;;  %v7810_v46 = vmul.f32 3.8918573e-05, %v13875_v34 }
 0x95a   : > { %v10268_v59 = vpop.eup %10267  ;;  %v7779_v24 = vadd.f32 1.0, %v7778_v29  ;;  %v7768_v17 = vadd.f32 1.1283791, %v7767_v54  ;;  %v9575_v54 = vld [vmem:[%s11446_s29 + $0x30] sm:$0xf0] }
 0x95b   : > { %v7741_v0 = vmul.f32 %v10268_v59, %v7739_v63  ;;  %vm7746_vm4 = vweird.f32 %v10268_v59  ;;  %v7729_v63 = vmul.f32 %v7728_v9, %v13845_v6  ;;  %v7811_v47 = vadd.f32 0.001143296, %v7810_v46  ;;  %v9894_v46 = vld [vmem:[%s11446_s29 + $0xc] sm:$0xf] }
 0x95c   : > { %10269 = vrcp.f32 %v7779_v24  ;;  %vm7747_vm6 = vmor %vm7745_vm5, %vm7746_vm4  ;;  %v7789_v43 = vand.u32 2147483647, %v7779_v24  ;;  %vm7785_vm9 = vweird.f32 %v7779_v24  ;;  %v7769_v42 = vmul.f32 %v7768_v17, %v13860_v55  ;;  %v9557_v17 = vld [vmem:[%s11446_s29] sm:$0xf] }
 0x95d   : > { %v7742_v8 = vsub.f32 1.0, %v7741_v0  ;;  %v7791_v0 = vand.u32 2147483648, %v7779_v24  ;;  %v7812_v2 = vmul.f32 %v7811_v47, %v13875_v34 }
 0x95e   : > { %vm7790_vm11 = vcmp.eq.f32.partialorder %v7789_v43, 8.507059e+37 }
 0x95f   : > { %v7743_v10 = vmul.f32 %v10268_v59, %v7742_v8  ;;  %v7792_v8 = vor.u32 1.1754944e-38, %v7791_v0  ;;  %v7813_v31 = vadd.f32 0.014752088, %v7812_v2 }
 0x961   : > { %v7744_v13 = vadd.f32 %v10268_v59, %v7743_v10  ;;  %v7814_v29 = vmul.f32 %v7813_v31, %v13875_v34  ;;  %v7711_v10 = vmul.f32 0.5, %v13842_v44 }
 0x962   : > { %v10270_v26 = vpop.eup %10269 }
 0x963   : > { %v7748_v33 = vsel %vm7747_vm6, %v10268_v59, %v7744_v13  ;;  %v7781_v38 = vmul.f32 %v10270_v26, %v7779_v24  ;;  %vm7786_vm8 = vweird.f32 %v10270_v26  ;;  %v7800_v59 = vadd.f32 0.00028619796, %v7799_v20  ;;  %v9898_v13 = vld [vmem:[%s11446_s29 + $0x2c] sm:$0xf] }
 0x964   : > { %v7753_v45 = vsel %vm7750_vm7, %v7752_v60, %v7748_v33  ;;  %vm7787_vm10 = vmor %vm7785_vm9, %vm7786_vm8  ;;  %v7815_v55 = vadd.f32 0.112945676, %v7814_v29  ;;  %v7712_v24 = vmul.f32 0.5, %v13856_v32  ;;  %v9586_v44 = vor.u32 %v9898_v13, %v9583_v23  ;;  %v9899_v32 = vld [vmem:[%s11446_s29 + $0x2c] sm:$0xf0] }
 0x965   : > { %v7782_v21 = vsub.f32 1.0, %v7781_v38  ;;  %v7754_v16 = vmul.f32 %v7753_v45, %v7729_v63  ;;  %v7801_v30 = vmul.f32 %v7800_v59, %v13875_v34  ;;  %v9574_v33 = vor.u32 %v9899_v32, %v9573_v35  ;;  %v9565_v60 = vld [vmem:[%s11446_s29 + $0x8] sm:$0xf]  ;;  %v9896_v38 = vld [vmem:[%s11446_s29 + $0x14] sm:$0xf0] }
 0x966   : > { %v7816_v25 = vmul.f32 %v7815_v55, %v13875_v34  ;;  %7970 = vmatpush.bf16.msrb.mxu3 %v9586_v44  ;;  %v9566_v20 = vor.u32 %v9896_v38, %v9565_v60  ;;  %v9567_v63 = vld [vmem:[%s11446_s29 + $0x18] sm:$0xf0] }
 0x967   : > { %v7783_v50 = vmul.f32 %v10270_v26, %v7782_v21  ;;  %v7802_v6 = vadd.f32 0.0036580483, %v7801_v30  ;;  %v9552_v36 = vclamps-f32 %v7754_v16, 1.0  ;;  %7916 = vmatpush.bf16.msrb.mxu0 %v9574_v33  ;;  %v9570_v0 = vor.u32 %v9894_v46, %v9567_v63  ;;  %v9559_v30 = vld [vmem:[%s11446_s29 + $0x10] sm:$0xf0] }
 0x968   : > { %v7817_v41 = vadd.f32 0.4994258, %v7816_v25  ;;  %7953 = vmatpush.bf16.msrb.mxu2 %v9566_v20 }
 0x969   : > { %v7784_v7 = vadd.f32 %v10270_v26, %v7783_v50  ;;  %v7803_v15 = vmul.f32 %v7802_v6, %v13875_v34  ;;  %v7837_v58 = vadd.f32 1.0, %v9552_v36  ;;  %v9895_v50 = vld [vmem:[%s11446_s29 + $0xc] sm:$0xf0] }
 0x96a   : > { %v7818_v9 = vmul.f32 %v7817_v41, %v13875_v34  ;;  %v9558_v16 = vor.u32 %v9895_v50, %v9557_v17  ;;  %7971 = vmatpush.bf16.msrb.mxu3 %v9570_v0 }
 0x96b   : > { %v7788_v62 = vsel %vm7787_vm10, %v10270_v26, %v7784_v7  ;;  %v7804_v3 = vadd.f32 0.05243302, %v7803_v15  ;;  %v9897_v26 = vld [vmem:[%s11446_s29 + $0x24] sm:$0xf]  ;;  %v7840_v45 = vmul.f32 %v7837_v58, %v7711_v10 }
 0x96c   : > { %v7793_v14 = vsel %vm7790_vm11, %v7792_v8, %v7788_v62  ;;  %v9578_v21 = vor.u32 %v9897_v26, %v9575_v54  ;;  %v7819_v43 = vadd.f32 1.0, %v7818_v9  ;;  %v9893_v7 = vld [vmem:[%s11446_s29 + $0x4] sm:$0xf]  ;;  %7917 = vmatpush.bf16.msrb.mxu0 %v9558_v16 }
 0x96d   : > { %v7794_v28 = vmul.f32 %v7793_v14, %v7769_v42  ;;  %v7805_v47 = vmul.f32 %v7804_v3, %v13875_v34  ;;  %v9562_v2 = vor.u32 %v9893_v7, %v9559_v30 }
 0x96e   : > { %7934 = vmatpush.bf16.msrb.mxu1 %v9578_v21  ;;  %10271 = vrcp.f32 %v7819_v43  ;;  %v7831_v14 = vand.u32 2147483648, %v7819_v43  ;;  %v7829_v29 = vand.u32 2147483647, %v7819_v43  ;;  %vm7825_vm14 = vweird.f32 %v7819_v43 }
 0x96f   : > { %v9553_v5 = vclamps-f32 %v7794_v28, 1.0  ;;  %v7806_v42 = vadd.f32 0.18741608, %v7805_v47 }
 0x970   : > { %v7832_v15 = vor.u32 1.1754944e-38, %v7831_v14  ;;  %vm7830_vm0 = vcmp.eq.f32.partialorder %v7829_v29, 8.507059e+37 }
 0x971   : > { %v7838_v1 = vadd.f32 1.0, %v9553_v5  ;;  %v7807_v62 = vmul.f32 %v7806_v42, %v13875_v34  ;;  %v7713_v34 = vmul.f32 0.5, %v13867_v40 }
 0x972   : > { %7935 = vmatpush.bf16.msrb.mxu1 %v9562_v2 }
 0x973   : > { %v7841_v22 = vmul.f32 %v7838_v1, %v7712_v24  ;;  %v7808_v36 = vadd.f32 1.1283791, %v7807_v62 }
 0x974   : > { %v10272_v8 = vpop.eup %10271 }
 0x975   : > { %v7843_v59 = vpack.c.bf16 %v7841_v22, %v7840_v45  ;;  %v7821_v6 = vmul.f32 %v10272_v8, %v7819_v43  ;;  %vm7826_vm13 = vweird.f32 %v10272_v8  ;;  %v7809_v55 = vmul.f32 %v7808_v36, %v13871_v12  ;;  %v7853_v12 = vld [vmem:[%s14393_s0] sm:$0xf] }
 0x976   : > { %vm7827_vm15 = vmor %vm7825_vm14, %vm7826_vm13  ;;  %v7855_v13 = vperm.slane %v7853_v12, 0  ;;  %v7856_v3 = vperm.slane %v7853_v12, 1  ;;  %v7857_v22 = vperm.slane %v7853_v12, 2  ;;  %v7858_v44 = vperm.slane %v7853_v12, 3 }
 0x977   : > { %9591 = vmatmul.msk.bf16.vlgmr.msrb.gmra.mxu2 %vm7903_vm12, %v7843_v59  ;;  %9593 = vmatmul.msk.bf16.vlgmr.msrb.gmra.mxu3 %vm7903_vm12, %v7843_v59  ;;  %v7822_v31 = vsub.f32 1.0, %v7821_v6 }
 0x978   : > { %9587 = vmatmul.msk.bf16.vlgmr.msrb.gmra.mxu0 %vm7903_vm12, %v7843_v59  ;;  %9589 = vmatmul.msk.bf16.vlgmr.msrb.gmra.mxu1 %vm7903_vm12, %v7843_v59 }
 0x979   : > { %v7823_v28 = vmul.f32 %v10272_v8, %v7822_v31 }
 0x97b   : > { %v7824_v5 = vadd.f32 %v10272_v8, %v7823_v28 }
 0x97d   : > { %v7828_v10 = vsel %vm7827_vm15, %v10272_v8, %v7824_v5 }
 0x97e   : > { %v7833_v58 = vsel %vm7830_vm0, %v7832_v15, %v7828_v10 }
 0x97f   : > { %v7834_v24 = vmul.f32 %v7833_v58, %v7809_v55 }
 0x981   : > { %v9554_v1 = vclamps-f32 %v7834_v24, 1.0 }
 0x983   : > { %v7839_v25 = vadd.f32 1.0, %v9554_v1 }
 0x985   : > { %v7842_v51 = vmul.f32 %v7839_v25, %v7713_v34 }
 0x987   : > { %v7844_v57 = vpack.c.bf16 %v7842_v51, %v7842_v51 }
 0x989   : > { %9588 = vmatmul.msk.bf16.gmra.mxu0 %vm7903_vm12, %v7844_v57  ;;  %9590 = vmatmul.msk.bf16.gmra.mxu1 %vm7903_vm12, %v7844_v57 }
 0x98a   : > { %9592 = vmatmul.msk.bf16.gmra.mxu2 %vm7903_vm12, %v7844_v57  ;;  %9594 = vmatmul.msk.bf16.gmra.mxu3 %vm7903_vm12, %v7844_v57 }
 0x9f5   : > { %v7919_v41 = vpop.f32.mrf.mxu0  ;;  %v7937_v23 = vpop.f32.mrf.mxu1 }
 0x9f6   : > { %v7920_v27 = vadd.f32 %v7919_v41, %v7855_v13  ;;  %v7938_v40 = vadd.f32 %v7937_v23, %v7856_v3 }
 0x9f8   : > { %v13920_v35 = vadd.f32 %v7920_v27, %v13629_v18  ;;  %v13923_v32 = vadd.f32 %v7938_v40, %v13619_v4 }
 0x9fa   : > { %v7955_v26 = vpop.f32.mrf.mxu2  ;;  %v7973_v33 = vpop.f32.mrf.mxu3 }
 0x9fb   : > { %v7956_v9 = vadd.f32 %v7955_v26, %v7857_v22  ;;  %v7974_v54 = vadd.f32 %v7973_v33, %v7858_v44 }
 0x9fd   : > { %v13926_v60 = vadd.f32 %v7956_v9, %v13634_v52  ;;  %v13929_v38 = vadd.f32 %v7974_v54, %v13659_v19  ;;  %v7921_v45 = vpop.f32.mrf.mxu0  ;;  %v7939_v20 = vpop.f32.mrf.mxu1 }
 0x9fe   : > { %v7922_v21 = vadd.f32 %v7921_v45, %v7855_v13  ;;  %v7940_v46 = vadd.f32 %v7939_v20, %v7856_v3 }
 0xa00   : > { %v13932_v18 = vadd.f32 %v7922_v21, %v13665_v61  ;;  %v13935_v4 = vadd.f32 %v7940_v46, %v13654_v37 }
 0xa02   : > { %v7957_v63 = vpop.f32.mrf.mxu2  ;;  %v7975_v43 = vpop.f32.mrf.mxu3 }
 0xa03   : > { %v7958_v17 = vadd.f32 %v7957_v63, %v7857_v22  ;;  %v7976_v0 = vadd.f32 %v7975_v43, %v7858_v44 }
 0xa05   : > { %v13938_v52 = vadd.f32 %v7958_v17, %v13670_v49  ;;  %v13941_v19 = vadd.f32 %v7976_v0, %v13695_v56 }
 0xa06   : > { %v7924_v50 = vpop.f32.mrf.mxu0  ;;  %v7942_v59 = vpop.f32.mrf.mxu1 }
 0xa07   : > { %v7925_v47 = vadd.f32 %v7924_v50, %v7855_v13  ;;  %v7943_v16 = vadd.f32 %v7942_v59, %v7856_v3 }
 0xa09   : > { %v13944_v61 = vadd.f32 %v7925_v47, %v13712_v53  ;;  %v13947_v37 = vadd.f32 %v7943_v16, %v13706_v11 }
 0xa0d   : > { %v7960_v7 = vpop.f32.mrf.mxu2  ;;  %v7978_v30 = vpop.f32.mrf.mxu3 }
 0xa0e   : > { %v7961_v2 = vadd.f32 %v7960_v7, %v7857_v22  ;;  %v7979_v42 = vadd.f32 %v7978_v30, %v7858_v44  ;;  %v7926_v8 = vpop.f32.mrf.mxu0  ;;  %v7944_v49 = vpop.f32.mrf.mxu1 }
 0xa10   : > { %v13950_v62 = vadd.f32 %v7961_v2, %v13717_v48  ;;  %v13953_v56 = vadd.f32 %v7979_v42, %v13723_v39 }
 0xa11   : > { %7997 = sbr.rel (%p9595_p5) target bundleno = 2594 (0xa22), region = 192 }
 0xa15   : > { %v7962_v6 = vpop.f32.mrf.mxu2  ;;  %v7980_v31 = vpop.f32.mrf.mxu3 }
 0xa16   : > { %7998 = vst [vmem:[%s14395_s27] sm:$0xff] %v13920_v35 }
 0xa17   : > { %7999 = vst [vmem:[%s14395_s27 + $0x8] sm:$0xff] %v13923_v32 }
 0xa18   : > { %8000 = vst [vmem:[%s14395_s27 + $0x10] sm:$0xff] %v13926_v60 }
 0xa19   : > { %8001 = vst [vmem:[%s14395_s27 + $0x18] sm:$0xff] %v13929_v38 }
 0xa1a   : > { %8002 = vst [vmem:[%s14395_s27 + $0x20] sm:$0xff] %v13932_v18 }
 0xa1b   : > { %8003 = vst [vmem:[%s14395_s27 + $0x28] sm:$0xff] %v13935_v4 }
 0xa1c   : > { %8004 = vst [vmem:[%s14395_s27 + $0x30] sm:$0xff] %v13938_v52 }
 0xa1d   : > { %8005 = vst [vmem:[%s14395_s27 + $0x38] sm:$0xff] %v13941_v19 }
 0xa1e   : > { %8006 = vst [vmem:[%s14395_s27 + $0x40] sm:$0xff] %v13944_v61 }
 0xa1f   : > { %8007 = vst [vmem:[%s14395_s27 + $0x48] sm:$0xff] %v13947_v37 }
 0xa20   : > { %8008 = vst [vmem:[%s14395_s27 + $0x50] sm:$0xff] %v13950_v62 }
 0xa21   : > { %8009 = vst [vmem:[%s14395_s27 + $0x58] sm:$0xff] %v13953_v56 }
 0xa22 PF: > { %s14396_s24 = sld [smem:[#allocation43_spill]] }
 0xa28   : > { %p9596_p8 = scmp.ne.s32.totalorder %s14396_s24, 7 }
 0xa29   : > { %s14397_s4 = sld [smem:[#allocation76_spill]] (!%p9596_p8) }
 0xa2a   : > { %8013 = sbr.rel (%p9596_p8) target bundleno = 3126 (0xc36), region = 196 }
 0xa2f   : > { %v8026_v11 = vadd.f32 %v13947_v37, %v13944_v61  ;;  %v8016_v53 = vadd.f32 %v13923_v32, %v13920_v35  ;;  %v8034_v48 = vmul.f32 %v13920_v35, %v13920_v35  ;;  %v8035_v39 = vmul.f32 %v13923_v32, %v13923_v32  ;;  %v9908_v33 = vld [vmem:[#allocation25 + $0x38] sm:$0xff]  ;;  %v9907_v20 = vld [vmem:[#allocation25 + $0x30] sm:$0xff]  ;;  %v9906_v43 = vld [vmem:[#allocation25 + $0x28] sm:$0xff] }
 0xa30   : > { %v8036_v14 = vmul.f32 %v13926_v60, %v13926_v60  ;;  %v8037_v36 = vmul.f32 %v13929_v38, %v13929_v38  ;;  %v8042_v28 = vmul.f32 %v13944_v61, %v13944_v61  ;;  %v8043_v29 = vmul.f32 %v13947_v37, %v13947_v37  ;;  %v9916_v54 = vld [vmem:[#allocation25 + $0x78] sm:$0xff]  ;;  %8437 = vmatpush.bf16.msra.mxu0 %v9908_v33  ;;  %v9915_v46 = vld [vmem:[#allocation25 + $0x70] sm:$0xff]  ;;  %v9914_v0 = vld [vmem:[#allocation25 + $0x68] sm:$0xff] }
 0xa31   : > { %v8027_v5 = vadd.f32 %v8026_v11, %v13950_v62  ;;  %v8017_v15 = vadd.f32 %v8016_v53, %v13926_v60  ;;  %v8046_v55 = vadd.f32 %v8035_v39, %v8034_v48  ;;  %v8044_v10 = vmul.f32 %v13950_v62, %v13950_v62  ;;  %v9924_v45 = vld [vmem:[#allocation25 + $0xb8] sm:$0xff]  ;;  %8455 = vmatpush.bf16.msra.mxu1 %v9916_v54  ;;  %v9923_v63 = vld [vmem:[#allocation25 + $0xb0] sm:$0xff]  ;;  %v9922_v50 = vld [vmem:[#allocation25 + $0xa8] sm:$0xff] }
 0xa32   : > { %v8056_v58 = vadd.f32 %v8043_v29, %v8042_v28  ;;  %v8021_v24 = vadd.f32 %v13935_v4, %v13932_v18  ;;  %v8038_v1 = vmul.f32 %v13932_v18, %v13932_v18  ;;  %v8039_v57 = vmul.f32 %v13935_v4, %v13935_v4  ;;  %v9932_v21 = vld [vmem:[#allocation25 + $0xf8] sm:$0xff]  ;;  %8473 = vmatpush.bf16.msra.mxu2 %v9924_v45  ;;  %v9931_v17 = vld [vmem:[#allocation25 + $0xf0] sm:$0xff]  ;;  %v9930_v59 = vld [vmem:[#allocation25 + $0xe8] sm:$0xff] }
 0xa33   : > { %v8028_v34 = vadd.f32 %v8027_v5, %v13953_v56  ;;  %v8018_v25 = vadd.f32 %v8017_v15, %v13929_v38  ;;  %v8047_v51 = vadd.f32 %v8046_v55, %v8036_v14  ;;  %v8045_v12 = vmul.f32 %v13953_v56, %v13953_v56  ;;  %8491 = vmatpush.bf16.msra.mxu3 %v9932_v21  ;;  %v9905_v47 = vld [vmem:[#allocation25 + $0x20] sm:$0xff]  ;;  %v9904_v2 = vld [vmem:[#allocation25 + $0x18] sm:$0xff]  ;;  %v9903_v6 = vld [vmem:[#allocation25 + $0x10] sm:$0xff] }
 0xa34   : > { %v8057_v13 = vadd.f32 %v8056_v58, %v8044_v10  ;;  %v8040_v3 = vmul.f32 %v13938_v52, %v13938_v52  ;;  %v8022_v27 = vadd.f32 %v8021_v24, %v13938_v52  ;;  %v8051_v23 = vadd.f32 %v8039_v57, %v8038_v1  ;;  %8438 = vmatpush.bf16.msra.mxu0 %v9907_v20  ;;  %v9913_v16 = vld [vmem:[#allocation25 + $0x60] sm:$0xff]  ;;  %v9912_v42 = vld [vmem:[#allocation25 + $0x58] sm:$0xff]  ;;  %v9911_v31 = vld [vmem:[#allocation25 + $0x50] sm:$0xff] }
 0xa35   : > { %8029 = vadd.xlane.f32.xlu2 %v8028_v34  ;;  %8019 = vadd.xlane.f32.xlu0 %v8018_v25  ;;  %v8048_v41 = vadd.f32 %v8047_v51, %v8037_v36  ;;  %v8041_v22 = vmul.f32 %v13941_v19, %v13941_v19  ;;  %v9921_v7 = vld [vmem:[#allocation25 + $0xa0] sm:$0xff]  ;;  %v9920_v8 = vld [vmem:[#allocation25 + $0x98] sm:$0xff]  ;;  %v9919_v11 = vld [vmem:[#allocation25 + $0x90] sm:$0xff] }
 0xa36   : > { %v8052_v40 = vadd.f32 %v8051_v23, %v8040_v3  ;;  %v8058_v44 = vadd.f32 %v8057_v13, %v8045_v12  ;;  %v8023_v26 = vadd.f32 %v8022_v27, %v13941_v19  ;;  %8456 = vmatpush.bf16.msra.mxu1 %v9915_v46  ;;  %8474 = vmatpush.bf16.msra.mxu2 %v9923_v63  ;;  %v9929_v30 = vld [vmem:[#allocation25 + $0xe0] sm:$0xff]  ;;  %v9928_v49 = vld [vmem:[#allocation25 + $0xd8] sm:$0xff]  ;;  %v9927_v53 = vld [vmem:[#allocation25 + $0xd0] sm:$0xff] }
 0xa37   : > { %8049 = vadd.xlane.f32.xlu1 %v8048_v41  ;;  %8492 = vmatpush.bf16.msra.mxu3 %v9931_v17  ;;  %v9902_v28 = vld [vmem:[#allocation25 + $0x8] sm:$0xff]  ;;  %v9901_v24 = vld [vmem:[#allocation25] sm:$0xff] }
 0xa38   : > { %v8053_v9 = vadd.f32 %v8052_v40, %v8041_v22  ;;  %8439 = vmatpush.bf16.msra.mxu0 %v9906_v43  ;;  %v9910_v29 = vld [vmem:[#allocation25 + $0x48] sm:$0xff]  ;;  %v9909_v1 = vld [vmem:[#allocation25 + $0x40] sm:$0xff] }
 0xa39   : > { %v9918_v5 = vld [vmem:[#allocation25 + $0x88] sm:$0xff]  ;;  %v9917_v25 = vld [vmem:[#allocation25 + $0x80] sm:$0xff] }
 0xa3a   : > { %8457 = vmatpush.bf16.msra.mxu1 %v9914_v0  ;;  %8475 = vmatpush.bf16.msra.mxu2 %v9922_v50  ;;  %v9926_v58 = vld [vmem:[#allocation25 + $0xc8] sm:$0xff]  ;;  %v9925_v51 = vld [vmem:[#allocation25 + $0xc0] sm:$0xff] }
 0xa3b   : > { %8493 = vmatpush.bf16.msra.mxu3 %v9930_v59 }
 0xa3c   : > { %8440 = vmatpush.bf16.msra.mxu0 %v9905_v47  ;;  %v8014_v47 = vld [vmem:[#allocation22] sm:$0xf] }
 0xa3d   : > { %8059 = vadd.xlane.f32.xlu2 %v8058_v44  ;;  %8024 = vadd.xlane.f32.xlu0 %v8023_v26 }
 0xa3e   : > { %8458 = vmatpush.bf16.msra.mxu1 %v9913_v16  ;;  %8476 = vmatpush.bf16.msra.mxu2 %v9921_v7 }
 0xa3f   : > { %8054 = vadd.xlane.f32.xlu1 %v8053_v9  ;;  %8494 = vmatpush.bf16.msra.mxu3 %v9929_v30 }
 0xa40   : > { %8441 = vmatpush.bf16.msra.mxu0 %v9904_v2  ;;  %v14063_v2 = vperm.slane %v8014_v47, 0 }
 0xa42   : > { %8459 = vmatpush.bf16.msra.mxu1 %v9912_v42  ;;  %8477 = vmatpush.bf16.msra.mxu2 %v9920_v8  ;;  %v14067_v8 = vperm.slane %v8014_v47, 1 }
 0xa43   : > { %8495 = vmatpush.bf16.msra.mxu3 %v9928_v49 }
 0xa44   : > { %8442 = vmatpush.bf16.msra.mxu0 %v9903_v6 }
 0xa46   : > { %8460 = vmatpush.bf16.msra.mxu1 %v9911_v31  ;;  %8478 = vmatpush.bf16.msra.mxu2 %v9919_v11  ;;  %v8015_v31 = vld [vmem:[#allocation24] sm:$0xf] }
 0xa47   : > { %8496 = vmatpush.bf16.msra.mxu3 %v9927_v53 }
 0xa48   : > { %8443 = vmatpush.bf16.msra.mxu0 %v9902_v28 }
 0xa4a   : > { %8461 = vmatpush.bf16.msra.mxu1 %v9910_v29  ;;  %8479 = vmatpush.bf16.msra.mxu2 %v9918_v5 }
 0xa4b   : > { %8497 = vmatpush.bf16.msra.mxu3 %v9926_v58  ;;  %v8150_v58 = vperm.slane %v8015_v31, 1 }
 0xa4c   : > { %8444 = vmatpush.bf16.msra.mxu0 %v9901_v24  ;;  %v8151_v24 = vperm.slane %v8015_v31, 2 }
 0xa4e   : > { %8462 = vmatpush.bf16.msra.mxu1 %v9909_v1  ;;  %8480 = vmatpush.bf16.msra.mxu2 %v9917_v25  ;;  %v8152_v1 = vperm.slane %v8015_v31, 3 }
 0xa4f   : > { %8498 = vmatpush.bf16.msra.mxu3 %v9925_v51 }
 0xaa8   : > { %v8030_v48 = vpop.xlane.xlu2 %8029  ;;  %v8020_v39 = vpop.xlane.xlu0 %8019 }
 0xaa9   : > { %v14041_v14 = vmul.f32 0.0024509805, %v8020_v39  ;;  %v14043_v15 = vmul.f32 0.0024509805, %v8030_v48  ;;  %v8130_v39 = vperm.slane %v8014_v47, 2 }
 0xaaa   : > { %v8050_v36 = vpop.xlane.xlu1 %8049 }
 0xaab   : > { %v8061_v55 = vmul.f32 0.0024509805, %v8050_v36  ;;  %v8064_v10 = vmul.f32 %v14041_v14, %v14041_v14  ;;  %v8066_v12 = vmul.f32 %v14043_v15, %v14043_v15  ;;  %v8070_v30 = vsub.f32 %v13920_v35, %v14041_v14 }
 0xaac   : > { %v8071_v42 = vsub.f32 %v13923_v32, %v14041_v14  ;;  %v8072_v11 = vsub.f32 %v13926_v60, %v14041_v14  ;;  %v8073_v53 = vsub.f32 %v13929_v38, %v14041_v14  ;;  %v8131_v36 = vperm.slane %v8014_v47, 3 }
 0xaad   : > { %v8067_v34 = vsub.f32 %v8061_v55, %v8064_v10  ;;  %v8149_v10 = vperm.slane %v8015_v31, 0  ;;  %v8079_v31 = vsub.f32 %v13947_v37, %v14043_v15 }
 0xaaf   : > { %v8082_v57 = vadd.f32 1e-05, %v8067_v34 }
 0xab0   : > { %v8060_v13 = vpop.xlane.xlu2 %8059  ;;  %v8025_v3 = vpop.xlane.xlu0 %8024 }
 0xab1   : > { %10290 = vrsqrt.f32 %v8082_v57  ;;  %v8063_v41 = vmul.f32 0.0024509805, %v8060_v13  ;;  %v14049_v27 = vmul.f32 0.0024509805, %v8025_v3  ;;  %vm8091_vm2 = vweird.f32 %v8082_v57 }
 0xab2   : > { %v8055_v23 = vpop.xlane.xlu1 %8054 }
 0xab3   : > { %v8069_v22 = vsub.f32 %v8063_v41, %v8066_v12  ;;  %v8062_v40 = vmul.f32 0.0024509805, %v8055_v23  ;;  %v8065_v44 = vmul.f32 %v14049_v27, %v14049_v27  ;;  %v8074_v51 = vsub.f32 %v13932_v18, %v14049_v27 }
 0xab4   : > { %v8076_v12 = vsub.f32 %v13938_v52, %v14049_v27  ;;  %v8077_v13 = vsub.f32 %v13941_v19, %v14049_v27 }
 0xab5   : > { %v14053_v26 = vadd.f32 1e-05, %v8069_v22  ;;  %v8068_v9 = vsub.f32 %v8062_v40, %v8065_v44 }
 0xab7   : > { %v10291_v33 = vpop.eup %10290  ;;  %10292 = vrsqrt.f32 %v14053_v26  ;;  %v8083_v54 = vadd.f32 1e-05, %v8068_v9  ;;  %vm8111_vm7 = vweird.f32 %v14053_v26 }
 0xab8   : > { %v8086_v45 = vmul.f32 %v10291_v33, %v8082_v57  ;;  %vm8092_vm1 = vweird.f32 %v10291_v33  ;;  %v8075_v57 = vsub.f32 %v13935_v4, %v14049_v27 }
 0xab9   : > { %10294 = vrsqrt.f32 %v8083_v54  ;;  %vm8093_vm3 = vmor %vm8091_vm2, %vm8092_vm1  ;;  %vm8101_vm5 = vweird.f32 %v8083_v54 }
 0xaba   : > { %v8087_v21 = vmul.f32 %v10291_v33, %v8086_v45 }
 0xabc   : > { %v8088_v20 = vmul.f32 0.5, %v8087_v21 }
 0xabd   : > { %v14056_v46 = vpop.eup %10292 }
 0xabe   : > { %v8089_v63 = vsub.f32 1.5, %v8088_v20  ;;  %v8106_v17 = vmul.f32 %v14056_v46, %v14053_v26  ;;  %vm8112_vm8 = vweird.f32 %v14056_v46 }
 0xabf   : > { %v10295_v43 = vpop.eup %10294  ;;  %vm8113_vm9 = vmor %vm8111_vm7, %vm8112_vm8 }
 0xac0   : > { %v8090_v0 = vmul.f32 %v10291_v33, %v8089_v63  ;;  %v8107_v50 = vmul.f32 %v14056_v46, %v8106_v17  ;;  %v8096_v59 = vmul.f32 %v10295_v43, %v8083_v54  ;;  %vm8102_vm4 = vweird.f32 %v10295_v43 }
 0xac1   : > { %vm8103_vm6 = vmor %vm8101_vm5, %vm8102_vm4 }
 0xac2   : > { %v8094_v16 = vsel %vm8093_vm3, %v10291_v33, %v8090_v0  ;;  %v8097_v7 = vmul.f32 %v10295_v43, %v8096_v59  ;;  %v8108_v49 = vmul.f32 0.5, %v8107_v50 }
 0xac3   : > { %v8115_v48 = vmul.f32 %v8094_v16, %v8070_v30  ;;  %v8116_v29 = vmul.f32 %v8094_v16, %v8071_v42  ;;  %v8117_v5 = vmul.f32 %v8094_v16, %v8072_v11  ;;  %v8118_v55 = vmul.f32 %v8094_v16, %v8073_v53 }
 0xac4   : > { %v8098_v6 = vmul.f32 0.5, %v8097_v7  ;;  %v8109_v34 = vsub.f32 1.5, %v8108_v49  ;;  %v8080_v11 = vsub.f32 %v13950_v62, %v14043_v15  ;;  %v8081_v53 = vsub.f32 %v13953_v56, %v14043_v15 }
 0xac5   : > { %v8136_v14 = vmul.f32 %v14063_v2, %v8115_v48  ;;  %v8137_v41 = vmul.f32 %v14067_v8, %v8116_v29  ;;  %v8138_v23 = vmul.f32 %v8130_v39, %v8117_v5  ;;  %v8139_v22 = vmul.f32 %v8131_v36, %v8118_v55 }
 0xac6   : > { %v8099_v28 = vsub.f32 1.5, %v8098_v6  ;;  %v8110_v54 = vmul.f32 %v14056_v46, %v8109_v34  ;;  %v8078_v6 = vsub.f32 %v13944_v61, %v14043_v15  ;;  %v10289_v15 = vld [vmem:[#allocation27] ss:$0 sm:$0xff] }
 0xac7   : > { %v8157_v63 = vadd.f32 %v8149_v10, %v8136_v14  ;;  %v8158_v17 = vadd.f32 %v8150_v58, %v8137_v41  ;;  %v8160_v0 = vadd.f32 %v8152_v1, %v8139_v22 }
 0xac8   : > { %v8100_v25 = vmul.f32 %v10295_v43, %v8099_v28  ;;  %v8114_v49 = vsel %vm8113_vm9, %v14056_v46, %v8110_v54  ;;  %v9964_v54 = vld [vmem:[#allocation28 + $0xf4] sm:$0xf0] }
 0xac9   : > { %v8123_v48 = vmul.f32 %v8114_v49, %v8078_v6  ;;  %v8124_v28 = vmul.f32 %v8114_v49, %v8079_v31  ;;  %v8125_v29 = vmul.f32 %v8114_v49, %v8080_v11  ;;  %v8126_v46 = vmul.f32 %v8114_v49, %v8081_v53  ;;  %v9834_v11 = vld [vmem:[#allocation28 + $0xc8] sm:$0xf]  ;;  %v9960_v53 = vld [vmem:[#allocation28 + $0xd4] sm:$0xf0] }
 0xaca   : > { %v8104_v3 = vsel %vm8103_vm6, %v10295_v43, %v8100_v25  ;;  %v8159_v43 = vadd.f32 %v8151_v24, %v8138_v23 }
 0xacb   : > { %v8119_v40 = vmul.f32 %v8104_v3, %v8074_v51  ;;  %v8120_v44 = vmul.f32 %v8104_v3, %v8075_v57  ;;  %v8121_v9 = vmul.f32 %v8104_v3, %v8076_v12  ;;  %v8122_v33 = vmul.f32 %v8104_v3, %v8077_v13 }
 0xacc   : > { %v8144_v5 = vmul.f32 %v14063_v2, %v8123_v48  ;;  %v8145_v55 = vmul.f32 %v14067_v8, %v8124_v28  ;;  %v8146_v34 = vmul.f32 %v8130_v39, %v8125_v29  ;;  %v8147_v25 = vmul.f32 %v8131_v36, %v8126_v46  ;;  %v9958_v48 = vld [vmem:[#allocation28 + $0xcc] sm:$0xf] }
 0xacd   : > { %v8140_v45 = vmul.f32 %v14063_v2, %v8119_v40  ;;  %v8141_v21 = vmul.f32 %v14067_v8, %v8120_v44  ;;  %v8142_v27 = vmul.f32 %v8130_v39, %v8121_v9  ;;  %v8143_v20 = vmul.f32 %v8131_v36, %v8122_v33  ;;  %v9850_v33 = vld [vmem:[#allocation28 + $0xe8] sm:$0xf] }
 0xace   : > { %v8165_v51 = vadd.f32 %v8149_v10, %v8144_v5  ;;  %v8166_v14 = vadd.f32 %v8150_v58, %v8145_v55  ;;  %v8167_v57 = vadd.f32 %v8151_v24, %v8146_v34  ;;  %v8168_v12 = vadd.f32 %v8152_v1, %v8147_v25  ;;  %v9836_v55 = vld [vmem:[#allocation28 + $0xd8] sm:$0xf0]  ;;  %v9826_v25 = vld [vmem:[#allocation28 + $0xc0] sm:$0xf] }
 0xacf   : > { %v8161_v50 = vadd.f32 %v8149_v10, %v8140_v45  ;;  %v8162_v59 = vadd.f32 %v8150_v58, %v8141_v21  ;;  %v8163_v47 = vadd.f32 %v8151_v24, %v8142_v27  ;;  %v8164_v16 = vadd.f32 %v8152_v1, %v8143_v20  ;;  %v9962_v45 = vld [vmem:[#allocation28 + $0xec] sm:$0xf] }
 0xad0   : > { %v8173_v13 = vpack.c.bf16 %v8165_v51, %v8165_v51  ;;  %v8174_v3 = vpack.c.bf16 %v8166_v14, %v8166_v14  ;;  %v8175_v41 = vpack.c.bf16 %v8167_v57, %v8167_v57  ;;  %v8176_v23 = vpack.c.bf16 %v8168_v12, %v8168_v12  ;;  %v9959_v51 = vld [vmem:[#allocation28 + $0xcc] sm:$0xf0]  ;;  %v9957_v14 = vld [vmem:[#allocation28 + $0xc4] sm:$0xf] }
 0xad1   : > { %v8169_v7 = vpack.c.bf16 %v8161_v50, %v8157_v63  ;;  %v8170_v30 = vpack.c.bf16 %v8162_v59, %v8158_v17  ;;  %v8171_v26 = vpack.c.bf16 %v8163_v47, %v8159_v43  ;;  %v8172_v42 = vpack.c.bf16 %v8164_v16, %v8160_v0  ;;  %v9852_v63 = vld [vmem:[#allocation28 + $0xf8] sm:$0xf0]  ;;  %v9842_v17 = vld [vmem:[#allocation28 + $0xe0] sm:$0xf]  ;;  %v9963_v43 = vld [vmem:[#allocation28 + $0xec] sm:$0xf0] }
 0xad2   : > { %v9851_v20 = vor.u32 %v9964_v54, %v9850_v33  ;;  %v9855_v59 = vor.u32 %v9962_v45, %v9852_v63  ;;  %v9843_v47 = vor.u32 %v9963_v43, %v9842_v17  ;;  %v9961_v16 = vld [vmem:[#allocation28 + $0xe4] sm:$0xf]  ;;  %v9835_v5 = vor.u32 %v9960_v53, %v9834_v11  ;;  %v9810_v54 = vld [vmem:[#allocation28 + $0xa0] sm:$0xf]  ;;  %v9955_v45 = vld [vmem:[#allocation28 + $0xac] sm:$0xf0] }
 0xad3   : > { %8445 = vmatmul.bf16.vlgmr.msra.gmra.mxu0 %v8169_v7  ;;  %8463 = vmatmul.bf16.vlgmr.msra.gmra.mxu1 %v8170_v30  ;;  %v9844_v7 = vld [vmem:[#allocation28 + $0xf0] sm:$0xf0]  ;;  %v9839_v34 = vor.u32 %v9958_v48, %v9836_v55  ;;  %v9794_v11 = vld [vmem:[#allocation28 + $0x80] sm:$0xf] }
 0xad4   : > { %8481 = vmatmul.bf16.vlgmr.msra.gmra.mxu2 %v8171_v26  ;;  %8499 = vmatmul.bf16.vlgmr.msra.gmra.mxu3 %v8172_v42  ;;  %v9847_v6 = vor.u32 %v9961_v16, %v9844_v7  ;;  %v9802_v16 = vld [vmem:[#allocation28 + $0x88] sm:$0xf]  ;;  %v9952_v7 = vld [vmem:[#allocation28 + $0x94] sm:$0xf0] }
 0xad5   : > { %8881 = vmatpush.bf16.msrb.mxu2 %v9851_v20  ;;  %8899 = vmatpush.bf16.msrb.mxu3 %v9855_v59 }
 0xad6   : > { %8845 = vmatpush.bf16.msrb.mxu0 %v9843_v47  ;;  %8863 = vmatpush.bf16.msrb.mxu1 %v9847_v6  ;;  %v9950_v6 = vld [vmem:[#allocation28 + $0x8c] sm:$0xf] }
 0xad9   : > { %8882 = vmatpush.bf16.msrb.mxu2 %v9835_v5  ;;  %8900 = vmatpush.bf16.msrb.mxu3 %v9839_v34 }
 0xae3   : > { %8450 = vmatmul.bf16.gmra.mxu0 %v8173_v13  ;;  %8468 = vmatmul.bf16.gmra.mxu1 %v8174_v3  ;;  %v9827_v13 = vor.u32 %v9959_v51, %v9826_v25 }
 0xae4   : > { %8486 = vmatmul.bf16.gmra.mxu2 %v8175_v41  ;;  %8504 = vmatmul.bf16.gmra.mxu3 %v8176_v23  ;;  %v9828_v41 = vld [vmem:[#allocation28 + $0xd0] sm:$0xf0]  ;;  %v9818_v23 = vld [vmem:[#allocation28 + $0xa8] sm:$0xf] }
 0xae5   : > { %8846 = vmatpush.bf16.msrb.mxu0 %v9827_v13  ;;  %v9796_v13 = vld [vmem:[#allocation28 + $0x90] sm:$0xf0] }
 0xb50   : > { %v8446_v22 = vpop.f32.mrf.mxu0  ;;  %v8464_v40 = vpop.f32.mrf.mxu1 }
 0xb51   : > { %v8447_v2 = vadd.f32 %v10289_v15, %v8446_v22 }
 0xb53   : > { %v8465_v44 = vadd.f32 %v8464_v40, %v8447_v2  ;;  %v9831_v2 = vor.u32 %v9957_v14, %v9828_v41  ;;  %v9786_v41 = vld [vmem:[#allocation28 + $0x68] sm:$0xf] }
 0xb55   : > { %8864 = vmatpush.bf16.msrb.mxu1 %v9831_v2 }
 0xb57   : > { %v8482_v8 = vpop.f32.mrf.mxu2  ;;  %v8500_v39 = vpop.f32.mrf.mxu3 }
 0xb58   : > { %v8483_v36 = vadd.f32 %v8482_v8, %v8465_v44  ;;  %v8448_v10 = vpop.f32.mrf.mxu0  ;;  %v8466_v58 = vpop.f32.mrf.mxu1  ;;  %v9956_v44 = vld [vmem:[#allocation28 + $0xb4] sm:$0xf0]  ;;  %v9954_v8 = vld [vmem:[#allocation28 + $0xac] sm:$0xf] }
 0xb59   : > { %v8449_v1 = vadd.f32 %v10289_v15, %v8448_v10 }
 0xb5a   : > { %v14100_v24 = vadd.f32 %v8500_v39, %v8483_v36  ;;  %v9820_v39 = vld [vmem:[#allocation28 + $0xb8] sm:$0xf0] }
 0xb5b   : > { %v8467_v27 = vadd.f32 %v8466_v58, %v8449_v1  ;;  %v9819_v1 = vor.u32 %v9956_v44, %v9818_v23  ;;  %v9823_v33 = vor.u32 %v9954_v8, %v9820_v39  ;;  %v9948_v8 = vld [vmem:[#allocation28 + $0x74] sm:$0xf0]  ;;  %v9946_v39 = vld [vmem:[#allocation28 + $0x6c] sm:$0xf] }
 0xb5c   : > { %v14103_v9 = vmul.f32 0.70710677, %v14100_v24 }
 0xb5d   : > { %8883 = vmatpush.bf16.msrb.mxu2 %v9819_v1  ;;  %8901 = vmatpush.bf16.msrb.mxu3 %v9823_v33  ;;  %v9787_v1 = vor.u32 %v9948_v8, %v9786_v41  ;;  %v9754_v8 = vld [vmem:[#allocation28 + $0x28] sm:$0xf] }
 0xb5e   : > { %v8515_v21 = vmul.f32 %v14103_v9, %v14103_v9 }
 0xb5f   : > { %v8484_v0 = vpop.f32.mrf.mxu2  ;;  %v8502_v50 = vpop.f32.mrf.mxu3 }
 0xb60   : > { %v14107_v30 = vmin.f32 %v8515_v21, 16.0  ;;  %v8485_v26 = vadd.f32 %v8484_v0, %v8467_v27  ;;  %v8451_v42 = vpop.f32.mrf.mxu0  ;;  %v8469_v49 = vpop.f32.mrf.mxu1  ;;  %v9953_v21 = vld [vmem:[#allocation28 + $0xa4] sm:$0xf]  ;;  %v9811_v0 = vor.u32 %v9955_v45, %v9810_v54  ;;  %v9778_v54 = vld [vmem:[#allocation28 + $0x60] sm:$0xf] }
 0xb61   : > { %v8452_v31 = vadd.f32 %v10289_v15, %v8451_v42 }
 0xb62   : > { %v8517_v28 = vmul.f32 2.1237322e-06, %v14107_v30  ;;  %v8528_v29 = vmul.f32 3.8918573e-05, %v14107_v30  ;;  %v14111_v46 = vadd.f32 %v8502_v50, %v8485_v26  ;;  %v9812_v50 = vld [vmem:[#allocation28 + $0xb0] sm:$0xf0]  ;;  %8847 = vmatpush.bf16.msrb.mxu0 %v9811_v0 }
 0xb63   : > { %v8470_v40 = vadd.f32 %v8469_v49, %v8452_v31  ;;  %v9815_v47 = vor.u32 %v9953_v21, %v9812_v50  ;;  %v9803_v49 = vor.u32 %v9952_v7, %v9802_v16  ;;  %v9804_v31 = vld [vmem:[#allocation28 + $0x98] sm:$0xf0]  ;;  %v9770_v16 = vld [vmem:[#allocation28 + $0x48] sm:$0xf] }
 0xb64   : > { %v8518_v57 = vadd.f32 0.00028619796, %v8517_v28  ;;  %v8529_v12 = vadd.f32 0.001143296, %v8528_v29  ;;  %v14114_v3 = vmul.f32 0.70710677, %v14111_v46  ;;  %v9807_v28 = vor.u32 %v9950_v6, %v9804_v31 }
 0xb65   : > { %v9951_v29 = vld [vmem:[#allocation28 + $0x8c] sm:$0xf0]  ;;  %8865 = vmatpush.bf16.msrb.mxu1 %v9815_v47  ;;  %8884 = vmatpush.bf16.msrb.mxu2 %v9803_v49  ;;  %v9944_v31 = vld [vmem:[#allocation28 + $0x54] sm:$0xf0] }
 0xb66   : > { %v8519_v15 = vmul.f32 %v8518_v57, %v14107_v30  ;;  %v8530_v22 = vmul.f32 %v8529_v12, %v14107_v30  ;;  %v8555_v36 = vmul.f32 %v14114_v3, %v14114_v3  ;;  %v9795_v34 = vor.u32 %v9951_v29, %v9794_v11  ;;  %8902 = vmatpush.bf16.msrb.mxu3 %v9807_v28  ;;  %v9949_v12 = vld [vmem:[#allocation28 + $0x84] sm:$0xf]  ;;  %v9942_v29 = vld [vmem:[#allocation28 + $0x4c] sm:$0xf] }
 0xb67   : > { %v8487_v10 = vpop.f32.mrf.mxu2  ;;  %v8505_v58 = vpop.f32.mrf.mxu3  ;;  %v9799_v44 = vor.u32 %v9949_v12, %v9796_v13  ;;  %v9771_v28 = vor.u32 %v9944_v31, %v9770_v16  ;;  %v9937_v16 = vld [vmem:[#allocation28 + $0x24] sm:$0xf] }
 0xb68   : > { %v8520_v27 = vadd.f32 0.0036580483, %v8519_v15  ;;  %v8531_v20 = vadd.f32 0.014752088, %v8530_v22  ;;  %v8488_v63 = vadd.f32 %v8487_v10, %v8470_v40  ;;  %v8453_v17 = vpop.f32.mrf.mxu0  ;;  %v8471_v43 = vpop.f32.mrf.mxu1  ;;  %v14120_v59 = vmin.f32 %v8555_v36, 16.0  ;;  %8848 = vmatpush.bf16.msrb.mxu0 %v9795_v34 }
 0xb69   : > { %v9788_v36 = vld [vmem:[#allocation28 + $0x78] sm:$0xf0]  ;;  %8866 = vmatpush.bf16.msrb.mxu1 %v9799_v44  ;;  %8885 = vmatpush.bf16.msrb.mxu2 %v9787_v1  ;;  %v9945_v17 = vld [vmem:[#allocation28 + $0x64] sm:$0xf]  ;;  %v9780_v43 = vld [vmem:[#allocation28 + $0x70] sm:$0xf0] }
 0xb6a   : > { %v8532_v26 = vmul.f32 %v8531_v20, %v14107_v30  ;;  %v14123_v42 = vadd.f32 %v8505_v58, %v8488_v63  ;;  %v8557_v53 = vmul.f32 2.1237322e-06, %v14120_v59  ;;  %v8568_v48 = vmul.f32 3.8918573e-05, %v14120_v59  ;;  %v9947_v63 = vld [vmem:[#allocation28 + $0x6c] sm:$0xf0] }
 0xb6b   : > { %v8521_v5 = vmul.f32 %v8520_v27, %v14107_v30  ;;  %v9791_v33 = vor.u32 %v9946_v39, %v9788_v36  ;;  %v9779_v49 = vor.u32 %v9947_v63, %v9778_v54  ;;  %v9783_v6 = vor.u32 %v9945_v17, %v9780_v43  ;;  %v9764_v44 = vld [vmem:[#allocation28 + $0x50] sm:$0xf0]  ;;  %v9756_v1 = vld [vmem:[#allocation28 + $0x38] sm:$0xf0]  ;;  %v9746_v63 = vld [vmem:[#allocation28 + $0x20] sm:$0xf] }
 0xb6c   : > { %v8533_v55 = vadd.f32 0.112945676, %v8532_v26  ;;  %v8558_v25 = vadd.f32 0.00028619796, %v8557_v53  ;;  %v8569_v51 = vadd.f32 0.001143296, %v8568_v48 }
 0xb6d   : > { %v14129_v14 = vmul.f32 0.70710677, %v14123_v42  ;;  %v8522_v10 = vadd.f32 0.05243302, %v8521_v5  ;;  %8903 = vmatpush.bf16.msrb.mxu3 %v9791_v33  ;;  %8849 = vmatpush.bf16.msrb.mxu0 %v9779_v49  ;;  %v9772_v5 = vld [vmem:[#allocation28 + $0x58] sm:$0xf0] }
 0xb6e   : > { %v8534_v57 = vmul.f32 %v8533_v55, %v14107_v30  ;;  %v8559_v23 = vmul.f32 %v8558_v25, %v14120_v59  ;;  %v8570_v15 = vmul.f32 %v8569_v51, %v14120_v59  ;;  %8867 = vmatpush.bf16.msrb.mxu1 %v9783_v6  ;;  %8886 = vmatpush.bf16.msrb.mxu2 %v9771_v28  ;;  %v9762_v25 = vld [vmem:[#allocation28 + $0x40] sm:$0xf]  ;;  %v9943_v51 = vld [vmem:[#allocation28 + $0x4c] sm:$0xf0]  ;;  %v9738_v49 = vld [vmem:[#allocation28 + $0x8] sm:$0xf] }
 0xb6f   : > { %v8595_v22 = vmul.f32 %v14129_v14, %v14129_v14  ;;  %v8489_v40 = vpop.f32.mrf.mxu2  ;;  %v8507_v2 = vpop.f32.mrf.mxu3  ;;  %v8523_v11 = vmul.f32 %v8522_v10, %v14107_v30  ;;  %v9775_v13 = vor.u32 %v9942_v29, %v9772_v5  ;;  %v9763_v41 = vor.u32 %v9943_v51, %v9762_v25  ;;  %v9940_v10 = vld [vmem:[#allocation28 + $0x34] sm:$0xf0]  ;;  %v9939_v17 = vld [vmem:[#allocation28 + $0x2c] sm:$0xf0]  ;;  %v9934_v5 = vld [vmem:[#allocation28 + $0xc] sm:$0xf] }
 0xb70   : > { %v8535_v58 = vadd.f32 0.4994258, %v8534_v57  ;;  %v8560_v45 = vadd.f32 0.0036580483, %v8559_v23  ;;  %v8571_v21 = vadd.f32 0.014752088, %v8570_v15 }
 0xb71   : > { %v14136_v27 = vmin.f32 %v8595_v22, 16.0  ;;  %v9941_v23 = vld [vmem:[#allocation28 + $0x44] sm:$0xf]  ;;  %v8524_v15 = vadd.f32 0.18741608, %v8523_v11  ;;  %8904 = vmatpush.bf16.msrb.mxu3 %v9775_v13  ;;  %8850 = vmatpush.bf16.msrb.mxu0 %v9763_v41 }
 0xb72   : > { %v8536_v20 = vmul.f32 %v8535_v58, %v14107_v30  ;;  %v8561_v0 = vmul.f32 %v8560_v45, %v14120_v59  ;;  %v8572_v50 = vmul.f32 %v8571_v21, %v14120_v59  ;;  %v9767_v36 = vor.u32 %v9941_v23, %v9764_v44  ;;  %v9938_v58 = vld [vmem:[#allocation28 + $0x2c] sm:$0xf]  ;;  %v9936_v11 = vld [vmem:[#allocation28 + $0x14] sm:$0xf0]  ;;  %v9740_v51 = vld [vmem:[#allocation28 + $0x18] sm:$0xf0] }
 0xb73   : > { %v8597_v47 = vmul.f32 2.1237322e-06, %v14136_v27  ;;  %v8608_v26 = vmul.f32 3.8918573e-05, %v14136_v27  ;;  %v9755_v21 = vor.u32 %v9940_v10, %v9754_v8  ;;  %v9739_v25 = vor.u32 %v9936_v11, %v9738_v49  ;;  %v9933_v23 = vld [vmem:[#allocation28 + $0x4] sm:$0xf] }
 0xb74   : > { %v14142_v7 = vadd.f32 1.0, %v8536_v20  ;;  %v8573_v53 = vadd.f32 0.112945676, %v8572_v50  ;;  %v8562_v57 = vadd.f32 0.05243302, %v8561_v0  ;;  %v9759_v20 = vor.u32 %v9938_v58, %v9756_v1  ;;  %8868 = vmatpush.bf16.msrb.mxu1 %v9767_v36 }
 0xb75   : > { %v8598_v48 = vadd.f32 0.00028619796, %v8597_v47  ;;  %v8609_v12 = vadd.f32 0.001143296, %v8608_v26  ;;  %8887 = vmatpush.bf16.msrb.mxu2 %v9755_v21  ;;  %v9747_v47 = vor.u32 %v9939_v17, %v9746_v63  ;;  %v9748_v26 = vld [vmem:[#allocation28 + $0x30] sm:$0xf0] }
 0xb76   : > { %10296 = vrcp.f32 %v14142_v7  ;;  %v8574_v55 = vmul.f32 %v8573_v53, %v14120_v59  ;;  %v8563_v54 = vmul.f32 %v8562_v57, %v14120_v59  ;;  %8905 = vmatpush.bf16.msrb.mxu3 %v9759_v20  ;;  %v8549_v31 = vand.u32 2147483648, %v14142_v7  ;;  %v9730_v57 = vld [vmem:[#allocation28] sm:$0xf] }
 0xb77   : > { %v8599_v34 = vmul.f32 %v8598_v48, %v14136_v27  ;;  %v8610_v2 = vmul.f32 %v8609_v12, %v14136_v27  ;;  %v8525_v53 = vmul.f32 %v8524_v15, %v14107_v30  ;;  %8851 = vmatpush.bf16.msrb.mxu0 %v9747_v47  ;;  %v9935_v12 = vld [vmem:[#allocation28 + $0xc] sm:$0xf0]  ;;  %v8547_v13 = vand.u32 2147483647, %v14142_v7 }
 0xb78   : > { %v8575_v22 = vadd.f32 0.4994258, %v8574_v55  ;;  %v8564_v48 = vadd.f32 0.18741608, %v8563_v54  ;;  %vm8543_vm11 = vweird.f32 %v14142_v7  ;;  %v9743_v30 = vor.u32 %v9934_v5, %v9740_v51 }
 0xb79   : > { %v8600_v40 = vadd.f32 0.0036580483, %v8599_v34  ;;  %v8611_v45 = vadd.f32 0.014752088, %v8610_v2  ;;  %v9751_v34 = vor.u32 %v9937_v16, %v9748_v26  ;;  %8888 = vmatpush.bf16.msrb.mxu2 %v9739_v25  ;;  %v9731_v15 = vor.u32 %v9935_v12, %v9730_v57 }
 0xb7a   : > { %v8576_v39 = vmul.f32 %v8575_v22, %v14120_v59  ;;  %v8526_v2 = vadd.f32 1.1283791, %v8525_v53  ;;  %v8550_v10 = vor.u32 1.1754944e-38, %v8549_v31  ;;  %v8565_v58 = vmul.f32 %v8564_v48, %v14120_v59  ;;  %8906 = vmatpush.bf16.msrb.mxu3 %v9743_v30 }
 0xb7b   : > { %v8612_v50 = vmul.f32 %v8611_v45, %v14136_v27  ;;  %v8601_v28 = vmul.f32 %v8600_v40, %v14136_v27  ;;  %8869 = vmatpush.bf16.msrb.mxu1 %v9751_v34  ;;  %v9732_v40 = vld [vmem:[#allocation28 + $0x10] sm:$0xf0]  ;;  %8852 = vmatpush.bf16.msrb.mxu0 %v9731_v15  ;;  %vm8548_vm13 = vcmp.eq.f32.partialorder %v8547_v13, 8.507059e+37  ;;  %v8509_v34 = vmul.f32 0.5, %v14100_v24 }
 0xb7c   : > { %v10297_v33 = vpop.eup %10296  ;;  %v14153_v0 = vadd.f32 1.0, %v8576_v39  ;;  %v9735_v8 = vor.u32 %v9933_v23, %v9732_v40  ;;  %v8527_v21 = vmul.f32 %v8526_v2, %v14103_v9  ;;  %v8566_v63 = vadd.f32 1.1283791, %v8565_v58 }
 0xb7d   : > { %v8539_v43 = vmul.f32 %v10297_v33, %v14142_v7  ;;  %v8613_v29 = vadd.f32 0.112945676, %v8612_v50  ;;  %vm8544_vm10 = vweird.f32 %v10297_v33  ;;  %v8602_v1 = vadd.f32 0.05243302, %v8601_v28 }
 0xb7e   : > { %10298 = vrcp.f32 %v14153_v0  ;;  %vm8545_vm12 = vmor %vm8543_vm11, %vm8544_vm10  ;;  %v8589_v17 = vand.u32 2147483648, %v14153_v0  ;;  %v8587_v47 = vand.u32 2147483647, %v14153_v0  ;;  %vm8583_vm15 = vweird.f32 %v14153_v0 }
 0xb7f   : > { %v8540_v6 = vsub.f32 1.0, %v8539_v43  ;;  %v8614_v41 = vmul.f32 %v8613_v29, %v14136_v27  ;;  %8870 = vmatpush.bf16.msrb.mxu1 %v9735_v8  ;;  %v8511_v8 = vmul.f32 0.5, %v14123_v42 }
 0xb80   : > { %v8590_v26 = vor.u32 1.1754944e-38, %v8589_v17  ;;  %vm8588_vm1 = vcmp.eq.f32.partialorder %v8587_v47, 8.507059e+37 }
 0xb81   : > { %v8541_v55 = vmul.f32 %v10297_v33, %v8540_v6  ;;  %v8615_v44 = vadd.f32 0.4994258, %v8614_v41  ;;  %v8567_v6 = vmul.f32 %v8566_v63, %v14114_v3 }
 0xb83   : > { %v8542_v22 = vadd.f32 %v10297_v33, %v8541_v55  ;;  %v8616_v45 = vmul.f32 %v8615_v44, %v14136_v27 }
 0xb84   : > { %v10299_v39 = vpop.eup %10298 }
 0xb85   : > { %v8546_v36 = vsel %vm8545_vm12, %v10297_v33, %v8542_v22  ;;  %v8579_v7 = vmul.f32 %v10299_v39, %v14153_v0  ;;  %v8603_v33 = vmul.f32 %v8602_v1, %v14136_v27  ;;  %v8617_v43 = vadd.f32 1.0, %v8616_v45 }
 0xb86   : > { %v8551_v54 = vsel %vm8548_vm13, %v8550_v10, %v8546_v36  ;;  %vm8584_vm14 = vweird.f32 %v10299_v39  ;;  %v8510_v0 = vmul.f32 0.5, %v14111_v46  ;;  %v8675_v10 = vld [vmem:[#allocation30] sm:$0xf] }
 0xb87   : > { %v8580_v20 = vsub.f32 1.0, %v8579_v7  ;;  %v8552_v59 = vmul.f32 %v8551_v54, %v8527_v21  ;;  %10300 = vrcp.f32 %v8617_v43  ;;  %vm8585_vm0 = vmor %vm8583_vm15, %vm8584_vm14  ;;  %v8604_v49 = vadd.f32 0.18741608, %v8603_v33 }
 0xb88   : > { %v8627_v12 = vand.u32 2147483647, %v8617_v43  ;;  %v8629_v13 = vand.u32 2147483648, %v8617_v43  ;;  %vm8623_vm3 = vweird.f32 %v8617_v43  ;;  %v8678_v58 = vperm.slane %v8675_v10, 1 }
 0xb89   : > { %v8581_v50 = vmul.f32 %v10299_v39, %v8580_v20  ;;  %v9725_v9 = vclamps-f32 %v8552_v59, 1.0  ;;  %v8605_v28 = vmul.f32 %v8604_v49, %v14136_v27  ;;  %v8679_v63 = vperm.slane %v8675_v10, 2 }
 0xb8a   : > { %v8630_v27 = vor.u32 1.1754944e-38, %v8629_v13  ;;  %vm8628_vm5 = vcmp.eq.f32.partialorder %v8627_v12, 8.507059e+37  ;;  %v8680_v17 = vperm.slane %v8675_v10, 3 }
 0xb8b   : > { %v8582_v16 = vadd.f32 %v10299_v39, %v8581_v50  ;;  %v8635_v29 = vadd.f32 1.0, %v9725_v9  ;;  %v8606_v57 = vadd.f32 1.1283791, %v8605_v28 }
 0xb8d   : > { %v8586_v31 = vsel %vm8585_vm0, %v10299_v39, %v8582_v16  ;;  %v10301_v48 = vpop.eup %10300  ;;  %v8638_v3 = vmul.f32 %v8635_v29, %v8509_v34  ;;  %v8607_v15 = vmul.f32 %v8606_v57, %v14129_v14  ;;  %v8677_v14 = vperm.slane %v8675_v10, 0 }
 0xb8e   : > { %v8591_v11 = vsel %vm8588_vm1, %v8590_v26, %v8586_v31  ;;  %v8619_v55 = vmul.f32 %v10301_v48, %v8617_v43  ;;  %vm8624_vm2 = vweird.f32 %v10301_v48 }
 0xb8f   : > { %v8592_v53 = vmul.f32 %v8591_v11, %v8567_v6  ;;  %vm8625_vm4 = vmor %vm8623_vm3, %vm8624_vm2 }
 0xb90   : > { %v8620_v51 = vsub.f32 1.0, %v8619_v55 }
 0xb91   : > { %v9726_v5 = vclamps-f32 %v8592_v53, 1.0 }
 0xb92   : > { %v8621_v23 = vmul.f32 %v10301_v48, %v8620_v51 }
 0xb93   : > { %v8636_v25 = vadd.f32 1.0, %v9726_v5 }
 0xb94   : > { %v8622_v30 = vadd.f32 %v10301_v48, %v8621_v23 }
 0xb95   : > { %v8639_v41 = vmul.f32 %v8636_v25, %v8510_v0 }
 0xb96   : > { %v8626_v40 = vsel %vm8625_vm4, %v10301_v48, %v8622_v30 }
 0xb97   : > { %v8641_v22 = vpack.c.bf16 %v8639_v41, %v8638_v3  ;;  %v8631_v24 = vsel %vm8628_vm5, %v8630_v27, %v8626_v40 }
 0xb98   : > { %v8632_v46 = vmul.f32 %v8631_v24, %v8607_v15 }
 0xb99   : > { %8853 = vmatmul.bf16.vlgmr.msrb.gmra.mxu0 %v8641_v22  ;;  %8871 = vmatmul.bf16.vlgmr.msrb.gmra.mxu1 %v8641_v22 }
 0xb9a   : > { %8889 = vmatmul.bf16.vlgmr.msrb.gmra.mxu2 %v8641_v22  ;;  %8907 = vmatmul.bf16.vlgmr.msrb.gmra.mxu3 %v8641_v22  ;;  %v9727_v2 = vclamps-f32 %v8632_v46, 1.0 }
 0xb9c   : > { %v8637_v44 = vadd.f32 1.0, %v9727_v2 }
 0xb9e   : > { %v8640_v39 = vmul.f32 %v8637_v44, %v8511_v8 }
 0xba0   : > { %v8642_v36 = vpack.c.bf16 %v8640_v39, %v8640_v39 }
 0xba9   : > { %8858 = vmatmul.bf16.gmra.mxu0 %v8642_v36  ;;  %8876 = vmatmul.bf16.gmra.mxu1 %v8642_v36 }
 0xbaa   : > { %8894 = vmatmul.bf16.gmra.mxu2 %v8642_v36  ;;  %8912 = vmatmul.bf16.gmra.mxu3 %v8642_v36 }
 0xc16   : > { %v8854_v1 = vpop.f32.mrf.mxu0  ;;  %v8872_v7 = vpop.f32.mrf.mxu1 }
 0xc17   : > { %v8855_v54 = vadd.f32 %v8854_v1, %v8677_v14  ;;  %v8873_v45 = vadd.f32 %v8872_v7, %v8678_v58 }
 0xc19   : > { %v8917_v21 = vadd.f32 %v8855_v54, %v13920_v35  ;;  %v8918_v20 = vadd.f32 %v8873_v45, %v13923_v32 }
 0xc1b   : > { %8929 = vst [vmem:[%s14397_s4] sm:$0xff] %v8917_v21 }
 0xc1c   : > { %8930 = vst [vmem:[%s14397_s4 + $0x8] sm:$0xff] %v8918_v20 }
 0xc1d   : > { %v8890_v42 = vpop.f32.mrf.mxu2  ;;  %v8908_v33 = vpop.f32.mrf.mxu3 }
 0xc1e   : > { %v8891_v43 = vadd.f32 %v8890_v42, %v8679_v63  ;;  %v8909_v59 = vadd.f32 %v8908_v33, %v8680_v17  ;;  %v8856_v50 = vpop.f32.mrf.mxu0  ;;  %v8874_v47 = vpop.f32.mrf.mxu1 }
 0xc1f   : > { %v8857_v16 = vadd.f32 %v8856_v50, %v8677_v14  ;;  %v8875_v35 = vadd.f32 %v8874_v47, %v8678_v58 }
 0xc20   : > { %v8919_v32 = vadd.f32 %v8891_v43, %v13926_v60  ;;  %v8920_v26 = vadd.f32 %v8909_v59, %v13929_v38 }
 0xc21   : > { %v8921_v49 = vadd.f32 %v8857_v16, %v13932_v18  ;;  %v8922_v9 = vadd.f32 %v8875_v35, %v13935_v4 }
 0xc22   : > { %8931 = vst [vmem:[%s14397_s4 + $0x10] sm:$0xff] %v8919_v32 }
 0xc23   : > { %8932 = vst [vmem:[%s14397_s4 + $0x18] sm:$0xff] %v8920_v26 }
 0xc24   : > { %8933 = vst [vmem:[%s14397_s4 + $0x20] sm:$0xff] %v8921_v49 }
 0xc25   : > { %8934 = vst [vmem:[%s14397_s4 + $0x28] sm:$0xff] %v8922_v9  ;;  %v8892_v60 = vpop.f32.mrf.mxu2  ;;  %v8910_v38 = vpop.f32.mrf.mxu3 }
 0xc26   : > { %v8893_v18 = vadd.f32 %v8892_v60, %v8679_v63  ;;  %v8911_v4 = vadd.f32 %v8910_v38, %v8680_v17  ;;  %v8859_v6 = vpop.f32.mrf.mxu0  ;;  %v8877_v31 = vpop.f32.mrf.mxu1 }
 0xc27   : > { %v8860_v11 = vadd.f32 %v8859_v6, %v8677_v14  ;;  %v8878_v53 = vadd.f32 %v8877_v31, %v8678_v58 }
 0xc28   : > { %v8923_v48 = vadd.f32 %v8893_v18, %v13938_v52  ;;  %v8924_v28 = vadd.f32 %v8911_v4, %v13941_v19 }
 0xc29   : > { %v8925_v29 = vadd.f32 %v8860_v11, %v13944_v61  ;;  %v8926_v5 = vadd.f32 %v8878_v53, %v13947_v37 }
 0xc2a   : > { %8935 = vst [vmem:[%s14397_s4 + $0x30] sm:$0xff] %v8923_v48 }
 0xc2b   : > { %8936 = vst [vmem:[%s14397_s4 + $0x38] sm:$0xff] %v8924_v28 }
 0xc2c   : > { %8937 = vst [vmem:[%s14397_s4 + $0x40] sm:$0xff] %v8925_v29 }
 0xc2d   : > { %8938 = vst [vmem:[%s14397_s4 + $0x48] sm:$0xff] %v8926_v5  ;;  %v8895_v52 = vpop.f32.mrf.mxu2  ;;  %v8913_v19 = vpop.f32.mrf.mxu3 }
 0xc2e   : > { %v8896_v61 = vadd.f32 %v8895_v52, %v8679_v63  ;;  %v8914_v37 = vadd.f32 %v8913_v19, %v8680_v17  ;;  %v8861_v55 = vpop.f32.mrf.mxu0  ;;  %v8879_v34 = vpop.f32.mrf.mxu1 }
 0xc30   : > { %v8927_v0 = vadd.f32 %v8896_v61, %v13950_v62  ;;  %v8928_v25 = vadd.f32 %v8914_v37, %v13953_v56 }
 0xc32   : > { %8939 = vst [vmem:[%s14397_s4 + $0x50] sm:$0xff] %v8927_v0 }
 0xc33   : > { %8940 = vst [vmem:[%s14397_s4 + $0x58] sm:$0xff] %v8928_v25 }
 0xc35   : > { %v8897_v51 = vpop.f32.mrf.mxu2  ;;  %v8915_v57 = vpop.f32.mrf.mxu3 }
 0xc36 PF: > { %s14398_s30 = sld [smem:[#allocation44_spill]] }
 0xc37   : > { %s14399_s3 = sld [smem:[#allocation41_spill]] }
 0xc38   : > { %s14400_s28 = sld [smem:[#allocation42_spill]] }
 0xc39   : > { %s14401_s29 = sld [smem:[#allocation45_spill]] }
 0xc3c   : > { %p53_p9 = scmp.ge.s32.totalorder %s14398_s30, 10  }
 0xc3e   :  { %55 = sbr.rel (!%p53_p9) target bundleno = 36 (0x24), region = 327 }
 0xc43   :  { %8952 = vsyncpa [#allocation3], 1 }
 0xc44   :  { %8954 = vsyncpa [#allocation3 + $0x1], 1 }
 0xc45   :  { %8955 = vsyncpa [#allocation5], 1 }
 0xc46   :  { %8957 = vsyncpa [#allocation5 + $0x1], 1 }
 0xc47   :  { %8958 = vsyncpa [#allocation8], 1 }
 0xc48   :  { %8960 = vsyncpa [#allocation8 + $0x1], 1 }
 0xc49   :  { %8961 = vsyncpa [#allocation11], 1 }
 0xc4a   :  { %8963 = vsyncpa [#allocation11 + $0x1], 1 }
 0xc4b   :  { %8964 = vsyncpa [#allocation14], 1 }
 0xc4c   :  { %8966 = vsyncpa [#allocation14 + $0x1], 1 }
 0xc4d   :  { %8967 = vsyncpa [#allocation17], 1 }
 0xc4e   :  { %8969 = vsyncpa [#allocation17 + $0x1], 1 }
 0xc4f   :  { %8970 = vsyncpa [#allocation20], 1 }
 0xc50   :  { %8972 = vsyncpa [#allocation20 + $0x1], 1 }
 0xc51   :  { %8973 = vsyncpa [#allocation23], 1 }
 0xc52   :  { %8974 = vsyncpa [#allocation26], 1 }
 0xc53   :  { %8975 = vsyncpa [#allocation29], 1 }

</bundles_post_ra>
